<compile_context>
chip_gen: v5e
topology: v5e:2x2
jax: 0.10.0
libtpu: 0.0.40
codegen_flags: <defaults>
</compile_context>

<pallas_src>
import math
import numpy as np

import jax
import jax.numpy as jnp
from jax.experimental import pallas as pl
from jax.experimental.pallas import tpu as pltpu

TAIL_BOUND = 3.0
MIN_BIN_W = 1e-3
MIN_BIN_H = 1e-3
MIN_DERIV = 1e-3


def _softplus(u):
    # stable softplus using only exp/log/abs/max (EUP/VPU friendly)
    return jnp.maximum(u, 0.0) + jnp.log(1.0 + jnp.exp(-jnp.abs(u)))


# --------------------------- in-kernel spline --------------------------------
def _rq_spline(x, raw, *, K, Tp, T):
    """Unconstrained (linear-tail) rational-quadratic spline, forward.

    x:   [bm, Tp] transform-feature inputs (lanes >= T are zero-padded dummies)
    raw: [bm, (3K-1)*Tp] spline params, grouped per parameter index, each slab
         lane-dense and already scaled by 1/sqrt(hidden) where applicable.
    Returns (y:[bm,Tp], lad_elem:[bm,Tp] with dummy/outside lanes zeroed).
    """
    left, right = -TAIL_BOUND, TAIL_BOUND
    inside = (x >= left) & (x <= right)
    xc = jnp.clip(x, left, right)

    uw = [raw[:, k * Tp:(k + 1) * Tp] for k in range(K)]
    uh = [raw[:, (K + k) * Tp:(K + k + 1) * Tp] for k in range(K)]
    ud = [raw[:, (2 * K + k) * Tp:(2 * K + k + 1) * Tp] for k in range(K - 1)]

    def softmax_bins(us, min_b):
        m = us[0]
        for u in us[1:]:
            m = jnp.maximum(m, u)
        es = [jnp.exp(u - m) for u in us]
        s = es[0]
        for e in es[1:]:
            s = s + e
        inv_s = pl.reciprocal(s, approx=True)          # 1 EUP op instead of K divides
        return [min_b + (1.0 - min_b * K) * (e * inv_s) for e in es]

    w_bins = softmax_bins(uw, MIN_BIN_W)
    h_bins = softmax_bins(uh, MIN_BIN_H)

    def knots(bins):
        cs = [jnp.full_like(x, left)]
        acc = jnp.zeros_like(x)
        for k in range(K):
            acc = acc + bins[k]
            cs.append((right - left) * acc + left)
        cs[-1] = jnp.full_like(x, right)               # pin last knot to boundary
        sizes = [cs[k + 1] - cs[k] for k in range(K)]
        return cs, sizes

    cw, wb = knots(w_bins)
    ch, hb = knots(h_bins)

    # derivatives at K+1 knots; boundary knots pinned to exactly 1 (linear tails)
    d = [jnp.ones_like(x)]
    for k in range(K - 1):
        d.append(MIN_DERIV + _softplus(ud[k]))
    d.append(jnp.ones_like(x))

    # searchsorted over cumwidths (last knot gets +eps, nflows semantics)
    eps = 1e-6
    cnt = jnp.zeros(x.shape, jnp.int32)
    for j in range(K + 1):
        thr = cw[j] + (eps if j == K else 0.0)
        cnt = cnt + (xc >= thr).astype(jnp.int32)
    bin_idx = cnt - 1

    z0 = jnp.zeros_like(x)
    icw, iw, ich, ih, idr, idr1 = z0, z0, z0, z0, z0, z0
    for k in range(K):
        sel = (bin_idx == k).astype(x.dtype)
        icw = icw + sel * cw[k]
        iw = iw + sel * wb[k]
        ich = ich + sel * ch[k]
        ih = ih + sel * hb[k]
        idr = idr + sel * d[k]
        idr1 = idr1 + sel * d[k + 1]

    inv_iw = pl.reciprocal(iw)                 # shared by theta and delta
    delta = ih * inv_iw
    theta = (xc - icw) * inv_iw
    tt = theta * (1.0 - theta)
    num = ih * (delta * theta * theta + idr * tt)
    den = delta + (idr + idr1 - 2.0 * delta) * tt
    inv_den = pl.reciprocal(den)
    y_spline = ich + num * inv_den
    dnum = delta * delta * (idr1 * theta * theta + 2.0 * delta * tt
                            + idr * (1.0 - theta) * (1.0 - theta))
    lad = jnp.log(dnum * inv_den * inv_den)    # one log instead of two

    y = jnp.where(inside, y_spline, x)
    col = jax.lax.broadcasted_iota(jnp.int32, x.shape, dimension=1)
    lad_elem = jnp.where(inside & (col < T), lad, 0.0)
    return y, lad_elem


# --------------------------- fused per-block kernel ---------------------------
def _make_block_kernel(*, K, Tp, T, is_last, log_z):
    def kernel(z_ref, lad_ref,
               w0_ref, b0_ref, w1a_ref, b1a_ref, w1b_ref, b1b_ref,
               w2a_ref, b2a_ref, w2b_ref, b2b_ref, wf_ref, bf_ref,
               ptr_ref, rid_ref, str_ref,
               zo_ref, lo_ref):
        z = z_ref[...]                                       # [bm, D]

        # ResidualNet conditioner; the identity-feature gather (+ReversePerm)
        # is baked into the row order of w0 at prep time.
        h = jnp.dot(z, w0_ref[...], preferred_element_type=jnp.float32) + b0_ref[...]
        for wa, ba, wb_, bb in ((w1a_ref, b1a_ref, w1b_ref, b1b_ref),
                                (w2a_ref, b2a_ref, w2b_ref, b2b_ref)):
            t = jnp.maximum(h, 0.0)
            t = jnp.dot(t, wa[...], preferred_element_type=jnp.float32) + ba[...]
            t = jnp.maximum(t, 0.0)
            t = jnp.dot(t, wb_[...], preferred_element_type=jnp.float32) + bb[...]
            h = h + t
        raw = jnp.dot(h, wf_ref[...], preferred_element_type=jnp.float32) + bf_ref[...]

        # transform-feature gather (+ReversePerm) via 0/1 selection matrix (MXU)
        x_tr = jnp.dot(z, ptr_ref[...], preferred_element_type=jnp.float32)  # [bm,Tp]

        y_tr, lad_elem = _rq_spline(x_tr, raw, K=K, Tp=Tp, T=T)

        # merge identity + transformed features back into a lane-dense [bm, D]
        z_out = (jnp.dot(z, rid_ref[...], preferred_element_type=jnp.float32)
                 + jnp.dot(y_tr, str_ref[...], preferred_element_type=jnp.float32))
        zo_ref[...] = z_out

        lad_tot = lad_ref[...] + jnp.sum(lad_elem, axis=-1, keepdims=True)
        if is_last:
            # fold StandardNormal.log_prob into the last block
            lo_ref[...] = (lad_tot
                           - 0.5 * jnp.sum(z_out * z_out, axis=-1, keepdims=True)
                           - log_z)
        else:
            lo_ref[...] = lad_tot

    return kernel


def _pick_batch_tile(B):
    for cand in (512, 256, 128, 64, 32, 16, 8):
        if B % cand == 0:
            return cand
    return B  # small / odd batch -> single full block


def _block_call(kernel, z, lad, mats, *, bm):
    B, D = z.shape
    grid = (B // bm,)

    def row_spec(c):
        return pl.BlockSpec((bm, c), lambda i: (i, 0))

    def full_spec(shape):
        return pl.BlockSpec(shape, lambda i: (0,) * len(shape))

    in_specs = [row_spec(D), row_spec(1)] + [full_spec(m.shape) for m in mats]
    out_specs = (row_spec(D), row_spec(1))
    out_shape = (jax.ShapeDtypeStruct((B, D), jnp.float32),
                 jax.ShapeDtypeStruct((B, 1), jnp.float32))
    return pl.pallas_call(
        kernel,
        grid=grid,
        in_specs=in_specs,
        out_specs=out_specs,
        out_shape=out_shape,
        compiler_params=pltpu.CompilerParams(
            dimension_semantics=("parallel",),
            # explicit, safe on v5e/v6e/v7x; per-block footprint is ~3 MiB
            vmem_limit_bytes=32 * 1024 * 1024),
    )(z, lad, *mats)


# ----------------------------- parameter init --------------------------------
def _init_linear(key, fan_in, fan_out, bound=None):
    kw, kb = jax.random.split(key)
    if bound is None:
        bound = 1.0 / math.sqrt(fan_in)
    w = jax.random.uniform(kw, (fan_in, fan_out), jnp.float32, -bound, bound)
    b = jax.random.uniform(kb, (fan_out,), jnp.float32, -bound, bound)
    return w, b


def init_spline_flow(key, features, hidden, num_bins, num_blocks):
    """Deterministic synthetic parameters matching the module's shapes."""
    params, masks = [], []
    for _ in range(num_blocks):
        key, km = jax.random.split(key)
        mask = np.asarray(jax.random.normal(km, (features,)) > 0.5)  # randn > 0.5
        n_tr = int(mask.sum())
        assert 0 < n_tr < features, "degenerate coupling mask"
        masks.append(mask)
        n_id = features - n_tr
        out_feat = n_tr * (3 * num_bins - 1)     # tails='linear' multiplier

        key, *ks = jax.random.split(key, 7)
        W0, b0 = _init_linear(ks[0], n_id, hidden)
        W1a, b1a = _init_linear(ks[1], hidden, hidden)
        W1b, b1b = _init_linear(ks[2], hidden, hidden, bound=1e-3)  # zero-init layer
        W2a, b2a = _init_linear(ks[3], hidden, hidden)
        W2b, b2b = _init_linear(ks[4], hidden, hidden, bound=1e-3)  # zero-init layer
        Wf, bf = _init_linear(ks[5], hidden, out_feat)
        params.append(dict(W0=W0, b0=b0, W1a=W1a, b1a=b1a, W1b=W1b, b1b=b1b,
                           W2a=W2a, b2a=b2a, W2b=W2b, b2b=b2b, Wf=Wf, bf=bf))
    return params, masks


def prep_blocks(params, masks, *, features, hidden, num_bins):
    """Bake ReversePermutation + mask gathers/scatters + spline-param layout
    into static matrices (one-time, numpy)."""
    D, H, K = features, hidden, num_bins
    inv_sqrt_h = 1.0 / math.sqrt(H)
    blocks = []
    for p, mask in zip(params, masks):
        id_idx = np.where(~mask)[0]
        tr_idx = np.where(mask)[0]
        T = tr_idx.shape[0]
        Tp = max(128, ((T + 127) // 128) * 128)          # lane-dense padded T
        src_id = D - 1 - id_idx                          # positions pre-reversal
        src_tr = D - 1 - tr_idx

        # first linear: scatter rows so z @ W0g == x_id @ W0 (reversal included)
        W0g = np.zeros((D, H), np.float32)
        W0g[src_id, :] = np.asarray(p["W0"])

        # final linear: permute columns so raw is grouped per parameter index,
        # pad each group to Tp lanes, and fold the 1/sqrt(H) width/height scale.
        Wf = np.asarray(p["Wf"])
        bf = np.asarray(p["bf"])
        Wfp = np.zeros((H, (3 * K - 1) * Tp), np.float32)
        bfp = np.zeros((1, (3 * K - 1) * Tp), np.float32)
        for pidx in range(3 * K - 1):
            scale = inv_sqrt_h if pidx < 2 * K else 1.0
            Wfp[:, pidx * Tp:pidx * Tp + T] = Wf[:, pidx::(3 * K - 1)] * scale
            bfp[0, pidx * Tp:pidx * Tp + T] = bf[pidx::(3 * K - 1)] * scale

        # routing matrices (0/1), all include the ReversePermutation
        Ptr = np.zeros((D, Tp), np.float32); Ptr[src_tr, np.arange(T)] = 1.0
        Rid = np.zeros((D, D), np.float32);  Rid[src_id, id_idx] = 1.0
        Str = np.zeros((Tp, D), np.float32); Str[np.arange(T), tr_idx] = 1.0

        mats = [jnp.asarray(W0g), jnp.asarray(p["b0"]).reshape(1, H),
                p["W1a"], p["b1a"].reshape(1, H), p["W1b"], p["b1b"].reshape(1, H),
                p["W2a"], p["b2a"].reshape(1, H), p["W2b"], p["b2b"].reshape(1, H),
                jnp.asarray(Wfp), jnp.asarray(bfp),
                jnp.asarray(Ptr), jnp.asarray(Rid), jnp.asarray(Str)]
        blocks.append((mats, T, Tp))
    return blocks


# ------------------------------- flow forward ---------------------------------
def spline_flow_log_prob(x, blocks, *, num_bins):
    B, D = x.shape
    bm = _pick_batch_tile(B)
    log_z = 0.5 * D * math.log(2.0 * math.pi)
    z = x.astype(jnp.float32)
    lad = jnp.zeros((B, 1), jnp.float32)
    n = len(blocks)
    for bi, (mats, T, Tp) in enumerate(blocks):
        kern = _make_block_kernel(K=num_bins, Tp=Tp, T=T,
                                  is_last=(bi == n - 1), log_z=log_z)
        z, lad = _block_call(kern, z, lad, mats, bm=bm)
    return lad[:, 0]   # last block already added the StandardNormal log_prob


# ----------------------------------- main --------------------------------------
if __name__ == "__main__":
    # small shapes consistent with the module (in_channels, hidden_channels, num_bins)
    B, D, H, K = 8, 256, 32, 4
    NUM_BLOCKS = 3

    x = jax.random.normal(jax.random.PRNGKey(0), (B, D), jnp.float32)
    params, masks = init_spline_flow(jax.random.PRNGKey(42), D, H, K, NUM_BLOCKS)
    blocks = prep_blocks(params, masks, features=D, hidden=H, num_bins=K)

    fwd = jax.jit(lambda xx: spline_flow_log_prob(xx, blocks, num_bins=K))
    log_prob = fwd(x)
    jax.block_until_ready(log_prob)

    assert log_prob.shape == (B,)
    assert bool(jnp.all(jnp.isfinite(log_prob)))
    print("KERNEL_OK")
</pallas_src>

<mosaic_0001>
module attributes {stable_mosaic.version = 11 : i64} {
  func.func @kernel(%arg0: i32, %arg1: memref<8x256xf32, #tpu.memory_space<vmem>>, %arg2: memref<8x1xf32, #tpu.memory_space<vmem>>, %arg3: memref<256x32xf32, #tpu.memory_space<vmem>>, %arg4: memref<1x32xf32, #tpu.memory_space<vmem>>, %arg5: memref<32x32xf32, #tpu.memory_space<vmem>>, %arg6: memref<1x32xf32, #tpu.memory_space<vmem>>, %arg7: memref<32x32xf32, #tpu.memory_space<vmem>>, %arg8: memref<1x32xf32, #tpu.memory_space<vmem>>, %arg9: memref<32x32xf32, #tpu.memory_space<vmem>>, %arg10: memref<1x32xf32, #tpu.memory_space<vmem>>, %arg11: memref<32x32xf32, #tpu.memory_space<vmem>>, %arg12: memref<1x32xf32, #tpu.memory_space<vmem>>, %arg13: memref<32x1408xf32, #tpu.memory_space<vmem>>, %arg14: memref<1x1408xf32, #tpu.memory_space<vmem>>, %arg15: memref<256x128xf32, #tpu.memory_space<vmem>>, %arg16: memref<256x256xf32, #tpu.memory_space<vmem>>, %arg17: memref<128x256xf32, #tpu.memory_space<vmem>>, %arg18: memref<8x256xf32, #tpu.memory_space<vmem>>, %arg19: memref<8x1xf32, #tpu.memory_space<vmem>>) attributes {dimension_semantics = [#tpu.dimension_semantics<parallel>], iteration_bounds = array<i64: 1>, scalar_prefetch = 0 : i64, scratch_operands = 0 : i64, tpu.core_type = #tpu.core_type<tc>, window_params = [{transform_indices = @transform_0, window_bounds = array<i64: 8, 256>}, {transform_indices = @transform_1, window_bounds = array<i64: 8, 1>}, {pipeline_mode = #tpu.pipeline_mode<synchronous>, transform_indices = @transform_2, window_bounds = array<i64: 256, 32>}, {pipeline_mode = #tpu.pipeline_mode<synchronous>, transform_indices = @transform_3, window_bounds = array<i64: 1, 32>}, {pipeline_mode = #tpu.pipeline_mode<synchronous>, transform_indices = @transform_4, window_bounds = array<i64: 32, 32>}, {pipeline_mode = #tpu.pipeline_mode<synchronous>, transform_indices = @transform_5, window_bounds = array<i64: 1, 32>}, {pipeline_mode = #tpu.pipeline_mode<synchronous>, transform_indices = @transform_6, window_bounds = array<i64: 32, 32>}, {pipeline_mode = #tpu.pipeline_mode<synchronous>, transform_indices = @transform_7, window_bounds = array<i64: 1, 32>}, {pipeline_mode = #tpu.pipeline_mode<synchronous>, transform_indices = @transform_8, window_bounds = array<i64: 32, 32>}, {pipeline_mode = #tpu.pipeline_mode<synchronous>, transform_indices = @transform_9, window_bounds = array<i64: 1, 32>}, {pipeline_mode = #tpu.pipeline_mode<synchronous>, transform_indices = @transform_10, window_bounds = array<i64: 32, 32>}, {pipeline_mode = #tpu.pipeline_mode<synchronous>, transform_indices = @transform_11, window_bounds = array<i64: 1, 32>}, {pipeline_mode = #tpu.pipeline_mode<synchronous>, transform_indices = @transform_12, window_bounds = array<i64: 32, 1408>}, {pipeline_mode = #tpu.pipeline_mode<synchronous>, transform_indices = @transform_13, window_bounds = array<i64: 1, 1408>}, {pipeline_mode = #tpu.pipeline_mode<synchronous>, transform_indices = @transform_14, window_bounds = array<i64: 256, 128>}, {pipeline_mode = #tpu.pipeline_mode<synchronous>, transform_indices = @transform_15, window_bounds = array<i64: 256, 256>}, {pipeline_mode = #tpu.pipeline_mode<synchronous>, transform_indices = @transform_16, window_bounds = array<i64: 128, 256>}, {transform_indices = @transform_17, window_bounds = array<i64: 8, 256>}, {transform_indices = @transform_18, window_bounds = array<i64: 8, 1>}]} {
    %c0 = arith.constant 0 : index
    %c0_0 = arith.constant 0 : index
    %0 = vector.load %arg1[%c0, %c0_0] : memref<8x256xf32, #tpu.memory_space<vmem>>, vector<8x256xf32>
    %c0_1 = arith.constant 0 : index
    %c0_2 = arith.constant 0 : index
    %1 = vector.load %arg3[%c0_1, %c0_2] : memref<256x32xf32, #tpu.memory_space<vmem>>, vector<256x32xf32>
    %cst = arith.constant dense<0.000000e+00> : vector<8x32xf32>
    %2 = tpu.matmul %0, %1, %cst {dimension_numbers = #tpu.dot_dimension_numbers<[1], [0], [0], [1], [0, 0, 1, 1], [], []>} : vector<8x256xf32>, vector<256x32xf32>, vector<8x32xf32> -> vector<8x32xf32>
    %c0_3 = arith.constant 0 : index
    %c0_4 = arith.constant 0 : index
    %3 = vector.load %arg4[%c0_3, %c0_4] : memref<1x32xf32, #tpu.memory_space<vmem>>, vector<1x32xf32>
    %4 = vector.broadcast %3 : vector<1x32xf32> to vector<8x32xf32>
    %5 = arith.addf %2, %4 : vector<8x32xf32>
    %cst_5 = arith.constant 0.000000e+00 : f32
    %6 = vector.broadcast %cst_5 : f32 to vector<8x32xf32>
    %7 = arith.maximumf %5, %6 : vector<8x32xf32>
    %c0_6 = arith.constant 0 : index
    %c0_7 = arith.constant 0 : index
    %8 = vector.load %arg5[%c0_6, %c0_7] : memref<32x32xf32, #tpu.memory_space<vmem>>, vector<32x32xf32>
    %cst_8 = arith.constant dense<0.000000e+00> : vector<8x32xf32>
    %9 = tpu.matmul %7, %8, %cst_8 {dimension_numbers = #tpu.dot_dimension_numbers<[1], [0], [0], [1], [0, 0, 1, 1], [], []>} : vector<8x32xf32>, vector<32x32xf32>, vector<8x32xf32> -> vector<8x32xf32>
    %c0_9 = arith.constant 0 : index
    %c0_10 = arith.constant 0 : index
    %10 = vector.load %arg6[%c0_9, %c0_10] : memref<1x32xf32, #tpu.memory_space<vmem>>, vector<1x32xf32>
    %11 = vector.broadcast %10 : vector<1x32xf32> to vector<8x32xf32>
    %12 = arith.addf %9, %11 : vector<8x32xf32>
    %cst_11 = arith.constant 0.000000e+00 : f32
    %13 = vector.broadcast %cst_11 : f32 to vector<8x32xf32>
    %14 = arith.maximumf %12, %13 : vector<8x32xf32>
    %c0_12 = arith.constant 0 : index
    %c0_13 = arith.constant 0 : index
    %15 = vector.load %arg7[%c0_12, %c0_13] : memref<32x32xf32, #tpu.memory_space<vmem>>, vector<32x32xf32>
    %cst_14 = arith.constant dense<0.000000e+00> : vector<8x32xf32>
    %16 = tpu.matmul %14, %15, %cst_14 {dimension_numbers = #tpu.dot_dimension_numbers<[1], [0], [0], [1], [0, 0, 1, 1], [], []>} : vector<8x32xf32>, vector<32x32xf32>, vector<8x32xf32> -> vector<8x32xf32>
    %c0_15 = arith.constant 0 : index
    %c0_16 = arith.constant 0 : index
    %17 = vector.load %arg8[%c0_15, %c0_16] : memref<1x32xf32, #tpu.memory_space<vmem>>, vector<1x32xf32>
    %18 = vector.broadcast %17 : vector<1x32xf32> to vector<8x32xf32>
    %19 = arith.addf %16, %18 : vector<8x32xf32>
    %20 = arith.addf %5, %19 : vector<8x32xf32>
    %cst_17 = arith.constant 0.000000e+00 : f32
    %21 = vector.broadcast %cst_17 : f32 to vector<8x32xf32>
    %22 = arith.maximumf %20, %21 : vector<8x32xf32>
    %c0_18 = arith.constant 0 : index
    %c0_19 = arith.constant 0 : index
    %23 = vector.load %arg9[%c0_18, %c0_19] : memref<32x32xf32, #tpu.memory_space<vmem>>, vector<32x32xf32>
    %cst_20 = arith.constant dense<0.000000e+00> : vector<8x32xf32>
    %24 = tpu.matmul %22, %23, %cst_20 {dimension_numbers = #tpu.dot_dimension_numbers<[1], [0], [0], [1], [0, 0, 1, 1], [], []>} : vector<8x32xf32>, vector<32x32xf32>, vector<8x32xf32> -> vector<8x32xf32>
    %c0_21 = arith.constant 0 : index
    %c0_22 = arith.constant 0 : index
    %25 = vector.load %arg10[%c0_21, %c0_22] : memref<1x32xf32, #tpu.memory_space<vmem>>, vector<1x32xf32>
    %26 = vector.broadcast %25 : vector<1x32xf32> to vector<8x32xf32>
    %27 = arith.addf %24, %26 : vector<8x32xf32>
    %cst_23 = arith.constant 0.000000e+00 : f32
    %28 = vector.broadcast %cst_23 : f32 to vector<8x32xf32>
    %29 = arith.maximumf %27, %28 : vector<8x32xf32>
    %c0_24 = arith.constant 0 : index
    %c0_25 = arith.constant 0 : index
    %30 = vector.load %arg11[%c0_24, %c0_25] : memref<32x32xf32, #tpu.memory_space<vmem>>, vector<32x32xf32>
    %cst_26 = arith.constant dense<0.000000e+00> : vector<8x32xf32>
    %31 = tpu.matmul %29, %30, %cst_26 {dimension_numbers = #tpu.dot_dimension_numbers<[1], [0], [0], [1], [0, 0, 1, 1], [], []>} : vector<8x32xf32>, vector<32x32xf32>, vector<8x32xf32> -> vector<8x32xf32>
    %c0_27 = arith.constant 0 : index
    %c0_28 = arith.constant 0 : index
    %32 = vector.load %arg12[%c0_27, %c0_28] : memref<1x32xf32, #tpu.memory_space<vmem>>, vector<1x32xf32>
    %33 = vector.broadcast %32 : vector<1x32xf32> to vector<8x32xf32>
    %34 = arith.addf %31, %33 : vector<8x32xf32>
    %35 = arith.addf %20, %34 : vector<8x32xf32>
    %c0_29 = arith.constant 0 : index
    %c0_30 = arith.constant 0 : index
    %36 = vector.load %arg13[%c0_29, %c0_30] : memref<32x1408xf32, #tpu.memory_space<vmem>>, vector<32x1408xf32>
    %cst_31 = arith.constant dense<0.000000e+00> : vector<8x1408xf32>
    %37 = tpu.matmul %35, %36, %cst_31 {dimension_numbers = #tpu.dot_dimension_numbers<[1], [0], [0], [1], [0, 0, 1, 1], [], []>} : vector<8x32xf32>, vector<32x1408xf32>, vector<8x1408xf32> -> vector<8x1408xf32>
    %c0_32 = arith.constant 0 : index
    %c0_33 = arith.constant 0 : index
    %38 = vector.load %arg14[%c0_32, %c0_33] : memref<1x1408xf32, #tpu.memory_space<vmem>>, vector<1x1408xf32>
    %39 = vector.broadcast %38 : vector<1x1408xf32> to vector<8x1408xf32>
    %40 = arith.addf %37, %39 : vector<8x1408xf32>
    %c0_34 = arith.constant 0 : index
    %c0_35 = arith.constant 0 : index
    %41 = vector.load %arg15[%c0_34, %c0_35] : memref<256x128xf32, #tpu.memory_space<vmem>>, vector<256x128xf32>
    %cst_36 = arith.constant dense<0.000000e+00> : vector<8x128xf32>
    %42 = tpu.matmul %0, %41, %cst_36 {dimension_numbers = #tpu.dot_dimension_numbers<[1], [0], [0], [1], [0, 0, 1, 1], [], []>} : vector<8x256xf32>, vector<256x128xf32>, vector<8x128xf32> -> vector<8x128xf32>
    %cst_37 = arith.constant -3.000000e+00 : f32
    %43 = vector.broadcast %cst_37 : f32 to vector<8x128xf32>
    %44 = arith.cmpf oge, %42, %43 : vector<8x128xf32>
    %cst_38 = arith.constant 3.000000e+00 : f32
    %45 = vector.broadcast %cst_38 : f32 to vector<8x128xf32>
    %46 = arith.cmpf ole, %42, %45 : vector<8x128xf32>
    %47 = arith.andi %44, %46 : vector<8x128xi1>
    %cst_39 = arith.constant -3.000000e+00 : f32
    %cst_40 = arith.constant 3.000000e+00 : f32
    %48 = vector.broadcast %cst_39 : f32 to vector<8x128xf32>
    %49 = arith.maximumf %48, %42 : vector<8x128xf32>
    %50 = vector.broadcast %cst_40 : f32 to vector<8x128xf32>
    %51 = arith.minimumf %50, %49 : vector<8x128xf32>
    %52 = vector.extract_strided_slice %40 {offsets = [0, 0], sizes = [8, 128], strides = [1, 1]} : vector<8x1408xf32> to vector<8x128xf32>
    %53 = vector.extract_strided_slice %40 {offsets = [0, 128], sizes = [8, 128], strides = [1, 1]} : vector<8x1408xf32> to vector<8x128xf32>
    %54 = vector.extract_strided_slice %40 {offsets = [0, 256], sizes = [8, 128], strides = [1, 1]} : vector<8x1408xf32> to vector<8x128xf32>
    %55 = vector.extract_strided_slice %40 {offsets = [0, 384], sizes = [8, 128], strides = [1, 1]} : vector<8x1408xf32> to vector<8x128xf32>
    %56 = vector.extract_strided_slice %40 {offsets = [0, 512], sizes = [8, 128], strides = [1, 1]} : vector<8x1408xf32> to vector<8x128xf32>
    %57 = vector.extract_strided_slice %40 {offsets = [0, 640], sizes = [8, 128], strides = [1, 1]} : vector<8x1408xf32> to vector<8x128xf32>
    %58 = vector.extract_strided_slice %40 {offsets = [0, 768], sizes = [8, 128], strides = [1, 1]} : vector<8x1408xf32> to vector<8x128xf32>
    %59 = vector.extract_strided_slice %40 {offsets = [0, 896], sizes = [8, 128], strides = [1, 1]} : vector<8x1408xf32> to vector<8x128xf32>
    %60 = vector.extract_strided_slice %40 {offsets = [0, 1024], sizes = [8, 128], strides = [1, 1]} : vector<8x1408xf32> to vector<8x128xf32>
    %61 = vector.extract_strided_slice %40 {offsets = [0, 1152], sizes = [8, 128], strides = [1, 1]} : vector<8x1408xf32> to vector<8x128xf32>
    %62 = vector.extract_strided_slice %40 {offsets = [0, 1280], sizes = [8, 128], strides = [1, 1]} : vector<8x1408xf32> to vector<8x128xf32>
    %63 = arith.maximumf %52, %53 : vector<8x128xf32>
    %64 = arith.maximumf %63, %54 : vector<8x128xf32>
    %65 = arith.maximumf %64, %55 : vector<8x128xf32>
    %66 = arith.subf %52, %65 : vector<8x128xf32>
    %67 = math.exp %66 : vector<8x128xf32>
    %68 = arith.subf %53, %65 : vector<8x128xf32>
    %69 = math.exp %68 : vector<8x128xf32>
    %70 = arith.subf %54, %65 : vector<8x128xf32>
    %71 = math.exp %70 : vector<8x128xf32>
    %72 = arith.subf %55, %65 : vector<8x128xf32>
    %73 = math.exp %72 : vector<8x128xf32>
    %74 = arith.addf %67, %69 : vector<8x128xf32>
    %75 = arith.addf %74, %71 : vector<8x128xf32>
    %76 = arith.addf %75, %73 : vector<8x128xf32>
    %77 = tpu.reciprocal %76 {approx = true} : vector<8x128xf32> -> vector<8x128xf32>
    %78 = arith.mulf %67, %77 : vector<8x128xf32>
    %cst_41 = arith.constant 0.995999991 : f32
    %79 = vector.broadcast %cst_41 : f32 to vector<8x128xf32>
    %80 = arith.mulf %79, %78 : vector<8x128xf32>
    %cst_42 = arith.constant 1.000000e-03 : f32
    %81 = vector.broadcast %cst_42 : f32 to vector<8x128xf32>
    %82 = arith.addf %81, %80 : vector<8x128xf32>
    %83 = arith.mulf %69, %77 : vector<8x128xf32>
    %cst_43 = arith.constant 0.995999991 : f32
    %84 = vector.broadcast %cst_43 : f32 to vector<8x128xf32>
    %85 = arith.mulf %84, %83 : vector<8x128xf32>
    %cst_44 = arith.constant 1.000000e-03 : f32
    %86 = vector.broadcast %cst_44 : f32 to vector<8x128xf32>
    %87 = arith.addf %86, %85 : vector<8x128xf32>
    %88 = arith.mulf %71, %77 : vector<8x128xf32>
    %cst_45 = arith.constant 0.995999991 : f32
    %89 = vector.broadcast %cst_45 : f32 to vector<8x128xf32>
    %90 = arith.mulf %89, %88 : vector<8x128xf32>
    %cst_46 = arith.constant 1.000000e-03 : f32
    %91 = vector.broadcast %cst_46 : f32 to vector<8x128xf32>
    %92 = arith.addf %91, %90 : vector<8x128xf32>
    %93 = arith.maximumf %56, %57 : vector<8x128xf32>
    %94 = arith.maximumf %93, %58 : vector<8x128xf32>
    %95 = arith.maximumf %94, %59 : vector<8x128xf32>
    %96 = arith.subf %56, %95 : vector<8x128xf32>
    %97 = math.exp %96 : vector<8x128xf32>
    %98 = arith.subf %57, %95 : vector<8x128xf32>
    %99 = math.exp %98 : vector<8x128xf32>
    %100 = arith.subf %58, %95 : vector<8x128xf32>
    %101 = math.exp %100 : vector<8x128xf32>
    %102 = arith.subf %59, %95 : vector<8x128xf32>
    %103 = math.exp %102 : vector<8x128xf32>
    %104 = arith.addf %97, %99 : vector<8x128xf32>
    %105 = arith.addf %104, %101 : vector<8x128xf32>
    %106 = arith.addf %105, %103 : vector<8x128xf32>
    %107 = tpu.reciprocal %106 {approx = true} : vector<8x128xf32> -> vector<8x128xf32>
    %108 = arith.mulf %97, %107 : vector<8x128xf32>
    %cst_47 = arith.constant 0.995999991 : f32
    %109 = vector.broadcast %cst_47 : f32 to vector<8x128xf32>
    %110 = arith.mulf %109, %108 : vector<8x128xf32>
    %cst_48 = arith.constant 1.000000e-03 : f32
    %111 = vector.broadcast %cst_48 : f32 to vector<8x128xf32>
    %112 = arith.addf %111, %110 : vector<8x128xf32>
    %113 = arith.mulf %99, %107 : vector<8x128xf32>
    %cst_49 = arith.constant 0.995999991 : f32
    %114 = vector.broadcast %cst_49 : f32 to vector<8x128xf32>
    %115 = arith.mulf %114, %113 : vector<8x128xf32>
    %cst_50 = arith.constant 1.000000e-03 : f32
    %116 = vector.broadcast %cst_50 : f32 to vector<8x128xf32>
    %117 = arith.addf %116, %115 : vector<8x128xf32>
    %118 = arith.mulf %101, %107 : vector<8x128xf32>
    %cst_51 = arith.constant 0.995999991 : f32
    %119 = vector.broadcast %cst_51 : f32 to vector<8x128xf32>
    %120 = arith.mulf %119, %118 : vector<8x128xf32>
    %cst_52 = arith.constant 1.000000e-03 : f32
    %121 = vector.broadcast %cst_52 : f32 to vector<8x128xf32>
    %122 = arith.addf %121, %120 : vector<8x128xf32>
    %cst_53 = arith.constant -3.000000e+00 : f32
    %123 = vector.broadcast %cst_53 : f32 to vector<8x128xf32>
    %cst_54 = arith.constant 0.000000e+00 : f32
    %124 = vector.broadcast %cst_54 : f32 to vector<8x128xf32>
    %125 = arith.addf %124, %82 : vector<8x128xf32>
    %cst_55 = arith.constant 6.000000e+00 : f32
    %126 = vector.broadcast %cst_55 : f32 to vector<8x128xf32>
    %127 = arith.mulf %126, %125 : vector<8x128xf32>
    %cst_56 = arith.constant -3.000000e+00 : f32
    %128 = vector.broadcast %cst_56 : f32 to vector<8x128xf32>
    %129 = arith.addf %127, %128 : vector<8x128xf32>
    %130 = arith.addf %125, %87 : vector<8x128xf32>
    %cst_57 = arith.constant 6.000000e+00 : f32
    %131 = vector.broadcast %cst_57 : f32 to vector<8x128xf32>
    %132 = arith.mulf %131, %130 : vector<8x128xf32>
    %cst_58 = arith.constant -3.000000e+00 : f32
    %133 = vector.broadcast %cst_58 : f32 to vector<8x128xf32>
    %134 = arith.addf %132, %133 : vector<8x128xf32>
    %135 = arith.addf %130, %92 : vector<8x128xf32>
    %cst_59 = arith.constant 6.000000e+00 : f32
    %136 = vector.broadcast %cst_59 : f32 to vector<8x128xf32>
    %137 = arith.mulf %136, %135 : vector<8x128xf32>
    %cst_60 = arith.constant -3.000000e+00 : f32
    %138 = vector.broadcast %cst_60 : f32 to vector<8x128xf32>
    %139 = arith.addf %137, %138 : vector<8x128xf32>
    %cst_61 = arith.constant 3.000000e+00 : f32
    %140 = vector.broadcast %cst_61 : f32 to vector<8x128xf32>
    %141 = arith.subf %129, %123 : vector<8x128xf32>
    %142 = arith.subf %134, %129 : vector<8x128xf32>
    %143 = arith.subf %139, %134 : vector<8x128xf32>
    %144 = arith.subf %140, %139 : vector<8x128xf32>
    %cst_62 = arith.constant -3.000000e+00 : f32
    %145 = vector.broadcast %cst_62 : f32 to vector<8x128xf32>
    %cst_63 = arith.constant 0.000000e+00 : f32
    %146 = vector.broadcast %cst_63 : f32 to vector<8x128xf32>
    %147 = arith.addf %146, %112 : vector<8x128xf32>
    %cst_64 = arith.constant 6.000000e+00 : f32
    %148 = vector.broadcast %cst_64 : f32 to vector<8x128xf32>
    %149 = arith.mulf %148, %147 : vector<8x128xf32>
    %cst_65 = arith.constant -3.000000e+00 : f32
    %150 = vector.broadcast %cst_65 : f32 to vector<8x128xf32>
    %151 = arith.addf %149, %150 : vector<8x128xf32>
    %152 = arith.addf %147, %117 : vector<8x128xf32>
    %cst_66 = arith.constant 6.000000e+00 : f32
    %153 = vector.broadcast %cst_66 : f32 to vector<8x128xf32>
    %154 = arith.mulf %153, %152 : vector<8x128xf32>
    %cst_67 = arith.constant -3.000000e+00 : f32
    %155 = vector.broadcast %cst_67 : f32 to vector<8x128xf32>
    %156 = arith.addf %154, %155 : vector<8x128xf32>
    %157 = arith.addf %152, %122 : vector<8x128xf32>
    %cst_68 = arith.constant 6.000000e+00 : f32
    %158 = vector.broadcast %cst_68 : f32 to vector<8x128xf32>
    %159 = arith.mulf %158, %157 : vector<8x128xf32>
    %cst_69 = arith.constant -3.000000e+00 : f32
    %160 = vector.broadcast %cst_69 : f32 to vector<8x128xf32>
    %161 = arith.addf %159, %160 : vector<8x128xf32>
    %cst_70 = arith.constant 3.000000e+00 : f32
    %162 = vector.broadcast %cst_70 : f32 to vector<8x128xf32>
    %163 = arith.subf %151, %145 : vector<8x128xf32>
    %164 = arith.subf %156, %151 : vector<8x128xf32>
    %165 = arith.subf %161, %156 : vector<8x128xf32>
    %166 = arith.subf %162, %161 : vector<8x128xf32>
    %cst_71 = arith.constant 1.000000e+00 : f32
    %167 = vector.broadcast %cst_71 : f32 to vector<8x128xf32>
    %cst_72 = arith.constant 0.000000e+00 : f32
    %168 = vector.broadcast %cst_72 : f32 to vector<8x128xf32>
    %169 = arith.maximumf %60, %168 : vector<8x128xf32>
    %170 = math.absf %60 : vector<8x128xf32>
    %cst_73 = arith.constant 0.000000e+00 : f32
    %171 = vector.broadcast %cst_73 : f32 to vector<8x128xf32>
    %172 = arith.subf %171, %170 : vector<8x128xf32>
    %173 = math.exp %172 : vector<8x128xf32>
    %cst_74 = arith.constant 1.000000e+00 : f32
    %174 = vector.broadcast %cst_74 : f32 to vector<8x128xf32>
    %175 = arith.addf %174, %173 : vector<8x128xf32>
    %176 = math.log %175 : vector<8x128xf32>
    %177 = arith.addf %169, %176 : vector<8x128xf32>
    %cst_75 = arith.constant 1.000000e-03 : f32
    %178 = vector.broadcast %cst_75 : f32 to vector<8x128xf32>
    %179 = arith.addf %178, %177 : vector<8x128xf32>
    %cst_76 = arith.constant 0.000000e+00 : f32
    %180 = vector.broadcast %cst_76 : f32 to vector<8x128xf32>
    %181 = arith.maximumf %61, %180 : vector<8x128xf32>
    %182 = math.absf %61 : vector<8x128xf32>
    %cst_77 = arith.constant 0.000000e+00 : f32
    %183 = vector.broadcast %cst_77 : f32 to vector<8x128xf32>
    %184 = arith.subf %183, %182 : vector<8x128xf32>
    %185 = math.exp %184 : vector<8x128xf32>
    %cst_78 = arith.constant 1.000000e+00 : f32
    %186 = vector.broadcast %cst_78 : f32 to vector<8x128xf32>
    %187 = arith.addf %186, %185 : vector<8x128xf32>
    %188 = math.log %187 : vector<8x128xf32>
    %189 = arith.addf %181, %188 : vector<8x128xf32>
    %cst_79 = arith.constant 1.000000e-03 : f32
    %190 = vector.broadcast %cst_79 : f32 to vector<8x128xf32>
    %191 = arith.addf %190, %189 : vector<8x128xf32>
    %cst_80 = arith.constant 0.000000e+00 : f32
    %192 = vector.broadcast %cst_80 : f32 to vector<8x128xf32>
    %193 = arith.maximumf %62, %192 : vector<8x128xf32>
    %194 = math.absf %62 : vector<8x128xf32>
    %cst_81 = arith.constant 0.000000e+00 : f32
    %195 = vector.broadcast %cst_81 : f32 to vector<8x128xf32>
    %196 = arith.subf %195, %194 : vector<8x128xf32>
    %197 = math.exp %196 : vector<8x128xf32>
    %cst_82 = arith.constant 1.000000e+00 : f32
    %198 = vector.broadcast %cst_82 : f32 to vector<8x128xf32>
    %199 = arith.addf %198, %197 : vector<8x128xf32>
    %200 = math.log %199 : vector<8x128xf32>
    %201 = arith.addf %193, %200 : vector<8x128xf32>
    %cst_83 = arith.constant 1.000000e-03 : f32
    %202 = vector.broadcast %cst_83 : f32 to vector<8x128xf32>
    %203 = arith.addf %202, %201 : vector<8x128xf32>
    %cst_84 = arith.constant 1.000000e+00 : f32
    %204 = vector.broadcast %cst_84 : f32 to vector<8x128xf32>
    %c0_i32 = arith.constant 0 : i32
    %205 = vector.broadcast %c0_i32 : i32 to vector<8x128xi32>
    %cst_85 = arith.constant 0.000000e+00 : f32
    %206 = vector.broadcast %cst_85 : f32 to vector<8x128xf32>
    %207 = arith.addf %123, %206 : vector<8x128xf32>
    %208 = arith.cmpf oge, %51, %207 : vector<8x128xf32>
    %209 = arith.extui %208 : vector<8x128xi1> to vector<8x128xi32>
    %210 = arith.addi %205, %209 : vector<8x128xi32>
    %cst_86 = arith.constant 0.000000e+00 : f32
    %211 = vector.broadcast %cst_86 : f32 to vector<8x128xf32>
    %212 = arith.addf %129, %211 : vector<8x128xf32>
    %213 = arith.cmpf oge, %51, %212 : vector<8x128xf32>
    %214 = arith.extui %213 : vector<8x128xi1> to vector<8x128xi32>
    %215 = arith.addi %210, %214 : vector<8x128xi32>
    %cst_87 = arith.constant 0.000000e+00 : f32
    %216 = vector.broadcast %cst_87 : f32 to vector<8x128xf32>
    %217 = arith.addf %134, %216 : vector<8x128xf32>
    %218 = arith.cmpf oge, %51, %217 : vector<8x128xf32>
    %219 = arith.extui %218 : vector<8x128xi1> to vector<8x128xi32>
    %220 = arith.addi %215, %219 : vector<8x128xi32>
    %cst_88 = arith.constant 0.000000e+00 : f32
    %221 = vector.broadcast %cst_88 : f32 to vector<8x128xf32>
    %222 = arith.addf %139, %221 : vector<8x128xf32>
    %223 = arith.cmpf oge, %51, %222 : vector<8x128xf32>
    %224 = arith.extui %223 : vector<8x128xi1> to vector<8x128xi32>
    %225 = arith.addi %220, %224 : vector<8x128xi32>
    %cst_89 = arith.constant 9.99999997E-7 : f32
    %226 = vector.broadcast %cst_89 : f32 to vector<8x128xf32>
    %227 = arith.addf %140, %226 : vector<8x128xf32>
    %228 = arith.cmpf oge, %51, %227 : vector<8x128xf32>
    %229 = arith.extui %228 : vector<8x128xi1> to vector<8x128xi32>
    %230 = arith.addi %225, %229 : vector<8x128xi32>
    %c1_i32 = arith.constant 1 : i32
    %231 = vector.broadcast %c1_i32 : i32 to vector<8x128xi32>
    %232 = arith.subi %230, %231 : vector<8x128xi32>
    %cst_90 = arith.constant 0.000000e+00 : f32
    %233 = vector.broadcast %cst_90 : f32 to vector<8x128xf32>
    %c0_i32_91 = arith.constant 0 : i32
    %234 = vector.broadcast %c0_i32_91 : i32 to vector<8x128xi32>
    %235 = arith.cmpi eq, %232, %234 : vector<8x128xi32>
    %236 = arith.extui %235 : vector<8x128xi1> to vector<8x128xi32>
    %237 = arith.sitofp %236 : vector<8x128xi32> to vector<8x128xf32>
    %238 = arith.mulf %237, %123 : vector<8x128xf32>
    %239 = arith.addf %233, %238 : vector<8x128xf32>
    %240 = arith.mulf %237, %141 : vector<8x128xf32>
    %241 = arith.addf %233, %240 : vector<8x128xf32>
    %242 = arith.mulf %237, %145 : vector<8x128xf32>
    %243 = arith.addf %233, %242 : vector<8x128xf32>
    %244 = arith.mulf %237, %163 : vector<8x128xf32>
    %245 = arith.addf %233, %244 : vector<8x128xf32>
    %246 = arith.mulf %237, %167 : vector<8x128xf32>
    %247 = arith.addf %233, %246 : vector<8x128xf32>
    %248 = arith.mulf %237, %179 : vector<8x128xf32>
    %249 = arith.addf %233, %248 : vector<8x128xf32>
    %c1_i32_92 = arith.constant 1 : i32
    %250 = vector.broadcast %c1_i32_92 : i32 to vector<8x128xi32>
    %251 = arith.cmpi eq, %232, %250 : vector<8x128xi32>
    %252 = arith.extui %251 : vector<8x128xi1> to vector<8x128xi32>
    %253 = arith.sitofp %252 : vector<8x128xi32> to vector<8x128xf32>
    %254 = arith.mulf %253, %129 : vector<8x128xf32>
    %255 = arith.addf %239, %254 : vector<8x128xf32>
    %256 = arith.mulf %253, %142 : vector<8x128xf32>
    %257 = arith.addf %241, %256 : vector<8x128xf32>
    %258 = arith.mulf %253, %151 : vector<8x128xf32>
    %259 = arith.addf %243, %258 : vector<8x128xf32>
    %260 = arith.mulf %253, %164 : vector<8x128xf32>
    %261 = arith.addf %245, %260 : vector<8x128xf32>
    %262 = arith.mulf %253, %179 : vector<8x128xf32>
    %263 = arith.addf %247, %262 : vector<8x128xf32>
    %264 = arith.mulf %253, %191 : vector<8x128xf32>
    %265 = arith.addf %249, %264 : vector<8x128xf32>
    %c2_i32 = arith.constant 2 : i32
    %266 = vector.broadcast %c2_i32 : i32 to vector<8x128xi32>
    %267 = arith.cmpi eq, %232, %266 : vector<8x128xi32>
    %268 = arith.extui %267 : vector<8x128xi1> to vector<8x128xi32>
    %269 = arith.sitofp %268 : vector<8x128xi32> to vector<8x128xf32>
    %270 = arith.mulf %269, %134 : vector<8x128xf32>
    %271 = arith.addf %255, %270 : vector<8x128xf32>
    %272 = arith.mulf %269, %143 : vector<8x128xf32>
    %273 = arith.addf %257, %272 : vector<8x128xf32>
    %274 = arith.mulf %269, %156 : vector<8x128xf32>
    %275 = arith.addf %259, %274 : vector<8x128xf32>
    %276 = arith.mulf %269, %165 : vector<8x128xf32>
    %277 = arith.addf %261, %276 : vector<8x128xf32>
    %278 = arith.mulf %269, %191 : vector<8x128xf32>
    %279 = arith.addf %263, %278 : vector<8x128xf32>
    %280 = arith.mulf %269, %203 : vector<8x128xf32>
    %281 = arith.addf %265, %280 : vector<8x128xf32>
    %c3_i32 = arith.constant 3 : i32
    %282 = vector.broadcast %c3_i32 : i32 to vector<8x128xi32>
    %283 = arith.cmpi eq, %232, %282 : vector<8x128xi32>
    %284 = arith.extui %283 : vector<8x128xi1> to vector<8x128xi32>
    %285 = arith.sitofp %284 : vector<8x128xi32> to vector<8x128xf32>
    %286 = arith.mulf %285, %139 : vector<8x128xf32>
    %287 = arith.addf %271, %286 : vector<8x128xf32>
    %288 = arith.mulf %285, %144 : vector<8x128xf32>
    %289 = arith.addf %273, %288 : vector<8x128xf32>
    %290 = arith.mulf %285, %161 : vector<8x128xf32>
    %291 = arith.addf %275, %290 : vector<8x128xf32>
    %292 = arith.mulf %285, %166 : vector<8x128xf32>
    %293 = arith.addf %277, %292 : vector<8x128xf32>
    %294 = arith.mulf %285, %203 : vector<8x128xf32>
    %295 = arith.addf %279, %294 : vector<8x128xf32>
    %296 = arith.mulf %285, %204 : vector<8x128xf32>
    %297 = arith.addf %281, %296 : vector<8x128xf32>
    %298 = tpu.reciprocal %289 : vector<8x128xf32> -> vector<8x128xf32>
    %299 = arith.mulf %293, %298 : vector<8x128xf32>
    %300 = arith.subf %51, %287 : vector<8x128xf32>
    %301 = arith.mulf %300, %298 : vector<8x128xf32>
    %cst_93 = arith.constant 1.000000e+00 : f32
    %302 = vector.broadcast %cst_93 : f32 to vector<8x128xf32>
    %303 = arith.subf %302, %301 : vector<8x128xf32>
    %304 = arith.mulf %301, %303 : vector<8x128xf32>
    %305 = arith.mulf %299, %301 : vector<8x128xf32>
    %306 = arith.mulf %305, %301 : vector<8x128xf32>
    %307 = arith.mulf %295, %304 : vector<8x128xf32>
    %308 = arith.addf %306, %307 : vector<8x128xf32>
    %309 = arith.mulf %293, %308 : vector<8x128xf32>
    %310 = arith.addf %295, %297 : vector<8x128xf32>
    %cst_94 = arith.constant 2.000000e+00 : f32
    %311 = vector.broadcast %cst_94 : f32 to vector<8x128xf32>
    %312 = arith.mulf %311, %299 : vector<8x128xf32>
    %313 = arith.subf %310, %312 : vector<8x128xf32>
    %314 = arith.mulf %313, %304 : vector<8x128xf32>
    %315 = arith.addf %299, %314 : vector<8x128xf32>
    %316 = tpu.reciprocal %315 : vector<8x128xf32> -> vector<8x128xf32>
    %317 = arith.mulf %309, %316 : vector<8x128xf32>
    %318 = arith.addf %291, %317 : vector<8x128xf32>
    %319 = arith.mulf %299, %299 : vector<8x128xf32>
    %320 = arith.mulf %297, %301 : vector<8x128xf32>
    %321 = arith.mulf %320, %301 : vector<8x128xf32>
    %cst_95 = arith.constant 2.000000e+00 : f32
    %322 = vector.broadcast %cst_95 : f32 to vector<8x128xf32>
    %323 = arith.mulf %322, %299 : vector<8x128xf32>
    %324 = arith.mulf %323, %304 : vector<8x128xf32>
    %325 = arith.addf %321, %324 : vector<8x128xf32>
    %cst_96 = arith.constant 1.000000e+00 : f32
    %326 = vector.broadcast %cst_96 : f32 to vector<8x128xf32>
    %327 = arith.subf %326, %301 : vector<8x128xf32>
    %328 = arith.mulf %295, %327 : vector<8x128xf32>
    %cst_97 = arith.constant 1.000000e+00 : f32
    %329 = vector.broadcast %cst_97 : f32 to vector<8x128xf32>
    %330 = arith.subf %329, %301 : vector<8x128xf32>
    %331 = arith.mulf %328, %330 : vector<8x128xf32>
    %332 = arith.addf %325, %331 : vector<8x128xf32>
    %333 = arith.mulf %319, %332 : vector<8x128xf32>
    %334 = arith.mulf %333, %316 : vector<8x128xf32>
    %335 = arith.mulf %334, %316 : vector<8x128xf32>
    %336 = math.log %335 : vector<8x128xf32>
    %337 = arith.select %47, %318, %42 : vector<8x128xi1>, vector<8x128xf32>
    %338 = tpu.iota {dimensions = array<i32: 1>} : vector<8x128xi32>
    %c89_i32 = arith.constant 89 : i32
    %339 = vector.broadcast %c89_i32 : i32 to vector<8x128xi32>
    %340 = arith.cmpi slt, %338, %339 : vector<8x128xi32>
    %341 = arith.andi %47, %340 : vector<8x128xi1>
    %cst_98 = arith.constant 0.000000e+00 : f32
    %342 = vector.broadcast %cst_98 : f32 to vector<8x128xf32>
    %343 = arith.select %341, %336, %342 : vector<8x128xi1>, vector<8x128xf32>
    %c0_99 = arith.constant 0 : index
    %c0_100 = arith.constant 0 : index
    %344 = vector.load %arg16[%c0_99, %c0_100] : memref<256x256xf32, #tpu.memory_space<vmem>>, vector<256x256xf32>
    %cst_101 = arith.constant dense<0.000000e+00> : vector<8x256xf32>
    %345 = tpu.matmul %0, %344, %cst_101 {dimension_numbers = #tpu.dot_dimension_numbers<[1], [0], [0], [1], [0, 0, 1, 1], [], []>} : vector<8x256xf32>, vector<256x256xf32>, vector<8x256xf32> -> vector<8x256xf32>
    %c0_102 = arith.constant 0 : index
    %c0_103 = arith.constant 0 : index
    %346 = vector.load %arg17[%c0_102, %c0_103] : memref<128x256xf32, #tpu.memory_space<vmem>>, vector<128x256xf32>
    %cst_104 = arith.constant dense<0.000000e+00> : vector<8x256xf32>
    %347 = tpu.matmul %337, %346, %cst_104 {dimension_numbers = #tpu.dot_dimension_numbers<[1], [0], [0], [1], [0, 0, 1, 1], [], []>} : vector<8x128xf32>, vector<128x256xf32>, vector<8x256xf32> -> vector<8x256xf32>
    %348 = arith.addf %345, %347 : vector<8x256xf32>
    %c0_105 = arith.constant 0 : index
    %c0_106 = arith.constant 0 : index
    %349 = vector.load %arg18[%c0_105, %c0_106] : memref<8x256xf32, #tpu.memory_space<vmem>>, vector<8x256xf32>
    tpu.vector_store %arg18[%c0_105, %c0_106], %348 {strides = array<i32>} : memref<8x256xf32, #tpu.memory_space<vmem>>, vector<8x256xf32>,
    %c0_107 = arith.constant 0 : index
    %c0_108 = arith.constant 0 : index
    %350 = vector.load %arg2[%c0_107, %c0_108] : memref<8x1xf32, #tpu.memory_space<vmem>>, vector<8x1xf32>
    %cst_109 = arith.constant dense<0.000000e+00> : vector<8xf32>
    %351 = vector.multi_reduction <add>, %343, %cst_109 [1] : vector<8x128xf32> to vector<8xf32>
    %352 = vector.shape_cast %351 : vector<8xf32> to vector<8x1xf32>
    %353 = arith.addf %350, %352 : vector<8x1xf32>
    %354 = arith.mulf %348, %348 : vector<8x256xf32>
    %cst_110 = arith.constant dense<0.000000e+00> : vector<8xf32>
    %355 = vector.multi_reduction <add>, %354, %cst_110 [1] : vector<8x256xf32> to vector<8xf32>
    %356 = vector.shape_cast %355 : vector<8xf32> to vector<8x1xf32>
    %cst_111 = arith.constant 5.000000e-01 : f32
    %357 = vector.broadcast %cst_111 : f32 to vector<8x1xf32>
    %358 = arith.mulf %357, %356 : vector<8x1xf32>
    %359 = arith.subf %353, %358 : vector<8x1xf32>
    %cst_112 = arith.constant 235.24826 : f32
    %360 = vector.broadcast %cst_112 : f32 to vector<8x1xf32>
    %361 = arith.subf %359, %360 : vector<8x1xf32>
    %c0_113 = arith.constant 0 : index
    %c0_114 = arith.constant 0 : index
    %362 = vector.load %arg19[%c0_113, %c0_114] : memref<8x1xf32, #tpu.memory_space<vmem>>, vector<8x1xf32>
    tpu.vector_store %arg19[%c0_113, %c0_114], %361 {strides = array<i32>} : memref<8x1xf32, #tpu.memory_space<vmem>>, vector<8x1xf32>,
    return
  }
  func.func @transform_0(%arg0: i32) -> (i32, i32) {
    %c0_i32 = arith.constant 0 : i32
    %c0_i32_0 = arith.constant 0 : i32
    return %arg0, %c0_i32 : i32, i32
  }
  func.func @transform_1(%arg0: i32) -> (i32, i32) {
    %c0_i32 = arith.constant 0 : i32
    %c0_i32_0 = arith.constant 0 : i32
    return %arg0, %c0_i32 : i32, i32
  }
  func.func @transform_2(%arg0: i32) -> (i32, i32) {
    %c0_i32 = arith.constant 0 : i32
    %c0_i32_0 = arith.constant 0 : i32
    %c0_i32_1 = arith.constant 0 : i32
    return %c0_i32, %c0_i32_0 : i32, i32
  }
  func.func @transform_3(%arg0: i32) -> (i32, i32) {
    %c0_i32 = arith.constant 0 : i32
    %c0_i32_0 = arith.constant 0 : i32
    %c0_i32_1 = arith.constant 0 : i32
    return %c0_i32, %c0_i32_0 : i32, i32
  }
  func.func @transform_4(%arg0: i32) -> (i32, i32) {
    %c0_i32 = arith.constant 0 : i32
    %c0_i32_0 = arith.constant 0 : i32
    %c0_i32_1 = arith.constant 0 : i32
    return %c0_i32, %c0_i32_0 : i32, i32
  }
  func.func @transform_5(%arg0: i32) -> (i32, i32) {
    %c0_i32 = arith.constant 0 : i32
    %c0_i32_0 = arith.constant 0 : i32
    %c0_i32_1 = arith.constant 0 : i32
    return %c0_i32, %c0_i32_0 : i32, i32
  }
  func.func @transform_6(%arg0: i32) -> (i32, i32) {
    %c0_i32 = arith.constant 0 : i32
    %c0_i32_0 = arith.constant 0 : i32
    %c0_i32_1 = arith.constant 0 : i32
    return %c0_i32, %c0_i32_0 : i32, i32
  }
  func.func @transform_7(%arg0: i32) -> (i32, i32) {
    %c0_i32 = arith.constant 0 : i32
    %c0_i32_0 = arith.constant 0 : i32
    %c0_i32_1 = arith.constant 0 : i32
    return %c0_i32, %c0_i32_0 : i32, i32
  }
  func.func @transform_8(%arg0: i32) -> (i32, i32) {
    %c0_i32 = arith.constant 0 : i32
    %c0_i32_0 = arith.constant 0 : i32
    %c0_i32_1 = arith.constant 0 : i32
    return %c0_i32, %c0_i32_0 : i32, i32
  }
  func.func @transform_9(%arg0: i32) -> (i32, i32) {
    %c0_i32 = arith.constant 0 : i32
    %c0_i32_0 = arith.constant 0 : i32
    %c0_i32_1 = arith.constant 0 : i32
    return %c0_i32, %c0_i32_0 : i32, i32
  }
  func.func @transform_10(%arg0: i32) -> (i32, i32) {
    %c0_i32 = arith.constant 0 : i32
    %c0_i32_0 = arith.constant 0 : i32
    %c0_i32_1 = arith.constant 0 : i32
    return %c0_i32, %c0_i32_0 : i32, i32
  }
  func.func @transform_11(%arg0: i32) -> (i32, i32) {
    %c0_i32 = arith.constant 0 : i32
    %c0_i32_0 = arith.constant 0 : i32
    %c0_i32_1 = arith.constant 0 : i32
    return %c0_i32, %c0_i32_0 : i32, i32
  }
  func.func @transform_12(%arg0: i32) -> (i32, i32) {
    %c0_i32 = arith.constant 0 : i32
    %c0_i32_0 = arith.constant 0 : i32
    %c0_i32_1 = arith.constant 0 : i32
    return %c0_i32, %c0_i32_0 : i32, i32
  }
  func.func @transform_13(%arg0: i32) -> (i32, i32) {
    %c0_i32 = arith.constant 0 : i32
    %c0_i32_0 = arith.constant 0 : i32
    %c0_i32_1 = arith.constant 0 : i32
    return %c0_i32, %c0_i32_0 : i32, i32
  }
  func.func @transform_14(%arg0: i32) -> (i32, i32) {
    %c0_i32 = arith.constant 0 : i32
    %c0_i32_0 = arith.constant 0 : i32
    %c0_i32_1 = arith.constant 0 : i32
    return %c0_i32, %c0_i32_0 : i32, i32
  }
  func.func @transform_15(%arg0: i32) -> (i32, i32) {
    %c0_i32 = arith.constant 0 : i32
    %c0_i32_0 = arith.constant 0 : i32
    %c0_i32_1 = arith.constant 0 : i32
    return %c0_i32, %c0_i32_0 : i32, i32
  }
  func.func @transform_16(%arg0: i32) -> (i32, i32) {
    %c0_i32 = arith.constant 0 : i32
    %c0_i32_0 = arith.constant 0 : i32
    %c0_i32_1 = arith.constant 0 : i32
    return %c0_i32, %c0_i32_0 : i32, i32
  }
  func.func @transform_17(%arg0: i32) -> (i32, i32) {
    %c0_i32 = arith.constant 0 : i32
    %c0_i32_0 = arith.constant 0 : i32
    return %arg0, %c0_i32 : i32, i32
  }
  func.func @transform_18(%arg0: i32) -> (i32, i32) {
    %c0_i32 = arith.constant 0 : i32
    %c0_i32_0 = arith.constant 0 : i32
    return %arg0, %c0_i32 : i32, i32
  }
}

module attributes {stable_mosaic.version = 11 : i64} {
  func.func @kernel(%arg0: i32, %arg1: memref<8x256xf32, #tpu.memory_space<vmem>>, %arg2: memref<8x1xf32, #tpu.memory_space<vmem>>, %arg3: memref<256x32xf32, #tpu.memory_space<vmem>>, %arg4: memref<1x32xf32, #tpu.memory_space<vmem>>, %arg5: memref<32x32xf32, #tpu.memory_space<vmem>>, %arg6: memref<1x32xf32, #tpu.memory_space<vmem>>, %arg7: memref<32x32xf32, #tpu.memory_space<vmem>>, %arg8: memref<1x32xf32, #tpu.memory_space<vmem>>, %arg9: memref<32x32xf32, #tpu.memory_space<vmem>>, %arg10: memref<1x32xf32, #tpu.memory_space<vmem>>, %arg11: memref<32x32xf32, #tpu.memory_space<vmem>>, %arg12: memref<1x32xf32, #tpu.memory_space<vmem>>, %arg13: memref<32x1408xf32, #tpu.memory_space<vmem>>, %arg14: memref<1x1408xf32, #tpu.memory_space<vmem>>, %arg15: memref<256x128xf32, #tpu.memory_space<vmem>>, %arg16: memref<256x256xf32, #tpu.memory_space<vmem>>, %arg17: memref<128x256xf32, #tpu.memory_space<vmem>>, %arg18: memref<8x256xf32, #tpu.memory_space<vmem>>, %arg19: memref<8x1xf32, #tpu.memory_space<vmem>>) attributes {dimension_semantics = [#tpu.dimension_semantics<parallel>], iteration_bounds = array<i64: 1>, scalar_prefetch = 0 : i64, scratch_operands = 0 : i64, tpu.core_type = #tpu.core_type<tc>, window_params = [{transform_indices = @transform_0, window_bounds = array<i64: 8, 256>}, {transform_indices = @transform_1, window_bounds = array<i64: 8, 1>}, {pipeline_mode = #tpu.pipeline_mode<synchronous>, transform_indices = @transform_2, window_bounds = array<i64: 256, 32>}, {pipeline_mode = #tpu.pipeline_mode<synchronous>, transform_indices = @transform_3, window_bounds = array<i64: 1, 32>}, {pipeline_mode = #tpu.pipeline_mode<synchronous>, transform_indices = @transform_4, window_bounds = array<i64: 32, 32>}, {pipeline_mode = #tpu.pipeline_mode<synchronous>, transform_indices = @transform_5, window_bounds = array<i64: 1, 32>}, {pipeline_mode = #tpu.pipeline_mode<synchronous>, transform_indices = @transform_6, window_bounds = array<i64: 32, 32>}, {pipeline_mode = #tpu.pipeline_mode<synchronous>, transform_indices = @transform_7, window_bounds = array<i64: 1, 32>}, {pipeline_mode = #tpu.pipeline_mode<synchronous>, transform_indices = @transform_8, window_bounds = array<i64: 32, 32>}, {pipeline_mode = #tpu.pipeline_mode<synchronous>, transform_indices = @transform_9, window_bounds = array<i64: 1, 32>}, {pipeline_mode = #tpu.pipeline_mode<synchronous>, transform_indices = @transform_10, window_bounds = array<i64: 32, 32>}, {pipeline_mode = #tpu.pipeline_mode<synchronous>, transform_indices = @transform_11, window_bounds = array<i64: 1, 32>}, {pipeline_mode = #tpu.pipeline_mode<synchronous>, transform_indices = @transform_12, window_bounds = array<i64: 32, 1408>}, {pipeline_mode = #tpu.pipeline_mode<synchronous>, transform_indices = @transform_13, window_bounds = array<i64: 1, 1408>}, {pipeline_mode = #tpu.pipeline_mode<synchronous>, transform_indices = @transform_14, window_bounds = array<i64: 256, 128>}, {pipeline_mode = #tpu.pipeline_mode<synchronous>, transform_indices = @transform_15, window_bounds = array<i64: 256, 256>}, {pipeline_mode = #tpu.pipeline_mode<synchronous>, transform_indices = @transform_16, window_bounds = array<i64: 128, 256>}, {transform_indices = @transform_17, window_bounds = array<i64: 8, 256>}, {transform_indices = @transform_18, window_bounds = array<i64: 8, 1>}]} {
    %c0 = arith.constant 0 : index
    %c0_0 = arith.constant 0 : index
    %0 = vector.load %arg1[%c0, %c0_0] : memref<8x256xf32, #tpu.memory_space<vmem>>, vector<8x256xf32>
    %c0_1 = arith.constant 0 : index
    %c0_2 = arith.constant 0 : index
    %1 = vector.load %arg3[%c0_1, %c0_2] : memref<256x32xf32, #tpu.memory_space<vmem>>, vector<256x32xf32>
    %cst = arith.constant dense<0.000000e+00> : vector<8x32xf32>
    %2 = tpu.matmul %0, %1, %cst {dimension_numbers = #tpu.dot_dimension_numbers<[1], [0], [0], [1], [0, 0, 1, 1], [], []>} : vector<8x256xf32>, vector<256x32xf32>, vector<8x32xf32> -> vector<8x32xf32>
    %c0_3 = arith.constant 0 : index
    %c0_4 = arith.constant 0 : index
    %3 = vector.load %arg4[%c0_3, %c0_4] : memref<1x32xf32, #tpu.memory_space<vmem>>, vector<1x32xf32>
    %4 = vector.broadcast %3 : vector<1x32xf32> to vector<8x32xf32>
    %5 = arith.addf %2, %4 : vector<8x32xf32>
    %cst_5 = arith.constant 0.000000e+00 : f32
    %6 = vector.broadcast %cst_5 : f32 to vector<8x32xf32>
    %7 = arith.maximumf %5, %6 : vector<8x32xf32>
    %c0_6 = arith.constant 0 : index
    %c0_7 = arith.constant 0 : index
    %8 = vector.load %arg5[%c0_6, %c0_7] : memref<32x32xf32, #tpu.memory_space<vmem>>, vector<32x32xf32>
    %cst_8 = arith.constant dense<0.000000e+00> : vector<8x32xf32>
    %9 = tpu.matmul %7, %8, %cst_8 {dimension_numbers = #tpu.dot_dimension_numbers<[1], [0], [0], [1], [0, 0, 1, 1], [], []>} : vector<8x32xf32>, vector<32x32xf32>, vector<8x32xf32> -> vector<8x32xf32>
    %c0_9 = arith.constant 0 : index
    %c0_10 = arith.constant 0 : index
    %10 = vector.load %arg6[%c0_9, %c0_10] : memref<1x32xf32, #tpu.memory_space<vmem>>, vector<1x32xf32>
    %11 = vector.broadcast %10 : vector<1x32xf32> to vector<8x32xf32>
    %12 = arith.addf %9, %11 : vector<8x32xf32>
    %cst_11 = arith.constant 0.000000e+00 : f32
    %13 = vector.broadcast %cst_11 : f32 to vector<8x32xf32>
    %14 = arith.maximumf %12, %13 : vector<8x32xf32>
    %c0_12 = arith.constant 0 : index
    %c0_13 = arith.constant 0 : index
    %15 = vector.load %arg7[%c0_12, %c0_13] : memref<32x32xf32, #tpu.memory_space<vmem>>, vector<32x32xf32>
    %cst_14 = arith.constant dense<0.000000e+00> : vector<8x32xf32>
    %16 = tpu.matmul %14, %15, %cst_14 {dimension_numbers = #tpu.dot_dimension_numbers<[1], [0], [0], [1], [0, 0, 1, 1], [], []>} : vector<8x32xf32>, vector<32x32xf32>, vector<8x32xf32> -> vector<8x32xf32>
    %c0_15 = arith.constant 0 : index
    %c0_16 = arith.constant 0 : index
    %17 = vector.load %arg8[%c0_15, %c0_16] : memref<1x32xf32, #tpu.memory_space<vmem>>, vector<1x32xf32>
    %18 = vector.broadcast %17 : vector<1x32xf32> to vector<8x32xf32>
    %19 = arith.addf %16, %18 : vector<8x32xf32>
    %20 = arith.addf %5, %19 : vector<8x32xf32>
    %cst_17 = arith.constant 0.000000e+00 : f32
    %21 = vector.broadcast %cst_17 : f32 to vector<8x32xf32>
    %22 = arith.maximumf %20, %21 : vector<8x32xf32>
    %c0_18 = arith.constant 0 : index
    %c0_19 = arith.constant 0 : index
    %23 = vector.load %arg9[%c0_18, %c0_19] : memref<32x32xf32, #tpu.memory_space<vmem>>, vector<32x32xf32>
    %cst_20 = arith.constant dense<0.000000e+00> : vector<8x32xf32>
    %24 = tpu.matmul %22, %23, %cst_20 {dimension_numbers = #tpu.dot_dimension_numbers<[1], [0], [0], [1], [0, 0, 1, 1], [], []>} : vector<8x32xf32>, vector<32x32xf32>, vector<8x32xf32> -> vector<8x32xf32>
    %c0_21 = arith.constant 0 : index
    %c0_22 = arith.constant 0 : index
    %25 = vector.load %arg10[%c0_21, %c0_22] : memref<1x32xf32, #tpu.memory_space<vmem>>, vector<1x32xf32>
    %26 = vector.broadcast %25 : vector<1x32xf32> to vector<8x32xf32>
    %27 = arith.addf %24, %26 : vector<8x32xf32>
    %cst_23 = arith.constant 0.000000e+00 : f32
    %28 = vector.broadcast %cst_23 : f32 to vector<8x32xf32>
    %29 = arith.maximumf %27, %28 : vector<8x32xf32>
    %c0_24 = arith.constant 0 : index
    %c0_25 = arith.constant 0 : index
    %30 = vector.load %arg11[%c0_24, %c0_25] : memref<32x32xf32, #tpu.memory_space<vmem>>, vector<32x32xf32>
    %cst_26 = arith.constant dense<0.000000e+00> : vector<8x32xf32>
    %31 = tpu.matmul %29, %30, %cst_26 {dimension_numbers = #tpu.dot_dimension_numbers<[1], [0], [0], [1], [0, 0, 1, 1], [], []>} : vector<8x32xf32>, vector<32x32xf32>, vector<8x32xf32> -> vector<8x32xf32>
    %c0_27 = arith.constant 0 : index
    %c0_28 = arith.constant 0 : index
    %32 = vector.load %arg12[%c0_27, %c0_28] : memref<1x32xf32, #tpu.memory_space<vmem>>, vector<1x32xf32>
    %33 = vector.broadcast %32 : vector<1x32xf32> to vector<8x32xf32>
    %34 = arith.addf %31, %33 : vector<8x32xf32>
    %35 = arith.addf %20, %34 : vector<8x32xf32>
    %c0_29 = arith.constant 0 : index
    %c0_30 = arith.constant 0 : index
    %36 = vector.load %arg13[%c0_29, %c0_30] : memref<32x1408xf32, #tpu.memory_space<vmem>>, vector<32x1408xf32>
    %cst_31 = arith.constant dense<0.000000e+00> : vector<8x1408xf32>
    %37 = tpu.matmul %35, %36, %cst_31 {dimension_numbers = #tpu.dot_dimension_numbers<[1], [0], [0], [1], [0, 0, 1, 1], [], []>} : vector<8x32xf32>, vector<32x1408xf32>, vector<8x1408xf32> -> vector<8x1408xf32>
    %c0_32 = arith.constant 0 : index
    %c0_33 = arith.constant 0 : index
    %38 = vector.load %arg14[%c0_32, %c0_33] : memref<1x1408xf32, #tpu.memory_space<vmem>>, vector<1x1408xf32>
    %39 = vector.broadcast %38 : vector<1x1408xf32> to vector<8x1408xf32>
    %40 = arith.addf %37, %39 : vector<8x1408xf32>
    %c0_34 = arith.constant 0 : index
    %c0_35 = arith.constant 0 : index
    %41 = vector.load %arg15[%c0_34, %c0_35] : memref<256x128xf32, #tpu.memory_space<vmem>>, vector<256x128xf32>
    %cst_36 = arith.constant dense<0.000000e+00> : vector<8x128xf32>
    %42 = tpu.matmul %0, %41, %cst_36 {dimension_numbers = #tpu.dot_dimension_numbers<[1], [0], [0], [1], [0, 0, 1, 1], [], []>} : vector<8x256xf32>, vector<256x128xf32>, vector<8x128xf32> -> vector<8x128xf32>
    %cst_37 = arith.constant -3.000000e+00 : f32
    %43 = vector.broadcast %cst_37 : f32 to vector<8x128xf32>
    %44 = arith.cmpf oge, %42, %43 : vector<8x128xf32>
    %cst_38 = arith.constant 3.000000e+00 : f32
    %45 = vector.broadcast %cst_38 : f32 to vector<8x128xf32>
    %46 = arith.cmpf ole, %42, %45 : vector<8x128xf32>
    %47 = arith.andi %44, %46 : vector<8x128xi1>
    %cst_39 = arith.constant -3.000000e+00 : f32
    %cst_40 = arith.constant 3.000000e+00 : f32
    %48 = vector.broadcast %cst_39 : f32 to vector<8x128xf32>
    %49 = arith.maximumf %48, %42 : vector<8x128xf32>
    %50 = vector.broadcast %cst_40 : f32 to vector<8x128xf32>
    %51 = arith.minimumf %50, %49 : vector<8x128xf32>
    %52 = vector.extract_strided_slice %40 {offsets = [0, 0], sizes = [8, 128], strides = [1, 1]} : vector<8x1408xf32> to vector<8x128xf32>
    %53 = vector.extract_strided_slice %40 {offsets = [0, 128], sizes = [8, 128], strides = [1, 1]} : vector<8x1408xf32> to vector<8x128xf32>
    %54 = vector.extract_strided_slice %40 {offsets = [0, 256], sizes = [8, 128], strides = [1, 1]} : vector<8x1408xf32> to vector<8x128xf32>
    %55 = vector.extract_strided_slice %40 {offsets = [0, 384], sizes = [8, 128], strides = [1, 1]} : vector<8x1408xf32> to vector<8x128xf32>
    %56 = vector.extract_strided_slice %40 {offsets = [0, 512], sizes = [8, 128], strides = [1, 1]} : vector<8x1408xf32> to vector<8x128xf32>
    %57 = vector.extract_strided_slice %40 {offsets = [0, 640], sizes = [8, 128], strides = [1, 1]} : vector<8x1408xf32> to vector<8x128xf32>
    %58 = vector.extract_strided_slice %40 {offsets = [0, 768], sizes = [8, 128], strides = [1, 1]} : vector<8x1408xf32> to vector<8x128xf32>
    %59 = vector.extract_strided_slice %40 {offsets = [0, 896], sizes = [8, 128], strides = [1, 1]} : vector<8x1408xf32> to vector<8x128xf32>
    %60 = vector.extract_strided_slice %40 {offsets = [0, 1024], sizes = [8, 128], strides = [1, 1]} : vector<8x1408xf32> to vector<8x128xf32>
    %61 = vector.extract_strided_slice %40 {offsets = [0, 1152], sizes = [8, 128], strides = [1, 1]} : vector<8x1408xf32> to vector<8x128xf32>
    %62 = vector.extract_strided_slice %40 {offsets = [0, 1280], sizes = [8, 128], strides = [1, 1]} : vector<8x1408xf32> to vector<8x128xf32>
    %63 = arith.maximumf %52, %53 : vector<8x128xf32>
    %64 = arith.maximumf %63, %54 : vector<8x128xf32>
    %65 = arith.maximumf %64, %55 : vector<8x128xf32>
    %66 = arith.subf %52, %65 : vector<8x128xf32>
    %67 = math.exp %66 : vector<8x128xf32>
    %68 = arith.subf %53, %65 : vector<8x128xf32>
    %69 = math.exp %68 : vector<8x128xf32>
    %70 = arith.subf %54, %65 : vector<8x128xf32>
    %71 = math.exp %70 : vector<8x128xf32>
    %72 = arith.subf %55, %65 : vector<8x128xf32>
    %73 = math.exp %72 : vector<8x128xf32>
    %74 = arith.addf %67, %69 : vector<8x128xf32>
    %75 = arith.addf %74, %71 : vector<8x128xf32>
    %76 = arith.addf %75, %73 : vector<8x128xf32>
    %77 = tpu.reciprocal %76 {approx = true} : vector<8x128xf32> -> vector<8x128xf32>
    %78 = arith.mulf %67, %77 : vector<8x128xf32>
    %cst_41 = arith.constant 0.995999991 : f32
    %79 = vector.broadcast %cst_41 : f32 to vector<8x128xf32>
    %80 = arith.mulf %79, %78 : vector<8x128xf32>
    %cst_42 = arith.constant 1.000000e-03 : f32
    %81 = vector.broadcast %cst_42 : f32 to vector<8x128xf32>
    %82 = arith.addf %81, %80 : vector<8x128xf32>
    %83 = arith.mulf %69, %77 : vector<8x128xf32>
    %cst_43 = arith.constant 0.995999991 : f32
    %84 = vector.broadcast %cst_43 : f32 to vector<8x128xf32>
    %85 = arith.mulf %84, %83 : vector<8x128xf32>
    %cst_44 = arith.constant 1.000000e-03 : f32
    %86 = vector.broadcast %cst_44 : f32 to vector<8x128xf32>
    %87 = arith.addf %86, %85 : vector<8x128xf32>
    %88 = arith.mulf %71, %77 : vector<8x128xf32>
    %cst_45 = arith.constant 0.995999991 : f32
    %89 = vector.broadcast %cst_45 : f32 to vector<8x128xf32>
    %90 = arith.mulf %89, %88 : vector<8x128xf32>
    %cst_46 = arith.constant 1.000000e-03 : f32
    %91 = vector.broadcast %cst_46 : f32 to vector<8x128xf32>
    %92 = arith.addf %91, %90 : vector<8x128xf32>
    %93 = arith.maximumf %56, %57 : vector<8x128xf32>
    %94 = arith.maximumf %93, %58 : vector<8x128xf32>
    %95 = arith.maximumf %94, %59 : vector<8x128xf32>
    %96 = arith.subf %56, %95 : vector<8x128xf32>
    %97 = math.exp %96 : vector<8x128xf32>
    %98 = arith.subf %57, %95 : vector<8x128xf32>
    %99 = math.exp %98 : vector<8x128xf32>
    %100 = arith.subf %58, %95 : vector<8x128xf32>
    %101 = math.exp %100 : vector<8x128xf32>
    %102 = arith.subf %59, %95 : vector<8x128xf32>
    %103 = math.exp %102 : vector<8x128xf32>
    %104 = arith.addf %97, %99 : vector<8x128xf32>
    %105 = arith.addf %104, %101 : vector<8x128xf32>
    %106 = arith.addf %105, %103 : vector<8x128xf32>
    %107 = tpu.reciprocal %106 {approx = true} : vector<8x128xf32> -> vector<8x128xf32>
    %108 = arith.mulf %97, %107 : vector<8x128xf32>
    %cst_47 = arith.constant 0.995999991 : f32
    %109 = vector.broadcast %cst_47 : f32 to vector<8x128xf32>
    %110 = arith.mulf %109, %108 : vector<8x128xf32>
    %cst_48 = arith.constant 1.000000e-03 : f32
    %111 = vector.broadcast %cst_48 : f32 to vector<8x128xf32>
    %112 = arith.addf %111, %110 : vector<8x128xf32>
    %113 = arith.mulf %99, %107 : vector<8x128xf32>
    %cst_49 = arith.constant 0.995999991 : f32
    %114 = vector.broadcast %cst_49 : f32 to vector<8x128xf32>
    %115 = arith.mulf %114, %113 : vector<8x128xf32>
    %cst_50 = arith.constant 1.000000e-03 : f32
    %116 = vector.broadcast %cst_50 : f32 to vector<8x128xf32>
    %117 = arith.addf %116, %115 : vector<8x128xf32>
    %118 = arith.mulf %101, %107 : vector<8x128xf32>
    %cst_51 = arith.constant 0.995999991 : f32
    %119 = vector.broadcast %cst_51 : f32 to vector<8x128xf32>
    %120 = arith.mulf %119, %118 : vector<8x128xf32>
    %cst_52 = arith.constant 1.000000e-03 : f32
    %121 = vector.broadcast %cst_52 : f32 to vector<8x128xf32>
    %122 = arith.addf %121, %120 : vector<8x128xf32>
    %cst_53 = arith.constant -3.000000e+00 : f32
    %123 = vector.broadcast %cst_53 : f32 to vector<8x128xf32>
    %cst_54 = arith.constant 0.000000e+00 : f32
    %124 = vector.broadcast %cst_54 : f32 to vector<8x128xf32>
    %125 = arith.addf %124, %82 : vector<8x128xf32>
    %cst_55 = arith.constant 6.000000e+00 : f32
    %126 = vector.broadcast %cst_55 : f32 to vector<8x128xf32>
    %127 = arith.mulf %126, %125 : vector<8x128xf32>
    %cst_56 = arith.constant -3.000000e+00 : f32
    %128 = vector.broadcast %cst_56 : f32 to vector<8x128xf32>
    %129 = arith.addf %127, %128 : vector<8x128xf32>
    %130 = arith.addf %125, %87 : vector<8x128xf32>
    %cst_57 = arith.constant 6.000000e+00 : f32
    %131 = vector.broadcast %cst_57 : f32 to vector<8x128xf32>
    %132 = arith.mulf %131, %130 : vector<8x128xf32>
    %cst_58 = arith.constant -3.000000e+00 : f32
    %133 = vector.broadcast %cst_58 : f32 to vector<8x128xf32>
    %134 = arith.addf %132, %133 : vector<8x128xf32>
    %135 = arith.addf %130, %92 : vector<8x128xf32>
    %cst_59 = arith.constant 6.000000e+00 : f32
    %136 = vector.broadcast %cst_59 : f32 to vector<8x128xf32>
    %137 = arith.mulf %136, %135 : vector<8x128xf32>
    %cst_60 = arith.constant -3.000000e+00 : f32
    %138 = vector.broadcast %cst_60 : f32 to vector<8x128xf32>
    %139 = arith.addf %137, %138 : vector<8x128xf32>
    %cst_61 = arith.constant 3.000000e+00 : f32
    %140 = vector.broadcast %cst_61 : f32 to vector<8x128xf32>
    %141 = arith.subf %129, %123 : vector<8x128xf32>
    %142 = arith.subf %134, %129 : vector<8x128xf32>
    %143 = arith.subf %139, %134 : vector<8x128xf32>
    %144 = arith.subf %140, %139 : vector<8x128xf32>
    %cst_62 = arith.constant -3.000000e+00 : f32
    %145 = vector.broadcast %cst_62 : f32 to vector<8x128xf32>
    %cst_63 = arith.constant 0.000000e+00 : f32
    %146 = vector.broadcast %cst_63 : f32 to vector<8x128xf32>
    %147 = arith.addf %146, %112 : vector<8x128xf32>
    %cst_64 = arith.constant 6.000000e+00 : f32
    %148 = vector.broadcast %cst_64 : f32 to vector<8x128xf32>
    %149 = arith.mulf %148, %147 : vector<8x128xf32>
    %cst_65 = arith.constant -3.000000e+00 : f32
    %150 = vector.broadcast %cst_65 : f32 to vector<8x128xf32>
    %151 = arith.addf %149, %150 : vector<8x128xf32>
    %152 = arith.addf %147, %117 : vector<8x128xf32>
    %cst_66 = arith.constant 6.000000e+00 : f32
    %153 = vector.broadcast %cst_66 : f32 to vector<8x128xf32>
    %154 = arith.mulf %153, %152 : vector<8x128xf32>
    %cst_67 = arith.constant -3.000000e+00 : f32
    %155 = vector.broadcast %cst_67 : f32 to vector<8x128xf32>
    %156 = arith.addf %154, %155 : vector<8x128xf32>
    %157 = arith.addf %152, %122 : vector<8x128xf32>
    %cst_68 = arith.constant 6.000000e+00 : f32
    %158 = vector.broadcast %cst_68 : f32 to vector<8x128xf32>
    %159 = arith.mulf %158, %157 : vector<8x128xf32>
    %cst_69 = arith.constant -3.000000e+00 : f32
    %160 = vector.broadcast %cst_69 : f32 to vector<8x128xf32>
    %161 = arith.addf %159, %160 : vector<8x128xf32>
    %cst_70 = arith.constant 3.000000e+00 : f32
    %162 = vector.broadcast %cst_70 : f32 to vector<8x128xf32>
    %163 = arith.subf %151, %145 : vector<8x128xf32>
    %164 = arith.subf %156, %151 : vector<8x128xf32>
    %165 = arith.subf %161, %156 : vector<8x128xf32>
    %166 = arith.subf %162, %161 : vector<8x128xf32>
    %cst_71 = arith.constant 1.000000e+00 : f32
    %167 = vector.broadcast %cst_71 : f32 to vector<8x128xf32>
    %cst_72 = arith.constant 0.000000e+00 : f32
    %168 = vector.broadcast %cst_72 : f32 to vector<8x128xf32>
    %169 = arith.maximumf %60, %168 : vector<8x128xf32>
    %170 = math.absf %60 : vector<8x128xf32>
    %cst_73 = arith.constant 0.000000e+00 : f32
    %171 = vector.broadcast %cst_73 : f32 to vector<8x128xf32>
    %172 = arith.subf %171, %170 : vector<8x128xf32>
    %173 = math.exp %172 : vector<8x128xf32>
    %cst_74 = arith.constant 1.000000e+00 : f32
    %174 = vector.broadcast %cst_74 : f32 to vector<8x128xf32>
    %175 = arith.addf %174, %173 : vector<8x128xf32>
    %176 = math.log %175 : vector<8x128xf32>
    %177 = arith.addf %169, %176 : vector<8x128xf32>
    %cst_75 = arith.constant 1.000000e-03 : f32
    %178 = vector.broadcast %cst_75 : f32 to vector<8x128xf32>
    %179 = arith.addf %178, %177 : vector<8x128xf32>
    %cst_76 = arith.constant 0.000000e+00 : f32
    %180 = vector.broadcast %cst_76 : f32 to vector<8x128xf32>
    %181 = arith.maximumf %61, %180 : vector<8x128xf32>
    %182 = math.absf %61 : vector<8x128xf32>
    %cst_77 = arith.constant 0.000000e+00 : f32
    %183 = vector.broadcast %cst_77 : f32 to vector<8x128xf32>
    %184 = arith.subf %183, %182 : vector<8x128xf32>
    %185 = math.exp %184 : vector<8x128xf32>
    %cst_78 = arith.constant 1.000000e+00 : f32
    %186 = vector.broadcast %cst_78 : f32 to vector<8x128xf32>
    %187 = arith.addf %186, %185 : vector<8x128xf32>
    %188 = math.log %187 : vector<8x128xf32>
    %189 = arith.addf %181, %188 : vector<8x128xf32>
    %cst_79 = arith.constant 1.000000e-03 : f32
    %190 = vector.broadcast %cst_79 : f32 to vector<8x128xf32>
    %191 = arith.addf %190, %189 : vector<8x128xf32>
    %cst_80 = arith.constant 0.000000e+00 : f32
    %192 = vector.broadcast %cst_80 : f32 to vector<8x128xf32>
    %193 = arith.maximumf %62, %192 : vector<8x128xf32>
    %194 = math.absf %62 : vector<8x128xf32>
    %cst_81 = arith.constant 0.000000e+00 : f32
    %195 = vector.broadcast %cst_81 : f32 to vector<8x128xf32>
    %196 = arith.subf %195, %194 : vector<8x128xf32>
    %197 = math.exp %196 : vector<8x128xf32>
    %cst_82 = arith.constant 1.000000e+00 : f32
    %198 = vector.broadcast %cst_82 : f32 to vector<8x128xf32>
    %199 = arith.addf %198, %197 : vector<8x128xf32>
    %200 = math.log %199 : vector<8x128xf32>
    %201 = arith.addf %193, %200 : vector<8x128xf32>
    %cst_83 = arith.constant 1.000000e-03 : f32
    %202 = vector.broadcast %cst_83 : f32 to vector<8x128xf32>
    %203 = arith.addf %202, %201 : vector<8x128xf32>
    %cst_84 = arith.constant 1.000000e+00 : f32
    %204 = vector.broadcast %cst_84 : f32 to vector<8x128xf32>
    %c0_i32 = arith.constant 0 : i32
    %205 = vector.broadcast %c0_i32 : i32 to vector<8x128xi32>
    %cst_85 = arith.constant 0.000000e+00 : f32
    %206 = vector.broadcast %cst_85 : f32 to vector<8x128xf32>
    %207 = arith.addf %123, %206 : vector<8x128xf32>
    %208 = arith.cmpf oge, %51, %207 : vector<8x128xf32>
    %209 = arith.extui %208 : vector<8x128xi1> to vector<8x128xi32>
    %210 = arith.addi %205, %209 : vector<8x128xi32>
    %cst_86 = arith.constant 0.000000e+00 : f32
    %211 = vector.broadcast %cst_86 : f32 to vector<8x128xf32>
    %212 = arith.addf %129, %211 : vector<8x128xf32>
    %213 = arith.cmpf oge, %51, %212 : vector<8x128xf32>
    %214 = arith.extui %213 : vector<8x128xi1> to vector<8x128xi32>
    %215 = arith.addi %210, %214 : vector<8x128xi32>
    %cst_87 = arith.constant 0.000000e+00 : f32
    %216 = vector.broadcast %cst_87 : f32 to vector<8x128xf32>
    %217 = arith.addf %134, %216 : vector<8x128xf32>
    %218 = arith.cmpf oge, %51, %217 : vector<8x128xf32>
    %219 = arith.extui %218 : vector<8x128xi1> to vector<8x128xi32>
    %220 = arith.addi %215, %219 : vector<8x128xi32>
    %cst_88 = arith.constant 0.000000e+00 : f32
    %221 = vector.broadcast %cst_88 : f32 to vector<8x128xf32>
    %222 = arith.addf %139, %221 : vector<8x128xf32>
    %223 = arith.cmpf oge, %51, %222 : vector<8x128xf32>
    %224 = arith.extui %223 : vector<8x128xi1> to vector<8x128xi32>
    %225 = arith.addi %220, %224 : vector<8x128xi32>
    %cst_89 = arith.constant 9.99999997E-7 : f32
    %226 = vector.broadcast %cst_89 : f32 to vector<8x128xf32>
    %227 = arith.addf %140, %226 : vector<8x128xf32>
    %228 = arith.cmpf oge, %51, %227 : vector<8x128xf32>
    %229 = arith.extui %228 : vector<8x128xi1> to vector<8x128xi32>
    %230 = arith.addi %225, %229 : vector<8x128xi32>
    %c1_i32 = arith.constant 1 : i32
    %231 = vector.broadcast %c1_i32 : i32 to vector<8x128xi32>
    %232 = arith.subi %230, %231 : vector<8x128xi32>
    %cst_90 = arith.constant 0.000000e+00 : f32
    %233 = vector.broadcast %cst_90 : f32 to vector<8x128xf32>
    %c0_i32_91 = arith.constant 0 : i32
    %234 = vector.broadcast %c0_i32_91 : i32 to vector<8x128xi32>
    %235 = arith.cmpi eq, %232, %234 : vector<8x128xi32>
    %236 = arith.extui %235 : vector<8x128xi1> to vector<8x128xi32>
    %237 = arith.sitofp %236 : vector<8x128xi32> to vector<8x128xf32>
    %238 = arith.mulf %237, %123 : vector<8x128xf32>
    %239 = arith.addf %233, %238 : vector<8x128xf32>
    %240 = arith.mulf %237, %141 : vector<8x128xf32>
    %241 = arith.addf %233, %240 : vector<8x128xf32>
    %242 = arith.mulf %237, %145 : vector<8x128xf32>
    %243 = arith.addf %233, %242 : vector<8x128xf32>
    %244 = arith.mulf %237, %163 : vector<8x128xf32>
    %245 = arith.addf %233, %244 : vector<8x128xf32>
    %246 = arith.mulf %237, %167 : vector<8x128xf32>
    %247 = arith.addf %233, %246 : vector<8x128xf32>
    %248 = arith.mulf %237, %179 : vector<8x128xf32>
    %249 = arith.addf %233, %248 : vector<8x128xf32>
    %c1_i32_92 = arith.constant 1 : i32
    %250 = vector.broadcast %c1_i32_92 : i32 to vector<8x128xi32>
    %251 = arith.cmpi eq, %232, %250 : vector<8x128xi32>
    %252 = arith.extui %251 : vector<8x128xi1> to vector<8x128xi32>
    %253 = arith.sitofp %252 : vector<8x128xi32> to vector<8x128xf32>
    %254 = arith.mulf %253, %129 : vector<8x128xf32>
    %255 = arith.addf %239, %254 : vector<8x128xf32>
    %256 = arith.mulf %253, %142 : vector<8x128xf32>
    %257 = arith.addf %241, %256 : vector<8x128xf32>
    %258 = arith.mulf %253, %151 : vector<8x128xf32>
    %259 = arith.addf %243, %258 : vector<8x128xf32>
    %260 = arith.mulf %253, %164 : vector<8x128xf32>
    %261 = arith.addf %245, %260 : vector<8x128xf32>
    %262 = arith.mulf %253, %179 : vector<8x128xf32>
    %263 = arith.addf %247, %262 : vector<8x128xf32>
    %264 = arith.mulf %253, %191 : vector<8x128xf32>
    %265 = arith.addf %249, %264 : vector<8x128xf32>
    %c2_i32 = arith.constant 2 : i32
    %266 = vector.broadcast %c2_i32 : i32 to vector<8x128xi32>
    %267 = arith.cmpi eq, %232, %266 : vector<8x128xi32>
    %268 = arith.extui %267 : vector<8x128xi1> to vector<8x128xi32>
    %269 = arith.sitofp %268 : vector<8x128xi32> to vector<8x128xf32>
    %270 = arith.mulf %269, %134 : vector<8x128xf32>
    %271 = arith.addf %255, %270 : vector<8x128xf32>
    %272 = arith.mulf %269, %143 : vector<8x128xf32>
    %273 = arith.addf %257, %272 : vector<8x128xf32>
    %274 = arith.mulf %269, %156 : vector<8x128xf32>
    %275 = arith.addf %259, %274 : vector<8x128xf32>
    %276 = arith.mulf %269, %165 : vector<8x128xf32>
    %277 = arith.addf %261, %276 : vector<8x128xf32>
    %278 = arith.mulf %269, %191 : vector<8x128xf32>
    %279 = arith.addf %263, %278 : vector<8x128xf32>
    %280 = arith.mulf %269, %203 : vector<8x128xf32>
    %281 = arith.addf %265, %280 : vector<8x128xf32>
    %c3_i32 = arith.constant 3 : i32
    %282 = vector.broadcast %c3_i32 : i32 to vector<8x128xi32>
    %283 = arith.cmpi eq, %232, %282 : vector<8x128xi32>
    %284 = arith.extui %283 : vector<8x128xi1> to vector<8x128xi32>
    %285 = arith.sitofp %284 : vector<8x128xi32> to vector<8x128xf32>
    %286 = arith.mulf %285, %139 : vector<8x128xf32>
    %287 = arith.addf %271, %286 : vector<8x128xf32>
    %288 = arith.mulf %285, %144 : vector<8x128xf32>
    %289 = arith.addf %273, %288 : vector<8x128xf32>
    %290 = arith.mulf %285, %161 : vector<8x128xf32>
    %291 = arith.addf %275, %290 : vector<8x128xf32>
    %292 = arith.mulf %285, %166 : vector<8x128xf32>
    %293 = arith.addf %277, %292 : vector<8x128xf32>
    %294 = arith.mulf %285, %203 : vector<8x128xf32>
    %295 = arith.addf %279, %294 : vector<8x128xf32>
    %296 = arith.mulf %285, %204 : vector<8x128xf32>
    %297 = arith.addf %281, %296 : vector<8x128xf32>
    %298 = tpu.reciprocal %289 : vector<8x128xf32> -> vector<8x128xf32>
    %299 = arith.mulf %293, %298 : vector<8x128xf32>
    %300 = arith.subf %51, %287 : vector<8x128xf32>
    %301 = arith.mulf %300, %298 : vector<8x128xf32>
    %cst_93 = arith.constant 1.000000e+00 : f32
    %302 = vector.broadcast %cst_93 : f32 to vector<8x128xf32>
    %303 = arith.subf %302, %301 : vector<8x128xf32>
    %304 = arith.mulf %301, %303 : vector<8x128xf32>
    %305 = arith.mulf %299, %301 : vector<8x128xf32>
    %306 = arith.mulf %305, %301 : vector<8x128xf32>
    %307 = arith.mulf %295, %304 : vector<8x128xf32>
    %308 = arith.addf %306, %307 : vector<8x128xf32>
    %309 = arith.mulf %293, %308 : vector<8x128xf32>
    %310 = arith.addf %295, %297 : vector<8x128xf32>
    %cst_94 = arith.constant 2.000000e+00 : f32
    %311 = vector.broadcast %cst_94 : f32 to vector<8x128xf32>
    %312 = arith.mulf %311, %299 : vector<8x128xf32>
    %313 = arith.subf %310, %312 : vector<8x128xf32>
    %314 = arith.mulf %313, %304 : vector<8x128xf32>
    %315 = arith.addf %299, %314 : vector<8x128xf32>
    %316 = tpu.reciprocal %315 : vector<8x128xf32> -> vector<8x128xf32>
    %317 = arith.mulf %309, %316 : vector<8x128xf32>
    %318 = arith.addf %291, %317 : vector<8x128xf32>
    %319 = arith.mulf %299, %299 : vector<8x128xf32>
    %320 = arith.mulf %297, %301 : vector<8x128xf32>
    %321 = arith.mulf %320, %301 : vector<8x128xf32>
    %cst_95 = arith.constant 2.000000e+00 : f32
    %322 = vector.broadcast %cst_95 : f32 to vector<8x128xf32>
    %323 = arith.mulf %322, %299 : vector<8x128xf32>
    %324 = arith.mulf %323, %304 : vector<8x128xf32>
    %325 = arith.addf %321, %324 : vector<8x128xf32>
    %cst_96 = arith.constant 1.000000e+00 : f32
    %326 = vector.broadcast %cst_96 : f32 to vector<8x128xf32>
    %327 = arith.subf %326, %301 : vector<8x128xf32>
    %328 = arith.mulf %295, %327 : vector<8x128xf32>
    %cst_97 = arith.constant 1.000000e+00 : f32
    %329 = vector.broadcast %cst_97 : f32 to vector<8x128xf32>
    %330 = arith.subf %329, %301 : vector<8x128xf32>
    %331 = arith.mulf %328, %330 : vector<8x128xf32>
    %332 = arith.addf %325, %331 : vector<8x128xf32>
    %333 = arith.mulf %319, %332 : vector<8x128xf32>
    %334 = arith.mulf %333, %316 : vector<8x128xf32>
    %335 = arith.mulf %334, %316 : vector<8x128xf32>
    %336 = math.log %335 : vector<8x128xf32>
    %337 = arith.select %47, %318, %42 : vector<8x128xi1>, vector<8x128xf32>
    %338 = tpu.iota {dimensions = array<i32: 1>} : vector<8x128xi32>
    %c79_i32 = arith.constant 79 : i32
    %339 = vector.broadcast %c79_i32 : i32 to vector<8x128xi32>
    %340 = arith.cmpi slt, %338, %339 : vector<8x128xi32>
    %341 = arith.andi %47, %340 : vector<8x128xi1>
    %cst_98 = arith.constant 0.000000e+00 : f32
    %342 = vector.broadcast %cst_98 : f32 to vector<8x128xf32>
    %343 = arith.select %341, %336, %342 : vector<8x128xi1>, vector<8x128xf32>
    %c0_99 = arith.constant 0 : index
    %c0_100 = arith.constant 0 : index
    %344 = vector.load %arg16[%c0_99, %c0_100] : memref<256x256xf32, #tpu.memory_space<vmem>>, vector<256x256xf32>
    %cst_101 = arith.constant dense<0.000000e+00> : vector<8x256xf32>
    %345 = tpu.matmul %0, %344, %cst_101 {dimension_numbers = #tpu.dot_dimension_numbers<[1], [0], [0], [1], [0, 0, 1, 1], [], []>} : vector<8x256xf32>, vector<256x256xf32>, vector<8x256xf32> -> vector<8x256xf32>
    %c0_102 = arith.constant 0 : index
    %c0_103 = arith.constant 0 : index
    %346 = vector.load %arg17[%c0_102, %c0_103] : memref<128x256xf32, #tpu.memory_space<vmem>>, vector<128x256xf32>
    %cst_104 = arith.constant dense<0.000000e+00> : vector<8x256xf32>
    %347 = tpu.matmul %337, %346, %cst_104 {dimension_numbers = #tpu.dot_dimension_numbers<[1], [0], [0], [1], [0, 0, 1, 1], [], []>} : vector<8x128xf32>, vector<128x256xf32>, vector<8x256xf32> -> vector<8x256xf32>
    %348 = arith.addf %345, %347 : vector<8x256xf32>
    %c0_105 = arith.constant 0 : index
    %c0_106 = arith.constant 0 : index
    %349 = vector.load %arg18[%c0_105, %c0_106] : memref<8x256xf32, #tpu.memory_space<vmem>>, vector<8x256xf32>
    tpu.vector_store %arg18[%c0_105, %c0_106], %348 {strides = array<i32>} : memref<8x256xf32, #tpu.memory_space<vmem>>, vector<8x256xf32>,
    %c0_107 = arith.constant 0 : index
    %c0_108 = arith.constant 0 : index
    %350 = vector.load %arg2[%c0_107, %c0_108] : memref<8x1xf32, #tpu.memory_space<vmem>>, vector<8x1xf32>
    %cst_109 = arith.constant dense<0.000000e+00> : vector<8xf32>
    %351 = vector.multi_reduction <add>, %343, %cst_109 [1] : vector<8x128xf32> to vector<8xf32>
    %352 = vector.shape_cast %351 : vector<8xf32> to vector<8x1xf32>
    %353 = arith.addf %350, %352 : vector<8x1xf32>
    %c0_110 = arith.constant 0 : index
    %c0_111 = arith.constant 0 : index
    %354 = vector.load %arg19[%c0_110, %c0_111] : memref<8x1xf32, #tpu.memory_space<vmem>>, vector<8x1xf32>
    tpu.vector_store %arg19[%c0_110, %c0_111], %353 {strides = array<i32>} : memref<8x1xf32, #tpu.memory_space<vmem>>, vector<8x1xf32>,
    return
  }
  func.func @transform_0(%arg0: i32) -> (i32, i32) {
    %c0_i32 = arith.constant 0 : i32
    %c0_i32_0 = arith.constant 0 : i32
    return %arg0, %c0_i32 : i32, i32
  }
  func.func @transform_1(%arg0: i32) -> (i32, i32) {
    %c0_i32 = arith.constant 0 : i32
    %c0_i32_0 = arith.constant 0 : i32
    return %arg0, %c0_i32 : i32, i32
  }
  func.func @transform_2(%arg0: i32) -> (i32, i32) {
    %c0_i32 = arith.constant 0 : i32
    %c0_i32_0 = arith.constant 0 : i32
    %c0_i32_1 = arith.constant 0 : i32
    return %c0_i32, %c0_i32_0 : i32, i32
  }
  func.func @transform_3(%arg0: i32) -> (i32, i32) {
    %c0_i32 = arith.constant 0 : i32
    %c0_i32_0 = arith.constant 0 : i32
    %c0_i32_1 = arith.constant 0 : i32
    return %c0_i32, %c0_i32_0 : i32, i32
  }
  func.func @transform_4(%arg0: i32) -> (i32, i32) {
    %c0_i32 = arith.constant 0 : i32
    %c0_i32_0 = arith.constant 0 : i32
    %c0_i32_1 = arith.constant 0 : i32
    return %c0_i32, %c0_i32_0 : i32, i32
  }
  func.func @transform_5(%arg0: i32) -> (i32, i32) {
    %c0_i32 = arith.constant 0 : i32
    %c0_i32_0 = arith.constant 0 : i32
    %c0_i32_1 = arith.constant 0 : i32
    return %c0_i32, %c0_i32_0 : i32, i32
  }
  func.func @transform_6(%arg0: i32) -> (i32, i32) {
    %c0_i32 = arith.constant 0 : i32
    %c0_i32_0 = arith.constant 0 : i32
    %c0_i32_1 = arith.constant 0 : i32
    return %c0_i32, %c0_i32_0 : i32, i32
  }
  func.func @transform_7(%arg0: i32) -> (i32, i32) {
    %c0_i32 = arith.constant 0 : i32
    %c0_i32_0 = arith.constant 0 : i32
    %c0_i32_1 = arith.constant 0 : i32
    return %c0_i32, %c0_i32_0 : i32, i32
  }
  func.func @transform_8(%arg0: i32) -> (i32, i32) {
    %c0_i32 = arith.constant 0 : i32
    %c0_i32_0 = arith.constant 0 : i32
    %c0_i32_1 = arith.constant 0 : i32
    return %c0_i32, %c0_i32_0 : i32, i32
  }
  func.func @transform_9(%arg0: i32) -> (i32, i32) {
    %c0_i32 = arith.constant 0 : i32
    %c0_i32_0 = arith.constant 0 : i32
    %c0_i32_1 = arith.constant 0 : i32
    return %c0_i32, %c0_i32_0 : i32, i32
  }
  func.func @transform_10(%arg0: i32) -> (i32, i32) {
    %c0_i32 = arith.constant 0 : i32
    %c0_i32_0 = arith.constant 0 : i32
    %c0_i32_1 = arith.constant 0 : i32
    return %c0_i32, %c0_i32_0 : i32, i32
  }
  func.func @transform_11(%arg0: i32) -> (i32, i32) {
    %c0_i32 = arith.constant 0 : i32
    %c0_i32_0 = arith.constant 0 : i32
    %c0_i32_1 = arith.constant 0 : i32
    return %c0_i32, %c0_i32_0 : i32, i32
  }
  func.func @transform_12(%arg0: i32) -> (i32, i32) {
    %c0_i32 = arith.constant 0 : i32
    %c0_i32_0 = arith.constant 0 : i32
    %c0_i32_1 = arith.constant 0 : i32
    return %c0_i32, %c0_i32_0 : i32, i32
  }
  func.func @transform_13(%arg0: i32) -> (i32, i32) {
    %c0_i32 = arith.constant 0 : i32
    %c0_i32_0 = arith.constant 0 : i32
    %c0_i32_1 = arith.constant 0 : i32
    return %c0_i32, %c0_i32_0 : i32, i32
  }
  func.func @transform_14(%arg0: i32) -> (i32, i32) {
    %c0_i32 = arith.constant 0 : i32
    %c0_i32_0 = arith.constant 0 : i32
    %c0_i32_1 = arith.constant 0 : i32
    return %c0_i32, %c0_i32_0 : i32, i32
  }
  func.func @transform_15(%arg0: i32) -> (i32, i32) {
    %c0_i32 = arith.constant 0 : i32
    %c0_i32_0 = arith.constant 0 : i32
    %c0_i32_1 = arith.constant 0 : i32
    return %c0_i32, %c0_i32_0 : i32, i32
  }
  func.func @transform_16(%arg0: i32) -> (i32, i32) {
    %c0_i32 = arith.constant 0 : i32
    %c0_i32_0 = arith.constant 0 : i32
    %c0_i32_1 = arith.constant 0 : i32
    return %c0_i32, %c0_i32_0 : i32, i32
  }
  func.func @transform_17(%arg0: i32) -> (i32, i32) {
    %c0_i32 = arith.constant 0 : i32
    %c0_i32_0 = arith.constant 0 : i32
    return %arg0, %c0_i32 : i32, i32
  }
  func.func @transform_18(%arg0: i32) -> (i32, i32) {
    %c0_i32 = arith.constant 0 : i32
    %c0_i32_0 = arith.constant 0 : i32
    return %arg0, %c0_i32 : i32, i32
  }
}

module attributes {stable_mosaic.version = 11 : i64} {
  func.func @kernel(%arg0: i32, %arg1: memref<8x256xf32, #tpu.memory_space<vmem>>, %arg2: memref<8x1xf32, #tpu.memory_space<vmem>>, %arg3: memref<256x32xf32, #tpu.memory_space<vmem>>, %arg4: memref<1x32xf32, #tpu.memory_space<vmem>>, %arg5: memref<32x32xf32, #tpu.memory_space<vmem>>, %arg6: memref<1x32xf32, #tpu.memory_space<vmem>>, %arg7: memref<32x32xf32, #tpu.memory_space<vmem>>, %arg8: memref<1x32xf32, #tpu.memory_space<vmem>>, %arg9: memref<32x32xf32, #tpu.memory_space<vmem>>, %arg10: memref<1x32xf32, #tpu.memory_space<vmem>>, %arg11: memref<32x32xf32, #tpu.memory_space<vmem>>, %arg12: memref<1x32xf32, #tpu.memory_space<vmem>>, %arg13: memref<32x1408xf32, #tpu.memory_space<vmem>>, %arg14: memref<1x1408xf32, #tpu.memory_space<vmem>>, %arg15: memref<256x128xf32, #tpu.memory_space<vmem>>, %arg16: memref<256x256xf32, #tpu.memory_space<vmem>>, %arg17: memref<128x256xf32, #tpu.memory_space<vmem>>, %arg18: memref<8x256xf32, #tpu.memory_space<vmem>>, %arg19: memref<8x1xf32, #tpu.memory_space<vmem>>) attributes {dimension_semantics = [#tpu.dimension_semantics<parallel>], iteration_bounds = array<i64: 1>, scalar_prefetch = 0 : i64, scratch_operands = 0 : i64, tpu.core_type = #tpu.core_type<tc>, window_params = [{transform_indices = @transform_0, window_bounds = array<i64: 8, 256>}, {transform_indices = @transform_1, window_bounds = array<i64: 8, 1>}, {pipeline_mode = #tpu.pipeline_mode<synchronous>, transform_indices = @transform_2, window_bounds = array<i64: 256, 32>}, {pipeline_mode = #tpu.pipeline_mode<synchronous>, transform_indices = @transform_3, window_bounds = array<i64: 1, 32>}, {pipeline_mode = #tpu.pipeline_mode<synchronous>, transform_indices = @transform_4, window_bounds = array<i64: 32, 32>}, {pipeline_mode = #tpu.pipeline_mode<synchronous>, transform_indices = @transform_5, window_bounds = array<i64: 1, 32>}, {pipeline_mode = #tpu.pipeline_mode<synchronous>, transform_indices = @transform_6, window_bounds = array<i64: 32, 32>}, {pipeline_mode = #tpu.pipeline_mode<synchronous>, transform_indices = @transform_7, window_bounds = array<i64: 1, 32>}, {pipeline_mode = #tpu.pipeline_mode<synchronous>, transform_indices = @transform_8, window_bounds = array<i64: 32, 32>}, {pipeline_mode = #tpu.pipeline_mode<synchronous>, transform_indices = @transform_9, window_bounds = array<i64: 1, 32>}, {pipeline_mode = #tpu.pipeline_mode<synchronous>, transform_indices = @transform_10, window_bounds = array<i64: 32, 32>}, {pipeline_mode = #tpu.pipeline_mode<synchronous>, transform_indices = @transform_11, window_bounds = array<i64: 1, 32>}, {pipeline_mode = #tpu.pipeline_mode<synchronous>, transform_indices = @transform_12, window_bounds = array<i64: 32, 1408>}, {pipeline_mode = #tpu.pipeline_mode<synchronous>, transform_indices = @transform_13, window_bounds = array<i64: 1, 1408>}, {pipeline_mode = #tpu.pipeline_mode<synchronous>, transform_indices = @transform_14, window_bounds = array<i64: 256, 128>}, {pipeline_mode = #tpu.pipeline_mode<synchronous>, transform_indices = @transform_15, window_bounds = array<i64: 256, 256>}, {pipeline_mode = #tpu.pipeline_mode<synchronous>, transform_indices = @transform_16, window_bounds = array<i64: 128, 256>}, {transform_indices = @transform_17, window_bounds = array<i64: 8, 256>}, {transform_indices = @transform_18, window_bounds = array<i64: 8, 1>}]} {
    %c0 = arith.constant 0 : index
    %c0_0 = arith.constant 0 : index
    %0 = vector.load %arg1[%c0, %c0_0] : memref<8x256xf32, #tpu.memory_space<vmem>>, vector<8x256xf32>
    %c0_1 = arith.constant 0 : index
    %c0_2 = arith.constant 0 : index
    %1 = vector.load %arg3[%c0_1, %c0_2] : memref<256x32xf32, #tpu.memory_space<vmem>>, vector<256x32xf32>
    %cst = arith.constant dense<0.000000e+00> : vector<8x32xf32>
    %2 = tpu.matmul %0, %1, %cst {dimension_numbers = #tpu.dot_dimension_numbers<[1], [0], [0], [1], [0, 0, 1, 1], [], []>} : vector<8x256xf32>, vector<256x32xf32>, vector<8x32xf32> -> vector<8x32xf32>
    %c0_3 = arith.constant 0 : index
    %c0_4 = arith.constant 0 : index
    %3 = vector.load %arg4[%c0_3, %c0_4] : memref<1x32xf32, #tpu.memory_space<vmem>>, vector<1x32xf32>
    %4 = vector.broadcast %3 : vector<1x32xf32> to vector<8x32xf32>
    %5 = arith.addf %2, %4 : vector<8x32xf32>
    %cst_5 = arith.constant 0.000000e+00 : f32
    %6 = vector.broadcast %cst_5 : f32 to vector<8x32xf32>
    %7 = arith.maximumf %5, %6 : vector<8x32xf32>
    %c0_6 = arith.constant 0 : index
    %c0_7 = arith.constant 0 : index
    %8 = vector.load %arg5[%c0_6, %c0_7] : memref<32x32xf32, #tpu.memory_space<vmem>>, vector<32x32xf32>
    %cst_8 = arith.constant dense<0.000000e+00> : vector<8x32xf32>
    %9 = tpu.matmul %7, %8, %cst_8 {dimension_numbers = #tpu.dot_dimension_numbers<[1], [0], [0], [1], [0, 0, 1, 1], [], []>} : vector<8x32xf32>, vector<32x32xf32>, vector<8x32xf32> -> vector<8x32xf32>
    %c0_9 = arith.constant 0 : index
    %c0_10 = arith.constant 0 : index
    %10 = vector.load %arg6[%c0_9, %c0_10] : memref<1x32xf32, #tpu.memory_space<vmem>>, vector<1x32xf32>
    %11 = vector.broadcast %10 : vector<1x32xf32> to vector<8x32xf32>
    %12 = arith.addf %9, %11 : vector<8x32xf32>
    %cst_11 = arith.constant 0.000000e+00 : f32
    %13 = vector.broadcast %cst_11 : f32 to vector<8x32xf32>
    %14 = arith.maximumf %12, %13 : vector<8x32xf32>
    %c0_12 = arith.constant 0 : index
    %c0_13 = arith.constant 0 : index
    %15 = vector.load %arg7[%c0_12, %c0_13] : memref<32x32xf32, #tpu.memory_space<vmem>>, vector<32x32xf32>
    %cst_14 = arith.constant dense<0.000000e+00> : vector<8x32xf32>
    %16 = tpu.matmul %14, %15, %cst_14 {dimension_numbers = #tpu.dot_dimension_numbers<[1], [0], [0], [1], [0, 0, 1, 1], [], []>} : vector<8x32xf32>, vector<32x32xf32>, vector<8x32xf32> -> vector<8x32xf32>
    %c0_15 = arith.constant 0 : index
    %c0_16 = arith.constant 0 : index
    %17 = vector.load %arg8[%c0_15, %c0_16] : memref<1x32xf32, #tpu.memory_space<vmem>>, vector<1x32xf32>
    %18 = vector.broadcast %17 : vector<1x32xf32> to vector<8x32xf32>
    %19 = arith.addf %16, %18 : vector<8x32xf32>
    %20 = arith.addf %5, %19 : vector<8x32xf32>
    %cst_17 = arith.constant 0.000000e+00 : f32
    %21 = vector.broadcast %cst_17 : f32 to vector<8x32xf32>
    %22 = arith.maximumf %20, %21 : vector<8x32xf32>
    %c0_18 = arith.constant 0 : index
    %c0_19 = arith.constant 0 : index
    %23 = vector.load %arg9[%c0_18, %c0_19] : memref<32x32xf32, #tpu.memory_space<vmem>>, vector<32x32xf32>
    %cst_20 = arith.constant dense<0.000000e+00> : vector<8x32xf32>
    %24 = tpu.matmul %22, %23, %cst_20 {dimension_numbers = #tpu.dot_dimension_numbers<[1], [0], [0], [1], [0, 0, 1, 1], [], []>} : vector<8x32xf32>, vector<32x32xf32>, vector<8x32xf32> -> vector<8x32xf32>
    %c0_21 = arith.constant 0 : index
    %c0_22 = arith.constant 0 : index
    %25 = vector.load %arg10[%c0_21, %c0_22] : memref<1x32xf32, #tpu.memory_space<vmem>>, vector<1x32xf32>
    %26 = vector.broadcast %25 : vector<1x32xf32> to vector<8x32xf32>
    %27 = arith.addf %24, %26 : vector<8x32xf32>
    %cst_23 = arith.constant 0.000000e+00 : f32
    %28 = vector.broadcast %cst_23 : f32 to vector<8x32xf32>
    %29 = arith.maximumf %27, %28 : vector<8x32xf32>
    %c0_24 = arith.constant 0 : index
    %c0_25 = arith.constant 0 : index
    %30 = vector.load %arg11[%c0_24, %c0_25] : memref<32x32xf32, #tpu.memory_space<vmem>>, vector<32x32xf32>
    %cst_26 = arith.constant dense<0.000000e+00> : vector<8x32xf32>
    %31 = tpu.matmul %29, %30, %cst_26 {dimension_numbers = #tpu.dot_dimension_numbers<[1], [0], [0], [1], [0, 0, 1, 1], [], []>} : vector<8x32xf32>, vector<32x32xf32>, vector<8x32xf32> -> vector<8x32xf32>
    %c0_27 = arith.constant 0 : index
    %c0_28 = arith.constant 0 : index
    %32 = vector.load %arg12[%c0_27, %c0_28] : memref<1x32xf32, #tpu.memory_space<vmem>>, vector<1x32xf32>
    %33 = vector.broadcast %32 : vector<1x32xf32> to vector<8x32xf32>
    %34 = arith.addf %31, %33 : vector<8x32xf32>
    %35 = arith.addf %20, %34 : vector<8x32xf32>
    %c0_29 = arith.constant 0 : index
    %c0_30 = arith.constant 0 : index
    %36 = vector.load %arg13[%c0_29, %c0_30] : memref<32x1408xf32, #tpu.memory_space<vmem>>, vector<32x1408xf32>
    %cst_31 = arith.constant dense<0.000000e+00> : vector<8x1408xf32>
    %37 = tpu.matmul %35, %36, %cst_31 {dimension_numbers = #tpu.dot_dimension_numbers<[1], [0], [0], [1], [0, 0, 1, 1], [], []>} : vector<8x32xf32>, vector<32x1408xf32>, vector<8x1408xf32> -> vector<8x1408xf32>
    %c0_32 = arith.constant 0 : index
    %c0_33 = arith.constant 0 : index
    %38 = vector.load %arg14[%c0_32, %c0_33] : memref<1x1408xf32, #tpu.memory_space<vmem>>, vector<1x1408xf32>
    %39 = vector.broadcast %38 : vector<1x1408xf32> to vector<8x1408xf32>
    %40 = arith.addf %37, %39 : vector<8x1408xf32>
    %c0_34 = arith.constant 0 : index
    %c0_35 = arith.constant 0 : index
    %41 = vector.load %arg15[%c0_34, %c0_35] : memref<256x128xf32, #tpu.memory_space<vmem>>, vector<256x128xf32>
    %cst_36 = arith.constant dense<0.000000e+00> : vector<8x128xf32>
    %42 = tpu.matmul %0, %41, %cst_36 {dimension_numbers = #tpu.dot_dimension_numbers<[1], [0], [0], [1], [0, 0, 1, 1], [], []>} : vector<8x256xf32>, vector<256x128xf32>, vector<8x128xf32> -> vector<8x128xf32>
    %cst_37 = arith.constant -3.000000e+00 : f32
    %43 = vector.broadcast %cst_37 : f32 to vector<8x128xf32>
    %44 = arith.cmpf oge, %42, %43 : vector<8x128xf32>
    %cst_38 = arith.constant 3.000000e+00 : f32
    %45 = vector.broadcast %cst_38 : f32 to vector<8x128xf32>
    %46 = arith.cmpf ole, %42, %45 : vector<8x128xf32>
    %47 = arith.andi %44, %46 : vector<8x128xi1>
    %cst_39 = arith.constant -3.000000e+00 : f32
    %cst_40 = arith.constant 3.000000e+00 : f32
    %48 = vector.broadcast %cst_39 : f32 to vector<8x128xf32>
    %49 = arith.maximumf %48, %42 : vector<8x128xf32>
    %50 = vector.broadcast %cst_40 : f32 to vector<8x128xf32>
    %51 = arith.minimumf %50, %49 : vector<8x128xf32>
    %52 = vector.extract_strided_slice %40 {offsets = [0, 0], sizes = [8, 128], strides = [1, 1]} : vector<8x1408xf32> to vector<8x128xf32>
    %53 = vector.extract_strided_slice %40 {offsets = [0, 128], sizes = [8, 128], strides = [1, 1]} : vector<8x1408xf32> to vector<8x128xf32>
    %54 = vector.extract_strided_slice %40 {offsets = [0, 256], sizes = [8, 128], strides = [1, 1]} : vector<8x1408xf32> to vector<8x128xf32>
    %55 = vector.extract_strided_slice %40 {offsets = [0, 384], sizes = [8, 128], strides = [1, 1]} : vector<8x1408xf32> to vector<8x128xf32>
    %56 = vector.extract_strided_slice %40 {offsets = [0, 512], sizes = [8, 128], strides = [1, 1]} : vector<8x1408xf32> to vector<8x128xf32>
    %57 = vector.extract_strided_slice %40 {offsets = [0, 640], sizes = [8, 128], strides = [1, 1]} : vector<8x1408xf32> to vector<8x128xf32>
    %58 = vector.extract_strided_slice %40 {offsets = [0, 768], sizes = [8, 128], strides = [1, 1]} : vector<8x1408xf32> to vector<8x128xf32>
    %59 = vector.extract_strided_slice %40 {offsets = [0, 896], sizes = [8, 128], strides = [1, 1]} : vector<8x1408xf32> to vector<8x128xf32>
    %60 = vector.extract_strided_slice %40 {offsets = [0, 1024], sizes = [8, 128], strides = [1, 1]} : vector<8x1408xf32> to vector<8x128xf32>
    %61 = vector.extract_strided_slice %40 {offsets = [0, 1152], sizes = [8, 128], strides = [1, 1]} : vector<8x1408xf32> to vector<8x128xf32>
    %62 = vector.extract_strided_slice %40 {offsets = [0, 1280], sizes = [8, 128], strides = [1, 1]} : vector<8x1408xf32> to vector<8x128xf32>
    %63 = arith.maximumf %52, %53 : vector<8x128xf32>
    %64 = arith.maximumf %63, %54 : vector<8x128xf32>
    %65 = arith.maximumf %64, %55 : vector<8x128xf32>
    %66 = arith.subf %52, %65 : vector<8x128xf32>
    %67 = math.exp %66 : vector<8x128xf32>
    %68 = arith.subf %53, %65 : vector<8x128xf32>
    %69 = math.exp %68 : vector<8x128xf32>
    %70 = arith.subf %54, %65 : vector<8x128xf32>
    %71 = math.exp %70 : vector<8x128xf32>
    %72 = arith.subf %55, %65 : vector<8x128xf32>
    %73 = math.exp %72 : vector<8x128xf32>
    %74 = arith.addf %67, %69 : vector<8x128xf32>
    %75 = arith.addf %74, %71 : vector<8x128xf32>
    %76 = arith.addf %75, %73 : vector<8x128xf32>
    %77 = tpu.reciprocal %76 {approx = true} : vector<8x128xf32> -> vector<8x128xf32>
    %78 = arith.mulf %67, %77 : vector<8x128xf32>
    %cst_41 = arith.constant 0.995999991 : f32
    %79 = vector.broadcast %cst_41 : f32 to vector<8x128xf32>
    %80 = arith.mulf %79, %78 : vector<8x128xf32>
    %cst_42 = arith.constant 1.000000e-03 : f32
    %81 = vector.broadcast %cst_42 : f32 to vector<8x128xf32>
    %82 = arith.addf %81, %80 : vector<8x128xf32>
    %83 = arith.mulf %69, %77 : vector<8x128xf32>
    %cst_43 = arith.constant 0.995999991 : f32
    %84 = vector.broadcast %cst_43 : f32 to vector<8x128xf32>
    %85 = arith.mulf %84, %83 : vector<8x128xf32>
    %cst_44 = arith.constant 1.000000e-03 : f32
    %86 = vector.broadcast %cst_44 : f32 to vector<8x128xf32>
    %87 = arith.addf %86, %85 : vector<8x128xf32>
    %88 = arith.mulf %71, %77 : vector<8x128xf32>
    %cst_45 = arith.constant 0.995999991 : f32
    %89 = vector.broadcast %cst_45 : f32 to vector<8x128xf32>
    %90 = arith.mulf %89, %88 : vector<8x128xf32>
    %cst_46 = arith.constant 1.000000e-03 : f32
    %91 = vector.broadcast %cst_46 : f32 to vector<8x128xf32>
    %92 = arith.addf %91, %90 : vector<8x128xf32>
    %93 = arith.maximumf %56, %57 : vector<8x128xf32>
    %94 = arith.maximumf %93, %58 : vector<8x128xf32>
    %95 = arith.maximumf %94, %59 : vector<8x128xf32>
    %96 = arith.subf %56, %95 : vector<8x128xf32>
    %97 = math.exp %96 : vector<8x128xf32>
    %98 = arith.subf %57, %95 : vector<8x128xf32>
    %99 = math.exp %98 : vector<8x128xf32>
    %100 = arith.subf %58, %95 : vector<8x128xf32>
    %101 = math.exp %100 : vector<8x128xf32>
    %102 = arith.subf %59, %95 : vector<8x128xf32>
    %103 = math.exp %102 : vector<8x128xf32>
    %104 = arith.addf %97, %99 : vector<8x128xf32>
    %105 = arith.addf %104, %101 : vector<8x128xf32>
    %106 = arith.addf %105, %103 : vector<8x128xf32>
    %107 = tpu.reciprocal %106 {approx = true} : vector<8x128xf32> -> vector<8x128xf32>
    %108 = arith.mulf %97, %107 : vector<8x128xf32>
    %cst_47 = arith.constant 0.995999991 : f32
    %109 = vector.broadcast %cst_47 : f32 to vector<8x128xf32>
    %110 = arith.mulf %109, %108 : vector<8x128xf32>
    %cst_48 = arith.constant 1.000000e-03 : f32
    %111 = vector.broadcast %cst_48 : f32 to vector<8x128xf32>
    %112 = arith.addf %111, %110 : vector<8x128xf32>
    %113 = arith.mulf %99, %107 : vector<8x128xf32>
    %cst_49 = arith.constant 0.995999991 : f32
    %114 = vector.broadcast %cst_49 : f32 to vector<8x128xf32>
    %115 = arith.mulf %114, %113 : vector<8x128xf32>
    %cst_50 = arith.constant 1.000000e-03 : f32
    %116 = vector.broadcast %cst_50 : f32 to vector<8x128xf32>
    %117 = arith.addf %116, %115 : vector<8x128xf32>
    %118 = arith.mulf %101, %107 : vector<8x128xf32>
    %cst_51 = arith.constant 0.995999991 : f32
    %119 = vector.broadcast %cst_51 : f32 to vector<8x128xf32>
    %120 = arith.mulf %119, %118 : vector<8x128xf32>
    %cst_52 = arith.constant 1.000000e-03 : f32
    %121 = vector.broadcast %cst_52 : f32 to vector<8x128xf32>
    %122 = arith.addf %121, %120 : vector<8x128xf32>
    %cst_53 = arith.constant -3.000000e+00 : f32
    %123 = vector.broadcast %cst_53 : f32 to vector<8x128xf32>
    %cst_54 = arith.constant 0.000000e+00 : f32
    %124 = vector.broadcast %cst_54 : f32 to vector<8x128xf32>
    %125 = arith.addf %124, %82 : vector<8x128xf32>
    %cst_55 = arith.constant 6.000000e+00 : f32
    %126 = vector.broadcast %cst_55 : f32 to vector<8x128xf32>
    %127 = arith.mulf %126, %125 : vector<8x128xf32>
    %cst_56 = arith.constant -3.000000e+00 : f32
    %128 = vector.broadcast %cst_56 : f32 to vector<8x128xf32>
    %129 = arith.addf %127, %128 : vector<8x128xf32>
    %130 = arith.addf %125, %87 : vector<8x128xf32>
    %cst_57 = arith.constant 6.000000e+00 : f32
    %131 = vector.broadcast %cst_57 : f32 to vector<8x128xf32>
    %132 = arith.mulf %131, %130 : vector<8x128xf32>
    %cst_58 = arith.constant -3.000000e+00 : f32
    %133 = vector.broadcast %cst_58 : f32 to vector<8x128xf32>
    %134 = arith.addf %132, %133 : vector<8x128xf32>
    %135 = arith.addf %130, %92 : vector<8x128xf32>
    %cst_59 = arith.constant 6.000000e+00 : f32
    %136 = vector.broadcast %cst_59 : f32 to vector<8x128xf32>
    %137 = arith.mulf %136, %135 : vector<8x128xf32>
    %cst_60 = arith.constant -3.000000e+00 : f32
    %138 = vector.broadcast %cst_60 : f32 to vector<8x128xf32>
    %139 = arith.addf %137, %138 : vector<8x128xf32>
    %cst_61 = arith.constant 3.000000e+00 : f32
    %140 = vector.broadcast %cst_61 : f32 to vector<8x128xf32>
    %141 = arith.subf %129, %123 : vector<8x128xf32>
    %142 = arith.subf %134, %129 : vector<8x128xf32>
    %143 = arith.subf %139, %134 : vector<8x128xf32>
    %144 = arith.subf %140, %139 : vector<8x128xf32>
    %cst_62 = arith.constant -3.000000e+00 : f32
    %145 = vector.broadcast %cst_62 : f32 to vector<8x128xf32>
    %cst_63 = arith.constant 0.000000e+00 : f32
    %146 = vector.broadcast %cst_63 : f32 to vector<8x128xf32>
    %147 = arith.addf %146, %112 : vector<8x128xf32>
    %cst_64 = arith.constant 6.000000e+00 : f32
    %148 = vector.broadcast %cst_64 : f32 to vector<8x128xf32>
    %149 = arith.mulf %148, %147 : vector<8x128xf32>
    %cst_65 = arith.constant -3.000000e+00 : f32
    %150 = vector.broadcast %cst_65 : f32 to vector<8x128xf32>
    %151 = arith.addf %149, %150 : vector<8x128xf32>
    %152 = arith.addf %147, %117 : vector<8x128xf32>
    %cst_66 = arith.constant 6.000000e+00 : f32
    %153 = vector.broadcast %cst_66 : f32 to vector<8x128xf32>
    %154 = arith.mulf %153, %152 : vector<8x128xf32>
    %cst_67 = arith.constant -3.000000e+00 : f32
    %155 = vector.broadcast %cst_67 : f32 to vector<8x128xf32>
    %156 = arith.addf %154, %155 : vector<8x128xf32>
    %157 = arith.addf %152, %122 : vector<8x128xf32>
    %cst_68 = arith.constant 6.000000e+00 : f32
    %158 = vector.broadcast %cst_68 : f32 to vector<8x128xf32>
    %159 = arith.mulf %158, %157 : vector<8x128xf32>
    %cst_69 = arith.constant -3.000000e+00 : f32
    %160 = vector.broadcast %cst_69 : f32 to vector<8x128xf32>
    %161 = arith.addf %159, %160 : vector<8x128xf32>
    %cst_70 = arith.constant 3.000000e+00 : f32
    %162 = vector.broadcast %cst_70 : f32 to vector<8x128xf32>
    %163 = arith.subf %151, %145 : vector<8x128xf32>
    %164 = arith.subf %156, %151 : vector<8x128xf32>
    %165 = arith.subf %161, %156 : vector<8x128xf32>
    %166 = arith.subf %162, %161 : vector<8x128xf32>
    %cst_71 = arith.constant 1.000000e+00 : f32
    %167 = vector.broadcast %cst_71 : f32 to vector<8x128xf32>
    %cst_72 = arith.constant 0.000000e+00 : f32
    %168 = vector.broadcast %cst_72 : f32 to vector<8x128xf32>
    %169 = arith.maximumf %60, %168 : vector<8x128xf32>
    %170 = math.absf %60 : vector<8x128xf32>
    %cst_73 = arith.constant 0.000000e+00 : f32
    %171 = vector.broadcast %cst_73 : f32 to vector<8x128xf32>
    %172 = arith.subf %171, %170 : vector<8x128xf32>
    %173 = math.exp %172 : vector<8x128xf32>
    %cst_74 = arith.constant 1.000000e+00 : f32
    %174 = vector.broadcast %cst_74 : f32 to vector<8x128xf32>
    %175 = arith.addf %174, %173 : vector<8x128xf32>
    %176 = math.log %175 : vector<8x128xf32>
    %177 = arith.addf %169, %176 : vector<8x128xf32>
    %cst_75 = arith.constant 1.000000e-03 : f32
    %178 = vector.broadcast %cst_75 : f32 to vector<8x128xf32>
    %179 = arith.addf %178, %177 : vector<8x128xf32>
    %cst_76 = arith.constant 0.000000e+00 : f32
    %180 = vector.broadcast %cst_76 : f32 to vector<8x128xf32>
    %181 = arith.maximumf %61, %180 : vector<8x128xf32>
    %182 = math.absf %61 : vector<8x128xf32>
    %cst_77 = arith.constant 0.000000e+00 : f32
    %183 = vector.broadcast %cst_77 : f32 to vector<8x128xf32>
    %184 = arith.subf %183, %182 : vector<8x128xf32>
    %185 = math.exp %184 : vector<8x128xf32>
    %cst_78 = arith.constant 1.000000e+00 : f32
    %186 = vector.broadcast %cst_78 : f32 to vector<8x128xf32>
    %187 = arith.addf %186, %185 : vector<8x128xf32>
    %188 = math.log %187 : vector<8x128xf32>
    %189 = arith.addf %181, %188 : vector<8x128xf32>
    %cst_79 = arith.constant 1.000000e-03 : f32
    %190 = vector.broadcast %cst_79 : f32 to vector<8x128xf32>
    %191 = arith.addf %190, %189 : vector<8x128xf32>
    %cst_80 = arith.constant 0.000000e+00 : f32
    %192 = vector.broadcast %cst_80 : f32 to vector<8x128xf32>
    %193 = arith.maximumf %62, %192 : vector<8x128xf32>
    %194 = math.absf %62 : vector<8x128xf32>
    %cst_81 = arith.constant 0.000000e+00 : f32
    %195 = vector.broadcast %cst_81 : f32 to vector<8x128xf32>
    %196 = arith.subf %195, %194 : vector<8x128xf32>
    %197 = math.exp %196 : vector<8x128xf32>
    %cst_82 = arith.constant 1.000000e+00 : f32
    %198 = vector.broadcast %cst_82 : f32 to vector<8x128xf32>
    %199 = arith.addf %198, %197 : vector<8x128xf32>
    %200 = math.log %199 : vector<8x128xf32>
    %201 = arith.addf %193, %200 : vector<8x128xf32>
    %cst_83 = arith.constant 1.000000e-03 : f32
    %202 = vector.broadcast %cst_83 : f32 to vector<8x128xf32>
    %203 = arith.addf %202, %201 : vector<8x128xf32>
    %cst_84 = arith.constant 1.000000e+00 : f32
    %204 = vector.broadcast %cst_84 : f32 to vector<8x128xf32>
    %c0_i32 = arith.constant 0 : i32
    %205 = vector.broadcast %c0_i32 : i32 to vector<8x128xi32>
    %cst_85 = arith.constant 0.000000e+00 : f32
    %206 = vector.broadcast %cst_85 : f32 to vector<8x128xf32>
    %207 = arith.addf %123, %206 : vector<8x128xf32>
    %208 = arith.cmpf oge, %51, %207 : vector<8x128xf32>
    %209 = arith.extui %208 : vector<8x128xi1> to vector<8x128xi32>
    %210 = arith.addi %205, %209 : vector<8x128xi32>
    %cst_86 = arith.constant 0.000000e+00 : f32
    %211 = vector.broadcast %cst_86 : f32 to vector<8x128xf32>
    %212 = arith.addf %129, %211 : vector<8x128xf32>
    %213 = arith.cmpf oge, %51, %212 : vector<8x128xf32>
    %214 = arith.extui %213 : vector<8x128xi1> to vector<8x128xi32>
    %215 = arith.addi %210, %214 : vector<8x128xi32>
    %cst_87 = arith.constant 0.000000e+00 : f32
    %216 = vector.broadcast %cst_87 : f32 to vector<8x128xf32>
    %217 = arith.addf %134, %216 : vector<8x128xf32>
    %218 = arith.cmpf oge, %51, %217 : vector<8x128xf32>
    %219 = arith.extui %218 : vector<8x128xi1> to vector<8x128xi32>
    %220 = arith.addi %215, %219 : vector<8x128xi32>
    %cst_88 = arith.constant 0.000000e+00 : f32
    %221 = vector.broadcast %cst_88 : f32 to vector<8x128xf32>
    %222 = arith.addf %139, %221 : vector<8x128xf32>
    %223 = arith.cmpf oge, %51, %222 : vector<8x128xf32>
    %224 = arith.extui %223 : vector<8x128xi1> to vector<8x128xi32>
    %225 = arith.addi %220, %224 : vector<8x128xi32>
    %cst_89 = arith.constant 9.99999997E-7 : f32
    %226 = vector.broadcast %cst_89 : f32 to vector<8x128xf32>
    %227 = arith.addf %140, %226 : vector<8x128xf32>
    %228 = arith.cmpf oge, %51, %227 : vector<8x128xf32>
    %229 = arith.extui %228 : vector<8x128xi1> to vector<8x128xi32>
    %230 = arith.addi %225, %229 : vector<8x128xi32>
    %c1_i32 = arith.constant 1 : i32
    %231 = vector.broadcast %c1_i32 : i32 to vector<8x128xi32>
    %232 = arith.subi %230, %231 : vector<8x128xi32>
    %cst_90 = arith.constant 0.000000e+00 : f32
    %233 = vector.broadcast %cst_90 : f32 to vector<8x128xf32>
    %c0_i32_91 = arith.constant 0 : i32
    %234 = vector.broadcast %c0_i32_91 : i32 to vector<8x128xi32>
    %235 = arith.cmpi eq, %232, %234 : vector<8x128xi32>
    %236 = arith.extui %235 : vector<8x128xi1> to vector<8x128xi32>
    %237 = arith.sitofp %236 : vector<8x128xi32> to vector<8x128xf32>
    %238 = arith.mulf %237, %123 : vector<8x128xf32>
    %239 = arith.addf %233, %238 : vector<8x128xf32>
    %240 = arith.mulf %237, %141 : vector<8x128xf32>
    %241 = arith.addf %233, %240 : vector<8x128xf32>
    %242 = arith.mulf %237, %145 : vector<8x128xf32>
    %243 = arith.addf %233, %242 : vector<8x128xf32>
    %244 = arith.mulf %237, %163 : vector<8x128xf32>
    %245 = arith.addf %233, %244 : vector<8x128xf32>
    %246 = arith.mulf %237, %167 : vector<8x128xf32>
    %247 = arith.addf %233, %246 : vector<8x128xf32>
    %248 = arith.mulf %237, %179 : vector<8x128xf32>
    %249 = arith.addf %233, %248 : vector<8x128xf32>
    %c1_i32_92 = arith.constant 1 : i32
    %250 = vector.broadcast %c1_i32_92 : i32 to vector<8x128xi32>
    %251 = arith.cmpi eq, %232, %250 : vector<8x128xi32>
    %252 = arith.extui %251 : vector<8x128xi1> to vector<8x128xi32>
    %253 = arith.sitofp %252 : vector<8x128xi32> to vector<8x128xf32>
    %254 = arith.mulf %253, %129 : vector<8x128xf32>
    %255 = arith.addf %239, %254 : vector<8x128xf32>
    %256 = arith.mulf %253, %142 : vector<8x128xf32>
    %257 = arith.addf %241, %256 : vector<8x128xf32>
    %258 = arith.mulf %253, %151 : vector<8x128xf32>
    %259 = arith.addf %243, %258 : vector<8x128xf32>
    %260 = arith.mulf %253, %164 : vector<8x128xf32>
    %261 = arith.addf %245, %260 : vector<8x128xf32>
    %262 = arith.mulf %253, %179 : vector<8x128xf32>
    %263 = arith.addf %247, %262 : vector<8x128xf32>
    %264 = arith.mulf %253, %191 : vector<8x128xf32>
    %265 = arith.addf %249, %264 : vector<8x128xf32>
    %c2_i32 = arith.constant 2 : i32
    %266 = vector.broadcast %c2_i32 : i32 to vector<8x128xi32>
    %267 = arith.cmpi eq, %232, %266 : vector<8x128xi32>
    %268 = arith.extui %267 : vector<8x128xi1> to vector<8x128xi32>
    %269 = arith.sitofp %268 : vector<8x128xi32> to vector<8x128xf32>
    %270 = arith.mulf %269, %134 : vector<8x128xf32>
    %271 = arith.addf %255, %270 : vector<8x128xf32>
    %272 = arith.mulf %269, %143 : vector<8x128xf32>
    %273 = arith.addf %257, %272 : vector<8x128xf32>
    %274 = arith.mulf %269, %156 : vector<8x128xf32>
    %275 = arith.addf %259, %274 : vector<8x128xf32>
    %276 = arith.mulf %269, %165 : vector<8x128xf32>
    %277 = arith.addf %261, %276 : vector<8x128xf32>
    %278 = arith.mulf %269, %191 : vector<8x128xf32>
    %279 = arith.addf %263, %278 : vector<8x128xf32>
    %280 = arith.mulf %269, %203 : vector<8x128xf32>
    %281 = arith.addf %265, %280 : vector<8x128xf32>
    %c3_i32 = arith.constant 3 : i32
    %282 = vector.broadcast %c3_i32 : i32 to vector<8x128xi32>
    %283 = arith.cmpi eq, %232, %282 : vector<8x128xi32>
    %284 = arith.extui %283 : vector<8x128xi1> to vector<8x128xi32>
    %285 = arith.sitofp %284 : vector<8x128xi32> to vector<8x128xf32>
    %286 = arith.mulf %285, %139 : vector<8x128xf32>
    %287 = arith.addf %271, %286 : vector<8x128xf32>
    %288 = arith.mulf %285, %144 : vector<8x128xf32>
    %289 = arith.addf %273, %288 : vector<8x128xf32>
    %290 = arith.mulf %285, %161 : vector<8x128xf32>
    %291 = arith.addf %275, %290 : vector<8x128xf32>
    %292 = arith.mulf %285, %166 : vector<8x128xf32>
    %293 = arith.addf %277, %292 : vector<8x128xf32>
    %294 = arith.mulf %285, %203 : vector<8x128xf32>
    %295 = arith.addf %279, %294 : vector<8x128xf32>
    %296 = arith.mulf %285, %204 : vector<8x128xf32>
    %297 = arith.addf %281, %296 : vector<8x128xf32>
    %298 = tpu.reciprocal %289 : vector<8x128xf32> -> vector<8x128xf32>
    %299 = arith.mulf %293, %298 : vector<8x128xf32>
    %300 = arith.subf %51, %287 : vector<8x128xf32>
    %301 = arith.mulf %300, %298 : vector<8x128xf32>
    %cst_93 = arith.constant 1.000000e+00 : f32
    %302 = vector.broadcast %cst_93 : f32 to vector<8x128xf32>
    %303 = arith.subf %302, %301 : vector<8x128xf32>
    %304 = arith.mulf %301, %303 : vector<8x128xf32>
    %305 = arith.mulf %299, %301 : vector<8x128xf32>
    %306 = arith.mulf %305, %301 : vector<8x128xf32>
    %307 = arith.mulf %295, %304 : vector<8x128xf32>
    %308 = arith.addf %306, %307 : vector<8x128xf32>
    %309 = arith.mulf %293, %308 : vector<8x128xf32>
    %310 = arith.addf %295, %297 : vector<8x128xf32>
    %cst_94 = arith.constant 2.000000e+00 : f32
    %311 = vector.broadcast %cst_94 : f32 to vector<8x128xf32>
    %312 = arith.mulf %311, %299 : vector<8x128xf32>
    %313 = arith.subf %310, %312 : vector<8x128xf32>
    %314 = arith.mulf %313, %304 : vector<8x128xf32>
    %315 = arith.addf %299, %314 : vector<8x128xf32>
    %316 = tpu.reciprocal %315 : vector<8x128xf32> -> vector<8x128xf32>
    %317 = arith.mulf %309, %316 : vector<8x128xf32>
    %318 = arith.addf %291, %317 : vector<8x128xf32>
    %319 = arith.mulf %299, %299 : vector<8x128xf32>
    %320 = arith.mulf %297, %301 : vector<8x128xf32>
    %321 = arith.mulf %320, %301 : vector<8x128xf32>
    %cst_95 = arith.constant 2.000000e+00 : f32
    %322 = vector.broadcast %cst_95 : f32 to vector<8x128xf32>
    %323 = arith.mulf %322, %299 : vector<8x128xf32>
    %324 = arith.mulf %323, %304 : vector<8x128xf32>
    %325 = arith.addf %321, %324 : vector<8x128xf32>
    %cst_96 = arith.constant 1.000000e+00 : f32
    %326 = vector.broadcast %cst_96 : f32 to vector<8x128xf32>
    %327 = arith.subf %326, %301 : vector<8x128xf32>
    %328 = arith.mulf %295, %327 : vector<8x128xf32>
    %cst_97 = arith.constant 1.000000e+00 : f32
    %329 = vector.broadcast %cst_97 : f32 to vector<8x128xf32>
    %330 = arith.subf %329, %301 : vector<8x128xf32>
    %331 = arith.mulf %328, %330 : vector<8x128xf32>
    %332 = arith.addf %325, %331 : vector<8x128xf32>
    %333 = arith.mulf %319, %332 : vector<8x128xf32>
    %334 = arith.mulf %333, %316 : vector<8x128xf32>
    %335 = arith.mulf %334, %316 : vector<8x128xf32>
    %336 = math.log %335 : vector<8x128xf32>
    %337 = arith.select %47, %318, %42 : vector<8x128xi1>, vector<8x128xf32>
    %338 = tpu.iota {dimensions = array<i32: 1>} : vector<8x128xi32>
    %c76_i32 = arith.constant 76 : i32
    %339 = vector.broadcast %c76_i32 : i32 to vector<8x128xi32>
    %340 = arith.cmpi slt, %338, %339 : vector<8x128xi32>
    %341 = arith.andi %47, %340 : vector<8x128xi1>
    %cst_98 = arith.constant 0.000000e+00 : f32
    %342 = vector.broadcast %cst_98 : f32 to vector<8x128xf32>
    %343 = arith.select %341, %336, %342 : vector<8x128xi1>, vector<8x128xf32>
    %c0_99 = arith.constant 0 : index
    %c0_100 = arith.constant 0 : index
    %344 = vector.load %arg16[%c0_99, %c0_100] : memref<256x256xf32, #tpu.memory_space<vmem>>, vector<256x256xf32>
    %cst_101 = arith.constant dense<0.000000e+00> : vector<8x256xf32>
    %345 = tpu.matmul %0, %344, %cst_101 {dimension_numbers = #tpu.dot_dimension_numbers<[1], [0], [0], [1], [0, 0, 1, 1], [], []>} : vector<8x256xf32>, vector<256x256xf32>, vector<8x256xf32> -> vector<8x256xf32>
    %c0_102 = arith.constant 0 : index
    %c0_103 = arith.constant 0 : index
    %346 = vector.load %arg17[%c0_102, %c0_103] : memref<128x256xf32, #tpu.memory_space<vmem>>, vector<128x256xf32>
    %cst_104 = arith.constant dense<0.000000e+00> : vector<8x256xf32>
    %347 = tpu.matmul %337, %346, %cst_104 {dimension_numbers = #tpu.dot_dimension_numbers<[1], [0], [0], [1], [0, 0, 1, 1], [], []>} : vector<8x128xf32>, vector<128x256xf32>, vector<8x256xf32> -> vector<8x256xf32>
    %348 = arith.addf %345, %347 : vector<8x256xf32>
    %c0_105 = arith.constant 0 : index
    %c0_106 = arith.constant 0 : index
    %349 = vector.load %arg18[%c0_105, %c0_106] : memref<8x256xf32, #tpu.memory_space<vmem>>, vector<8x256xf32>
    tpu.vector_store %arg18[%c0_105, %c0_106], %348 {strides = array<i32>} : memref<8x256xf32, #tpu.memory_space<vmem>>, vector<8x256xf32>,
    %c0_107 = arith.constant 0 : index
    %c0_108 = arith.constant 0 : index
    %350 = vector.load %arg2[%c0_107, %c0_108] : memref<8x1xf32, #tpu.memory_space<vmem>>, vector<8x1xf32>
    %cst_109 = arith.constant dense<0.000000e+00> : vector<8xf32>
    %351 = vector.multi_reduction <add>, %343, %cst_109 [1] : vector<8x128xf32> to vector<8xf32>
    %352 = vector.shape_cast %351 : vector<8xf32> to vector<8x1xf32>
    %353 = arith.addf %350, %352 : vector<8x1xf32>
    %c0_110 = arith.constant 0 : index
    %c0_111 = arith.constant 0 : index
    %354 = vector.load %arg19[%c0_110, %c0_111] : memref<8x1xf32, #tpu.memory_space<vmem>>, vector<8x1xf32>
    tpu.vector_store %arg19[%c0_110, %c0_111], %353 {strides = array<i32>} : memref<8x1xf32, #tpu.memory_space<vmem>>, vector<8x1xf32>,
    return
  }
  func.func @transform_0(%arg0: i32) -> (i32, i32) {
    %c0_i32 = arith.constant 0 : i32
    %c0_i32_0 = arith.constant 0 : i32
    return %arg0, %c0_i32 : i32, i32
  }
  func.func @transform_1(%arg0: i32) -> (i32, i32) {
    %c0_i32 = arith.constant 0 : i32
    %c0_i32_0 = arith.constant 0 : i32
    return %arg0, %c0_i32 : i32, i32
  }
  func.func @transform_2(%arg0: i32) -> (i32, i32) {
    %c0_i32 = arith.constant 0 : i32
    %c0_i32_0 = arith.constant 0 : i32
    %c0_i32_1 = arith.constant 0 : i32
    return %c0_i32, %c0_i32_0 : i32, i32
  }
  func.func @transform_3(%arg0: i32) -> (i32, i32) {
    %c0_i32 = arith.constant 0 : i32
    %c0_i32_0 = arith.constant 0 : i32
    %c0_i32_1 = arith.constant 0 : i32
    return %c0_i32, %c0_i32_0 : i32, i32
  }
  func.func @transform_4(%arg0: i32) -> (i32, i32) {
    %c0_i32 = arith.constant 0 : i32
    %c0_i32_0 = arith.constant 0 : i32
    %c0_i32_1 = arith.constant 0 : i32
    return %c0_i32, %c0_i32_0 : i32, i32
  }
  func.func @transform_5(%arg0: i32) -> (i32, i32) {
    %c0_i32 = arith.constant 0 : i32
    %c0_i32_0 = arith.constant 0 : i32
    %c0_i32_1 = arith.constant 0 : i32
    return %c0_i32, %c0_i32_0 : i32, i32
  }
  func.func @transform_6(%arg0: i32) -> (i32, i32) {
    %c0_i32 = arith.constant 0 : i32
    %c0_i32_0 = arith.constant 0 : i32
    %c0_i32_1 = arith.constant 0 : i32
    return %c0_i32, %c0_i32_0 : i32, i32
  }
  func.func @transform_7(%arg0: i32) -> (i32, i32) {
    %c0_i32 = arith.constant 0 : i32
    %c0_i32_0 = arith.constant 0 : i32
    %c0_i32_1 = arith.constant 0 : i32
    return %c0_i32, %c0_i32_0 : i32, i32
  }
  func.func @transform_8(%arg0: i32) -> (i32, i32) {
    %c0_i32 = arith.constant 0 : i32
    %c0_i32_0 = arith.constant 0 : i32
    %c0_i32_1 = arith.constant 0 : i32
    return %c0_i32, %c0_i32_0 : i32, i32
  }
  func.func @transform_9(%arg0: i32) -> (i32, i32) {
    %c0_i32 = arith.constant 0 : i32
    %c0_i32_0 = arith.constant 0 : i32
    %c0_i32_1 = arith.constant 0 : i32
    return %c0_i32, %c0_i32_0 : i32, i32
  }
  func.func @transform_10(%arg0: i32) -> (i32, i32) {
    %c0_i32 = arith.constant 0 : i32
    %c0_i32_0 = arith.constant 0 : i32
    %c0_i32_1 = arith.constant 0 : i32
    return %c0_i32, %c0_i32_0 : i32, i32
  }
  func.func @transform_11(%arg0: i32) -> (i32, i32) {
    %c0_i32 = arith.constant 0 : i32
    %c0_i32_0 = arith.constant 0 : i32
    %c0_i32_1 = arith.constant 0 : i32
    return %c0_i32, %c0_i32_0 : i32, i32
  }
  func.func @transform_12(%arg0: i32) -> (i32, i32) {
    %c0_i32 = arith.constant 0 : i32
    %c0_i32_0 = arith.constant 0 : i32
    %c0_i32_1 = arith.constant 0 : i32
    return %c0_i32, %c0_i32_0 : i32, i32
  }
  func.func @transform_13(%arg0: i32) -> (i32, i32) {
    %c0_i32 = arith.constant 0 : i32
    %c0_i32_0 = arith.constant 0 : i32
    %c0_i32_1 = arith.constant 0 : i32
    return %c0_i32, %c0_i32_0 : i32, i32
  }
  func.func @transform_14(%arg0: i32) -> (i32, i32) {
    %c0_i32 = arith.constant 0 : i32
    %c0_i32_0 = arith.constant 0 : i32
    %c0_i32_1 = arith.constant 0 : i32
    return %c0_i32, %c0_i32_0 : i32, i32
  }
  func.func @transform_15(%arg0: i32) -> (i32, i32) {
    %c0_i32 = arith.constant 0 : i32
    %c0_i32_0 = arith.constant 0 : i32
    %c0_i32_1 = arith.constant 0 : i32
    return %c0_i32, %c0_i32_0 : i32, i32
  }
  func.func @transform_16(%arg0: i32) -> (i32, i32) {
    %c0_i32 = arith.constant 0 : i32
    %c0_i32_0 = arith.constant 0 : i32
    %c0_i32_1 = arith.constant 0 : i32
    return %c0_i32, %c0_i32_0 : i32, i32
  }
  func.func @transform_17(%arg0: i32) -> (i32, i32) {
    %c0_i32 = arith.constant 0 : i32
    %c0_i32_0 = arith.constant 0 : i32
    return %arg0, %c0_i32 : i32, i32
  }
  func.func @transform_18(%arg0: i32) -> (i32, i32) {
    %c0_i32 = arith.constant 0 : i32
    %c0_i32_0 = arith.constant 0 : i32
    return %arg0, %c0_i32 : i32, i32
  }
}

</mosaic_0001>

<bundles_post_ra>
// kernel: _lambda_.5
= control target key start
LH: loop header
LB: loop body
LE: loop exit
PB: predicated region body
PF: predicated region fallthrough
CT: control target
= control target key end

     0   :  { %s2126_s0 = inlined_call_operand.vmem [shape: f32[8,256], index: 0, kind: input, shape index: {}]   ;;  %s2127_s1 = inlined_call_operand.vmem [shape: f32[8,1], index: 1, kind: input, shape index: {}]   ;;  %s2128_s2 = inlined_call_operand.hbm [shape: f32[256,32], index: 2, kind: input, shape index: {}]   ;;  %s2129_s3 = inlined_call_operand.hbm [shape: f32[1,32], index: 3, kind: input, shape index: {}]   ;;  %s2130_s4 = inlined_call_operand.hbm [shape: f32[32,32], index: 4, kind: input, shape index: {}]   ;;  %s2131_s5 = inlined_call_operand.hbm [shape: f32[1,32], index: 5, kind: input, shape index: {}]   ;;  %s2132_s6 = inlined_call_operand.hbm [shape: f32[32,32], index: 6, kind: input, shape index: {}]   ;;  %s2133_s7 = inlined_call_operand.vmem [shape: f32[1,32], index: 7, kind: input, shape index: {}]   ;;  %s2134_s8 = inlined_call_operand.hbm [shape: f32[32,32], index: 8, kind: input, shape index: {}]   ;;  %s2135_s9 = inlined_call_operand.vmem [shape: f32[1,32], index: 9, kind: input, shape index: {}]   ;;  %s2136_s10 = inlined_call_operand.hbm [shape: f32[32,32], index: 10, kind: input, shape index: {}]   ;;  %s2137_s11 = inlined_call_operand.vmem [shape: f32[1,32], index: 11, kind: input, shape index: {}]   ;;  %s2138_s12 = inlined_call_operand.hbm [shape: f32[32,1408], index: 12, kind: input, shape index: {}]   ;;  %s2139_s13 = inlined_call_operand.hbm [shape: f32[1,1408], index: 13, kind: input, shape index: {}]   ;;  %s2140_s14 = inlined_call_operand.hbm [shape: f32[256,128], index: 14, kind: input, shape index: {}]   ;;  %s2141_s15 = inlined_call_operand.hbm [shape: f32[256,256], index: 15, kind: input, shape index: {}]   ;;  %s2142_s16 = inlined_call_operand.hbm [shape: f32[128,256], index: 16, kind: input, shape index: {}]   ;;  %s2143_s17 = inlined_call_operand.hbm [shape: f32[8,256], index: 17, kind: output, shape index: {0}]   ;;  %s2144_s18 = inlined_call_operand.vmem [shape: f32[8,1], index: 18, kind: output, shape index: {1}]  }
   0x1   :  { %2146 = sst [smem:[#allocation31_spill]] %s2126_s0 }
   0x2   :  { %2147 = sst [smem:[#allocation32_spill]] %s2127_s1 }
   0x3   :  { %2148 = sst [smem:[#allocation33_spill]] %s2128_s2 }
   0x4   :  { %24 = vsyncpa [#allocation3], 0 }
   0x5   :  { %25 = vsyncpa [#allocation6], 0 }
   0x6   :  { %26 = vsyncpa [#allocation9], 0 }
   0x7   :  { %27 = vsyncpa [#allocation12], 0 }
   0x8   :  { %28 = vsyncpa [#allocation15], 0 }
   0x9   :  { %29 = vsyncpa [#allocation18], 0 }
   0xa   :  { %30 = vsyncpa [#allocation21], 0  ;;  %s54_s29 = sshll.u32 %s2129_s3, 4  ;;  %s55_s29 = int_to_ptr.hbm [resolvable:$true] %s54_s29 }
   0xb   :  { %31 = vsyncpa [#allocation4], 0  ;;  %s1746_s30 = smov [#allocation5]   ;;  %s78_s20 = sshll.u32 %s2131_s5, 4  ;;  %s79_s20 = int_to_ptr.hbm [resolvable:$true] %s78_s20 }
   0xc   :  { %s56_s0 = sshll.u32 %s1746_s30, 4  ;;  %s1747_s21 = smov [#allocation8]   ;;  %s57_s0 = int_to_ptr.vmem [resolvable:$true] %s56_s0 }
   0xd   :  { %59 = dma.hbm_to_vmem [thread:$0]  %s55_s29, 16, %s57_s0, [#allocation6]  }
   0xe   :  { %s80_s22 = sshll.u32 %s1747_s21, 4  ;;  %s103_s24 = sshll.u32 %s2134_s8, 4  ;;  %s81_s22 = int_to_ptr.vmem [resolvable:$true] %s80_s22  ;;  %s104_s24 = int_to_ptr.hbm [resolvable:$true] %s103_s24 }
   0xf   :  { %83 = dma.hbm_to_vmem [thread:$0]  %s79_s20, 16, %s81_s22, [#allocation9]  }
  0x10   :  { %s1748_s3 = smov [#allocation11]   ;;  %s133_s28 = sshll.u32 %s2138_s12, 4  ;;  %s134_s28 = int_to_ptr.hbm [resolvable:$true] %s133_s28 }
  0x11   :  { %s105_s25 = sshll.u32 %s1748_s3, 4  ;;  %s1749_s30 = smov 128   ;;  %s106_s25 = int_to_ptr.vmem [resolvable:$true] %s105_s25 }
  0x12   :  { %s1750_s5 = smov 8   ;;  %s1751_s29 = smov [#allocation14]  }
  0x13   :  { %111 = dma.hbm_to_vmem [thread:$0]  %s104_s24, 512, %s106_s25, [#allocation12], %s1749_s30, %s1749_s30, %s1750_s5  }
  0x14   :  { %s135_s0 = sshll.u32 %s1751_s29, 4  ;;  %s1752_s19 = smov 1408   ;;  %s136_s0 = int_to_ptr.vmem [resolvable:$true] %s135_s0 }
  0x15   :  { %s1753_s8 = smov 88   ;;  %s157_s21 = sshll.u32 %s2140_s14, 4  ;;  %s158_s21 = int_to_ptr.hbm [resolvable:$true] %s157_s21 }
  0x16   :  { %141 = dma.hbm_to_vmem [thread:$0]  %s134_s28, 5632, %s136_s0, [#allocation15], %s1752_s19, %s1752_s19, %s1753_s8  }
  0x17   :  { %s1754_s22 = smov [#allocation17]   ;;  %s2149_s3 = sld [smem:[#allocation33_spill]] }
  0x18   :  { %s159_s12 = sshll.u32 %s1754_s22, 4  ;;  %s1755_s24 = smov [#allocation2]   ;;  %s160_s12 = int_to_ptr.vmem [resolvable:$true] %s159_s12 }
  0x19   :  { %165 = dma.hbm_to_vmem [thread:$0]  %s158_s21, 4096, %s160_s12, [#allocation18], %s1749_s30, %s1749_s30, %s1750_s5  }
  0x1a   :  { %s42_s25 = sshll.u32 %s1755_s24, 4  ;;  %s64_s29 = sshll.u32 %s2130_s4, 4  ;;  %s43_s25 = int_to_ptr.vmem [resolvable:$true] %s42_s25  ;;  %s65_s29 = int_to_ptr.hbm [resolvable:$true] %s64_s29 }
  0x1b   :  { %s88_s19 = sshll.u32 %s2132_s6, 4  ;;  %s1756_s8 = smov [#allocation7]   ;;  %s89_s19 = int_to_ptr.hbm [resolvable:$true] %s88_s19 }
  0x1c   :  { %s66_s1 = sshll.u32 %s1756_s8, 4  ;;  %s1757_s20 = smov [#allocation10]   ;;  %s67_s1 = int_to_ptr.vmem [resolvable:$true] %s66_s1 }
  0x1d   :  { %s40_s26 = sshll.u32 %s2149_s3, 4  ;;  %s90_s4 = sshll.u32 %s1757_s20, 4  ;;  %s41_s26 = int_to_ptr.hbm [resolvable:$true] %s40_s26  ;;  %s91_s4 = int_to_ptr.vmem [resolvable:$true] %s90_s4 }
  0x1e   :  { %48 = dma.hbm_to_vmem [thread:$0]  %s41_s26, 4096, %s43_s25, [#allocation3], %s1749_s30, %s1749_s30, %s1750_s5  }
  0x1f   :  { %72 = dma.hbm_to_vmem [thread:$0]  %s65_s29, 512, %s67_s1, [#allocation6], %s1749_s30, %s1749_s30, %s1750_s5  }
  0x20   :  { %s118_s12 = sshll.u32 %s2136_s10, 4  ;;  %s147_s23 = sshll.u32 %s2139_s13, 4  ;;  %s119_s12 = int_to_ptr.hbm [resolvable:$true] %s118_s12  ;;  %s148_s23 = int_to_ptr.hbm [resolvable:$true] %s147_s23 }
  0x21   :  { %96 = dma.hbm_to_vmem [thread:$0]  %s89_s19, 512, %s91_s4, [#allocation9], %s1749_s30, %s1749_s30, %s1750_s5  }
  0x22   :  { %s1758_s3 = smov [#allocation13]   ;;  %s1759_s24 = smov [#allocation16]  }
  0x23   :  { %s120_s26 = sshll.u32 %s1758_s3, 4  ;;  %s149_s10 = sshll.u32 %s1759_s24, 4  ;;  %s121_s26 = int_to_ptr.vmem [resolvable:$true] %s120_s26  ;;  %s150_s10 = int_to_ptr.vmem [resolvable:$true] %s149_s10 }
  0x24   :  { %126 = dma.hbm_to_vmem [thread:$0]  %s119_s12, 512, %s121_s26, [#allocation12], %s1749_s30, %s1749_s30, %s1750_s5  }
  0x25   :  { %s170_s28 = sshll.u32 %s2141_s15, 4  ;;  %s1760_s29 = smov [#allocation19]   ;;  %s171_s28 = int_to_ptr.hbm [resolvable:$true] %s170_s28 }
  0x26   :  { %152 = dma.hbm_to_vmem [thread:$0]  %s148_s23, 176, %s150_s10, [#allocation15]  }
  0x27   :  { %s172_s14 = sshll.u32 %s1760_s29, 4  ;;  %s183_s19 = sshll.u32 %s2142_s16, 4  ;;  %s173_s14 = int_to_ptr.vmem [resolvable:$true] %s172_s14  ;;  %s184_s19 = int_to_ptr.hbm [resolvable:$true] %s183_s19 }
  0x28   :  { %s1761_s8 = smov 256   ;;  %s1762_s1 = smov 16  }
  0x29   :  { %178 = dma.hbm_to_vmem [thread:$0]  %s171_s28, 8192, %s173_s14, [#allocation18], %s1761_s8, %s1761_s8, %s1762_s1  }
  0x2a   :  { %s1763_s30 = smov [#allocation20]  }
  0x2b   :  { %s185_s5 = sshll.u32 %s1763_s30, 4  ;;  %s186_s5 = int_to_ptr.vmem [resolvable:$true] %s185_s5 }
  0x2c   :  { %191 = dma.hbm_to_vmem [thread:$0]  %s184_s19, 4096, %s186_s5, [#allocation21], %s1761_s8, %s1761_s8, %s1762_s1  }
  0x2d   :  { %1730 = dma.done.wait [#allocation3], 4096  }
  0x2e   :  { %1731 = vsyncadd [#allocation3], 4294963200 }
  0x2f   :  { %1732 = dma.done.wait [#allocation6], 528  }
  0x30   :  { %1733 = vsyncadd [#allocation6], 4294966768 }
  0x31   :  { %1734 = dma.done.wait [#allocation9], 528  }
  0x32   :  { %1735 = vsyncadd [#allocation9], 4294966768 }
  0x33   :  { %1736 = dma.done.wait [#allocation12], 1024  }
  0x34   :  { %1737 = vsyncadd [#allocation12], 4294966272 }
  0x35   :  { %1738 = dma.done.wait [#allocation15], 5808  }
  0x36   :  { %1739 = vsyncadd [#allocation15], 4294961488 }
  0x37   :  { %1740 = dma.done.wait [#allocation18], 12288  }
  0x38   :  { %1741 = vsyncadd [#allocation18], 4294955008 }
  0x39   :  { %1742 = dma.done.wait [#allocation21], 4096  }
  0x3a   :  { %1743 = vsyncadd [#allocation21], 4294963200  ;;  %v257_v0 = vld [vmem:[#allocation2 + $0x78] sm:$0xff]  ;;  %v256_v1 = vld [vmem:[#allocation2 + $0x70] sm:$0xff]  ;;  %s2150_s20 = sld [smem:[#allocation31_spill]]  ;;  %vm327_vm0 = vcmask 261120  }
  0x3b   :  { %v273_v2 = vld [vmem:[#allocation2 + $0xf8] sm:$0xff]  ;;  %278 = vmatpush.msra.mxu0 %v257_v0  ;;  %v272_v3 = vld [vmem:[#allocation2 + $0xf0] sm:$0xff]  ;;  %v255_v4 = vld [vmem:[#allocation2 + $0x68] sm:$0xff]  ;;  %s1308_s25 = sshll.u32 %s2143_s17, 4  ;;  %s1766_s27 = smov [#allocation22]   ;;  %s1309_s25 = int_to_ptr.hbm [resolvable:$true] %s1308_s25 }
  0x3c   :  { %298 = vmatpush.msra.mxu1 %v273_v2  ;;  %v271_v5 = vld [vmem:[#allocation2 + $0xe8] sm:$0xff]  ;;  %v254_v6 = vld [vmem:[#allocation2 + $0x60] sm:$0xff]  ;;  %v253_v8 = vld [vmem:[#allocation2 + $0x58] sm:$0xff]  ;;  %s1306_s28 = sshll.u32 %s1766_s27, 4  ;;  %s2151_s13 = sld [smem:[#allocation32_spill]]  ;;  %s1307_s28 = int_to_ptr.vmem [resolvable:$true] %s1306_s28 }
  0x3d   :  { %279 = vmatpush.msra.mxu0 %v256_v1  ;;  %v270_v7 = vld [vmem:[#allocation2 + $0xe0] sm:$0xff]  ;;  %v269_v9 = vld [vmem:[#allocation2 + $0xd8] sm:$0xff]  ;;  %v252_v10 = vld [vmem:[#allocation2 + $0x50] sm:$0xff] }
  0x3e   :  { %299 = vmatpush.msra.mxu1 %v272_v3  ;;  %v268_v11 = vld [vmem:[#allocation2 + $0xd0] sm:$0xff]  ;;  %v251_v12 = vld [vmem:[#allocation2 + $0x48] sm:$0xff]  ;;  %v250_v14 = vld [vmem:[#allocation2 + $0x40] sm:$0xff] }
  0x3f   :  { %280 = vmatpush.msra.mxu0 %v255_v4  ;;  %v267_v13 = vld [vmem:[#allocation2 + $0xc8] sm:$0xff]  ;;  %v266_v15 = vld [vmem:[#allocation2 + $0xc0] sm:$0xff]  ;;  %v249_v16 = vld [vmem:[#allocation2 + $0x38] sm:$0xff] }
  0x40   :  { %300 = vmatpush.msra.mxu1 %v271_v5  ;;  %v265_v17 = vld [vmem:[#allocation2 + $0xb8] sm:$0xff]  ;;  %v248_v18 = vld [vmem:[#allocation2 + $0x30] sm:$0xff]  ;;  %v247_v20 = vld [vmem:[#allocation2 + $0x28] sm:$0xff] }
  0x41   :  { %281 = vmatpush.msra.mxu0 %v254_v6  ;;  %v264_v19 = vld [vmem:[#allocation2 + $0xb0] sm:$0xff]  ;;  %v263_v21 = vld [vmem:[#allocation2 + $0xa8] sm:$0xff]  ;;  %v246_v22 = vld [vmem:[#allocation2 + $0x20] sm:$0xff] }
  0x42   :  { %301 = vmatpush.msra.mxu1 %v270_v7  ;;  %v262_v23 = vld [vmem:[#allocation2 + $0xa0] sm:$0xff]  ;;  %v245_v24 = vld [vmem:[#allocation2 + $0x18] sm:$0xff]  ;;  %v244_v26 = vld [vmem:[#allocation2 + $0x10] sm:$0xff] }
  0x43   :  { %282 = vmatpush.msra.mxu0 %v253_v8  ;;  %v261_v25 = vld [vmem:[#allocation2 + $0x98] sm:$0xff]  ;;  %v260_v27 = vld [vmem:[#allocation2 + $0x90] sm:$0xff]  ;;  %v243_v28 = vld [vmem:[#allocation2 + $0x8] sm:$0xff] }
  0x44   :  { %302 = vmatpush.msra.mxu1 %v269_v9  ;;  %v259_v29 = vld [vmem:[#allocation2 + $0x88] sm:$0xff]  ;;  %v242_v30 = vld [vmem:[#allocation2] sm:$0xff]  ;;  %v321_v35 = vld [vmem:[#allocation7 + $0x10] sm:$0xff] }
  0x45   :  { %283 = vmatpush.msra.mxu0 %v252_v10  ;;  %v258_v31 = vld [vmem:[#allocation2 + $0x80] sm:$0xff]  ;;  %v1924_v33 = vld [vmem:[%s2150_s20 + $0x8] sm:$0xff]  ;;  %v354_v45 = vld [vmem:[#allocation10 + $0x10] sm:$0xff] }
  0x46   :  { %303 = vmatpush.msra.mxu1 %v268_v11  ;;  %v1919_v32 = vld [vmem:[%s2150_s20] sm:$0xff]  ;;  %v320_v36 = vld [vmem:[#allocation7 + $0x8] sm:$0xff]  ;;  %v387_v53 = vld [vmem:[#allocation11 + $0x10] sm:$0xff] }
  0x47   :  { %284 = vmatpush.msra.mxu0 %v251_v12  ;;  %v322_v34 = vld [vmem:[#allocation7 + $0x18] sm:$0xff]  ;;  %v319_v37 = vld [vmem:[#allocation7] sm:$0xff]  ;;  %v353_v46 = vld [vmem:[#allocation10 + $0x8] sm:$0xff] }
  0x48   :  { %304 = vmatpush.msra.mxu1 %v267_v13  ;;  %343 = vmatpush.msra.mxu2 %v322_v34  ;;  %v355_v38 = vld [vmem:[#allocation10 + $0x18] sm:$0xff]  ;;  %v352_v47 = vld [vmem:[#allocation10] sm:$0xff]  ;;  %v386_v54 = vld [vmem:[#allocation11 + $0x8] sm:$0xff] }
  0x49   :  { %285 = vmatpush.msra.mxu0 %v250_v14  ;;  %375 = vmatpush.msra.mxu3 %v355_v38  ;;  %v1373_v39 = vld [vmem:[#allocation5] ss:$0 sm:$0xff]  ;;  %v1374_v49 = vld [vmem:[#allocation8] ss:$0 sm:$0xff]  ;;  %v385_v55 = vld [vmem:[#allocation11] sm:$0xff] }
  0x4a   :  { %305 = vmatpush.msra.mxu1 %v266_v15  ;;  %344 = vmatpush.msra.mxu2 %v321_v35  ;;  %v388_v48 = vld [vmem:[#allocation11 + $0x18] sm:$0xff]  ;;  %v419_v57 = vld [vmem:[#allocation13 + $0x10] sm:$0xff]  ;;  %v418_v63 = vld [vmem:[#allocation13 + $0x8] sm:$0xff] }
  0x4b   :  { %286 = vmatpush.msra.mxu0 %v249_v16  ;;  %376 = vmatpush.msra.mxu3 %v354_v45  ;;  %v420_v56 = vld [vmem:[#allocation13 + $0x18] sm:$0xff]  ;;  %v417_v0 = vld [vmem:[#allocation13] sm:$0xff]  ;;  %v482_v1 = vld [vmem:[#allocation14 + $0x108] sm:$0xff] }
  0x4c   :  { %306 = vmatpush.msra.mxu1 %v265_v17  ;;  %345 = vmatpush.msra.mxu2 %v320_v36  ;;  %v1375_v58 = vld [vmem:[%s2133_s7] ss:$0 sm:$0xff]  ;;  %v483_v2 = vld [vmem:[#allocation14 + $0x110] sm:$0xff]  ;;  %v486_v3 = vld [vmem:[#allocation14 + $0x128] sm:$0xff] }
  0x4d   :  { %287 = vmatpush.msra.mxu0 %v248_v18  ;;  %377 = vmatpush.msra.mxu3 %v353_v46  ;;  %v487_v4 = vld [vmem:[#allocation14 + $0x130] sm:$0xff]  ;;  %v472_v6 = vld [vmem:[#allocation14 + $0xb8] sm:$0xff]  ;;  %v461_v13 = vld [vmem:[#allocation14 + $0x60] sm:$0xff] }
  0x4e   :  { %307 = vmatpush.msra.mxu1 %v264_v19  ;;  %346 = vmatpush.msra.mxu2 %v319_v37  ;;  %v471_v5 = vld [vmem:[#allocation14 + $0xb0] sm:$0xff]  ;;  %v1376_v7 = vld [vmem:[%s2135_s9] ss:$0 sm:$0xff]  ;;  %v465_v16 = vld [vmem:[#allocation14 + $0x80] sm:$0xff] }
  0x4f   :  { %288 = vmatpush.msra.mxu0 %v247_v20  ;;  %378 = vmatpush.msra.mxu3 %v352_v47  ;;  %v475_v11 = vld [vmem:[#allocation14 + $0xd0] sm:$0xff]  ;;  %v476_v12 = vld [vmem:[#allocation14 + $0xd8] sm:$0xff]  ;;  %v450_v17 = vld [vmem:[#allocation14 + $0x8] sm:$0xff] }
  0x50   :  { %308 = vmatpush.msra.mxu1 %v263_v21  ;;  %408 = vmatpush.msrb.mxu2 %v388_v48  ;;  %v460_v14 = vld [vmem:[#allocation14 + $0x58] sm:$0xff]  ;;  %v449_v18 = vld [vmem:[#allocation14] sm:$0xff]  ;;  %v454_v21 = vld [vmem:[#allocation14 + $0x28] sm:$0xff] }
  0x51   :  { %289 = vmatpush.msra.mxu0 %v246_v22  ;;  %440 = vmatpush.msrb.mxu3 %v420_v56  ;;  %v464_v15 = vld [vmem:[#allocation14 + $0x78] sm:$0xff]  ;;  %v485_v19 = vld [vmem:[#allocation14 + $0x120] sm:$0xff]  ;;  %v451_v36 = vld [vmem:[#allocation14 + $0x10] sm:$0xff] }
  0x52   :  { %309 = vmatpush.msra.mxu1 %v262_v23  ;;  %409 = vmatpush.msrb.mxu2 %v387_v53  ;;  %v453_v20 = vld [vmem:[#allocation14 + $0x20] sm:$0xff]  ;;  %v484_v22 = vld [vmem:[#allocation14 + $0x118] sm:$0xff]  ;;  %v474_v23 = vld [vmem:[#allocation14 + $0xc8] sm:$0xff] }
  0x53   :  { %290 = vmatpush.msra.mxu0 %v245_v24  ;;  %441 = vmatpush.msrb.mxu3 %v419_v57  ;;  %v490_v24 = vld [vmem:[#allocation14 + $0x148] sm:$0xff]  ;;  %v468_v34 = vld [vmem:[#allocation14 + $0x98] sm:$0xff]  ;;  %v469_v35 = vld [vmem:[#allocation14 + $0xa0] sm:$0xff] }
  0x54   :  { %310 = vmatpush.msra.mxu1 %v261_v25  ;;  %410 = vmatpush.msrb.mxu2 %v386_v54  ;;  %v491_v25 = vld [vmem:[#allocation14 + $0x150] sm:$0xff]  ;;  %v457_v37 = vld [vmem:[#allocation14 + $0x40] sm:$0xff]  ;;  %v458_v38 = vld [vmem:[#allocation14 + $0x48] sm:$0xff] }
  0x55   :  { %291 = vmatpush.msra.mxu0 %v244_v26  ;;  %442 = vmatpush.msrb.mxu3 %v418_v63  ;;  %v473_v26 = vld [vmem:[#allocation14 + $0xc0] sm:$0xff]  ;;  %v478_v46 = vld [vmem:[#allocation14 + $0xe8] sm:$0xff]  ;;  %v455_v53 = vld [vmem:[#allocation14 + $0x30] sm:$0xff] }
  0x56   :  { %311 = vmatpush.msra.mxu1 %v260_v27  ;;  %411 = vmatpush.msrb.mxu2 %v385_v55  ;;  %v463_v27 = vld [vmem:[#allocation14 + $0x70] sm:$0xff]  ;;  %v773_v45 = vld [vmem:[#allocation17 + $0xf8] sm:$0xff]  ;;  %v772_v48 = vld [vmem:[#allocation17 + $0xf0] sm:$0xff] }
  0x57   :  { %292 = vmatpush.msra.mxu0 %v243_v28  ;;  %443 = vmatpush.msrb.mxu3 %v417_v0  ;;  %v479_v28 = vld [vmem:[#allocation14 + $0xf0] sm:$0xff]  ;;  %v477_v47 = vld [vmem:[#allocation14 + $0xe0] sm:$0xff]  ;;  %v492_v55 = vld [vmem:[#allocation14 + $0x158] sm:$0xff] }
  0x58   :  { %312 = vmatpush.msra.mxu1 %v259_v29  ;;  %v480_v29 = vld [vmem:[#allocation14 + $0xf8] sm:$0xff]  ;;  %v757_v54 = vld [vmem:[#allocation17 + $0x78] sm:$0xff]  ;;  %v770_v56 = vld [vmem:[#allocation17 + $0xe0] sm:$0xff] }
  0x59   :  { %293 = vmatpush.msra.mxu0 %v242_v30  ;;  %v462_v30 = vld [vmem:[#allocation14 + $0x68] sm:$0xff]  ;;  %v756_v57 = vld [vmem:[#allocation17 + $0x70] sm:$0xff]  ;;  %v459_v63 = vld [vmem:[#allocation14 + $0x50] sm:$0xff] }
  0x5a   :  { %313 = vmatpush.msra.mxu1 %v258_v31  ;;  %294 = vmatmul.f32.vlgmr.msra.gmra.mxu0 %v1919_v32  ;;  %v452_v31 = vld [vmem:[#allocation14 + $0x18] sm:$0xff] }
  0x5b   :  { %314 = vmatmul.f32.vlgmr.msra.gmra.mxu1 %v1924_v33  ;;  %614 = vmatpush.msrb.mxu0 %v486_v3  ;;  %v768_v0 = vld [vmem:[#allocation17 + $0xd0] sm:$0xff] }
  0x5c   :  { %634 = vmatpush.msrb.mxu1 %v487_v4  ;;  %v752_v3 = vld [vmem:[#allocation17 + $0x50] sm:$0xff]  ;;  %v766_v4 = vld [vmem:[#allocation17 + $0xc0] sm:$0xff] }
  0x5d   :  { %615 = vmatpush.msrb.mxu0 %v475_v11  ;;  %v748_v11 = vld [vmem:[#allocation17 + $0x30] sm:$0xff] }
  0x5e   :  { %635 = vmatpush.msrb.mxu1 %v476_v12  ;;  %v762_v12 = vld [vmem:[#allocation17 + $0xa0] sm:$0xff] }
  0x5f   :  { %616 = vmatpush.msrb.mxu0 %v464_v15  ;;  %v746_v15 = vld [vmem:[#allocation17 + $0x20] sm:$0xff] }
  0x60   :  { %636 = vmatpush.msrb.mxu1 %v465_v16  ;;  %v760_v16 = vld [vmem:[#allocation17 + $0x90] sm:$0xff] }
  0x61   :  { %617 = vmatpush.msrb.mxu0 %v453_v20  ;;  %v758_v20 = vld [vmem:[#allocation17 + $0x80] sm:$0xff] }
  0x62   :  { %637 = vmatpush.msrb.mxu1 %v454_v21  ;;  %v743_v21 = vld [vmem:[#allocation17 + $0x8] sm:$0xff] }
  0x63   :  { %694 = vmatpush.msra.mxu0 %v490_v24 }
  0x64   :  { %714 = vmatpush.msra.mxu1 %v491_v25 }
  0x65   :  { %695 = vmatpush.msra.mxu0 %v479_v28 }
  0x66   :  { %715 = vmatpush.msra.mxu1 %v480_v29 }
  0x67   :  { %696 = vmatpush.msra.mxu0 %v468_v34 }
  0x68   :  { %716 = vmatpush.msra.mxu1 %v469_v35 }
  0x69   :  { %697 = vmatpush.msra.mxu0 %v457_v37 }
  0x6a   :  { %717 = vmatpush.msra.mxu1 %v458_v38 }
  0xd7   :  { %v295_v40 = vpop.f32.mrf.mxu0 }
  0xd8   :  { %v315_v41 = vpop.f32.mrf.mxu1  ;;  %v296_v42 = vadd.f32 %v1373_v39, %v295_v40  ;;  %v1377_v39 = vld [vmem:[%s2137_s11] ss:$0 sm:$0xff] }
  0xda   :  { %v316_v43 = vadd.f32 %v315_v41, %v296_v42 }
  0xdc   :  { %v318_v44 = vmax.f32 %v316_v43, 0.0 }
  0xde   :  { %1328 = vmatmul.msk.f32.vlgmr.msra.gmra.mxu2 %vm327_vm0, %v318_v44  ;;  %v488_v44 = vld [vmem:[#allocation14 + $0x138] sm:$0xff] }
  0xdf   :  { %534 = vmatpush.msra.mxu2 %v482_v1  ;;  %v753_v1 = vld [vmem:[#allocation17 + $0x58] sm:$0xff] }
  0xe1   :  { %535 = vmatpush.msra.mxu2 %v471_v5  ;;  %v751_v5 = vld [vmem:[#allocation17 + $0x48] sm:$0xff] }
  0xe3   :  { %536 = vmatpush.msra.mxu2 %v460_v14  ;;  %v761_v14 = vld [vmem:[#allocation17 + $0x98] sm:$0xff] }
  0xe5   :  { %537 = vmatpush.msra.mxu2 %v449_v18  ;;  %v759_v18 = vld [vmem:[#allocation17 + $0x88] sm:$0xff] }
 0x161   :  { %v348_v50 = vpop.f32.mrf.mxu2 }
 0x162   :  { %v349_v51 = vadd.f32 %v1374_v49, %v348_v50  ;;  %v467_v49 = vld [vmem:[#allocation14 + $0x90] sm:$0xff]  ;;  %v466_v50 = vld [vmem:[#allocation14 + $0x88] sm:$0xff] }
 0x164   :  { %v351_v52 = vmax.f32 %v349_v51, 0.0  ;;  %v771_v51 = vld [vmem:[#allocation17 + $0xe8] sm:$0xff] }
 0x166   :  { %1329 = vmatmul.msk.f32.vlgmr.msra.gmra.mxu3 %vm327_vm0, %v351_v52  ;;  %v456_v52 = vld [vmem:[#allocation14 + $0x38] sm:$0xff] }
 0x167   :  { %554 = vmatpush.msra.mxu3 %v483_v2  ;;  %v767_v2 = vld [vmem:[#allocation17 + $0xc8] sm:$0xff] }
 0x169   :  { %555 = vmatpush.msra.mxu3 %v472_v6  ;;  %v765_v6 = vld [vmem:[#allocation17 + $0xb8] sm:$0xff] }
 0x16b   :  { %556 = vmatpush.msra.mxu3 %v461_v13  ;;  %v747_v13 = vld [vmem:[#allocation17 + $0x28] sm:$0xff] }
 0x16d   :  { %557 = vmatpush.msra.mxu3 %v450_v17  ;;  %v745_v17 = vld [vmem:[#allocation17 + $0x18] sm:$0xff] }
 0x1e9   :  { %v380_v59 = vpop.f32.mrf.mxu3 }
 0x1ea   :  { %v381_v60 = vadd.f32 %v1375_v58, %v380_v59  ;;  %v481_v58 = vld [vmem:[#allocation14 + $0x100] sm:$0xff] }
 0x1eb   :  { %v769_v59 = vld [vmem:[#allocation17 + $0xd8] sm:$0xff] }
 0x1ec   :  { %v1933_v61 = vadd.f32 %v381_v60, %v316_v43  ;;  %v489_v43 = vld [vmem:[#allocation14 + $0x140] sm:$0xff]  ;;  %v755_v60 = vld [vmem:[#allocation17 + $0x68] sm:$0xff] }
 0x1ee   :  { %v384_v62 = vmax.f32 %v1933_v61, 0.0 }
 0x1f0   :  { %1330 = vmatmul.msk.f32.vlgmr.msrb.gmra.mxu2 %vm327_vm0, %v384_v62  ;;  %v754_v62 = vld [vmem:[#allocation17 + $0x60] sm:$0xff] }
 0x1f1   :  { %574 = vmatpush.msrb.mxu2 %v484_v22  ;;  %v742_v22 = vld [vmem:[#allocation17] sm:$0xff] }
 0x1f3   :  { %575 = vmatpush.msrb.mxu2 %v473_v26 }
 0x1f5   :  { %576 = vmatpush.msrb.mxu2 %v462_v30 }
 0x1f7   :  { %577 = vmatpush.msrb.mxu2 %v451_v36 }
 0x273   :  { %v413_v8 = vpop.f32.mrf.mxu2 }
 0x274   :  { %v414_v9 = vadd.f32 %v1376_v7, %v413_v8  ;;  %v750_v7 = vld [vmem:[#allocation17 + $0x40] sm:$0xff]  ;;  %v764_v8 = vld [vmem:[#allocation17 + $0xb0] sm:$0xff] }
 0x276   :  { %v416_v10 = vmax.f32 %v414_v9, 0.0  ;;  %v749_v9 = vld [vmem:[#allocation17 + $0x38] sm:$0xff] }
 0x278   :  { %1331 = vmatmul.msk.f32.vlgmr.msrb.gmra.mxu3 %vm327_vm0, %v416_v10  ;;  %v763_v10 = vld [vmem:[#allocation17 + $0xa8] sm:$0xff] }
 0x279   :  { %594 = vmatpush.msrb.mxu3 %v485_v19  ;;  %v744_v19 = vld [vmem:[#allocation17 + $0x10] sm:$0xff] }
 0x27b   :  { %595 = vmatpush.msrb.mxu3 %v474_v23  ;;  %v493_v23 = vld [vmem:[#allocation16] sm:$0xff] }
 0x27c   :  { %v497_v26 = vperm.slane %v493_v23, 0  ;;  %v499_v30 = vperm.slane %v493_v23, 2  ;;  %v501_v34 = vperm.slane %v493_v23, 4  ;;  %v502_v35 = vperm.slane %v493_v23, 5 }
 0x27d   :  { %596 = vmatpush.msrb.mxu3 %v463_v27  ;;  %v498_v27 = vperm.slane %v493_v23, 1 }
 0x27f   :  { %597 = vmatpush.msrb.mxu3 %v452_v31  ;;  %v500_v31 = vperm.slane %v493_v23, 3 }
 0x2fb   :  { %v445_v40 = vpop.f32.mrf.mxu3 }
 0x2fc   :  { %v446_v41 = vadd.f32 %v1377_v39, %v445_v40 }
 0x2fe   :  { %v1945_v42 = vadd.f32 %v446_v41, %v1933_v61  ;;  %v470_v61 = vld [vmem:[#allocation14 + $0xa8] sm:$0xff] }
 0x300   :  { %1332 = vmatmul.msk.f32.vlgmr.msra.gmra.mxu2 %vm327_vm0, %v1945_v42  ;;  %1333 = vmatmul.msk.f32.vlgmr.msra.gmra.mxu3 %vm327_vm0, %v1945_v42 }
 0x301   :  { %1336 = vmatmul.msk.f32.vlgmr.msrb.gmra.mxu0 %vm327_vm0, %v1945_v42  ;;  %1337 = vmatmul.msk.f32.vlgmr.msrb.gmra.mxu1 %vm327_vm0, %v1945_v42 }
 0x302   :  { %674 = vmatpush.msra.mxu3 %v489_v43  ;;  %654 = vmatpush.msra.mxu2 %v488_v44 }
 0x303   :  { %794 = vmatpush.msrb.mxu0 %v773_v45  ;;  %v503_v45 = vperm.slane %v493_v23, 6 }
 0x304   :  { %675 = vmatpush.msra.mxu3 %v478_v46  ;;  %655 = vmatpush.msra.mxu2 %v477_v47 }
 0x305   :  { %795 = vmatpush.msrb.mxu0 %v772_v48 }
 0x306   :  { %676 = vmatpush.msra.mxu3 %v467_v49  ;;  %656 = vmatpush.msra.mxu2 %v466_v50  ;;  %v504_v49 = vperm.slane %v493_v23, 7 }
 0x307   :  { %796 = vmatpush.msrb.mxu0 %v771_v51 }
 0x308   :  { %1334 = vmatmul.msk.f32.vlgmr.msrb.gmra.mxu2 %vm327_vm0, %v1945_v42  ;;  %1335 = vmatmul.msk.f32.vlgmr.msrb.gmra.mxu3 %vm327_vm0, %v1945_v42 }
 0x309   :  { %1340 = vmatmul.msk.f32.vlgmr.msra.gmra.mxu0 %vm327_vm0, %v1945_v42  ;;  %1341 = vmatmul.msk.f32.vlgmr.msra.gmra.mxu1 %vm327_vm0, %v1945_v42 }
 0x30a   :  { %677 = vmatpush.msra.mxu3 %v456_v52  ;;  %657 = vmatpush.msra.mxu2 %v455_v53 }
 0x30b   :  { %797 = vmatpush.msrb.mxu0 %v770_v56 }
 0x30c   :  { %774 = vmatpush.msrb.mxu3 %v757_v54  ;;  %734 = vmatpush.msrb.mxu2 %v492_v55 }
 0x30d   :  { %798 = vmatpush.msrb.mxu0 %v769_v59 }
 0x30e   :  { %775 = vmatpush.msrb.mxu3 %v756_v57  ;;  %735 = vmatpush.msrb.mxu2 %v481_v58 }
 0x30f   :  { %799 = vmatpush.msrb.mxu0 %v768_v0 }
 0x310   :  { %776 = vmatpush.msrb.mxu3 %v755_v60  ;;  %736 = vmatpush.msrb.mxu2 %v470_v61 }
 0x311   :  { %1338 = vmatmul.msk.f32.vlgmr.msra.gmra.mxu2 %vm327_vm0, %v1945_v42  ;;  %1339 = vmatmul.msk.f32.vlgmr.msra.gmra.mxu3 %vm327_vm0, %v1945_v42 }
 0x312   :  { %777 = vmatpush.msrb.mxu3 %v754_v62  ;;  %737 = vmatpush.msrb.mxu2 %v459_v63  ;;  %v494_v62 = vld [vmem:[#allocation16 + $0x8] sm:$0x7] }
 0x313   :  { %800 = vmatpush.msrb.mxu0 %v767_v2 }
 0x314   :  { %778 = vmatpush.msrb.mxu3 %v753_v1 }
 0x315   :  { %801 = vmatpush.msrb.mxu0 %v766_v4 }
 0x316   :  { %779 = vmatpush.msrb.mxu3 %v752_v3 }
 0x317   :  { %802 = vmatpush.msrb.mxu0 %v765_v6  ;;  %v505_v6 = vperm.slane %v494_v62, 0 }
 0x318   :  { %780 = vmatpush.msrb.mxu3 %v751_v5 }
 0x319   :  { %1342 = vmatmul.msk.f32.vlgmr.msrb.gmra.mxu2 %vm327_vm0, %v1945_v42  ;;  %803 = vmatpush.msrb.mxu0 %v764_v8 }
 0x31a   :  { %781 = vmatpush.msrb.mxu3 %v750_v7 }
 0x31b   :  { %804 = vmatpush.msrb.mxu0 %v763_v10 }
 0x31c   :  { %782 = vmatpush.msrb.mxu3 %v749_v9 }
 0x31d   :  { %805 = vmatpush.msrb.mxu0 %v762_v12 }
 0x31e   :  { %783 = vmatpush.msrb.mxu3 %v748_v11  ;;  %v506_v11 = vperm.slane %v494_v62, 1 }
 0x31f   :  { %806 = vmatpush.msrb.mxu0 %v761_v14 }
 0x320   :  { %784 = vmatpush.msrb.mxu3 %v747_v13 }
 0x321   :  { %807 = vmatpush.msrb.mxu0 %v760_v16  ;;  %v1163_v16 = vld [vmem:[#allocation20 + $0xf0] sm:$0xff] }
 0x322   :  { %785 = vmatpush.msrb.mxu3 %v746_v15  ;;  %1165 = vmatpush.msrb.mxu1 %v1163_v16  ;;  %v1146_v16 = vld [vmem:[#allocation20 + $0x68] sm:$0xff] }
 0x323   :  { %808 = vmatpush.msrb.mxu0 %v759_v18  ;;  %v1161_v18 = vld [vmem:[#allocation20 + $0xe0] sm:$0xff] }
 0x324   :  { %786 = vmatpush.msrb.mxu3 %v745_v17  ;;  %v1164_v17 = vld [vmem:[#allocation20 + $0xf8] sm:$0xff]  ;;  %1166 = vmatpush.msrb.mxu1 %v1161_v18 }
 0x325   :  { %809 = vmatpush.msrb.mxu0 %v758_v20  ;;  %1185 = vmatpush.msra.mxu2 %v1164_v17  ;;  %v1125_v17 = vld [vmem:[#allocation19 + $0x1c0] sm:$0xff] }
 0x326   :  { %787 = vmatpush.msrb.mxu3 %v744_v19  ;;  %810 = vmatmul.f32.vlgmr.msrb.gmra.mxu0 %v1924_v33 }
 0x328   :  { %788 = vmatpush.msrb.mxu3 %v743_v21  ;;  %v1162_v21 = vld [vmem:[#allocation20 + $0xe8] sm:$0xff] }
 0x329   :  { %1186 = vmatpush.msra.mxu2 %v1162_v21  ;;  %v1087_v21 = vld [vmem:[#allocation19 + $0x90] sm:$0xff] }
 0x32a   :  { %789 = vmatpush.msrb.mxu3 %v742_v22 }
 0x32b   :  { %790 = vmatmul.f32.vlgmr.msrb.gmra.mxu3 %v1919_v32 }
 0x37e   :  { %v619_v38 = vpop.f32.mrf.mxu0  ;;  %v639_v39 = vpop.f32.mrf.mxu1 }
 0x37f   :  { %v620_v32 = vadd.f32 %v619_v38, %v501_v34  ;;  %v640_v43 = vadd.f32 %v639_v39, %v502_v35  ;;  %v1158_v34 = vld [vmem:[#allocation20 + $0xc8] sm:$0xff]  ;;  %v1155_v38 = vld [vmem:[#allocation20 + $0xb0] sm:$0xff]  ;;  %v1156_v39 = vld [vmem:[#allocation20 + $0xb8] sm:$0xff] }
 0x381   :  { %v847_v50 = vmax.f32 %v620_v32, %v640_v43 }
 0x383   :  { %v539_v24 = vpop.f32.mrf.mxu2  ;;  %v559_v25 = vpop.f32.mrf.mxu3 }
 0x384   :  { %v540_v28 = vadd.f32 %v539_v24, %v497_v26  ;;  %v560_v29 = vadd.f32 %v559_v25, %v498_v27  ;;  %v507_v24 = vperm.slane %v494_v62, 2  ;;  %v1159_v25 = vld [vmem:[#allocation20 + $0xd0] sm:$0xff]  ;;  %v1160_v26 = vld [vmem:[#allocation20 + $0xd8] sm:$0xff]  ;;  %v1149_v62 = vld [vmem:[#allocation20 + $0x80] sm:$0xff] }
 0x385   :  { %1167 = vmatpush.msrb.mxu1 %v1159_v25  ;;  %1187 = vmatpush.msra.mxu2 %v1160_v26  ;;  %v1143_v25 = vld [vmem:[#allocation20 + $0x50] sm:$0xff]  ;;  %v1144_v26 = vld [vmem:[#allocation20 + $0x58] sm:$0xff] }
 0x386   :  { %v819_v40 = vmax.f32 %v540_v28, %v560_v29  ;;  %v699_v7 = vpop.f32.mrf.mxu0  ;;  %v719_v13 = vpop.f32.mrf.mxu1 }
 0x387   :  { %v1977_v14 = vadd.f32 %v699_v7, %v505_v6  ;;  %v1979_v22 = vadd.f32 %v719_v13, %v506_v11  ;;  %1188 = vmatpush.msra.mxu2 %v1158_v34  ;;  %v1147_v7 = vld [vmem:[#allocation20 + $0x70] sm:$0xff]  ;;  %v1085_v34 = vld [vmem:[#allocation19 + $0x80] sm:$0xff] }
 0x389   :  { %1189 = vmatpush.msra.mxu2 %v1156_v39 }
 0x38b   :  { %v579_v36 = vpop.f32.mrf.mxu2  ;;  %v599_v37 = vpop.f32.mrf.mxu3 }
 0x38c   :  { %v580_v33 = vadd.f32 %v579_v36, %v499_v30  ;;  %v600_v42 = vadd.f32 %v599_v37, %v500_v31  ;;  %v902_v30 = vand.u32 2147483647, %v1977_v14  ;;  %v1157_v31 = vld [vmem:[#allocation20 + $0xc0] sm:$0xff]  ;;  %v912_v36 = vand.u32 2147483647, %v1979_v22 }
 0x38d   :  { %1168 = vmatpush.msrb.mxu1 %v1157_v31 }
 0x38e   :  { %v820_v41 = vmax.f32 %v819_v40, %v580_v33  ;;  %v1099_v40 = vld [vmem:[#allocation19 + $0xf0] sm:$0xff] }
 0x38f   :  { %1205 = vmatpush.msra.mxu3 %v1099_v40  ;;  %1169 = vmatpush.msrb.mxu1 %v1155_v38  ;;  %v1142_v38 = vld [vmem:[#allocation20 + $0x48] sm:$0xff] }
 0x390   :  { %v821_v44 = vmax.f32 %v820_v41, %v600_v42  ;;  %v1097_v41 = vld [vmem:[#allocation19 + $0xe0] sm:$0xff] }
 0x391   :  { %1206 = vmatpush.msra.mxu3 %v1097_v41  ;;  %v1083_v41 = vld [vmem:[#allocation19 + $0x70] sm:$0xff] }
 0x392   :  { %v822_v46 = vsub.f32 %v540_v28, %v821_v44  ;;  %v825_v47 = vsub.f32 %v560_v29, %v821_v44  ;;  %v828_v48 = vsub.f32 %v580_v33, %v821_v44  ;;  %v831_v55 = vsub.f32 %v600_v42, %v821_v44  ;;  %v1154_v44 = vld [vmem:[#allocation20 + $0xa8] sm:$0xff] }
 0x393   :  { %v903_v42 = vsub.f32 0.0, %v902_v30  ;;  %1190 = vmatpush.msra.mxu2 %v1154_v44 }
 0x394   :  { %v659_v51 = vpop.f32.mrf.mxu2  ;;  %v679_v52 = vpop.f32.mrf.mxu3  ;;  %v823_v53 = vmul.f32 1.442695, %v822_v46  ;;  %v826_v54 = vmul.f32 1.442695, %v825_v47  ;;  %v829_v57 = vmul.f32 1.442695, %v828_v48 }
 0x395   :  { %v660_v56 = vadd.f32 %v659_v51, %v503_v45  ;;  %v680_v59 = vadd.f32 %v679_v52, %v504_v49  ;;  %v832_v60 = vmul.f32 1.442695, %v831_v55  ;;  %v1095_v45 = vld [vmem:[#allocation19 + $0xd0] sm:$0xff]  ;;  %v913_v47 = vsub.f32 0.0, %v912_v36  ;;  %v1152_v51 = vld [vmem:[#allocation20 + $0x98] sm:$0xff]  ;;  %v1141_v36 = vld [vmem:[#allocation20 + $0x40] sm:$0xff] }
 0x396   :  { %1378 = vpow2.f32 %v823_v53  ;;  %v1131_v52 = vld [vmem:[#allocation19 + $0x1f0] sm:$0xff]  ;;  %1207 = vmatpush.msra.mxu3 %v1095_v45  ;;  %1191 = vmatpush.msra.mxu2 %v1152_v51 }
 0x397   :  { %v848_v58 = vmax.f32 %v847_v50, %v660_v56  ;;  %1380 = vpow2.f32 %v826_v54  ;;  %v1151_v50 = vld [vmem:[#allocation20 + $0x90] sm:$0xff]  ;;  %1225 = vmatpush.msra.mxu0 %v1131_v52 }
 0x398   :  { %1382 = vpow2.f32 %v829_v57  ;;  %v1093_v57 = vld [vmem:[#allocation19 + $0xc0] sm:$0xff]  ;;  %v1139_v45 = vld [vmem:[#allocation20 + $0x30] sm:$0xff] }
 0x399   :  { %v849_v61 = vmax.f32 %v848_v58, %v680_v59  ;;  %1384 = vpow2.f32 %v832_v60  ;;  %v1129_v58 = vld [vmem:[#allocation19 + $0x1e0] sm:$0xff]  ;;  %1208 = vmatpush.msra.mxu3 %v1093_v57 }
 0x39a   :  { %1226 = vmatpush.msra.mxu0 %v1129_v58 }
 0x39b   :  { %v850_v63 = vsub.f32 %v620_v32, %v849_v61  ;;  %v853_v0 = vsub.f32 %v640_v43, %v849_v61  ;;  %v856_v1 = vsub.f32 %v660_v56, %v849_v61  ;;  %v859_v10 = vsub.f32 %v680_v59, %v849_v61  ;;  %v1153_v43 = vld [vmem:[#allocation20 + $0xa0] sm:$0xff] }
 0x39c   :  { %v1971_v2 = vpop.eup %1378  ;;  %v739_v28 = vpop.f32.mrf.mxu2  ;;  %1170 = vmatpush.msrb.mxu1 %v1153_v43  ;;  %v904_v59 = vmul.f32 1.442695, %v903_v42  ;;  %v1119_v42 = vld [vmem:[#allocation19 + $0x190] sm:$0xff]  ;;  %v1764_v43 = vmov 0  }
 0x39d   :  { %v851_v3 = vmul.f32 1.442695, %v850_v63  ;;  %v854_v4 = vmul.f32 1.442695, %v853_v0  ;;  %v1973_v5 = vpop.eup %1380  ;;  %v857_v9 = vmul.f32 1.442695, %v856_v1  ;;  %v1989_v37 = vadd.f32 %v739_v28, %v507_v24 }
 0x39e   :  { %v834_v8 = vadd.f32 %v1973_v5, %v1971_v2  ;;  %v1383_v12 = vpop.eup %1382  ;;  %v860_v20 = vmul.f32 1.442695, %v859_v10  ;;  %v1150_v63 = vld [vmem:[#allocation20 + $0x88] sm:$0xff]  ;;  %v1091_v0 = vld [vmem:[#allocation19 + $0xb0] sm:$0xff]  ;;  %1171 = vmatpush.msrb.mxu1 %v1151_v50  ;;  %v1081_v50 = vld [vmem:[#allocation19 + $0x60] sm:$0xff] }
 0x39f   :  { %1386 = vpow2.f32 %v851_v3  ;;  %v1385_v19 = vpop.eup %1384  ;;  %v922_v48 = vand.u32 2147483647, %v1989_v37  ;;  %1192 = vmatpush.msra.mxu2 %v1150_v63  ;;  %1209 = vmatpush.msra.mxu3 %v1091_v0  ;;  %v1135_v63 = vld [vmem:[#allocation20 + $0x10] sm:$0xff]  ;;  %v1136_v0 = vld [vmem:[#allocation20 + $0x18] sm:$0xff] }
 0x3a0   :  { %1388 = vpow2.f32 %v854_v4  ;;  %v835_v15 = vadd.f32 %v1383_v12, %v834_v8  ;;  %v1148_v8 = vld [vmem:[#allocation20 + $0x78] sm:$0xff]  ;;  %1172 = vmatpush.msrb.mxu1 %v1149_v62 }
 0x3a1   :  { %1390 = vpow2.f32 %v857_v9  ;;  %v1127_v9 = vld [vmem:[#allocation19 + $0x1d0] sm:$0xff]  ;;  %1193 = vmatpush.msra.mxu2 %v1148_v8  ;;  %v1100_v8 = vld [vmem:[#allocation19 + $0xf8] sm:$0xff] }
 0x3a2   :  { %v836_v23 = vadd.f32 %v1385_v19, %v835_v15  ;;  %v1145_v15 = vld [vmem:[#allocation20 + $0x60] sm:$0xff]  ;;  %1227 = vmatpush.msra.mxu0 %v1127_v9  ;;  %1173 = vmatpush.msrb.mxu1 %v1147_v7  ;;  %v1134_v7 = vld [vmem:[#allocation20 + $0x8] sm:$0xff] }
 0x3a3   :  { %v811_v49 = vpop.f32.mrf.mxu0  ;;  %1194 = vmatpush.msra.mxu2 %v1146_v16 }
 0x3a4   :  { %1392 = vrcp.f32 %v836_v23  ;;  %v1123_v23 = vld [vmem:[#allocation19 + $0x1b0] sm:$0xff]  ;;  %1228 = vmatpush.msra.mxu0 %v1125_v17  ;;  %1174 = vmatpush.msrb.mxu1 %v1145_v15  ;;  %v1132_v15 = vld [vmem:[#allocation19 + $0x1f8] sm:$0xff] }
 0x3a5   :  { %v1981_v27 = vpop.eup %1386  ;;  %1394 = vpow2.f32 %v860_v20  ;;  %1195 = vmatpush.msra.mxu2 %v1144_v26  ;;  %v1075_v17 = vld [vmem:[#allocation19 + $0x30] sm:$0xff] }
 0x3a6   :  { %v1983_v29 = vpop.eup %1388  ;;  %1229 = vmatpush.msra.mxu0 %v1123_v23  ;;  %1175 = vmatpush.msrb.mxu1 %v1143_v25  ;;  %v1109_v25 = vld [vmem:[#allocation19 + $0x140] sm:$0xff] }
 0x3a7   :  { %v862_v35 = vadd.f32 %v1983_v29, %v1981_v27  ;;  %v1991_v33 = vpop.eup %1390  ;;  %1196 = vmatpush.msra.mxu2 %v1142_v38  ;;  %v1107_v38 = vld [vmem:[#allocation19 + $0x130] sm:$0xff] }
 0x3a8   :  { %1176 = vmatpush.msrb.mxu1 %v1141_v36  ;;  %v1071_v36 = vld [vmem:[#allocation19 + $0x10] sm:$0xff] }
 0x3a9   :  { %v863_v32 = vadd.f32 %v1991_v33, %v862_v35  ;;  %v1121_v35 = vld [vmem:[#allocation19 + $0x1a0] sm:$0xff] }
 0x3aa   :  { %v1393_v46 = vpop.eup %1392  ;;  %1230 = vmatpush.msra.mxu0 %v1121_v35  ;;  %1177 = vmatpush.msrb.mxu1 %v1139_v45  ;;  %v1069_v45 = vld [vmem:[#allocation19] sm:$0xff] }
 0x3ab   :  { %v1395_v53 = vpop.eup %1394  ;;  %v838_v54 = vmul.f32 %v1393_v46, %v1971_v2  ;;  %v841_v55 = vmul.f32 %v1393_v46, %v1973_v5  ;;  %v844_v56 = vmul.f32 %v1393_v46, %v1383_v12  ;;  %v914_v2 = vmul.f32 1.442695, %v913_v47  ;;  %v1089_v12 = vld [vmem:[#allocation19 + $0xa0] sm:$0xff]  ;;  %v1140_v46 = vld [vmem:[#allocation20 + $0x38] sm:$0xff] }
 0x3ac   :  { %v864_v60 = vadd.f32 %v1395_v53, %v863_v32  ;;  %v923_v5 = vsub.f32 0.0, %v922_v48  ;;  %1210 = vmatpush.msra.mxu3 %v1089_v12  ;;  %v1137_v53 = vld [vmem:[#allocation20 + $0x20] sm:$0xff]  ;;  %1231 = vmatpush.msra.mxu0 %v1119_v42  ;;  %v1126_v42 = vld [vmem:[#allocation19 + $0x1c8] sm:$0xff] }
 0x3ad   :  { %v839_v1 = vmul.f32 0.996, %v838_v54  ;;  %v842_v3 = vmul.f32 0.996, %v841_v55  ;;  %v845_v4 = vmul.f32 0.996, %v844_v56  ;;  %1197 = vmatpush.msra.mxu2 %v1140_v46  ;;  %1178 = vmatpush.msrb.mxu1 %v1137_v53 }
 0x3ae   :  { %v791_v61 = vpop.f32.mrf.mxu3  ;;  %1396 = vrcp.f32 %v864_v60  ;;  %v924_v24 = vmul.f32 1.442695, %v923_v5  ;;  %1211 = vmatpush.msra.mxu3 %v1087_v21  ;;  %v1138_v54 = vld [vmem:[#allocation20 + $0x28] sm:$0xff]  ;;  %v1117_v55 = vld [vmem:[#allocation19 + $0x180] sm:$0xff]  ;;  %v1115_v60 = vld [vmem:[#allocation19 + $0x170] sm:$0xff] }
 0x3af   :  { %v1997_v6 = vadd.f32 %v811_v49, %v791_v61  ;;  %v840_v10 = vadd.f32 0.001, %v839_v1  ;;  %v843_v11 = vadd.f32 0.001, %v842_v3  ;;  %1398 = vpow2.f32 %v904_v59  ;;  %v1079_v59 = vld [vmem:[#allocation19 + $0x50] sm:$0xff]  ;;  %1232 = vmatpush.msra.mxu0 %v1117_v55  ;;  %1198 = vmatpush.msra.mxu2 %v1138_v54  ;;  %v1133_v5 = vld [vmem:[#allocation20] sm:$0xff] }
 0x3b0   :  { %v846_v18 = vadd.f32 0.001, %v845_v4  ;;  %1400 = vpow2.f32 %v914_v2  ;;  %1212 = vmatpush.msra.mxu3 %v1085_v34  ;;  %1179 = vmatpush.msrb.mxu1 %v1135_v63  ;;  %v1128_v34 = vld [vmem:[#allocation19 + $0x1d8] sm:$0xff]  ;;  %v1105_v46 = vld [vmem:[#allocation19 + $0x120] sm:$0xff]  ;;  %v1103_v55 = vld [vmem:[#allocation19 + $0x110] sm:$0xff] }
 0x3b1   :  { %v2000_v13 = vclamps-f32 %v1997_v6, 3.0  ;;  %v876_v19 = vmul.f32 6.0, %v840_v10  ;;  %v878_v20 = vadd.f32 %v843_v11, %v840_v10  ;;  %1402 = vpow2.f32 %v924_v24  ;;  %1233 = vmatpush.msra.mxu0 %v1115_v60  ;;  %1199 = vmatpush.msra.mxu2 %v1136_v0  ;;  %v1073_v24 = vld [vmem:[#allocation19 + $0x20] sm:$0xff] }
 0x3b2   :  { %1213 = vmatpush.msra.mxu3 %v1083_v41  ;;  %1180 = vmatpush.msrb.mxu1 %v1133_v5  ;;  %v1094_v41 = vld [vmem:[#allocation19 + $0xc8] sm:$0xff]  ;;  %v901_v5 = vmax.f32 %v1977_v14, 0.0 }
 0x3b3   :  { %v2002_v28 = vadd.f32 -3.0, %v876_v19  ;;  %v879_v30 = vmul.f32 6.0, %v878_v20  ;;  %v881_v31 = vadd.f32 %v878_v20, %v846_v18  ;;  %vm931_vm1 = vcmp.ge.f32.partialorder %v2000_v13, -3.0  ;;  %1200 = vmatpush.msra.mxu2 %v1134_v7  ;;  %v1098_v18 = vld [vmem:[#allocation19 + $0xe8] sm:$0xff] }
 0x3b4   :  { %v1397_v32 = vpop.eup %1396  ;;  %v932_v44 = vsel %vm931_vm1, 1, %v1764_v43  ;;  %vm945_vm5 = vcmp.ge.f32.partialorder %v2000_v13, 3.000001  ;;  %1214 = vmatpush.msra.mxu3 %v1081_v50  ;;  %v1130_v19 = vld [vmem:[#allocation19 + $0x1e8] sm:$0xff]  ;;  %1245 = vmatpush.msra.mxu1 %v1100_v8  ;;  %v1092_v50 = vld [vmem:[#allocation19 + $0xb8] sm:$0xff] }
 0x3b5   :  { %v2005_v39 = vadd.f32 -3.0, %v879_v30  ;;  %v882_v40 = vmul.f32 6.0, %v881_v31  ;;  %vm934_vm2 = vcmp.ge.f32.partialorder %v2000_v13, %v2002_v28  ;;  %v1399_v47 = vpop.eup %1398  ;;  %v866_v56 = vmul.f32 %v1397_v32, %v1981_v27  ;;  %v1077_v27 = vld [vmem:[#allocation19 + $0x40] sm:$0xff]  ;;  %1265 = vmatpush.msrb.mxu2 %v1132_v15  ;;  %v1096_v31 = vld [vmem:[#allocation19 + $0xd8] sm:$0xff] }
 0x3b6   :  { %v935_v49 = vsel %vm934_vm2, 1, %v1764_v43  ;;  %v1401_v51 = vpop.eup %1400  ;;  %v869_v57 = vmul.f32 %v1397_v32, %v1983_v29  ;;  %v906_v1 = vadd.f32 1.0, %v1399_v47  ;;  %v1113_v29 = vld [vmem:[#allocation19 + $0x160] sm:$0xff]  ;;  %v872_v4 = vmul.f32 %v1397_v32, %v1991_v33  ;;  %1215 = vmatpush.msra.mxu3 %v1079_v59  ;;  %v1111_v33 = vld [vmem:[#allocation19 + $0x150] sm:$0xff]  ;;  %1246 = vmatpush.msra.mxu1 %v1098_v18  ;;  %v1122_v59 = vld [vmem:[#allocation19 + $0x1a8] sm:$0xff] }
 0x3b7   :  { %v2011_v48 = vadd.f32 -3.0, %v882_v40  ;;  %v936_v52 = vadd.s32 %v935_v49, %v932_v44  ;;  %vm938_vm3 = vcmp.ge.f32.partialorder %v2000_v13, %v2005_v39  ;;  %v916_v3 = vadd.f32 1.0, %v1401_v51  ;;  %v1403_v9 = vpop.eup %1402  ;;  %1234 = vmatpush.msra.mxu0 %v1113_v29  ;;  %1266 = vmatpush.msrb.mxu2 %v1130_v19  ;;  %v1124_v51 = vld [vmem:[#allocation19 + $0x1b8] sm:$0xff]  ;;  %v2047_v29 = vld [vmem:[%s2150_s20] sm:$0xff] }
 0x3b8   :  { %v939_v58 = vsel %vm938_vm3, 1, %v1764_v43  ;;  %v867_v10 = vmul.f32 0.996, %v866_v56  ;;  %v870_v11 = vmul.f32 0.996, %v869_v57  ;;  %v946_v12 = vsel %vm945_vm5, 1, %v1764_v43  ;;  %1216 = vmatpush.msra.mxu3 %v1077_v27  ;;  %1247 = vmatpush.msra.mxu1 %v1096_v31 }
 0x3b9   :  { %vm942_vm4 = vcmp.ge.f32.partialorder %v2000_v13, %v2011_v48  ;;  %v940_v61 = vadd.s32 %v939_v58, %v936_v52  ;;  %1404 = vlog2.f32 %v906_v1  ;;  %v873_v20 = vmul.f32 0.996, %v872_v4  ;;  %1235 = vmatpush.msra.mxu0 %v1111_v33  ;;  %1267 = vmatpush.msrb.mxu2 %v1128_v34  ;;  %v1090_v58 = vld [vmem:[#allocation19 + $0xa8] sm:$0xff]  ;;  %v1088_v1 = vld [vmem:[#allocation19 + $0x98] sm:$0xff] }
 0x3ba   :  { %v943_v62 = vsel %vm942_vm4, 1, %v1764_v43  ;;  %1406 = vlog2.f32 %v916_v3  ;;  %v926_v21 = vadd.f32 1.0, %v1403_v9  ;;  %v868_v26 = vadd.f32 0.001, %v867_v10  ;;  %1217 = vmatpush.msra.mxu3 %v1075_v17  ;;  %1248 = vmatpush.msra.mxu1 %v1094_v41  ;;  %v1120_v27 = vld [vmem:[#allocation19 + $0x198] sm:$0xff] }
 0x3bb   :  { %v944_v2 = vadd.s32 %v943_v62, %v940_v61  ;;  %v871_v30 = vadd.f32 0.001, %v870_v11  ;;  %v1344_v35 = vadd.f32 3.0, %v2002_v28  ;;  %v885_v40 = vsub.f32 %v2005_v39, %v2002_v28  ;;  %1236 = vmatpush.msra.mxu0 %v1109_v25  ;;  %1268 = vmatpush.msrb.mxu2 %v1126_v42  ;;  %v1086_v11 = vld [vmem:[#allocation19 + $0x88] sm:$0xff]  ;;  %v1084_v33 = vld [vmem:[#allocation19 + $0x78] sm:$0xff] }
 0x3bc   :  { %1218 = vmatpush.msra.mxu3 %v1073_v24  ;;  %v1765_v32 = vmov 0.0   ;;  %1408 = vlog2.f32 %v926_v21  ;;  %v886_v57 = vsub.f32 %v2011_v48, %v2005_v39  ;;  %v874_v60 = vadd.f32 0.001, %v873_v20  ;;  %1249 = vmatpush.msra.mxu1 %v1092_v50  ;;  %v1116_v18 = vld [vmem:[#allocation19 + $0x178] sm:$0xff]  ;;  %v1082_v24 = vld [vmem:[#allocation19 + $0x68] sm:$0xff] }
 0x3bd   :  { %v947_v16 = vadd.s32 %v946_v12, %v944_v2  ;;  %1237 = vmatpush.msra.mxu0 %v1107_v38  ;;  %v891_v52 = vadd.f32 %v871_v30, %v868_v26  ;;  %1269 = vmatpush.msrb.mxu2 %v1124_v51  ;;  %v889_v63 = vmul.f32 6.0, %v868_v26  ;;  %v911_v9 = vmax.f32 %v1979_v22, 0.0  ;;  %v1118_v12 = vld [vmem:[#allocation19 + $0x188] sm:$0xff]  ;;  %v1080_v38 = vld [vmem:[#allocation19 + $0x58] sm:$0xff] }
 0x3be   :  { %1219 = vmatpush.msra.mxu3 %v1071_v36  ;;  %1250 = vmatpush.msra.mxu1 %v1090_v58  ;;  %v887_v10 = vsub.f32 3.0, %v2011_v48  ;;  %v921_v22 = vmax.f32 %v1989_v37, 0.0  ;;  %v1114_v25 = vld [vmem:[#allocation19 + $0x168] sm:$0xff]  ;;  %vm814_vm2 = vcmp.ge.f32.partialorder %v1997_v6, -3.0  ;;  %vm815_vm3 = vcmp.le.f32.partialorder %v1997_v6, 3.0 }
 0x3bf   :  { %v2023_v23 = vadd.s32 4294967295, %v947_v16  ;;  %v1405_v49 = vpop.eup %1404  ;;  %1238 = vmatpush.msra.mxu0 %v1105_v46  ;;  %v892_v3 = vmul.f32 6.0, %v891_v52  ;;  %v894_v4 = vadd.f32 %v891_v52, %v874_v60  ;;  %1270 = vmatpush.msrb.mxu2 %v1122_v59  ;;  %v2058_v17 = vadd.f32 -3.0, %v889_v63  ;;  %v1110_v46 = vld [vmem:[#allocation19 + $0x148] sm:$0xff]  ;;  %vm816_vm4 = vmand %vm814_vm2, %vm815_vm3 }
 0x3c0   :  { %v1407_v54 = vpop.eup %1406  ;;  %1220 = vmatpush.msra.mxu3 %v1069_v45  ;;  %v908_v62 = vmul.f32 0.6931472, %v1405_v49  ;;  %1251 = vmatpush.msra.mxu1 %v1088_v1  ;;  %v1078_v45 = vld [vmem:[#allocation19 + $0x48] sm:$0xff] }
 0x3c1   :  { %vm949_vm6 = vcmp.eq.s32.totalorder %v2023_v23, 0  ;;  %vm961_vm7 = vcmp.eq.s32.totalorder %v2023_v23, 1  ;;  %vm976_vm8 = vcmp.eq.s32.totalorder %v2023_v23, 2  ;;  %vm991_vm9 = vcmp.eq.s32.totalorder %v2023_v23, 3  ;;  %1221 = vmatmul.f32.vlgmr.msra.gmra.mxu3 %v2047_v29  ;;  %1239 = vmatpush.msra.mxu0 %v1103_v55 }
 0x3c2   :  { %v2030_v43 = vsel %vm949_vm6, 1.0, %v1765_v32  ;;  %v2032_v44 = vsel %vm961_vm7, 1.0, %v1765_v32  ;;  %v2039_v56 = vsel %vm976_vm8, 1.0, %v1765_v32  ;;  %v918_v0 = vmul.f32 0.6931472, %v1407_v54  ;;  %v1409_v8 = vpop.eup %1408  ;;  %1271 = vmatpush.msrb.mxu2 %v1120_v27  ;;  %1252 = vmatpush.msra.mxu1 %v1086_v11 }
 0x3c3   :  { %v954_v47 = vmul.f32 %v2030_v43, %v1344_v35  ;;  %v966_v53 = vmul.f32 %v2032_v44, %v885_v40  ;;  %v981_v2 = vmul.f32 %v2039_v56, %v886_v57  ;;  %v2054_v7 = vsel %vm991_vm9, 1.0, %v1765_v32  ;;  %v1112_v40 = vld [vmem:[#allocation19 + $0x158] sm:$0xff] }
 0x3c4   :  { %v909_v16 = vadd.f32 %v908_v62, %v901_v5  ;;  %v919_v14 = vadd.f32 %v918_v0, %v911_v9  ;;  %v2060_v19 = vadd.f32 -3.0, %v892_v3  ;;  %v895_v20 = vmul.f32 6.0, %v894_v4  ;;  %1272 = vmatpush.msrb.mxu2 %v1118_v12  ;;  %1253 = vmatpush.msra.mxu1 %v1084_v33 }
 0x3c5   :  { %v967_v61 = vadd.f32 %v966_v53, %v954_v47  ;;  %v996_v21 = vmul.f32 %v2054_v7, %v887_v10  ;;  %v928_v23 = vmul.f32 0.6931472, %v1409_v8  ;;  %v1345_v31 = vadd.f32 3.0, %v2058_v17 }
 0x3c6   :  { %v910_v30 = vadd.f32 0.001, %v909_v16  ;;  %1273 = vmatpush.msrb.mxu2 %v1116_v18  ;;  %v2066_v34 = vmul.f32 -3.0, %v2030_v43  ;;  %v964_v35 = vmul.f32 %v2032_v44, %v2002_v28  ;;  %v920_v36 = vadd.f32 0.001, %v919_v14  ;;  %1254 = vmatpush.msra.mxu1 %v1082_v24  ;;  %v1076_v24 = vld [vmem:[#allocation19 + $0x38] sm:$0xff] }
 0x3c7   :  { %v982_v15 = vadd.f32 %v981_v2, %v967_v61  ;;  %v2070_v41 = vadd.f32 -3.0, %v895_v20  ;;  %v898_v37 = vsub.f32 %v2060_v19, %v2058_v17  ;;  %v929_v42 = vadd.f32 %v928_v23, %v921_v22  ;;  %v1101_v22 = vld [vmem:[#allocation19 + $0x100] sm:$0xff] }
 0x3c8   :  { %1274 = vmatpush.msrb.mxu2 %v1114_v25  ;;  %v956_v32 = vmul.f32 %v2030_v43, %v1345_v31  ;;  %v959_v47 = vmul.f32 %v2030_v43, %v910_v30  ;;  %v972_v49 = vmul.f32 %v2032_v44, %v910_v30  ;;  %v974_v50 = vmul.f32 %v2032_v44, %v920_v36  ;;  %v1108_v25 = vld [vmem:[#allocation19 + $0x138] sm:$0xff]  ;;  %v1106_v30 = vld [vmem:[#allocation19 + $0x128] sm:$0xff] }
 0x3c9   :  { %v997_v26 = vadd.f32 %v996_v21, %v982_v15  ;;  %v970_v28 = vmul.f32 %v2032_v44, %v898_v37  ;;  %1255 = vmatpush.msra.mxu1 %v1080_v38  ;;  %v965_v51 = vadd.f32 %v964_v35, %v2066_v34  ;;  %v899_v52 = vsub.f32 %v2070_v41, %v2060_v19  ;;  %v2101_v38 = vld [vmem:[%s2150_s20 + $0x8] sm:$0xff] }
 0x3ca   :  { %1275 = vmatpush.msrb.mxu2 %v1112_v40  ;;  %v979_v53 = vmul.f32 %v2039_v56, %v2005_v39  ;;  %v930_v55 = vadd.f32 0.001, %v929_v42  ;;  %v973_v58 = vadd.f32 %v2030_v43, %v972_v49  ;;  %v975_v59 = vadd.f32 %v974_v50, %v959_v47  ;;  %1240 = vmatpush.msra.mxu0 %v1101_v22  ;;  %v1104_v40 = vld [vmem:[#allocation19 + $0x118] sm:$0xff] }
 0x3cb   :  { %1410 = vrcp.f32 %v997_v26  ;;  %1256 = vmatpush.msra.mxu1 %v1078_v45  ;;  %v971_v57 = vadd.f32 %v970_v28, %v956_v32  ;;  %v900_v62 = vsub.f32 3.0, %v2070_v41  ;;  %v985_v63 = vmul.f32 %v2039_v56, %v899_v52  ;;  %1241 = vmatmul.f32.vlgmr.msra.gmra.mxu0 %v2101_v38  ;;  %v1070_v32 = vld [vmem:[#allocation19 + $0x8] sm:$0xff] }
 0x3cc   :  { %1276 = vmatpush.msrb.mxu2 %v1110_v46  ;;  %v980_v60 = vadd.f32 %v979_v53, %v965_v51  ;;  %v987_v0 = vmul.f32 %v2039_v56, %v920_v36  ;;  %v989_v1 = vmul.f32 %v2039_v56, %v930_v55  ;;  %v994_v27 = vmul.f32 %v2054_v7, %v2011_v48  ;;  %v1102_v45 = vld [vmem:[#allocation19 + $0x108] sm:$0xff] }
 0x3cd   :  { %v986_v3 = vadd.f32 %v985_v63, %v971_v57  ;;  %v1016_v5 = vand.u32 2147483648, %v997_v26  ;;  %v1014_v9 = vand.u32 2147483647, %v997_v26  ;;  %v1000_v10 = vmul.f32 %v2054_v7, %v900_v62  ;;  %1257 = vmatpush.msra.mxu1 %v1076_v24 }
 0x3ce   :  { %v988_v4 = vadd.f32 %v987_v0, %v973_v58  ;;  %v990_v2 = vadd.f32 %v989_v1, %v975_v59  ;;  %v995_v43 = vadd.f32 %v994_v27, %v980_v60  ;;  %v1002_v11 = vmul.f32 %v2054_v7, %v930_v55  ;;  %1277 = vmatpush.msrb.mxu2 %v1108_v25 }
 0x3cf   :  { %vm1010_vm11 = vweird.f32 %v997_v26  ;;  %v2093_v15 = vadd.f32 %v1000_v10, %v986_v3  ;;  %v1017_v48 = vor.u32 1.1754944e-38, %v1016_v5  ;;  %vm1015_vm13 = vcmp.eq.f32.partialorder %v1014_v9, 8.507059e+37 }
 0x3d0   :  { %v1004_v16 = vadd.f32 %v2054_v7, %v990_v2  ;;  %v1003_v14 = vadd.f32 %v1002_v11, %v988_v4  ;;  %v1020_v18 = vsub.f32 %v2000_v13, %v995_v43  ;;  %v1072_v13 = vld [vmem:[#allocation19 + $0x18] sm:$0xff]  ;;  %1278 = vmatpush.msrb.mxu2 %v1106_v30  ;;  %v968_v51 = vmul.f32 %v2032_v44, %v2058_v17 }
 0x3d1   :  { %v1411_v54 = vpop.eup %1410  ;;  %v983_v63 = vmul.f32 %v2039_v56, %v2060_v19  ;;  %v998_v2 = vmul.f32 %v2054_v7, %v2070_v41  ;;  %v1064_v11 = vlaneseq  ;;  %vm1299_vm7 = vcmask 7168  }
 0x3d2   :  { %v1006_v61 = vmul.f32 %v1411_v54, %v997_v26  ;;  %vm1011_vm10 = vweird.f32 %v1411_v54  ;;  %v1074_v26 = vld [vmem:[#allocation19 + $0x28] sm:$0xff]  ;;  %v1029_v35 = vadd.f32 %v1004_v16, %v1003_v14  ;;  %1279 = vmatpush.msrb.mxu2 %v1104_v40  ;;  %v969_v60 = vadd.f32 %v968_v51, %v2066_v34 }
 0x3d3   :  { %vm1012_vm12 = vmor %vm1010_vm11, %vm1011_vm10  ;;  %1258 = vmatpush.msra.mxu1 %v1074_v26  ;;  %v1065_v41 = vand.u32 127, %v1064_v11 }
 0x3d4   :  { %v1007_v39 = vsub.f32 1.0, %v1006_v61  ;;  %1280 = vmatpush.msrb.mxu2 %v1102_v45  ;;  %v984_v17 = vadd.f32 %v983_v63, %v969_v60 }
 0x3d5   :  { %1259 = vmatpush.msra.mxu1 %v1072_v13  ;;  %vm1066_vm5 = vcmp.lt.s32.totalorder %v1065_v41, 89 }
 0x3d6   :  { %v1008_v8 = vmul.f32 %v1411_v54, %v1007_v39  ;;  %vm1067_vm6 = vmand %vm816_vm4, %vm1066_vm5 }
 0x3d7   :  { %1260 = vmatpush.msra.mxu1 %v1070_v32 }
 0x3d8   :  { %v1009_v12 = vadd.f32 %v1411_v54, %v1008_v8  ;;  %v999_v8 = vadd.f32 %v998_v2, %v984_v17 }
 0x3da   :  { %v1013_v33 = vsel %vm1012_vm12, %v1411_v54, %v1009_v12 }
 0x3db   :  { %v1018_v20 = vsel %vm1015_vm13, %v1017_v48, %v1013_v33 }
 0x3dc   :  { %v1019_v21 = vmul.f32 %v1018_v20, %v2093_v15  ;;  %v1021_v23 = vmul.f32 %v1020_v18, %v1018_v20 }
 0x3de   :  { %v1022_v31 = vsub.f32 1.0, %v1021_v23  ;;  %v1030_v36 = vmul.f32 2.0, %v1019_v21  ;;  %v1051_v28 = vmul.f32 %v1021_v23, %v1004_v16  ;;  %v1024_v50 = vmul.f32 %v1021_v23, %v1019_v21 }
 0x3df   :  { %v1050_v4 = vmul.f32 %v1019_v21, %v1019_v21 }
 0x3e0   :  { %v1023_v37 = vmul.f32 %v1022_v31, %v1021_v23  ;;  %v1031_v42 = vsub.f32 %v1029_v35, %v1030_v36  ;;  %v1052_v52 = vmul.f32 %v1051_v28, %v1021_v23  ;;  %v1055_v53 = vmul.f32 %v1022_v31, %v1003_v14 }
 0x3e1   :  { %v1025_v59 = vmul.f32 %v1024_v50, %v1021_v23 }
 0x3e2   :  { %v1032_v46 = vmul.f32 %v1031_v42, %v1023_v37  ;;  %v1053_v49 = vmul.f32 %v1030_v36, %v1023_v37  ;;  %v1026_v55 = vmul.f32 %v1023_v37, %v1003_v14  ;;  %v1056_v62 = vmul.f32 %v1055_v53, %v1022_v31  ;;  %v1287_v36 = vld [vmem:[%s2151_s13] sm:$0xff] }
 0x3e4   :  { %v1033_v47 = vadd.f32 %v1032_v46, %v1019_v21  ;;  %v1054_v58 = vadd.f32 %v1053_v49, %v1052_v52  ;;  %v1027_v0 = vadd.f32 %v1026_v55, %v1025_v59 }
 0x3e6   :  { %1412 = vrcp.f32 %v1033_v47  ;;  %v1045_v1 = vand.u32 2147483648, %v1033_v47  ;;  %v1043_v39 = vand.u32 2147483647, %v1033_v47  ;;  %v1057_v44 = vadd.f32 %v1056_v62, %v1054_v58 }
 0x3e7   :  { %vm1039_vm15 = vweird.f32 %v1033_v47  ;;  %v1028_v5 = vmul.f32 %v1027_v0, %v2093_v15 }
 0x3e8   :  { %v1046_v34 = vor.u32 1.1754944e-38, %v1045_v1  ;;  %vm1044_vm1 = vcmp.eq.f32.partialorder %v1043_v39, 8.507059e+37  ;;  %v1058_v56 = vmul.f32 %v1057_v44, %v1050_v4 }
 0x3ec   :  { %v1413_v54 = vpop.eup %1412 }
 0x3ed   :  { %v1035_v57 = vmul.f32 %v1413_v54, %v1033_v47  ;;  %vm1040_vm14 = vweird.f32 %v1413_v54 }
 0x3ee   :  { %vm1041_vm0 = vmor %vm1039_vm15, %vm1040_vm14 }
 0x3ef   :  { %v1036_v61 = vsub.f32 1.0, %v1035_v57 }
 0x3f1   :  { %v1037_v27 = vmul.f32 %v1413_v54, %v1036_v61 }
 0x3f3   :  { %v1038_v3 = vadd.f32 %v1413_v54, %v1037_v27 }
 0x3f5   :  { %v1042_v43 = vsel %vm1041_vm0, %v1413_v54, %v1038_v3 }
 0x3f6   :  { %v1047_v19 = vsel %vm1044_vm1, %v1046_v34, %v1042_v43 }
 0x3f7   :  { %v1048_v9 = vmul.f32 %v1047_v19, %v1028_v5  ;;  %v1059_v10 = vmul.f32 %v1058_v56, %v1047_v19 }
 0x3f9   :  { %v1049_v12 = vadd.f32 %v1048_v9, %v999_v8  ;;  %v1060_v16 = vmul.f32 %v1059_v10, %v1047_v19 }
 0x3fb   :  { %v1063_v7 = vsel %vm816_vm4, %v1049_v12, %v1997_v6  ;;  %1414 = vlog2.f32 %v1060_v16 }
 0x3fc   :  { %1181 = vmatmul.f32.vlgmr.msrb.gmra.mxu1 %v1063_v7  ;;  %1201 = vmatmul.f32.vlgmr.msra.gmra.mxu2 %v1063_v7 }
 0x401   :  { %v1415_v15 = vpop.eup %1414 }
 0x402   :  { %v1062_v48 = vmul.f32 0.6931472, %v1415_v15 }
 0x404   :  { %1261 = vmatmul.f32.vlgmr.msra.gmra.mxu1 %v2047_v29  ;;  %1281 = vmatmul.f32.vlgmr.msrb.gmra.mxu2 %v2101_v38  ;;  %v1068_v14 = vsel %vm1067_vm6, %v1062_v48, 0.0 }
 0x405   :  { %1288 = vadd.xlane.f32.xlu0 %v1068_v14 }
 0x444   :  { %v1222_v33 = vpop.f32.mrf.mxu3 }
 0x448   :  { %v1242_v20 = vpop.f32.mrf.mxu0 }
 0x478   :  { %v1289_v35 = vpop.xlane.xlu0 %1288 }
 0x479   :  { %v1182_v18 = vpop.f32.mrf.mxu1  ;;  %v1290_v13 = vadd.f32 %v1289_v35, %v1287_v36 }
 0x47a   :  { %v1223_v21 = vadd.f32 %v1222_v33, %v1182_v18 }
 0x47c   :  { %v1243_v23 = vadd.f32 %v1242_v20, %v1223_v21 }
 0x47e   :  { %1285 = vst [vmem:[#allocation22] sm:$0xff] %v1243_v23  ;;  %v1291_v29 = vmul.f32 %v1243_v23, %v1243_v23 }
 0x47f   :  { %v1202_v6 = vpop.f32.mrf.mxu2 }
 0x481   :  { %v1262_v22 = vpop.f32.mrf.mxu1 }
 0x482   :  { %v1263_v24 = vadd.f32 %v1262_v22, %v1202_v6 }
 0x487   :  { %v1282_v25 = vpop.f32.mrf.mxu2 }
 0x488   :  { %v1283_v26 = vadd.f32 %v1282_v25, %v1263_v24 }
 0x48a   :  { %1286 = vst [vmem:[#allocation22 + $0x8] sm:$0xff] %v1283_v26  ;;  %v1292_v30 = vmul.f32 %v1283_v26, %v1283_v26 }
 0x48b   :  { %1311 = dma.vmem_to_hbm [thread:$0]  %s1307_s28, 256, %s1309_s25, [#allocation4]  }
 0x48c   :  { %v1293_v31 = vadd.f32 %v1292_v30, %v1291_v29 }
 0x48e   :  { %1294 = vadd.xlane.f32.xlu0 %v1293_v31 }
 0x501   :  { %v1295_v38 = vpop.xlane.xlu0 %1294 }
 0x502   :  { %v1296_v40 = vmul.f32 0.5, %v1295_v38 }
 0x504   :  { %v1297_v37 = vsub.f32 %v1290_v13, %v1296_v40 }
 0x506   :  { %v1351_v42 = vadd.f32 -235.24826, %v1297_v37 }
 0x508   :  { %1300 = vst.msk [vmem:[%s2144_s18] sm:$0xff] %vm1299_vm7, %v1351_v42 }
 0x509   :  { %1744 = dma.done.wait [#allocation4], 256  }
 0x50a   :  { %1745 = vsyncadd [#allocation4], 4294967040 }
 0x50b   :  { %1320 = vsyncpa [#allocation3], 1 }
 0x50c   :  { %1321 = vsyncpa [#allocation6], 1 }
 0x50d   :  { %1322 = vsyncpa [#allocation9], 1 }
 0x50e   :  { %1323 = vsyncpa [#allocation12], 1 }
 0x50f   :  { %1324 = vsyncpa [#allocation15], 1 }
 0x510   :  { %1325 = vsyncpa [#allocation18], 1 }
 0x511   :  { %1326 = vsyncpa [#allocation21], 1 }
 0x512   :  { %1327 = vsyncpa [#allocation4], 1 }

// kernel: _lambda_.3
= control target key start
LH: loop header
LB: loop body
LE: loop exit
PB: predicated region body
PF: predicated region fallthrough
CT: control target
= control target key end

     0   :  { %s2073_s0 = inlined_call_operand.hbm [shape: f32[8,256], index: 0, kind: input, shape index: {}]   ;;  %s2074_s1 = inlined_call_operand.vmem [shape: f32[8,1], index: 1, kind: input, shape index: {}]   ;;  %s2075_s2 = inlined_call_operand.hbm [shape: f32[256,32], index: 2, kind: input, shape index: {}]   ;;  %s2076_s3 = inlined_call_operand.hbm [shape: f32[1,32], index: 3, kind: input, shape index: {}]   ;;  %s2077_s4 = inlined_call_operand.hbm [shape: f32[32,32], index: 4, kind: input, shape index: {}]   ;;  %s2078_s5 = inlined_call_operand.hbm [shape: f32[1,32], index: 5, kind: input, shape index: {}]   ;;  %s2079_s6 = inlined_call_operand.hbm [shape: f32[32,32], index: 6, kind: input, shape index: {}]   ;;  %s2080_s7 = inlined_call_operand.vmem [shape: f32[1,32], index: 7, kind: input, shape index: {}]   ;;  %s2081_s8 = inlined_call_operand.hbm [shape: f32[32,32], index: 8, kind: input, shape index: {}]   ;;  %s2082_s9 = inlined_call_operand.vmem [shape: f32[1,32], index: 9, kind: input, shape index: {}]   ;;  %s2083_s10 = inlined_call_operand.hbm [shape: f32[32,32], index: 10, kind: input, shape index: {}]   ;;  %s2084_s11 = inlined_call_operand.vmem [shape: f32[1,32], index: 11, kind: input, shape index: {}]   ;;  %s2085_s12 = inlined_call_operand.hbm [shape: f32[32,1408], index: 12, kind: input, shape index: {}]   ;;  %s2086_s13 = inlined_call_operand.vmem [shape: f32[1,1408], index: 13, kind: input, shape index: {}]   ;;  %s2087_s14 = inlined_call_operand.hbm [shape: f32[256,128], index: 14, kind: input, shape index: {}]   ;;  %s2088_s15 = inlined_call_operand.hbm [shape: f32[256,256], index: 15, kind: input, shape index: {}]   ;;  %s2089_s16 = inlined_call_operand.hbm [shape: f32[128,256], index: 16, kind: input, shape index: {}]   ;;  %s2090_s17 = inlined_call_operand.vmem [shape: f32[8,256], index: 17, kind: output, shape index: {0}]   ;;  %s2091_s18 = inlined_call_operand.vmem [shape: f32[8,1], index: 18, kind: output, shape index: {1}]  }
   0x1   :  { %2092 = sst [smem:[#allocation28_spill]] %s2073_s0 }
   0x2   :  { %2093 = sst [smem:[#allocation29_spill]] %s2074_s1 }
   0x3   :  { %2094 = sst [smem:[#allocation30_spill]] %s2075_s2 }
   0x4   :  { %24 = vsyncpa [#allocation3], 0 }
   0x5   :  { %25 = vsyncpa [#allocation5], 0 }
   0x6   :  { %26 = vsyncpa [#allocation8], 0 }
   0x7   :  { %27 = vsyncpa [#allocation11], 0 }
   0x8   :  { %28 = vsyncpa [#allocation14], 0 }
   0x9   :  { %29 = vsyncpa [#allocation17], 0  ;;  %s2095_s29 = sld [smem:[#allocation30_spill]] }
   0xf   :  { %s48_s30 = sshll.u32 %s2095_s29, 4  ;;  %s49_s30 = int_to_ptr.hbm [resolvable:$true] %s48_s30 }
  0x10   :  { %30 = vsyncpa [#allocation20], 0  ;;  %s1697_s0 = smov [#allocation4]   ;;  %s72_s21 = sshll.u32 %s2077_s4, 4  ;;  %s73_s21 = int_to_ptr.hbm [resolvable:$true] %s72_s21 }
  0x11   :  { %s50_s19 = sshll.u32 %s1697_s0, 4  ;;  %s1698_s22 = smov 128   ;;  %s51_s19 = int_to_ptr.vmem [resolvable:$true] %s50_s19 }
  0x12   :  { %s1699_s2 = smov 8   ;;  %s1700_s23 = smov [#allocation7]  }
  0x13   :  { %56 = dma.hbm_to_vmem [thread:$0]  %s49_s30, 4096, %s51_s19, [#allocation5], %s1698_s22, %s1698_s22, %s1699_s2  }
  0x14   :  { %s74_s24 = sshll.u32 %s1700_s23, 4  ;;  %s96_s27 = sshll.u32 %s2079_s6, 4  ;;  %s75_s24 = int_to_ptr.vmem [resolvable:$true] %s74_s24  ;;  %s97_s27 = int_to_ptr.hbm [resolvable:$true] %s96_s27 }
  0x15   :  { %80 = dma.hbm_to_vmem [thread:$0]  %s73_s21, 512, %s75_s24, [#allocation8], %s1698_s22, %s1698_s22, %s1699_s2  }
  0x16   :  { %s126_s29 = sshll.u32 %s2083_s10, 4  ;;  %s1701_s0 = smov [#allocation10]   ;;  %s127_s29 = int_to_ptr.hbm [resolvable:$true] %s126_s29 }
  0x17   :  { %s98_s1 = sshll.u32 %s1701_s0, 4  ;;  %s1702_s30 = smov [#allocation13]   ;;  %s99_s1 = int_to_ptr.vmem [resolvable:$true] %s98_s1 }
  0x18   :  { %104 = dma.hbm_to_vmem [thread:$0]  %s97_s27, 512, %s99_s1, [#allocation11], %s1698_s22, %s1698_s22, %s1699_s2  }
  0x19   :  { %s128_s6 = sshll.u32 %s1702_s30, 4  ;;  %s156_s23 = sshll.u32 %s2087_s14, 4  ;;  %s129_s6 = int_to_ptr.vmem [resolvable:$true] %s128_s6  ;;  %s157_s23 = int_to_ptr.hbm [resolvable:$true] %s156_s23 }
  0x1a   :  { %134 = dma.hbm_to_vmem [thread:$0]  %s127_s29, 512, %s129_s6, [#allocation14], %s1698_s22, %s1698_s22, %s1699_s2  }
  0x1b   :  { %s2096_s24 = sld [smem:[#allocation28_spill]]  ;;  %s1703_s26 = smov [#allocation16]  }
  0x1c   :  { %s158_s4 = sshll.u32 %s1703_s26, 4  ;;  %s1704_s27 = smov [#allocation2]   ;;  %s159_s4 = int_to_ptr.vmem [resolvable:$true] %s158_s4 }
  0x1d   :  { %164 = dma.hbm_to_vmem [thread:$0]  %s157_s23, 4096, %s159_s4, [#allocation17], %s1698_s22, %s1698_s22, %s1699_s2  }
  0x1e   :  { %s38_s14 = sshll.u32 %s1704_s27, 4  ;;  %s62_s1 = sshll.u32 %s2076_s3, 4  ;;  %s39_s14 = int_to_ptr.vmem [resolvable:$true] %s38_s14  ;;  %s63_s1 = int_to_ptr.hbm [resolvable:$true] %s62_s1 }
  0x1f   :  { %s86_s6 = sshll.u32 %s2078_s5, 4  ;;  %s1705_s19 = smov [#allocation6]   ;;  %s87_s6 = int_to_ptr.hbm [resolvable:$true] %s86_s6 }
  0x20   :  { %s64_s20 = sshll.u32 %s1705_s19, 4  ;;  %s1706_s10 = smov [#allocation9]   ;;  %s65_s20 = int_to_ptr.vmem [resolvable:$true] %s64_s20 }
  0x21   :  { %s36_s25 = sshll.u32 %s2096_s24, 4  ;;  %s88_s23 = sshll.u32 %s1706_s10, 4  ;;  %s37_s25 = int_to_ptr.hbm [resolvable:$true] %s36_s25  ;;  %s89_s23 = int_to_ptr.vmem [resolvable:$true] %s88_s23 }
  0x22   :  { %41 = dma.hbm_to_vmem [thread:$0]  %s37_s25, 256, %s39_s14, [#allocation3]  }
  0x23   :  { %67 = dma.hbm_to_vmem [thread:$0]  %s63_s1, 16, %s65_s20, [#allocation5]  }
  0x24   :  { %s111_s26 = sshll.u32 %s2081_s8, 4  ;;  %s141_s4 = sshll.u32 %s2085_s12, 4  ;;  %s112_s26 = int_to_ptr.hbm [resolvable:$true] %s111_s26  ;;  %s142_s4 = int_to_ptr.hbm [resolvable:$true] %s141_s4 }
  0x25   :  { %91 = dma.hbm_to_vmem [thread:$0]  %s87_s6, 16, %s89_s23, [#allocation8]  }
  0x26   :  { %s1707_s27 = smov [#allocation12]   ;;  %s1708_s14 = smov [#allocation15]  }
  0x27   :  { %s113_s5 = sshll.u32 %s1707_s27, 4  ;;  %s143_s28 = sshll.u32 %s1708_s14, 4  ;;  %s114_s5 = int_to_ptr.vmem [resolvable:$true] %s113_s5  ;;  %s144_s28 = int_to_ptr.vmem [resolvable:$true] %s143_s28 }
  0x28   :  { %119 = dma.hbm_to_vmem [thread:$0]  %s112_s26, 512, %s114_s5, [#allocation11], %s1698_s22, %s1698_s22, %s1699_s2  }
  0x29   :  { %s1709_s0 = smov 1408   ;;  %s1710_s8 = smov 88  }
  0x2a   :  { %149 = dma.hbm_to_vmem [thread:$0]  %s142_s4, 5632, %s144_s28, [#allocation14], %s1709_s0, %s1709_s0, %s1710_s8  }
  0x2b   :  { %s169_s30 = sshll.u32 %s2088_s15, 4  ;;  %s1711_s12 = smov [#allocation18]   ;;  %s170_s30 = int_to_ptr.hbm [resolvable:$true] %s169_s30 }
  0x2c   :  { %s171_s6 = sshll.u32 %s1711_s12, 4  ;;  %s182_s10 = sshll.u32 %s2089_s16, 4  ;;  %s172_s6 = int_to_ptr.vmem [resolvable:$true] %s171_s6  ;;  %s183_s10 = int_to_ptr.hbm [resolvable:$true] %s182_s10 }
  0x2d   :  { %s1712_s23 = smov 256   ;;  %s1713_s22 = smov 16  }
  0x2e   :  { %177 = dma.hbm_to_vmem [thread:$0]  %s170_s30, 8192, %s172_s6, [#allocation17], %s1712_s23, %s1712_s23, %s1713_s22  }
  0x2f   :  { %s1714_s2 = smov [#allocation19]  }
  0x30   :  { %s184_s21 = sshll.u32 %s1714_s2, 4  ;;  %s185_s21 = int_to_ptr.vmem [resolvable:$true] %s184_s21 }
  0x31   :  { %190 = dma.hbm_to_vmem [thread:$0]  %s183_s10, 4096, %s185_s21, [#allocation20], %s1712_s23, %s1712_s23, %s1713_s22  }
  0x32   :  { %1683 = dma.done.wait [#allocation3], 256  }
  0x33   :  { %1684 = vsyncadd [#allocation3], 4294967040 }
  0x34   :  { %1685 = dma.done.wait [#allocation5], 4112  }
  0x35   :  { %1686 = vsyncadd [#allocation5], 4294963184 }
  0x36   :  { %1687 = dma.done.wait [#allocation8], 528  }
  0x37   :  { %1688 = vsyncadd [#allocation8], 4294966768 }
  0x38   :  { %1689 = dma.done.wait [#allocation11], 1024  }
  0x39   :  { %1690 = vsyncadd [#allocation11], 4294966272 }
  0x3a   :  { %1691 = dma.done.wait [#allocation14], 6144  }
  0x3b   :  { %1692 = vsyncadd [#allocation14], 4294961152 }
  0x3c   :  { %1693 = dma.done.wait [#allocation17], 12288  }
  0x3d   :  { %1694 = vsyncadd [#allocation17], 4294955008 }
  0x3e   :  { %1695 = dma.done.wait [#allocation20], 4096  }
  0x3f   :  { %1696 = vsyncadd [#allocation20], 4294963200  ;;  %v256_v0 = vld [vmem:[#allocation4 + $0x78] sm:$0xff]  ;;  %v255_v1 = vld [vmem:[#allocation4 + $0x70] sm:$0xff]  ;;  %vm326_vm0 = vcmask 261120   ;;  %s2097_s5 = sld [smem:[#allocation29_spill]] }
  0x40   :  { %v272_v2 = vld [vmem:[#allocation4 + $0xf8] sm:$0xff]  ;;  %277 = vmatpush.msra.mxu0 %v256_v0  ;;  %v271_v3 = vld [vmem:[#allocation4 + $0xf0] sm:$0xff]  ;;  %v254_v4 = vld [vmem:[#allocation4 + $0x68] sm:$0xff] }
  0x41   :  { %297 = vmatpush.msra.mxu1 %v272_v2  ;;  %v270_v5 = vld [vmem:[#allocation4 + $0xe8] sm:$0xff]  ;;  %v253_v6 = vld [vmem:[#allocation4 + $0x60] sm:$0xff]  ;;  %v252_v8 = vld [vmem:[#allocation4 + $0x58] sm:$0xff] }
  0x42   :  { %278 = vmatpush.msra.mxu0 %v255_v1  ;;  %v269_v7 = vld [vmem:[#allocation4 + $0xe0] sm:$0xff]  ;;  %v268_v9 = vld [vmem:[#allocation4 + $0xd8] sm:$0xff]  ;;  %v251_v10 = vld [vmem:[#allocation4 + $0x50] sm:$0xff] }
  0x43   :  { %298 = vmatpush.msra.mxu1 %v271_v3  ;;  %v267_v11 = vld [vmem:[#allocation4 + $0xd0] sm:$0xff]  ;;  %v250_v12 = vld [vmem:[#allocation4 + $0x48] sm:$0xff]  ;;  %v249_v14 = vld [vmem:[#allocation4 + $0x40] sm:$0xff] }
  0x44   :  { %279 = vmatpush.msra.mxu0 %v254_v4  ;;  %v266_v13 = vld [vmem:[#allocation4 + $0xc8] sm:$0xff]  ;;  %v265_v15 = vld [vmem:[#allocation4 + $0xc0] sm:$0xff]  ;;  %v248_v16 = vld [vmem:[#allocation4 + $0x38] sm:$0xff] }
  0x45   :  { %299 = vmatpush.msra.mxu1 %v270_v5  ;;  %v264_v17 = vld [vmem:[#allocation4 + $0xb8] sm:$0xff]  ;;  %v247_v18 = vld [vmem:[#allocation4 + $0x30] sm:$0xff]  ;;  %v246_v20 = vld [vmem:[#allocation4 + $0x28] sm:$0xff] }
  0x46   :  { %280 = vmatpush.msra.mxu0 %v253_v6  ;;  %v263_v19 = vld [vmem:[#allocation4 + $0xb0] sm:$0xff]  ;;  %v262_v21 = vld [vmem:[#allocation4 + $0xa8] sm:$0xff]  ;;  %v245_v22 = vld [vmem:[#allocation4 + $0x20] sm:$0xff] }
  0x47   :  { %300 = vmatpush.msra.mxu1 %v269_v7  ;;  %v261_v23 = vld [vmem:[#allocation4 + $0xa0] sm:$0xff]  ;;  %v244_v24 = vld [vmem:[#allocation4 + $0x18] sm:$0xff]  ;;  %v243_v26 = vld [vmem:[#allocation4 + $0x10] sm:$0xff] }
  0x48   :  { %281 = vmatpush.msra.mxu0 %v252_v8  ;;  %v260_v25 = vld [vmem:[#allocation4 + $0x98] sm:$0xff]  ;;  %v259_v27 = vld [vmem:[#allocation4 + $0x90] sm:$0xff]  ;;  %v242_v28 = vld [vmem:[#allocation4 + $0x8] sm:$0xff] }
  0x49   :  { %301 = vmatpush.msra.mxu1 %v268_v9  ;;  %v258_v29 = vld [vmem:[#allocation4 + $0x88] sm:$0xff]  ;;  %v241_v30 = vld [vmem:[#allocation4] sm:$0xff]  ;;  %v1866_v32 = vld [vmem:[#allocation2] sm:$0xff] }
  0x4a   :  { %282 = vmatpush.msra.mxu0 %v251_v10  ;;  %v257_v31 = vld [vmem:[#allocation4 + $0x80] sm:$0xff]  ;;  %v1868_v33 = vld [vmem:[#allocation2 + $0x8] sm:$0xff]  ;;  %v319_v36 = vld [vmem:[#allocation7 + $0x8] sm:$0xff] }
  0x4b   :  { %302 = vmatpush.msra.mxu1 %v267_v11  ;;  %v321_v34 = vld [vmem:[#allocation7 + $0x18] sm:$0xff]  ;;  %v320_v35 = vld [vmem:[#allocation7 + $0x10] sm:$0xff]  ;;  %v318_v37 = vld [vmem:[#allocation7] sm:$0xff] }
  0x4c   :  { %283 = vmatpush.msra.mxu0 %v250_v12  ;;  %342 = vmatpush.msra.mxu2 %v321_v34  ;;  %v354_v38 = vld [vmem:[#allocation10 + $0x18] sm:$0xff]  ;;  %v353_v45 = vld [vmem:[#allocation10 + $0x10] sm:$0xff]  ;;  %v352_v46 = vld [vmem:[#allocation10 + $0x8] sm:$0xff] }
  0x4d   :  { %303 = vmatpush.msra.mxu1 %v266_v13  ;;  %374 = vmatpush.msra.mxu3 %v354_v38  ;;  %v1350_v39 = vld [vmem:[#allocation6] ss:$0 sm:$0xff]  ;;  %v351_v47 = vld [vmem:[#allocation10] sm:$0xff]  ;;  %v1351_v49 = vld [vmem:[#allocation9] ss:$0 sm:$0xff] }
  0x4e   :  { %284 = vmatpush.msra.mxu0 %v249_v14  ;;  %343 = vmatpush.msra.mxu2 %v320_v35  ;;  %v387_v48 = vld [vmem:[#allocation12 + $0x18] sm:$0xff]  ;;  %v386_v53 = vld [vmem:[#allocation12 + $0x10] sm:$0xff]  ;;  %v385_v54 = vld [vmem:[#allocation12 + $0x8] sm:$0xff] }
  0x4f   :  { %304 = vmatpush.msra.mxu1 %v265_v15  ;;  %375 = vmatpush.msra.mxu3 %v353_v45  ;;  %v384_v55 = vld [vmem:[#allocation12] sm:$0xff]  ;;  %v419_v56 = vld [vmem:[#allocation13 + $0x18] sm:$0xff]  ;;  %v418_v57 = vld [vmem:[#allocation13 + $0x10] sm:$0xff] }
  0x50   :  { %285 = vmatpush.msra.mxu0 %v248_v16  ;;  %344 = vmatpush.msra.mxu2 %v319_v36  ;;  %v1352_v58 = vld [vmem:[%s2080_s7] ss:$0 sm:$0xff]  ;;  %v416_v0 = vld [vmem:[#allocation13] sm:$0xff]  ;;  %v482_v2 = vld [vmem:[#allocation15 + $0x110] sm:$0xff] }
  0x51   :  { %305 = vmatpush.msra.mxu1 %v264_v17  ;;  %376 = vmatpush.msra.mxu3 %v352_v46  ;;  %v417_v63 = vld [vmem:[#allocation13 + $0x8] sm:$0xff]  ;;  %v486_v4 = vld [vmem:[#allocation15 + $0x130] sm:$0xff]  ;;  %v471_v6 = vld [vmem:[#allocation15 + $0xb8] sm:$0xff] }
  0x52   :  { %286 = vmatpush.msra.mxu0 %v247_v18  ;;  %345 = vmatpush.msra.mxu2 %v318_v37  ;;  %v481_v1 = vld [vmem:[#allocation15 + $0x108] sm:$0xff]  ;;  %v470_v5 = vld [vmem:[#allocation15 + $0xb0] sm:$0xff]  ;;  %v475_v12 = vld [vmem:[#allocation15 + $0xd8] sm:$0xff] }
  0x53   :  { %306 = vmatpush.msra.mxu1 %v263_v19  ;;  %377 = vmatpush.msra.mxu3 %v351_v47  ;;  %v485_v3 = vld [vmem:[#allocation15 + $0x128] sm:$0xff]  ;;  %v474_v11 = vld [vmem:[#allocation15 + $0xd0] sm:$0xff]  ;;  %v460_v13 = vld [vmem:[#allocation15 + $0x60] sm:$0xff] }
  0x54   :  { %287 = vmatpush.msra.mxu0 %v246_v20  ;;  %407 = vmatpush.msrb.mxu2 %v387_v48  ;;  %v1353_v7 = vld [vmem:[%s2082_s9] ss:$0 sm:$0xff]  ;;  %v459_v14 = vld [vmem:[#allocation15 + $0x58] sm:$0xff]  ;;  %v464_v16 = vld [vmem:[#allocation15 + $0x80] sm:$0xff] }
  0x55   :  { %307 = vmatpush.msra.mxu1 %v262_v21  ;;  %439 = vmatpush.msrb.mxu3 %v419_v56  ;;  %v463_v15 = vld [vmem:[#allocation15 + $0x78] sm:$0xff]  ;;  %v449_v17 = vld [vmem:[#allocation15 + $0x8] sm:$0xff]  ;;  %v448_v18 = vld [vmem:[#allocation15] sm:$0xff] }
  0x56   :  { %288 = vmatpush.msra.mxu0 %v245_v22  ;;  %408 = vmatpush.msrb.mxu2 %v386_v53  ;;  %v484_v19 = vld [vmem:[#allocation15 + $0x120] sm:$0xff]  ;;  %v453_v21 = vld [vmem:[#allocation15 + $0x28] sm:$0xff]  ;;  %v483_v22 = vld [vmem:[#allocation15 + $0x118] sm:$0xff] }
  0x57   :  { %308 = vmatpush.msra.mxu1 %v261_v23  ;;  %440 = vmatpush.msrb.mxu3 %v418_v57  ;;  %v452_v20 = vld [vmem:[#allocation15 + $0x20] sm:$0xff]  ;;  %v473_v23 = vld [vmem:[#allocation15 + $0xc8] sm:$0xff]  ;;  %v467_v34 = vld [vmem:[#allocation15 + $0x98] sm:$0xff] }
  0x58   :  { %289 = vmatpush.msra.mxu0 %v244_v24  ;;  %409 = vmatpush.msrb.mxu2 %v385_v54  ;;  %v489_v24 = vld [vmem:[#allocation15 + $0x148] sm:$0xff]  ;;  %v468_v35 = vld [vmem:[#allocation15 + $0xa0] sm:$0xff]  ;;  %v450_v36 = vld [vmem:[#allocation15 + $0x10] sm:$0xff] }
  0x59   :  { %309 = vmatpush.msra.mxu1 %v260_v25  ;;  %441 = vmatpush.msrb.mxu3 %v417_v63  ;;  %v490_v25 = vld [vmem:[#allocation15 + $0x150] sm:$0xff]  ;;  %v456_v37 = vld [vmem:[#allocation15 + $0x40] sm:$0xff]  ;;  %v457_v38 = vld [vmem:[#allocation15 + $0x48] sm:$0xff] }
  0x5a   :  { %290 = vmatpush.msra.mxu0 %v243_v26  ;;  %410 = vmatpush.msrb.mxu2 %v384_v55  ;;  %v472_v26 = vld [vmem:[#allocation15 + $0xc0] sm:$0xff]  ;;  %v772_v45 = vld [vmem:[#allocation16 + $0xf8] sm:$0xff]  ;;  %v477_v46 = vld [vmem:[#allocation15 + $0xe8] sm:$0xff] }
  0x5b   :  { %310 = vmatpush.msra.mxu1 %v259_v27  ;;  %442 = vmatpush.msrb.mxu3 %v416_v0  ;;  %v462_v27 = vld [vmem:[#allocation15 + $0x70] sm:$0xff]  ;;  %v476_v47 = vld [vmem:[#allocation15 + $0xe0] sm:$0xff]  ;;  %v756_v54 = vld [vmem:[#allocation16 + $0x78] sm:$0xff] }
  0x5c   :  { %291 = vmatpush.msra.mxu0 %v242_v28  ;;  %v478_v28 = vld [vmem:[#allocation15 + $0xf0] sm:$0xff]  ;;  %v491_v55 = vld [vmem:[#allocation15 + $0x158] sm:$0xff]  ;;  %v769_v56 = vld [vmem:[#allocation16 + $0xe0] sm:$0xff] }
  0x5d   :  { %311 = vmatpush.msra.mxu1 %v258_v29  ;;  %v479_v29 = vld [vmem:[#allocation15 + $0xf8] sm:$0xff]  ;;  %v771_v48 = vld [vmem:[#allocation16 + $0xf0] sm:$0xff] }
  0x5e   :  { %292 = vmatpush.msra.mxu0 %v241_v30  ;;  %v461_v30 = vld [vmem:[#allocation15 + $0x68] sm:$0xff]  ;;  %v454_v53 = vld [vmem:[#allocation15 + $0x30] sm:$0xff] }
  0x5f   :  { %312 = vmatpush.msra.mxu1 %v257_v31  ;;  %293 = vmatmul.f32.vlgmr.msra.gmra.mxu0 %v1866_v32  ;;  %v451_v31 = vld [vmem:[#allocation15 + $0x18] sm:$0xff]  ;;  %v755_v57 = vld [vmem:[#allocation16 + $0x70] sm:$0xff] }
  0x60   :  { %313 = vmatmul.f32.vlgmr.msra.gmra.mxu1 %v1868_v33  ;;  %613 = vmatpush.msrb.mxu0 %v485_v3  ;;  %v458_v63 = vld [vmem:[#allocation15 + $0x50] sm:$0xff] }
  0x61   :  { %633 = vmatpush.msrb.mxu1 %v486_v4  ;;  %v767_v0 = vld [vmem:[#allocation16 + $0xd0] sm:$0xff]  ;;  %v765_v4 = vld [vmem:[#allocation16 + $0xc0] sm:$0xff] }
  0x62   :  { %614 = vmatpush.msrb.mxu0 %v474_v11  ;;  %v751_v3 = vld [vmem:[#allocation16 + $0x50] sm:$0xff] }
  0x63   :  { %634 = vmatpush.msrb.mxu1 %v475_v12  ;;  %v747_v11 = vld [vmem:[#allocation16 + $0x30] sm:$0xff]  ;;  %v761_v12 = vld [vmem:[#allocation16 + $0xa0] sm:$0xff] }
  0x64   :  { %615 = vmatpush.msrb.mxu0 %v463_v15  ;;  %v745_v15 = vld [vmem:[#allocation16 + $0x20] sm:$0xff] }
  0x65   :  { %635 = vmatpush.msrb.mxu1 %v464_v16  ;;  %v759_v16 = vld [vmem:[#allocation16 + $0x90] sm:$0xff] }
  0x66   :  { %616 = vmatpush.msrb.mxu0 %v452_v20  ;;  %v757_v20 = vld [vmem:[#allocation16 + $0x80] sm:$0xff] }
  0x67   :  { %636 = vmatpush.msrb.mxu1 %v453_v21  ;;  %v742_v21 = vld [vmem:[#allocation16 + $0x8] sm:$0xff] }
  0x68   :  { %693 = vmatpush.msra.mxu0 %v489_v24 }
  0x69   :  { %713 = vmatpush.msra.mxu1 %v490_v25 }
  0x6a   :  { %694 = vmatpush.msra.mxu0 %v478_v28 }
  0x6b   :  { %714 = vmatpush.msra.mxu1 %v479_v29 }
  0x6c   :  { %695 = vmatpush.msra.mxu0 %v467_v34 }
  0x6d   :  { %715 = vmatpush.msra.mxu1 %v468_v35 }
  0x6e   :  { %696 = vmatpush.msra.mxu0 %v456_v37 }
  0x6f   :  { %716 = vmatpush.msra.mxu1 %v457_v38 }
  0xdc   :  { %v294_v40 = vpop.f32.mrf.mxu0 }
  0xdd   :  { %v314_v41 = vpop.f32.mrf.mxu1  ;;  %v295_v42 = vadd.f32 %v1350_v39, %v294_v40  ;;  %v1354_v39 = vld [vmem:[%s2084_s11] ss:$0 sm:$0xff] }
  0xdf   :  { %v315_v43 = vadd.f32 %v314_v41, %v295_v42 }
  0xe1   :  { %v317_v44 = vmax.f32 %v315_v43, 0.0 }
  0xe3   :  { %1307 = vmatmul.msk.f32.vlgmr.msra.gmra.mxu2 %vm326_vm0, %v317_v44  ;;  %v487_v44 = vld [vmem:[#allocation15 + $0x138] sm:$0xff] }
  0xe4   :  { %533 = vmatpush.msra.mxu2 %v481_v1  ;;  %v752_v1 = vld [vmem:[#allocation16 + $0x58] sm:$0xff] }
  0xe6   :  { %534 = vmatpush.msra.mxu2 %v470_v5  ;;  %v750_v5 = vld [vmem:[#allocation16 + $0x48] sm:$0xff] }
  0xe8   :  { %535 = vmatpush.msra.mxu2 %v459_v14  ;;  %v760_v14 = vld [vmem:[#allocation16 + $0x98] sm:$0xff] }
  0xea   :  { %536 = vmatpush.msra.mxu2 %v448_v18  ;;  %v758_v18 = vld [vmem:[#allocation16 + $0x88] sm:$0xff] }
 0x166   :  { %v347_v50 = vpop.f32.mrf.mxu2 }
 0x167   :  { %v348_v51 = vadd.f32 %v1351_v49, %v347_v50  ;;  %v466_v49 = vld [vmem:[#allocation15 + $0x90] sm:$0xff]  ;;  %v465_v50 = vld [vmem:[#allocation15 + $0x88] sm:$0xff] }
 0x169   :  { %v350_v52 = vmax.f32 %v348_v51, 0.0  ;;  %v770_v51 = vld [vmem:[#allocation16 + $0xe8] sm:$0xff] }
 0x16b   :  { %1308 = vmatmul.msk.f32.vlgmr.msra.gmra.mxu3 %vm326_vm0, %v350_v52  ;;  %v455_v52 = vld [vmem:[#allocation15 + $0x38] sm:$0xff] }
 0x16c   :  { %553 = vmatpush.msra.mxu3 %v482_v2  ;;  %v766_v2 = vld [vmem:[#allocation16 + $0xc8] sm:$0xff] }
 0x16e   :  { %554 = vmatpush.msra.mxu3 %v471_v6  ;;  %v764_v6 = vld [vmem:[#allocation16 + $0xb8] sm:$0xff] }
 0x170   :  { %555 = vmatpush.msra.mxu3 %v460_v13  ;;  %v746_v13 = vld [vmem:[#allocation16 + $0x28] sm:$0xff] }
 0x172   :  { %556 = vmatpush.msra.mxu3 %v449_v17  ;;  %v744_v17 = vld [vmem:[#allocation16 + $0x18] sm:$0xff] }
 0x1ee   :  { %v379_v59 = vpop.f32.mrf.mxu3 }
 0x1ef   :  { %v380_v60 = vadd.f32 %v1352_v58, %v379_v59  ;;  %v480_v58 = vld [vmem:[#allocation15 + $0x100] sm:$0xff]  ;;  %v768_v59 = vld [vmem:[#allocation16 + $0xd8] sm:$0xff] }
 0x1f1   :  { %v1877_v61 = vadd.f32 %v380_v60, %v315_v43  ;;  %v488_v43 = vld [vmem:[#allocation15 + $0x140] sm:$0xff]  ;;  %v754_v60 = vld [vmem:[#allocation16 + $0x68] sm:$0xff] }
 0x1f3   :  { %v383_v62 = vmax.f32 %v1877_v61, 0.0 }
 0x1f5   :  { %1309 = vmatmul.msk.f32.vlgmr.msrb.gmra.mxu2 %vm326_vm0, %v383_v62  ;;  %v753_v62 = vld [vmem:[#allocation16 + $0x60] sm:$0xff] }
 0x1f6   :  { %573 = vmatpush.msrb.mxu2 %v483_v22  ;;  %v741_v22 = vld [vmem:[#allocation16] sm:$0xff] }
 0x1f8   :  { %574 = vmatpush.msrb.mxu2 %v472_v26 }
 0x1fa   :  { %575 = vmatpush.msrb.mxu2 %v461_v30 }
 0x1fc   :  { %576 = vmatpush.msrb.mxu2 %v450_v36 }
 0x278   :  { %v412_v8 = vpop.f32.mrf.mxu2 }
 0x279   :  { %v413_v9 = vadd.f32 %v1353_v7, %v412_v8  ;;  %v749_v7 = vld [vmem:[#allocation16 + $0x40] sm:$0xff]  ;;  %v763_v8 = vld [vmem:[#allocation16 + $0xb0] sm:$0xff] }
 0x27b   :  { %v415_v10 = vmax.f32 %v413_v9, 0.0  ;;  %v748_v9 = vld [vmem:[#allocation16 + $0x38] sm:$0xff] }
 0x27d   :  { %1310 = vmatmul.msk.f32.vlgmr.msrb.gmra.mxu3 %vm326_vm0, %v415_v10  ;;  %v762_v10 = vld [vmem:[#allocation16 + $0xa8] sm:$0xff] }
 0x27e   :  { %593 = vmatpush.msrb.mxu3 %v484_v19  ;;  %v743_v19 = vld [vmem:[#allocation16 + $0x10] sm:$0xff] }
 0x280   :  { %594 = vmatpush.msrb.mxu3 %v473_v23  ;;  %v492_v23 = vld [vmem:[%s2086_s13] sm:$0xff] }
 0x281   :  { %v496_v26 = vperm.slane %v492_v23, 0  ;;  %v498_v30 = vperm.slane %v492_v23, 2  ;;  %v500_v34 = vperm.slane %v492_v23, 4  ;;  %v501_v35 = vperm.slane %v492_v23, 5 }
 0x282   :  { %595 = vmatpush.msrb.mxu3 %v462_v27  ;;  %v497_v27 = vperm.slane %v492_v23, 1 }
 0x284   :  { %596 = vmatpush.msrb.mxu3 %v451_v31  ;;  %v499_v31 = vperm.slane %v492_v23, 3 }
 0x300   :  { %v444_v40 = vpop.f32.mrf.mxu3 }
 0x301   :  { %v445_v41 = vadd.f32 %v1354_v39, %v444_v40 }
 0x303   :  { %v1889_v42 = vadd.f32 %v445_v41, %v1877_v61  ;;  %v469_v61 = vld [vmem:[#allocation15 + $0xa8] sm:$0xff] }
 0x305   :  { %1311 = vmatmul.msk.f32.vlgmr.msra.gmra.mxu2 %vm326_vm0, %v1889_v42  ;;  %1312 = vmatmul.msk.f32.vlgmr.msra.gmra.mxu3 %vm326_vm0, %v1889_v42 }
 0x306   :  { %1315 = vmatmul.msk.f32.vlgmr.msrb.gmra.mxu0 %vm326_vm0, %v1889_v42  ;;  %1316 = vmatmul.msk.f32.vlgmr.msrb.gmra.mxu1 %vm326_vm0, %v1889_v42 }
 0x307   :  { %673 = vmatpush.msra.mxu3 %v488_v43  ;;  %653 = vmatpush.msra.mxu2 %v487_v44 }
 0x308   :  { %793 = vmatpush.msrb.mxu0 %v772_v45  ;;  %v502_v45 = vperm.slane %v492_v23, 6 }
 0x309   :  { %674 = vmatpush.msra.mxu3 %v477_v46  ;;  %654 = vmatpush.msra.mxu2 %v476_v47 }
 0x30a   :  { %794 = vmatpush.msrb.mxu0 %v771_v48 }
 0x30b   :  { %675 = vmatpush.msra.mxu3 %v466_v49  ;;  %655 = vmatpush.msra.mxu2 %v465_v50  ;;  %v503_v49 = vperm.slane %v492_v23, 7 }
 0x30c   :  { %795 = vmatpush.msrb.mxu0 %v770_v51 }
 0x30d   :  { %1313 = vmatmul.msk.f32.vlgmr.msrb.gmra.mxu2 %vm326_vm0, %v1889_v42  ;;  %1314 = vmatmul.msk.f32.vlgmr.msrb.gmra.mxu3 %vm326_vm0, %v1889_v42 }
 0x30e   :  { %1319 = vmatmul.msk.f32.vlgmr.msra.gmra.mxu0 %vm326_vm0, %v1889_v42  ;;  %1320 = vmatmul.msk.f32.vlgmr.msra.gmra.mxu1 %vm326_vm0, %v1889_v42 }
 0x30f   :  { %676 = vmatpush.msra.mxu3 %v455_v52  ;;  %656 = vmatpush.msra.mxu2 %v454_v53 }
 0x310   :  { %796 = vmatpush.msrb.mxu0 %v769_v56 }
 0x311   :  { %773 = vmatpush.msrb.mxu3 %v756_v54  ;;  %733 = vmatpush.msrb.mxu2 %v491_v55 }
 0x312   :  { %797 = vmatpush.msrb.mxu0 %v768_v59 }
 0x313   :  { %774 = vmatpush.msrb.mxu3 %v755_v57  ;;  %734 = vmatpush.msrb.mxu2 %v480_v58 }
 0x314   :  { %798 = vmatpush.msrb.mxu0 %v767_v0 }
 0x315   :  { %775 = vmatpush.msrb.mxu3 %v754_v60  ;;  %735 = vmatpush.msrb.mxu2 %v469_v61 }
 0x316   :  { %1317 = vmatmul.msk.f32.vlgmr.msra.gmra.mxu2 %vm326_vm0, %v1889_v42  ;;  %1318 = vmatmul.msk.f32.vlgmr.msra.gmra.mxu3 %vm326_vm0, %v1889_v42 }
 0x317   :  { %776 = vmatpush.msrb.mxu3 %v753_v62  ;;  %736 = vmatpush.msrb.mxu2 %v458_v63  ;;  %v493_v62 = vld [vmem:[%s2086_s13 + $0x8] sm:$0x7] }
 0x318   :  { %799 = vmatpush.msrb.mxu0 %v766_v2 }
 0x319   :  { %777 = vmatpush.msrb.mxu3 %v752_v1 }
 0x31a   :  { %800 = vmatpush.msrb.mxu0 %v765_v4 }
 0x31b   :  { %778 = vmatpush.msrb.mxu3 %v751_v3 }
 0x31c   :  { %801 = vmatpush.msrb.mxu0 %v764_v6  ;;  %v504_v6 = vperm.slane %v493_v62, 0 }
 0x31d   :  { %779 = vmatpush.msrb.mxu3 %v750_v5 }
 0x31e   :  { %1321 = vmatmul.msk.f32.vlgmr.msrb.gmra.mxu2 %vm326_vm0, %v1889_v42  ;;  %802 = vmatpush.msrb.mxu0 %v763_v8 }
 0x31f   :  { %780 = vmatpush.msrb.mxu3 %v749_v7 }
 0x320   :  { %803 = vmatpush.msrb.mxu0 %v762_v10 }
 0x321   :  { %781 = vmatpush.msrb.mxu3 %v748_v9 }
 0x322   :  { %804 = vmatpush.msrb.mxu0 %v761_v12 }
 0x323   :  { %782 = vmatpush.msrb.mxu3 %v747_v11  ;;  %v505_v11 = vperm.slane %v493_v62, 1 }
 0x324   :  { %805 = vmatpush.msrb.mxu0 %v760_v14 }
 0x325   :  { %783 = vmatpush.msrb.mxu3 %v746_v13 }
 0x326   :  { %806 = vmatpush.msrb.mxu0 %v759_v16  ;;  %v1162_v16 = vld [vmem:[#allocation19 + $0xf0] sm:$0xff] }
 0x327   :  { %784 = vmatpush.msrb.mxu3 %v745_v15  ;;  %1164 = vmatpush.msrb.mxu1 %v1162_v16  ;;  %v1145_v16 = vld [vmem:[#allocation19 + $0x68] sm:$0xff] }
 0x328   :  { %807 = vmatpush.msrb.mxu0 %v758_v18  ;;  %v1160_v18 = vld [vmem:[#allocation19 + $0xe0] sm:$0xff] }
 0x329   :  { %785 = vmatpush.msrb.mxu3 %v744_v17  ;;  %v1163_v17 = vld [vmem:[#allocation19 + $0xf8] sm:$0xff]  ;;  %1165 = vmatpush.msrb.mxu1 %v1160_v18 }
 0x32a   :  { %808 = vmatpush.msrb.mxu0 %v757_v20  ;;  %1184 = vmatpush.msra.mxu2 %v1163_v17  ;;  %v1124_v17 = vld [vmem:[#allocation18 + $0x1c0] sm:$0xff] }
 0x32b   :  { %786 = vmatpush.msrb.mxu3 %v743_v19  ;;  %809 = vmatmul.f32.vlgmr.msrb.gmra.mxu0 %v1868_v33 }
 0x32d   :  { %787 = vmatpush.msrb.mxu3 %v742_v21  ;;  %v1161_v21 = vld [vmem:[#allocation19 + $0xe8] sm:$0xff] }
 0x32e   :  { %1185 = vmatpush.msra.mxu2 %v1161_v21  ;;  %v1086_v21 = vld [vmem:[#allocation18 + $0x90] sm:$0xff] }
 0x32f   :  { %788 = vmatpush.msrb.mxu3 %v741_v22 }
 0x330   :  { %789 = vmatmul.f32.vlgmr.msrb.gmra.mxu3 %v1866_v32 }
 0x383   :  { %v618_v33 = vpop.f32.mrf.mxu0  ;;  %v638_v38 = vpop.f32.mrf.mxu1 }
 0x384   :  { %v619_v42 = vadd.f32 %v618_v33, %v500_v34  ;;  %v639_v43 = vadd.f32 %v638_v38, %v501_v35  ;;  %v1157_v34 = vld [vmem:[#allocation19 + $0xc8] sm:$0xff]  ;;  %v1154_v33 = vld [vmem:[#allocation19 + $0xb0] sm:$0xff]  ;;  %v1155_v38 = vld [vmem:[#allocation19 + $0xb8] sm:$0xff] }
 0x386   :  { %v846_v50 = vmax.f32 %v619_v42, %v639_v43 }
 0x388   :  { %v538_v24 = vpop.f32.mrf.mxu2  ;;  %v558_v25 = vpop.f32.mrf.mxu3 }
 0x389   :  { %v539_v28 = vadd.f32 %v538_v24, %v496_v26  ;;  %v559_v29 = vadd.f32 %v558_v25, %v497_v27  ;;  %v506_v24 = vperm.slane %v493_v62, 2  ;;  %v1158_v25 = vld [vmem:[#allocation19 + $0xd0] sm:$0xff]  ;;  %v1159_v26 = vld [vmem:[#allocation19 + $0xd8] sm:$0xff]  ;;  %v1148_v62 = vld [vmem:[#allocation19 + $0x80] sm:$0xff] }
 0x38a   :  { %1166 = vmatpush.msrb.mxu1 %v1158_v25  ;;  %1186 = vmatpush.msra.mxu2 %v1159_v26  ;;  %v1142_v25 = vld [vmem:[#allocation19 + $0x50] sm:$0xff]  ;;  %v1143_v26 = vld [vmem:[#allocation19 + $0x58] sm:$0xff] }
 0x38b   :  { %v818_v39 = vmax.f32 %v539_v28, %v559_v29  ;;  %v698_v7 = vpop.f32.mrf.mxu0  ;;  %v718_v13 = vpop.f32.mrf.mxu1 }
 0x38c   :  { %v1927_v14 = vadd.f32 %v698_v7, %v504_v6  ;;  %v1929_v22 = vadd.f32 %v718_v13, %v505_v11  ;;  %1187 = vmatpush.msra.mxu2 %v1157_v34  ;;  %v1146_v7 = vld [vmem:[#allocation19 + $0x70] sm:$0xff]  ;;  %v1084_v34 = vld [vmem:[#allocation18 + $0x80] sm:$0xff] }
 0x38e   :  { %1188 = vmatpush.msra.mxu2 %v1155_v38 }
 0x390   :  { %v578_v36 = vpop.f32.mrf.mxu2  ;;  %v598_v37 = vpop.f32.mrf.mxu3 }
 0x391   :  { %v579_v32 = vadd.f32 %v578_v36, %v498_v30  ;;  %v599_v41 = vadd.f32 %v598_v37, %v499_v31  ;;  %v901_v30 = vand.u32 2147483647, %v1927_v14  ;;  %v1156_v31 = vld [vmem:[#allocation19 + $0xc0] sm:$0xff]  ;;  %v911_v36 = vand.u32 2147483647, %v1929_v22 }
 0x392   :  { %1167 = vmatpush.msrb.mxu1 %v1156_v31 }
 0x393   :  { %v819_v40 = vmax.f32 %v818_v39, %v579_v32  ;;  %v1098_v39 = vld [vmem:[#allocation18 + $0xf0] sm:$0xff] }
 0x394   :  { %1204 = vmatpush.msra.mxu3 %v1098_v39  ;;  %1168 = vmatpush.msrb.mxu1 %v1154_v33  ;;  %v1141_v33 = vld [vmem:[#allocation19 + $0x48] sm:$0xff] }
 0x395   :  { %v820_v44 = vmax.f32 %v819_v40, %v599_v41  ;;  %v1096_v40 = vld [vmem:[#allocation18 + $0xe0] sm:$0xff] }
 0x396   :  { %1205 = vmatpush.msra.mxu3 %v1096_v40  ;;  %v1082_v40 = vld [vmem:[#allocation18 + $0x70] sm:$0xff] }
 0x397   :  { %v821_v46 = vsub.f32 %v539_v28, %v820_v44  ;;  %v824_v47 = vsub.f32 %v559_v29, %v820_v44  ;;  %v827_v48 = vsub.f32 %v579_v32, %v820_v44  ;;  %v830_v55 = vsub.f32 %v599_v41, %v820_v44  ;;  %v1153_v44 = vld [vmem:[#allocation19 + $0xa8] sm:$0xff] }
 0x398   :  { %v902_v41 = vsub.f32 0.0, %v901_v30  ;;  %1189 = vmatpush.msra.mxu2 %v1153_v44 }
 0x399   :  { %v658_v51 = vpop.f32.mrf.mxu2  ;;  %v678_v52 = vpop.f32.mrf.mxu3  ;;  %v822_v53 = vmul.f32 1.442695, %v821_v46  ;;  %v825_v54 = vmul.f32 1.442695, %v824_v47  ;;  %v828_v57 = vmul.f32 1.442695, %v827_v48 }
 0x39a   :  { %v659_v56 = vadd.f32 %v658_v51, %v502_v45  ;;  %v679_v59 = vadd.f32 %v678_v52, %v503_v49  ;;  %v831_v60 = vmul.f32 1.442695, %v830_v55  ;;  %v1094_v45 = vld [vmem:[#allocation18 + $0xd0] sm:$0xff]  ;;  %v912_v47 = vsub.f32 0.0, %v911_v36  ;;  %v1151_v51 = vld [vmem:[#allocation19 + $0x98] sm:$0xff]  ;;  %v1140_v36 = vld [vmem:[#allocation19 + $0x40] sm:$0xff] }
 0x39b   :  { %1355 = vpow2.f32 %v822_v53  ;;  %v1130_v52 = vld [vmem:[#allocation18 + $0x1f0] sm:$0xff]  ;;  %1206 = vmatpush.msra.mxu3 %v1094_v45  ;;  %1190 = vmatpush.msra.mxu2 %v1151_v51 }
 0x39c   :  { %v847_v58 = vmax.f32 %v846_v50, %v659_v56  ;;  %1357 = vpow2.f32 %v825_v54  ;;  %v1150_v50 = vld [vmem:[#allocation19 + $0x90] sm:$0xff]  ;;  %1224 = vmatpush.msra.mxu0 %v1130_v52 }
 0x39d   :  { %1359 = vpow2.f32 %v828_v57  ;;  %v1092_v57 = vld [vmem:[#allocation18 + $0xc0] sm:$0xff]  ;;  %v1138_v45 = vld [vmem:[#allocation19 + $0x30] sm:$0xff] }
 0x39e   :  { %v848_v61 = vmax.f32 %v847_v58, %v679_v59  ;;  %1361 = vpow2.f32 %v831_v60  ;;  %v1128_v58 = vld [vmem:[#allocation18 + $0x1e0] sm:$0xff]  ;;  %1207 = vmatpush.msra.mxu3 %v1092_v57 }
 0x39f   :  { %1225 = vmatpush.msra.mxu0 %v1128_v58 }
 0x3a0   :  { %v849_v63 = vsub.f32 %v619_v42, %v848_v61  ;;  %v852_v0 = vsub.f32 %v639_v43, %v848_v61  ;;  %v855_v1 = vsub.f32 %v659_v56, %v848_v61  ;;  %v858_v10 = vsub.f32 %v679_v59, %v848_v61  ;;  %v1152_v43 = vld [vmem:[#allocation19 + $0xa0] sm:$0xff] }
 0x3a1   :  { %v1921_v2 = vpop.eup %1355  ;;  %v738_v28 = vpop.f32.mrf.mxu2  ;;  %1169 = vmatpush.msrb.mxu1 %v1152_v43  ;;  %v903_v59 = vmul.f32 1.442695, %v902_v41  ;;  %v1118_v41 = vld [vmem:[#allocation18 + $0x190] sm:$0xff]  ;;  %v1715_v43 = vmov 0  }
 0x3a2   :  { %v850_v3 = vmul.f32 1.442695, %v849_v63  ;;  %v853_v4 = vmul.f32 1.442695, %v852_v0  ;;  %v1923_v5 = vpop.eup %1357  ;;  %v856_v9 = vmul.f32 1.442695, %v855_v1  ;;  %v1939_v37 = vadd.f32 %v738_v28, %v506_v24 }
 0x3a3   :  { %v833_v8 = vadd.f32 %v1923_v5, %v1921_v2  ;;  %v1360_v12 = vpop.eup %1359  ;;  %v859_v20 = vmul.f32 1.442695, %v858_v10  ;;  %v1149_v63 = vld [vmem:[#allocation19 + $0x88] sm:$0xff]  ;;  %v1090_v0 = vld [vmem:[#allocation18 + $0xb0] sm:$0xff]  ;;  %1170 = vmatpush.msrb.mxu1 %v1150_v50  ;;  %v1080_v50 = vld [vmem:[#allocation18 + $0x60] sm:$0xff] }
 0x3a4   :  { %1363 = vpow2.f32 %v850_v3  ;;  %v1362_v19 = vpop.eup %1361  ;;  %v921_v48 = vand.u32 2147483647, %v1939_v37  ;;  %1191 = vmatpush.msra.mxu2 %v1149_v63  ;;  %1208 = vmatpush.msra.mxu3 %v1090_v0  ;;  %v1134_v63 = vld [vmem:[#allocation19 + $0x10] sm:$0xff]  ;;  %v1135_v0 = vld [vmem:[#allocation19 + $0x18] sm:$0xff] }
 0x3a5   :  { %1365 = vpow2.f32 %v853_v4  ;;  %v834_v15 = vadd.f32 %v1360_v12, %v833_v8  ;;  %v1147_v8 = vld [vmem:[#allocation19 + $0x78] sm:$0xff]  ;;  %1171 = vmatpush.msrb.mxu1 %v1148_v62 }
 0x3a6   :  { %1367 = vpow2.f32 %v856_v9  ;;  %v1126_v9 = vld [vmem:[#allocation18 + $0x1d0] sm:$0xff]  ;;  %1192 = vmatpush.msra.mxu2 %v1147_v8  ;;  %v1099_v8 = vld [vmem:[#allocation18 + $0xf8] sm:$0xff] }
 0x3a7   :  { %v835_v23 = vadd.f32 %v1362_v19, %v834_v15  ;;  %v1144_v15 = vld [vmem:[#allocation19 + $0x60] sm:$0xff]  ;;  %1226 = vmatpush.msra.mxu0 %v1126_v9  ;;  %1172 = vmatpush.msrb.mxu1 %v1146_v7  ;;  %v1133_v7 = vld [vmem:[#allocation19 + $0x8] sm:$0xff] }
 0x3a8   :  { %v810_v49 = vpop.f32.mrf.mxu0  ;;  %1193 = vmatpush.msra.mxu2 %v1145_v16 }
 0x3a9   :  { %1369 = vrcp.f32 %v835_v23  ;;  %v1122_v23 = vld [vmem:[#allocation18 + $0x1b0] sm:$0xff]  ;;  %1227 = vmatpush.msra.mxu0 %v1124_v17  ;;  %1173 = vmatpush.msrb.mxu1 %v1144_v15  ;;  %v1131_v15 = vld [vmem:[#allocation18 + $0x1f8] sm:$0xff] }
 0x3aa   :  { %v1931_v27 = vpop.eup %1363  ;;  %1371 = vpow2.f32 %v859_v20  ;;  %1194 = vmatpush.msra.mxu2 %v1143_v26  ;;  %v1074_v17 = vld [vmem:[#allocation18 + $0x30] sm:$0xff] }
 0x3ab   :  { %v1933_v29 = vpop.eup %1365  ;;  %1228 = vmatpush.msra.mxu0 %v1122_v23  ;;  %1174 = vmatpush.msrb.mxu1 %v1142_v25  ;;  %v1108_v25 = vld [vmem:[#allocation18 + $0x140] sm:$0xff] }
 0x3ac   :  { %v861_v35 = vadd.f32 %v1933_v29, %v1931_v27  ;;  %v1941_v32 = vpop.eup %1367  ;;  %1195 = vmatpush.msra.mxu2 %v1141_v33  ;;  %v1106_v33 = vld [vmem:[#allocation18 + $0x130] sm:$0xff] }
 0x3ad   :  { %1175 = vmatpush.msrb.mxu1 %v1140_v36  ;;  %v1070_v36 = vld [vmem:[#allocation18 + $0x10] sm:$0xff] }
 0x3ae   :  { %v862_v42 = vadd.f32 %v1941_v32, %v861_v35  ;;  %v1120_v35 = vld [vmem:[#allocation18 + $0x1a0] sm:$0xff] }
 0x3af   :  { %v1370_v46 = vpop.eup %1369  ;;  %1229 = vmatpush.msra.mxu0 %v1120_v35  ;;  %1176 = vmatpush.msrb.mxu1 %v1138_v45  ;;  %v1068_v45 = vld [vmem:[#allocation18] sm:$0xff] }
 0x3b0   :  { %v1372_v53 = vpop.eup %1371  ;;  %v837_v54 = vmul.f32 %v1370_v46, %v1921_v2  ;;  %v840_v55 = vmul.f32 %v1370_v46, %v1923_v5  ;;  %v843_v56 = vmul.f32 %v1370_v46, %v1360_v12  ;;  %v913_v2 = vmul.f32 1.442695, %v912_v47  ;;  %v1088_v12 = vld [vmem:[#allocation18 + $0xa0] sm:$0xff]  ;;  %v1139_v46 = vld [vmem:[#allocation19 + $0x38] sm:$0xff] }
 0x3b1   :  { %v863_v60 = vadd.f32 %v1372_v53, %v862_v42  ;;  %v922_v5 = vsub.f32 0.0, %v921_v48  ;;  %1209 = vmatpush.msra.mxu3 %v1088_v12  ;;  %v1136_v53 = vld [vmem:[#allocation19 + $0x20] sm:$0xff]  ;;  %1230 = vmatpush.msra.mxu0 %v1118_v41  ;;  %v1125_v41 = vld [vmem:[#allocation18 + $0x1c8] sm:$0xff] }
 0x3b2   :  { %v838_v1 = vmul.f32 0.996, %v837_v54  ;;  %v841_v3 = vmul.f32 0.996, %v840_v55  ;;  %v844_v4 = vmul.f32 0.996, %v843_v56  ;;  %1196 = vmatpush.msra.mxu2 %v1139_v46  ;;  %1177 = vmatpush.msrb.mxu1 %v1136_v53 }
 0x3b3   :  { %v790_v61 = vpop.f32.mrf.mxu3  ;;  %1373 = vrcp.f32 %v863_v60  ;;  %v923_v24 = vmul.f32 1.442695, %v922_v5  ;;  %1210 = vmatpush.msra.mxu3 %v1086_v21  ;;  %v1137_v54 = vld [vmem:[#allocation19 + $0x28] sm:$0xff]  ;;  %v1116_v55 = vld [vmem:[#allocation18 + $0x180] sm:$0xff]  ;;  %v1114_v60 = vld [vmem:[#allocation18 + $0x170] sm:$0xff] }
 0x3b4   :  { %v1947_v6 = vadd.f32 %v810_v49, %v790_v61  ;;  %v839_v10 = vadd.f32 0.001, %v838_v1  ;;  %v842_v11 = vadd.f32 0.001, %v841_v3  ;;  %1375 = vpow2.f32 %v903_v59  ;;  %v1078_v59 = vld [vmem:[#allocation18 + $0x50] sm:$0xff]  ;;  %1231 = vmatpush.msra.mxu0 %v1116_v55  ;;  %1197 = vmatpush.msra.mxu2 %v1137_v54  ;;  %v1132_v5 = vld [vmem:[#allocation19] sm:$0xff] }
 0x3b5   :  { %v845_v18 = vadd.f32 0.001, %v844_v4  ;;  %1377 = vpow2.f32 %v913_v2  ;;  %1211 = vmatpush.msra.mxu3 %v1084_v34  ;;  %1178 = vmatpush.msrb.mxu1 %v1134_v63  ;;  %v1127_v34 = vld [vmem:[#allocation18 + $0x1d8] sm:$0xff]  ;;  %v1104_v46 = vld [vmem:[#allocation18 + $0x120] sm:$0xff]  ;;  %v1102_v55 = vld [vmem:[#allocation18 + $0x110] sm:$0xff] }
 0x3b6   :  { %v1950_v13 = vclamps-f32 %v1947_v6, 3.0  ;;  %v875_v19 = vmul.f32 6.0, %v839_v10  ;;  %v877_v20 = vadd.f32 %v842_v11, %v839_v10  ;;  %1379 = vpow2.f32 %v923_v24  ;;  %1232 = vmatpush.msra.mxu0 %v1114_v60  ;;  %1198 = vmatpush.msra.mxu2 %v1135_v0  ;;  %v1072_v24 = vld [vmem:[#allocation18 + $0x20] sm:$0xff] }
 0x3b7   :  { %1212 = vmatpush.msra.mxu3 %v1082_v40  ;;  %1179 = vmatpush.msrb.mxu1 %v1132_v5  ;;  %v1093_v40 = vld [vmem:[#allocation18 + $0xc8] sm:$0xff]  ;;  %v900_v5 = vmax.f32 %v1927_v14, 0.0 }
 0x3b8   :  { %v1952_v28 = vadd.f32 -3.0, %v875_v19  ;;  %v878_v30 = vmul.f32 6.0, %v877_v20  ;;  %v880_v31 = vadd.f32 %v877_v20, %v845_v18  ;;  %vm930_vm1 = vcmp.ge.f32.partialorder %v1950_v13, -3.0  ;;  %1199 = vmatpush.msra.mxu2 %v1133_v7  ;;  %v1097_v18 = vld [vmem:[#allocation18 + $0xe8] sm:$0xff] }
 0x3b9   :  { %v1374_v42 = vpop.eup %1373  ;;  %v931_v44 = vsel %vm930_vm1, 1, %v1715_v43  ;;  %vm944_vm5 = vcmp.ge.f32.partialorder %v1950_v13, 3.000001  ;;  %1213 = vmatpush.msra.mxu3 %v1080_v50  ;;  %v1129_v19 = vld [vmem:[#allocation18 + $0x1e8] sm:$0xff]  ;;  %1244 = vmatpush.msra.mxu1 %v1099_v8  ;;  %v1091_v50 = vld [vmem:[#allocation18 + $0xb8] sm:$0xff] }
 0x3ba   :  { %v1955_v38 = vadd.f32 -3.0, %v878_v30  ;;  %v881_v39 = vmul.f32 6.0, %v880_v31  ;;  %vm933_vm2 = vcmp.ge.f32.partialorder %v1950_v13, %v1952_v28  ;;  %v1376_v47 = vpop.eup %1375  ;;  %v865_v56 = vmul.f32 %v1374_v42, %v1931_v27  ;;  %v1076_v27 = vld [vmem:[#allocation18 + $0x40] sm:$0xff]  ;;  %1264 = vmatpush.msrb.mxu2 %v1131_v15  ;;  %v1095_v31 = vld [vmem:[#allocation18 + $0xd8] sm:$0xff] }
 0x3bb   :  { %v934_v49 = vsel %vm933_vm2, 1, %v1715_v43  ;;  %v1378_v51 = vpop.eup %1377  ;;  %v868_v57 = vmul.f32 %v1374_v42, %v1933_v29  ;;  %v905_v1 = vadd.f32 1.0, %v1376_v47  ;;  %v1112_v29 = vld [vmem:[#allocation18 + $0x160] sm:$0xff]  ;;  %v871_v4 = vmul.f32 %v1374_v42, %v1941_v32  ;;  %1214 = vmatpush.msra.mxu3 %v1078_v59  ;;  %v1110_v32 = vld [vmem:[#allocation18 + $0x150] sm:$0xff]  ;;  %1245 = vmatpush.msra.mxu1 %v1097_v18  ;;  %v1121_v59 = vld [vmem:[#allocation18 + $0x1a8] sm:$0xff] }
 0x3bc   :  { %v1961_v48 = vadd.f32 -3.0, %v881_v39  ;;  %v935_v52 = vadd.s32 %v934_v49, %v931_v44  ;;  %vm937_vm3 = vcmp.ge.f32.partialorder %v1950_v13, %v1955_v38  ;;  %v915_v3 = vadd.f32 1.0, %v1378_v51  ;;  %v1380_v9 = vpop.eup %1379  ;;  %1233 = vmatpush.msra.mxu0 %v1112_v29  ;;  %1265 = vmatpush.msrb.mxu2 %v1129_v19  ;;  %v1123_v51 = vld [vmem:[#allocation18 + $0x1b8] sm:$0xff]  ;;  %v1994_v29 = vld [vmem:[#allocation2] sm:$0xff] }
 0x3bd   :  { %v938_v58 = vsel %vm937_vm3, 1, %v1715_v43  ;;  %v866_v10 = vmul.f32 0.996, %v865_v56  ;;  %v869_v11 = vmul.f32 0.996, %v868_v57  ;;  %v945_v12 = vsel %vm944_vm5, 1, %v1715_v43  ;;  %1215 = vmatpush.msra.mxu3 %v1076_v27  ;;  %1246 = vmatpush.msra.mxu1 %v1095_v31 }
 0x3be   :  { %vm941_vm4 = vcmp.ge.f32.partialorder %v1950_v13, %v1961_v48  ;;  %v939_v61 = vadd.s32 %v938_v58, %v935_v52  ;;  %1381 = vlog2.f32 %v905_v1  ;;  %v872_v20 = vmul.f32 0.996, %v871_v4  ;;  %1234 = vmatpush.msra.mxu0 %v1110_v32  ;;  %1266 = vmatpush.msrb.mxu2 %v1127_v34  ;;  %v1089_v58 = vld [vmem:[#allocation18 + $0xa8] sm:$0xff]  ;;  %v1087_v1 = vld [vmem:[#allocation18 + $0x98] sm:$0xff] }
 0x3bf   :  { %v942_v62 = vsel %vm941_vm4, 1, %v1715_v43  ;;  %1383 = vlog2.f32 %v915_v3  ;;  %v925_v21 = vadd.f32 1.0, %v1380_v9  ;;  %v867_v26 = vadd.f32 0.001, %v866_v10  ;;  %1216 = vmatpush.msra.mxu3 %v1074_v17  ;;  %1247 = vmatpush.msra.mxu1 %v1093_v40  ;;  %v1119_v27 = vld [vmem:[#allocation18 + $0x198] sm:$0xff] }
 0x3c0   :  { %v943_v2 = vadd.s32 %v942_v62, %v939_v61  ;;  %v870_v30 = vadd.f32 0.001, %v869_v11  ;;  %v1323_v35 = vadd.f32 3.0, %v1952_v28  ;;  %v884_v39 = vsub.f32 %v1955_v38, %v1952_v28  ;;  %1235 = vmatpush.msra.mxu0 %v1108_v25  ;;  %1267 = vmatpush.msrb.mxu2 %v1125_v41  ;;  %v1085_v11 = vld [vmem:[#allocation18 + $0x88] sm:$0xff]  ;;  %v1083_v32 = vld [vmem:[#allocation18 + $0x78] sm:$0xff] }
 0x3c1   :  { %1217 = vmatpush.msra.mxu3 %v1072_v24  ;;  %v1716_v42 = vmov 0.0   ;;  %1385 = vlog2.f32 %v925_v21  ;;  %v885_v57 = vsub.f32 %v1961_v48, %v1955_v38  ;;  %v873_v60 = vadd.f32 0.001, %v872_v20  ;;  %1248 = vmatpush.msra.mxu1 %v1091_v50  ;;  %v1115_v18 = vld [vmem:[#allocation18 + $0x178] sm:$0xff]  ;;  %v1081_v24 = vld [vmem:[#allocation18 + $0x68] sm:$0xff] }
 0x3c2   :  { %v946_v16 = vadd.s32 %v945_v12, %v943_v2  ;;  %1236 = vmatpush.msra.mxu0 %v1106_v33  ;;  %v890_v52 = vadd.f32 %v870_v30, %v867_v26  ;;  %1268 = vmatpush.msrb.mxu2 %v1123_v51  ;;  %v888_v63 = vmul.f32 6.0, %v867_v26  ;;  %v910_v9 = vmax.f32 %v1929_v22, 0.0  ;;  %v1117_v12 = vld [vmem:[#allocation18 + $0x188] sm:$0xff]  ;;  %v1079_v33 = vld [vmem:[#allocation18 + $0x58] sm:$0xff] }
 0x3c3   :  { %1218 = vmatpush.msra.mxu3 %v1070_v36  ;;  %1249 = vmatpush.msra.mxu1 %v1089_v58  ;;  %v886_v10 = vsub.f32 3.0, %v1961_v48  ;;  %v920_v22 = vmax.f32 %v1939_v37, 0.0  ;;  %v1113_v25 = vld [vmem:[#allocation18 + $0x168] sm:$0xff]  ;;  %vm813_vm2 = vcmp.ge.f32.partialorder %v1947_v6, -3.0  ;;  %vm814_vm3 = vcmp.le.f32.partialorder %v1947_v6, 3.0 }
 0x3c4   :  { %v1973_v23 = vadd.s32 4294967295, %v946_v16  ;;  %v1382_v49 = vpop.eup %1381  ;;  %1237 = vmatpush.msra.mxu0 %v1104_v46  ;;  %v891_v3 = vmul.f32 6.0, %v890_v52  ;;  %v893_v4 = vadd.f32 %v890_v52, %v873_v60  ;;  %1269 = vmatpush.msrb.mxu2 %v1121_v59  ;;  %v2005_v17 = vadd.f32 -3.0, %v888_v63  ;;  %v1109_v46 = vld [vmem:[#allocation18 + $0x148] sm:$0xff]  ;;  %vm815_vm4 = vmand %vm813_vm2, %vm814_vm3 }
 0x3c5   :  { %v1384_v54 = vpop.eup %1383  ;;  %1219 = vmatpush.msra.mxu3 %v1068_v45  ;;  %v907_v62 = vmul.f32 0.6931472, %v1382_v49  ;;  %1250 = vmatpush.msra.mxu1 %v1087_v1  ;;  %v1077_v45 = vld [vmem:[#allocation18 + $0x48] sm:$0xff] }
 0x3c6   :  { %vm948_vm6 = vcmp.eq.s32.totalorder %v1973_v23, 0  ;;  %vm960_vm7 = vcmp.eq.s32.totalorder %v1973_v23, 1  ;;  %vm975_vm8 = vcmp.eq.s32.totalorder %v1973_v23, 2  ;;  %vm990_vm9 = vcmp.eq.s32.totalorder %v1973_v23, 3  ;;  %1220 = vmatmul.f32.vlgmr.msra.gmra.mxu3 %v1994_v29  ;;  %1238 = vmatpush.msra.mxu0 %v1102_v55 }
 0x3c7   :  { %v1980_v43 = vsel %vm948_vm6, 1.0, %v1716_v42  ;;  %v1982_v44 = vsel %vm960_vm7, 1.0, %v1716_v42  ;;  %v1989_v56 = vsel %vm975_vm8, 1.0, %v1716_v42  ;;  %v917_v0 = vmul.f32 0.6931472, %v1384_v54  ;;  %v1386_v8 = vpop.eup %1385  ;;  %1270 = vmatpush.msrb.mxu2 %v1119_v27  ;;  %1251 = vmatpush.msra.mxu1 %v1085_v11 }
 0x3c8   :  { %v953_v47 = vmul.f32 %v1980_v43, %v1323_v35  ;;  %v965_v53 = vmul.f32 %v1982_v44, %v884_v39  ;;  %v980_v2 = vmul.f32 %v1989_v56, %v885_v57  ;;  %v2001_v7 = vsel %vm990_vm9, 1.0, %v1716_v42  ;;  %v1111_v39 = vld [vmem:[#allocation18 + $0x158] sm:$0xff] }
 0x3c9   :  { %v908_v16 = vadd.f32 %v907_v62, %v900_v5  ;;  %v918_v14 = vadd.f32 %v917_v0, %v910_v9  ;;  %v2007_v19 = vadd.f32 -3.0, %v891_v3  ;;  %v894_v20 = vmul.f32 6.0, %v893_v4  ;;  %1271 = vmatpush.msrb.mxu2 %v1117_v12  ;;  %1252 = vmatpush.msra.mxu1 %v1083_v32 }
 0x3ca   :  { %v966_v61 = vadd.f32 %v965_v53, %v953_v47  ;;  %v995_v21 = vmul.f32 %v2001_v7, %v886_v10  ;;  %v927_v23 = vmul.f32 0.6931472, %v1386_v8  ;;  %v1324_v31 = vadd.f32 3.0, %v2005_v17 }
 0x3cb   :  { %v909_v30 = vadd.f32 0.001, %v908_v16  ;;  %1272 = vmatpush.msrb.mxu2 %v1115_v18  ;;  %v2013_v34 = vmul.f32 -3.0, %v1980_v43  ;;  %v963_v35 = vmul.f32 %v1982_v44, %v1952_v28  ;;  %v919_v36 = vadd.f32 0.001, %v918_v14  ;;  %1253 = vmatpush.msra.mxu1 %v1081_v24  ;;  %v1075_v24 = vld [vmem:[#allocation18 + $0x38] sm:$0xff] }
 0x3cc   :  { %v981_v15 = vadd.f32 %v980_v2, %v966_v61  ;;  %v2017_v40 = vadd.f32 -3.0, %v894_v20  ;;  %v897_v37 = vsub.f32 %v2007_v19, %v2005_v17  ;;  %v928_v41 = vadd.f32 %v927_v23, %v920_v22  ;;  %v1100_v22 = vld [vmem:[#allocation18 + $0x100] sm:$0xff] }
 0x3cd   :  { %1273 = vmatpush.msrb.mxu2 %v1113_v25  ;;  %v955_v42 = vmul.f32 %v1980_v43, %v1324_v31  ;;  %v958_v47 = vmul.f32 %v1980_v43, %v909_v30  ;;  %v971_v49 = vmul.f32 %v1982_v44, %v909_v30  ;;  %v973_v50 = vmul.f32 %v1982_v44, %v919_v36  ;;  %v1107_v25 = vld [vmem:[#allocation18 + $0x138] sm:$0xff]  ;;  %v1105_v30 = vld [vmem:[#allocation18 + $0x128] sm:$0xff] }
 0x3ce   :  { %v996_v26 = vadd.f32 %v995_v21, %v981_v15  ;;  %v969_v28 = vmul.f32 %v1982_v44, %v897_v37  ;;  %1254 = vmatpush.msra.mxu1 %v1079_v33  ;;  %v964_v51 = vadd.f32 %v963_v35, %v2013_v34  ;;  %v898_v52 = vsub.f32 %v2017_v40, %v2007_v19  ;;  %v2045_v33 = vld [vmem:[#allocation2 + $0x8] sm:$0xff] }
 0x3cf   :  { %1274 = vmatpush.msrb.mxu2 %v1111_v39  ;;  %v978_v53 = vmul.f32 %v1989_v56, %v1955_v38  ;;  %v929_v55 = vadd.f32 0.001, %v928_v41  ;;  %v972_v58 = vadd.f32 %v1980_v43, %v971_v49  ;;  %v974_v59 = vadd.f32 %v973_v50, %v958_v47  ;;  %1239 = vmatpush.msra.mxu0 %v1100_v22  ;;  %v1103_v39 = vld [vmem:[#allocation18 + $0x118] sm:$0xff] }
 0x3d0   :  { %1387 = vrcp.f32 %v996_v26  ;;  %1255 = vmatpush.msra.mxu1 %v1077_v45  ;;  %v970_v57 = vadd.f32 %v969_v28, %v955_v42  ;;  %v899_v62 = vsub.f32 3.0, %v2017_v40  ;;  %v984_v63 = vmul.f32 %v1989_v56, %v898_v52  ;;  %1240 = vmatmul.f32.vlgmr.msra.gmra.mxu0 %v2045_v33  ;;  %v1069_v42 = vld [vmem:[#allocation18 + $0x8] sm:$0xff] }
 0x3d1   :  { %1275 = vmatpush.msrb.mxu2 %v1109_v46  ;;  %v979_v60 = vadd.f32 %v978_v53, %v964_v51  ;;  %v986_v0 = vmul.f32 %v1989_v56, %v919_v36  ;;  %v988_v1 = vmul.f32 %v1989_v56, %v929_v55  ;;  %v993_v27 = vmul.f32 %v2001_v7, %v1961_v48  ;;  %v1101_v45 = vld [vmem:[#allocation18 + $0x108] sm:$0xff] }
 0x3d2   :  { %v985_v3 = vadd.f32 %v984_v63, %v970_v57  ;;  %v1015_v5 = vand.u32 2147483648, %v996_v26  ;;  %v1013_v9 = vand.u32 2147483647, %v996_v26  ;;  %v999_v10 = vmul.f32 %v2001_v7, %v899_v62  ;;  %1256 = vmatpush.msra.mxu1 %v1075_v24 }
 0x3d3   :  { %v987_v4 = vadd.f32 %v986_v0, %v972_v58  ;;  %v989_v2 = vadd.f32 %v988_v1, %v974_v59  ;;  %v994_v43 = vadd.f32 %v993_v27, %v979_v60  ;;  %v1001_v11 = vmul.f32 %v2001_v7, %v929_v55  ;;  %1276 = vmatpush.msrb.mxu2 %v1107_v25 }
 0x3d4   :  { %vm1009_vm11 = vweird.f32 %v996_v26  ;;  %v2040_v15 = vadd.f32 %v999_v10, %v985_v3  ;;  %v1016_v48 = vor.u32 1.1754944e-38, %v1015_v5  ;;  %vm1014_vm13 = vcmp.eq.f32.partialorder %v1013_v9, 8.507059e+37 }
 0x3d5   :  { %v1003_v16 = vadd.f32 %v2001_v7, %v989_v2  ;;  %v1002_v14 = vadd.f32 %v1001_v11, %v987_v4  ;;  %v1019_v18 = vsub.f32 %v1950_v13, %v994_v43  ;;  %v1071_v13 = vld [vmem:[#allocation18 + $0x18] sm:$0xff]  ;;  %1277 = vmatpush.msrb.mxu2 %v1105_v30  ;;  %v967_v51 = vmul.f32 %v1982_v44, %v2005_v17 }
 0x3d6   :  { %v1388_v54 = vpop.eup %1387  ;;  %v982_v63 = vmul.f32 %v1989_v56, %v2007_v19  ;;  %v997_v2 = vmul.f32 %v2001_v7, %v2017_v40  ;;  %v1063_v11 = vlaneseq  ;;  %vm1290_vm7 = vcmask 7168  }
 0x3d7   :  { %v1005_v61 = vmul.f32 %v1388_v54, %v996_v26  ;;  %vm1010_vm10 = vweird.f32 %v1388_v54  ;;  %v1073_v26 = vld [vmem:[#allocation18 + $0x28] sm:$0xff]  ;;  %v1028_v35 = vadd.f32 %v1003_v16, %v1002_v14  ;;  %1278 = vmatpush.msrb.mxu2 %v1103_v39  ;;  %v968_v60 = vadd.f32 %v967_v51, %v2013_v34 }
 0x3d8   :  { %vm1011_vm12 = vmor %vm1009_vm11, %vm1010_vm10  ;;  %1257 = vmatpush.msra.mxu1 %v1073_v26  ;;  %v1064_v40 = vand.u32 127, %v1063_v11 }
 0x3d9   :  { %v1006_v38 = vsub.f32 1.0, %v1005_v61  ;;  %1279 = vmatpush.msrb.mxu2 %v1101_v45  ;;  %v983_v17 = vadd.f32 %v982_v63, %v968_v60 }
 0x3da   :  { %1258 = vmatpush.msra.mxu1 %v1071_v13  ;;  %vm1065_vm5 = vcmp.lt.s32.totalorder %v1064_v40, 76 }
 0x3db   :  { %v1007_v8 = vmul.f32 %v1388_v54, %v1006_v38  ;;  %vm1066_vm6 = vmand %vm815_vm4, %vm1065_vm5 }
 0x3dc   :  { %1259 = vmatpush.msra.mxu1 %v1069_v42 }
 0x3dd   :  { %v1008_v12 = vadd.f32 %v1388_v54, %v1007_v8  ;;  %v998_v8 = vadd.f32 %v997_v2, %v983_v17 }
 0x3df   :  { %v1012_v32 = vsel %vm1011_vm12, %v1388_v54, %v1008_v12 }
 0x3e0   :  { %v1017_v20 = vsel %vm1014_vm13, %v1016_v48, %v1012_v32  ;;  %v1286_v32 = vld [vmem:[%s2097_s5] sm:$0xff] }
 0x3e1   :  { %v1018_v21 = vmul.f32 %v1017_v20, %v2040_v15  ;;  %v1020_v23 = vmul.f32 %v1019_v18, %v1017_v20 }
 0x3e3   :  { %v1021_v31 = vsub.f32 1.0, %v1020_v23  ;;  %v1029_v36 = vmul.f32 2.0, %v1018_v21  ;;  %v1050_v28 = vmul.f32 %v1020_v23, %v1003_v16  ;;  %v1023_v50 = vmul.f32 %v1020_v23, %v1018_v21 }
 0x3e4   :  { %v1049_v4 = vmul.f32 %v1018_v21, %v1018_v21 }
 0x3e5   :  { %v1022_v37 = vmul.f32 %v1021_v31, %v1020_v23  ;;  %v1030_v41 = vsub.f32 %v1028_v35, %v1029_v36  ;;  %v1051_v52 = vmul.f32 %v1050_v28, %v1020_v23  ;;  %v1054_v53 = vmul.f32 %v1021_v31, %v1002_v14 }
 0x3e6   :  { %v1024_v59 = vmul.f32 %v1023_v50, %v1020_v23 }
 0x3e7   :  { %v1031_v46 = vmul.f32 %v1030_v41, %v1022_v37  ;;  %v1052_v49 = vmul.f32 %v1029_v36, %v1022_v37  ;;  %v1025_v55 = vmul.f32 %v1022_v37, %v1002_v14  ;;  %v1055_v62 = vmul.f32 %v1054_v53, %v1021_v31 }
 0x3e9   :  { %v1032_v47 = vadd.f32 %v1031_v46, %v1018_v21  ;;  %v1053_v58 = vadd.f32 %v1052_v49, %v1051_v52  ;;  %v1026_v0 = vadd.f32 %v1025_v55, %v1024_v59 }
 0x3eb   :  { %1389 = vrcp.f32 %v1032_v47  ;;  %v1044_v1 = vand.u32 2147483648, %v1032_v47  ;;  %v1042_v38 = vand.u32 2147483647, %v1032_v47  ;;  %v1056_v44 = vadd.f32 %v1055_v62, %v1053_v58 }
 0x3ec   :  { %vm1038_vm15 = vweird.f32 %v1032_v47  ;;  %v1027_v5 = vmul.f32 %v1026_v0, %v2040_v15 }
 0x3ed   :  { %v1045_v34 = vor.u32 1.1754944e-38, %v1044_v1  ;;  %vm1043_vm1 = vcmp.eq.f32.partialorder %v1042_v38, 8.507059e+37  ;;  %v1057_v56 = vmul.f32 %v1056_v44, %v1049_v4 }
 0x3f1   :  { %v1390_v54 = vpop.eup %1389 }
 0x3f2   :  { %v1034_v57 = vmul.f32 %v1390_v54, %v1032_v47  ;;  %vm1039_vm14 = vweird.f32 %v1390_v54 }
 0x3f3   :  { %vm1040_vm0 = vmor %vm1038_vm15, %vm1039_vm14 }
 0x3f4   :  { %v1035_v61 = vsub.f32 1.0, %v1034_v57 }
 0x3f6   :  { %v1036_v27 = vmul.f32 %v1390_v54, %v1035_v61 }
 0x3f8   :  { %v1037_v3 = vadd.f32 %v1390_v54, %v1036_v27 }
 0x3fa   :  { %v1041_v43 = vsel %vm1040_vm0, %v1390_v54, %v1037_v3 }
 0x3fb   :  { %v1046_v19 = vsel %vm1043_vm1, %v1045_v34, %v1041_v43 }
 0x3fc   :  { %v1047_v9 = vmul.f32 %v1046_v19, %v1027_v5  ;;  %v1058_v10 = vmul.f32 %v1057_v56, %v1046_v19 }
 0x3fe   :  { %v1048_v12 = vadd.f32 %v1047_v9, %v998_v8  ;;  %v1059_v16 = vmul.f32 %v1058_v10, %v1046_v19 }
 0x400   :  { %v1062_v7 = vsel %vm815_vm4, %v1048_v12, %v1947_v6  ;;  %1391 = vlog2.f32 %v1059_v16 }
 0x401   :  { %1180 = vmatmul.f32.vlgmr.msrb.gmra.mxu1 %v1062_v7  ;;  %1200 = vmatmul.f32.vlgmr.msra.gmra.mxu2 %v1062_v7 }
 0x406   :  { %v1392_v15 = vpop.eup %1391 }
 0x407   :  { %v1061_v48 = vmul.f32 0.6931472, %v1392_v15 }
 0x409   :  { %1260 = vmatmul.f32.vlgmr.msra.gmra.mxu1 %v1994_v29  ;;  %1280 = vmatmul.f32.vlgmr.msrb.gmra.mxu2 %v2045_v33  ;;  %v1067_v14 = vsel %vm1066_vm6, %v1061_v48, 0.0 }
 0x40a   :  { %1287 = vadd.xlane.f32.xlu0 %v1067_v14 }
 0x449   :  { %v1221_v18 = vpop.f32.mrf.mxu3 }
 0x44d   :  { %v1241_v23 = vpop.f32.mrf.mxu0 }
 0x47d   :  { %v1288_v6 = vpop.xlane.xlu0 %1287 }
 0x47e   :  { %v1289_v20 = vadd.f32 %v1288_v6, %v1286_v32  ;;  %v1181_v21 = vpop.f32.mrf.mxu1 }
 0x47f   :  { %v1222_v22 = vadd.f32 %v1221_v18, %v1181_v21 }
 0x480   :  { %1291 = vst.msk [vmem:[%s2091_s18] sm:$0xff] %vm1290_vm7, %v1289_v20 }
 0x481   :  { %v1242_v29 = vadd.f32 %v1241_v23, %v1222_v22 }
 0x483   :  { %1284 = vst [vmem:[%s2090_s17] sm:$0xff] %v1242_v29 }
 0x484   :  { %v1201_v24 = vpop.f32.mrf.mxu2 }
 0x486   :  { %v1261_v25 = vpop.f32.mrf.mxu1 }
 0x487   :  { %v1262_v26 = vadd.f32 %v1261_v25, %v1201_v24 }
 0x48c   :  { %v1281_v30 = vpop.f32.mrf.mxu2 }
 0x48d   :  { %v1282_v31 = vadd.f32 %v1281_v30, %v1262_v26 }
 0x48f   :  { %1285 = vst [vmem:[%s2090_s17 + $0x8] sm:$0xff] %v1282_v31 }
 0x490   :  { %1300 = vsyncpa [#allocation3], 1 }
 0x491   :  { %1301 = vsyncpa [#allocation5], 1 }
 0x492   :  { %1302 = vsyncpa [#allocation8], 1 }
 0x493   :  { %1303 = vsyncpa [#allocation11], 1 }
 0x494   :  { %1304 = vsyncpa [#allocation14], 1 }
 0x495   :  { %1305 = vsyncpa [#allocation17], 1 }
 0x496   :  { %1306 = vsyncpa [#allocation20], 1 }

// kernel: _lambda_.4
= control target key start
LH: loop header
LB: loop body
LE: loop exit
PB: predicated region body
PF: predicated region fallthrough
CT: control target
= control target key end

     0   :  { %s2150_s0 = inlined_call_operand.vmem [shape: f32[8,256], index: 0, kind: input, shape index: {}]   ;;  %s2151_s1 = inlined_call_operand.vmem [shape: f32[8,1], index: 1, kind: input, shape index: {}]   ;;  %s2152_s2 = inlined_call_operand.hbm [shape: f32[256,32], index: 2, kind: input, shape index: {}]   ;;  %s2153_s3 = inlined_call_operand.hbm [shape: f32[1,32], index: 3, kind: input, shape index: {}]   ;;  %s2154_s4 = inlined_call_operand.hbm [shape: f32[32,32], index: 4, kind: input, shape index: {}]   ;;  %s2155_s5 = inlined_call_operand.hbm [shape: f32[1,32], index: 5, kind: input, shape index: {}]   ;;  %s2156_s6 = inlined_call_operand.hbm [shape: f32[32,32], index: 6, kind: input, shape index: {}]   ;;  %s2157_s7 = inlined_call_operand.hbm [shape: f32[1,32], index: 7, kind: input, shape index: {}]   ;;  %s2158_s8 = inlined_call_operand.hbm [shape: f32[32,32], index: 8, kind: input, shape index: {}]   ;;  %s2159_s9 = inlined_call_operand.hbm [shape: f32[1,32], index: 9, kind: input, shape index: {}]   ;;  %s2160_s10 = inlined_call_operand.vmem [shape: f32[32,32], index: 10, kind: input, shape index: {}]   ;;  %s2161_s11 = inlined_call_operand.hbm [shape: f32[1,32], index: 11, kind: input, shape index: {}]   ;;  %s2162_s12 = inlined_call_operand.hbm [shape: f32[32,1408], index: 12, kind: input, shape index: {}]   ;;  %s2163_s13 = inlined_call_operand.hbm [shape: f32[1,1408], index: 13, kind: input, shape index: {}]   ;;  %s2164_s14 = inlined_call_operand.hbm [shape: f32[256,128], index: 14, kind: input, shape index: {}]   ;;  %s2165_s15 = inlined_call_operand.hbm [shape: f32[256,256], index: 15, kind: input, shape index: {}]   ;;  %s2166_s16 = inlined_call_operand.hbm [shape: f32[128,256], index: 16, kind: input, shape index: {}]   ;;  %s2167_s17 = inlined_call_operand.vmem [shape: f32[8,256], index: 17, kind: output, shape index: {0}]   ;;  %s2168_s18 = inlined_call_operand.vmem [shape: f32[8,1], index: 18, kind: output, shape index: {1}]  }
   0x1   :  { %2170 = sst [smem:[#allocation32_spill]] %s2150_s0 }
   0x2   :  { %2171 = sst [smem:[#allocation33_spill]] %s2151_s1 }
   0x3   :  { %2172 = sst [smem:[#allocation34_spill]] %s2152_s2 }
   0x4   :  { %24 = vsyncpa [#allocation3], 0 }
   0x5   :  { %25 = vsyncpa [#allocation5], 0 }
   0x6   :  { %26 = vsyncpa [#allocation8], 0 }
   0x7   :  { %27 = vsyncpa [#allocation11], 0 }
   0x8   :  { %28 = vsyncpa [#allocation14], 0 }
   0x9   :  { %29 = vsyncpa [#allocation17], 0 }
   0xa   :  { %30 = vsyncpa [#allocation20], 0  ;;  %s54_s29 = sshll.u32 %s2153_s3, 4  ;;  %s55_s29 = int_to_ptr.hbm [resolvable:$true] %s54_s29 }
   0xb   :  { %31 = vsyncpa [#allocation23], 0  ;;  %s1775_s30 = smov [#allocation4]   ;;  %s78_s20 = sshll.u32 %s2155_s5, 4  ;;  %s79_s20 = int_to_ptr.hbm [resolvable:$true] %s78_s20 }
   0xc   :  { %s56_s0 = sshll.u32 %s1775_s30, 4  ;;  %s1776_s21 = smov [#allocation7]   ;;  %s57_s0 = int_to_ptr.vmem [resolvable:$true] %s56_s0 }
   0xd   :  { %59 = dma.hbm_to_vmem [thread:$0]  %s55_s29, 16, %s57_s0, [#allocation5]  }
   0xe   :  { %s80_s22 = sshll.u32 %s1776_s21, 4  ;;  %s102_s24 = sshll.u32 %s2157_s7, 4  ;;  %s81_s22 = int_to_ptr.vmem [resolvable:$true] %s80_s22  ;;  %s103_s24 = int_to_ptr.hbm [resolvable:$true] %s102_s24 }
   0xf   :  { %83 = dma.hbm_to_vmem [thread:$0]  %s79_s20, 16, %s81_s22, [#allocation8]  }
  0x10   :  { %s126_s26 = sshll.u32 %s2159_s9, 4  ;;  %s1777_s27 = smov [#allocation10]   ;;  %s127_s26 = int_to_ptr.hbm [resolvable:$true] %s126_s26 }
  0x11   :  { %s104_s28 = sshll.u32 %s1777_s27, 4  ;;  %s1778_s5 = smov [#allocation13]   ;;  %s105_s28 = int_to_ptr.vmem [resolvable:$true] %s104_s28 }
  0x12   :  { %107 = dma.hbm_to_vmem [thread:$0]  %s103_s24, 16, %s105_s28, [#allocation11]  }
  0x13   :  { %s128_s29 = sshll.u32 %s1778_s5, 4  ;;  %s149_s19 = sshll.u32 %s2162_s12, 4  ;;  %s129_s29 = int_to_ptr.vmem [resolvable:$true] %s128_s29  ;;  %s150_s19 = int_to_ptr.hbm [resolvable:$true] %s149_s19 }
  0x14   :  { %131 = dma.hbm_to_vmem [thread:$0]  %s127_s26, 16, %s129_s29, [#allocation14]  }
  0x15   :  { %s1779_s7 = smov [#allocation16]   ;;  %s1780_s20 = smov 1408  }
  0x16   :  { %s151_s1 = sshll.u32 %s1779_s7, 4  ;;  %s1781_s21 = smov 88   ;;  %s152_s1 = int_to_ptr.vmem [resolvable:$true] %s151_s1 }
  0x17   :  { %157 = dma.hbm_to_vmem [thread:$0]  %s150_s19, 5632, %s152_s1, [#allocation17], %s1780_s20, %s1780_s20, %s1781_s21  }
  0x18   :  { %s173_s2 = sshll.u32 %s2164_s14, 4  ;;  %s1782_s23 = smov [#allocation19]   ;;  %s174_s2 = int_to_ptr.hbm [resolvable:$true] %s173_s2 }
  0x19   :  { %s175_s24 = sshll.u32 %s1782_s23, 4  ;;  %s2173_s27 = sld [smem:[#allocation34_spill]]  ;;  %s176_s24 = int_to_ptr.vmem [resolvable:$true] %s175_s24 }
  0x1a   :  { %s1783_s26 = smov 128   ;;  %s1784_s28 = smov 8  }
  0x1b   :  { %181 = dma.hbm_to_vmem [thread:$0]  %s174_s2, 4096, %s176_s24, [#allocation20], %s1783_s26, %s1783_s26, %s1784_s28  }
  0x1c   :  { %s64_s30 = sshll.u32 %s2154_s4, 4  ;;  %s1785_s0 = smov [#allocation2]   ;;  %s65_s30 = int_to_ptr.hbm [resolvable:$true] %s64_s30 }
  0x1d   :  { %s42_s19 = sshll.u32 %s1785_s0, 4  ;;  %s1786_s14 = smov [#allocation6]   ;;  %s43_s19 = int_to_ptr.vmem [resolvable:$true] %s42_s19 }
  0x1e   :  { %s66_s7 = sshll.u32 %s1786_s14, 4  ;;  %s88_s21 = sshll.u32 %s2156_s6, 4  ;;  %s67_s7 = int_to_ptr.vmem [resolvable:$true] %s66_s7  ;;  %s89_s21 = int_to_ptr.hbm [resolvable:$true] %s88_s21 }
  0x1f   :  { %s40_s12 = sshll.u32 %s2173_s27, 4  ;;  %s112_s2 = sshll.u32 %s2158_s8, 4  ;;  %s41_s12 = int_to_ptr.hbm [resolvable:$true] %s40_s12  ;;  %s113_s2 = int_to_ptr.hbm [resolvable:$true] %s112_s2 }
  0x20   :  { %48 = dma.hbm_to_vmem [thread:$0]  %s41_s12, 4096, %s43_s19, [#allocation3], %s1783_s26, %s1783_s26, %s1784_s28  }
  0x21   :  { %72 = dma.hbm_to_vmem [thread:$0]  %s65_s30, 512, %s67_s7, [#allocation5], %s1783_s26, %s1783_s26, %s1784_s28  }
  0x22   :  { %s1787_s23 = smov [#allocation9]   ;;  %s1788_s24 = smov [#allocation12]  }
  0x23   :  { %s90_s4 = sshll.u32 %s1787_s23, 4  ;;  %s114_s3 = sshll.u32 %s1788_s24, 4  ;;  %s91_s4 = int_to_ptr.vmem [resolvable:$true] %s90_s4  ;;  %s115_s3 = int_to_ptr.vmem [resolvable:$true] %s114_s3 }
  0x24   :  { %96 = dma.hbm_to_vmem [thread:$0]  %s89_s21, 512, %s91_s4, [#allocation8], %s1783_s26, %s1783_s26, %s1784_s28  }
  0x25   :  { %s139_s12 = sshll.u32 %s2161_s11, 4  ;;  %s163_s29 = sshll.u32 %s2163_s13, 4  ;;  %s140_s12 = int_to_ptr.hbm [resolvable:$true] %s139_s12  ;;  %s164_s29 = int_to_ptr.hbm [resolvable:$true] %s163_s29 }
  0x26   :  { %120 = dma.hbm_to_vmem [thread:$0]  %s113_s2, 512, %s115_s3, [#allocation11], %s1783_s26, %s1783_s26, %s1784_s28  }
  0x27   :  { %s1789_s30 = smov [#allocation15]   ;;  %s1790_s0 = smov [#allocation18]  }
  0x28   :  { %s141_s8 = sshll.u32 %s1789_s30, 4  ;;  %s165_s19 = sshll.u32 %s1790_s0, 4  ;;  %s142_s8 = int_to_ptr.vmem [resolvable:$true] %s141_s8  ;;  %s166_s19 = int_to_ptr.vmem [resolvable:$true] %s165_s19 }
  0x29   :  { %144 = dma.hbm_to_vmem [thread:$0]  %s140_s12, 16, %s142_s8, [#allocation14]  }
  0x2a   :  { %s186_s1 = sshll.u32 %s2165_s15, 4  ;;  %s1791_s11 = smov [#allocation21]   ;;  %s187_s1 = int_to_ptr.hbm [resolvable:$true] %s186_s1 }
  0x2b   :  { %168 = dma.hbm_to_vmem [thread:$0]  %s164_s29, 176, %s166_s19, [#allocation17]  }
  0x2c   :  { %s188_s26 = sshll.u32 %s1791_s11, 4  ;;  %s199_s13 = sshll.u32 %s2166_s16, 4  ;;  %s189_s26 = int_to_ptr.vmem [resolvable:$true] %s188_s26  ;;  %s200_s13 = int_to_ptr.hbm [resolvable:$true] %s199_s13 }
  0x2d   :  { %s1792_s21 = smov 256   ;;  %s1793_s9 = smov 16  }
  0x2e   :  { %194 = dma.hbm_to_vmem [thread:$0]  %s187_s1, 8192, %s189_s26, [#allocation20], %s1792_s21, %s1792_s21, %s1793_s9  }
  0x2f   :  { %s1794_s22 = smov [#allocation22]  }
  0x30   :  { %s201_s2 = sshll.u32 %s1794_s22, 4  ;;  %s202_s2 = int_to_ptr.vmem [resolvable:$true] %s201_s2 }
  0x31   :  { %207 = dma.hbm_to_vmem [thread:$0]  %s200_s13, 4096, %s202_s2, [#allocation23], %s1792_s21, %s1792_s21, %s1793_s9  }
  0x32   :  { %1759 = dma.done.wait [#allocation3], 4096  }
  0x33   :  { %1760 = vsyncadd [#allocation3], 4294963200 }
  0x34   :  { %1761 = dma.done.wait [#allocation5], 528  }
  0x35   :  { %1762 = vsyncadd [#allocation5], 4294966768 }
  0x36   :  { %1763 = dma.done.wait [#allocation8], 528  }
  0x37   :  { %1764 = vsyncadd [#allocation8], 4294966768 }
  0x38   :  { %1765 = dma.done.wait [#allocation11], 528  }
  0x39   :  { %1766 = vsyncadd [#allocation11], 4294966768 }
  0x3a   :  { %1767 = dma.done.wait [#allocation14], 32  }
  0x3b   :  { %1768 = vsyncadd [#allocation14], 4294967264 }
  0x3c   :  { %1769 = dma.done.wait [#allocation17], 5808  }
  0x3d   :  { %1770 = vsyncadd [#allocation17], 4294961488 }
  0x3e   :  { %1771 = dma.done.wait [#allocation20], 12288  }
  0x3f   :  { %1772 = vsyncadd [#allocation20], 4294955008 }
  0x40   :  { %1773 = dma.done.wait [#allocation23], 4096  }
  0x41   :  { %1774 = vsyncadd [#allocation23], 4294963200  ;;  %v281_v0 = vld [vmem:[#allocation2 + $0x78] sm:$0xff]  ;;  %v280_v1 = vld [vmem:[#allocation2 + $0x70] sm:$0xff]  ;;  %s2174_s23 = sld [smem:[#allocation32_spill]]  ;;  %vm351_vm0 = vcmask 261120  }
  0x42   :  { %v297_v2 = vld [vmem:[#allocation2 + $0xf8] sm:$0xff]  ;;  %302 = vmatpush.msra.mxu0 %v281_v0  ;;  %v296_v3 = vld [vmem:[#allocation2 + $0xf0] sm:$0xff]  ;;  %v279_v4 = vld [vmem:[#allocation2 + $0x68] sm:$0xff]  ;;  %s2175_s1 = sld [smem:[#allocation33_spill]] }
  0x43   :  { %322 = vmatpush.msra.mxu1 %v297_v2  ;;  %v295_v5 = vld [vmem:[#allocation2 + $0xe8] sm:$0xff]  ;;  %v278_v6 = vld [vmem:[#allocation2 + $0x60] sm:$0xff]  ;;  %v277_v8 = vld [vmem:[#allocation2 + $0x58] sm:$0xff] }
  0x44   :  { %303 = vmatpush.msra.mxu0 %v280_v1  ;;  %v294_v7 = vld [vmem:[#allocation2 + $0xe0] sm:$0xff]  ;;  %v293_v9 = vld [vmem:[#allocation2 + $0xd8] sm:$0xff]  ;;  %v276_v10 = vld [vmem:[#allocation2 + $0x50] sm:$0xff] }
  0x45   :  { %323 = vmatpush.msra.mxu1 %v296_v3  ;;  %v292_v11 = vld [vmem:[#allocation2 + $0xd0] sm:$0xff]  ;;  %v275_v12 = vld [vmem:[#allocation2 + $0x48] sm:$0xff]  ;;  %v274_v14 = vld [vmem:[#allocation2 + $0x40] sm:$0xff] }
  0x46   :  { %304 = vmatpush.msra.mxu0 %v279_v4  ;;  %v291_v13 = vld [vmem:[#allocation2 + $0xc8] sm:$0xff]  ;;  %v290_v15 = vld [vmem:[#allocation2 + $0xc0] sm:$0xff]  ;;  %v273_v16 = vld [vmem:[#allocation2 + $0x38] sm:$0xff] }
  0x47   :  { %324 = vmatpush.msra.mxu1 %v295_v5  ;;  %v289_v17 = vld [vmem:[#allocation2 + $0xb8] sm:$0xff]  ;;  %v272_v18 = vld [vmem:[#allocation2 + $0x30] sm:$0xff]  ;;  %v271_v20 = vld [vmem:[#allocation2 + $0x28] sm:$0xff] }
  0x48   :  { %305 = vmatpush.msra.mxu0 %v278_v6  ;;  %v288_v19 = vld [vmem:[#allocation2 + $0xb0] sm:$0xff]  ;;  %v287_v21 = vld [vmem:[#allocation2 + $0xa8] sm:$0xff]  ;;  %v270_v22 = vld [vmem:[#allocation2 + $0x20] sm:$0xff] }
  0x49   :  { %325 = vmatpush.msra.mxu1 %v294_v7  ;;  %v286_v23 = vld [vmem:[#allocation2 + $0xa0] sm:$0xff]  ;;  %v269_v24 = vld [vmem:[#allocation2 + $0x18] sm:$0xff]  ;;  %v268_v26 = vld [vmem:[#allocation2 + $0x10] sm:$0xff] }
  0x4a   :  { %306 = vmatpush.msra.mxu0 %v277_v8  ;;  %v285_v25 = vld [vmem:[#allocation2 + $0x98] sm:$0xff]  ;;  %v284_v27 = vld [vmem:[#allocation2 + $0x90] sm:$0xff]  ;;  %v267_v28 = vld [vmem:[#allocation2 + $0x8] sm:$0xff] }
  0x4b   :  { %326 = vmatpush.msra.mxu1 %v293_v9  ;;  %v283_v29 = vld [vmem:[#allocation2 + $0x88] sm:$0xff]  ;;  %v266_v30 = vld [vmem:[#allocation2] sm:$0xff]  ;;  %v345_v35 = vld [vmem:[#allocation6 + $0x10] sm:$0xff] }
  0x4c   :  { %307 = vmatpush.msra.mxu0 %v276_v10  ;;  %v282_v31 = vld [vmem:[#allocation2 + $0x80] sm:$0xff]  ;;  %v1942_v33 = vld [vmem:[%s2174_s23 + $0x8] sm:$0xff]  ;;  %v378_v45 = vld [vmem:[#allocation9 + $0x10] sm:$0xff] }
  0x4d   :  { %327 = vmatpush.msra.mxu1 %v292_v11  ;;  %v1937_v32 = vld [vmem:[%s2174_s23] sm:$0xff]  ;;  %v344_v36 = vld [vmem:[#allocation6 + $0x8] sm:$0xff]  ;;  %v411_v53 = vld [vmem:[#allocation12 + $0x10] sm:$0xff] }
  0x4e   :  { %308 = vmatpush.msra.mxu0 %v275_v12  ;;  %v346_v34 = vld [vmem:[#allocation6 + $0x18] sm:$0xff]  ;;  %v343_v37 = vld [vmem:[#allocation6] sm:$0xff]  ;;  %v377_v46 = vld [vmem:[#allocation9 + $0x8] sm:$0xff] }
  0x4f   :  { %328 = vmatpush.msra.mxu1 %v291_v13  ;;  %367 = vmatpush.msra.mxu2 %v346_v34  ;;  %v379_v38 = vld [vmem:[#allocation9 + $0x18] sm:$0xff]  ;;  %v376_v47 = vld [vmem:[#allocation9] sm:$0xff]  ;;  %v410_v54 = vld [vmem:[#allocation12 + $0x8] sm:$0xff] }
  0x50   :  { %309 = vmatpush.msra.mxu0 %v274_v14  ;;  %399 = vmatpush.msra.mxu3 %v379_v38  ;;  %v1378_v39 = vld [vmem:[#allocation4] ss:$0 sm:$0xff]  ;;  %v1379_v49 = vld [vmem:[#allocation7] ss:$0 sm:$0xff]  ;;  %v409_v55 = vld [vmem:[#allocation12] sm:$0xff] }
  0x51   :  { %329 = vmatpush.msra.mxu1 %v290_v15  ;;  %368 = vmatpush.msra.mxu2 %v345_v35  ;;  %v412_v48 = vld [vmem:[#allocation12 + $0x18] sm:$0xff]  ;;  %v443_v57 = vld [vmem:[%s2160_s10 + $0x10] sm:$0xff]  ;;  %v442_v63 = vld [vmem:[%s2160_s10 + $0x8] sm:$0xff] }
  0x52   :  { %310 = vmatpush.msra.mxu0 %v273_v16  ;;  %400 = vmatpush.msra.mxu3 %v378_v45  ;;  %v444_v56 = vld [vmem:[%s2160_s10 + $0x18] sm:$0xff]  ;;  %v1380_v58 = vld [vmem:[#allocation10] ss:$0 sm:$0xff]  ;;  %v1381_v7 = vld [vmem:[#allocation13] ss:$0 sm:$0xff] }
  0x53   :  { %330 = vmatpush.msra.mxu1 %v289_v17  ;;  %369 = vmatpush.msra.mxu2 %v344_v36  ;;  %v441_v0 = vld [vmem:[%s2160_s10] sm:$0xff]  ;;  %v506_v1 = vld [vmem:[#allocation16 + $0x108] sm:$0xff]  ;;  %v485_v13 = vld [vmem:[#allocation16 + $0x60] sm:$0xff] }
  0x54   :  { %311 = vmatpush.msra.mxu0 %v272_v18  ;;  %401 = vmatpush.msra.mxu3 %v377_v46  ;;  %v507_v2 = vld [vmem:[#allocation16 + $0x110] sm:$0xff]  ;;  %v510_v3 = vld [vmem:[#allocation16 + $0x128] sm:$0xff]  ;;  %v496_v6 = vld [vmem:[#allocation16 + $0xb8] sm:$0xff] }
  0x55   :  { %331 = vmatpush.msra.mxu1 %v288_v19  ;;  %370 = vmatpush.msra.mxu2 %v343_v37  ;;  %v511_v4 = vld [vmem:[#allocation16 + $0x130] sm:$0xff]  ;;  %v500_v12 = vld [vmem:[#allocation16 + $0xd8] sm:$0xff]  ;;  %v489_v16 = vld [vmem:[#allocation16 + $0x80] sm:$0xff] }
  0x56   :  { %312 = vmatpush.msra.mxu0 %v271_v20  ;;  %402 = vmatpush.msra.mxu3 %v376_v47  ;;  %v495_v5 = vld [vmem:[#allocation16 + $0xb0] sm:$0xff]  ;;  %v484_v14 = vld [vmem:[#allocation16 + $0x58] sm:$0xff]  ;;  %v474_v17 = vld [vmem:[#allocation16 + $0x8] sm:$0xff] }
  0x57   :  { %332 = vmatpush.msra.mxu1 %v287_v21  ;;  %432 = vmatpush.msrb.mxu2 %v412_v48  ;;  %v499_v11 = vld [vmem:[#allocation16 + $0xd0] sm:$0xff]  ;;  %v488_v15 = vld [vmem:[#allocation16 + $0x78] sm:$0xff]  ;;  %v473_v18 = vld [vmem:[#allocation16] sm:$0xff] }
  0x58   :  { %313 = vmatpush.msra.mxu0 %v270_v22  ;;  %464 = vmatpush.msrb.mxu3 %v444_v56  ;;  %v509_v19 = vld [vmem:[#allocation16 + $0x120] sm:$0xff]  ;;  %v478_v21 = vld [vmem:[#allocation16 + $0x28] sm:$0xff]  ;;  %v508_v22 = vld [vmem:[#allocation16 + $0x118] sm:$0xff] }
  0x59   :  { %333 = vmatpush.msra.mxu1 %v286_v23  ;;  %433 = vmatpush.msrb.mxu2 %v411_v53  ;;  %v477_v20 = vld [vmem:[#allocation16 + $0x20] sm:$0xff]  ;;  %v498_v23 = vld [vmem:[#allocation16 + $0xc8] sm:$0xff]  ;;  %v492_v34 = vld [vmem:[#allocation16 + $0x98] sm:$0xff] }
  0x5a   :  { %314 = vmatpush.msra.mxu0 %v269_v24  ;;  %465 = vmatpush.msrb.mxu3 %v443_v57  ;;  %v514_v24 = vld [vmem:[#allocation16 + $0x148] sm:$0xff]  ;;  %v493_v35 = vld [vmem:[#allocation16 + $0xa0] sm:$0xff]  ;;  %v475_v36 = vld [vmem:[#allocation16 + $0x10] sm:$0xff] }
  0x5b   :  { %334 = vmatpush.msra.mxu1 %v285_v25  ;;  %434 = vmatpush.msrb.mxu2 %v410_v54  ;;  %v515_v25 = vld [vmem:[#allocation16 + $0x150] sm:$0xff]  ;;  %v481_v37 = vld [vmem:[#allocation16 + $0x40] sm:$0xff]  ;;  %v482_v38 = vld [vmem:[#allocation16 + $0x48] sm:$0xff] }
  0x5c   :  { %315 = vmatpush.msra.mxu0 %v268_v26  ;;  %466 = vmatpush.msrb.mxu3 %v442_v63  ;;  %v497_v26 = vld [vmem:[#allocation16 + $0xc0] sm:$0xff]  ;;  %v502_v46 = vld [vmem:[#allocation16 + $0xe8] sm:$0xff]  ;;  %v479_v53 = vld [vmem:[#allocation16 + $0x30] sm:$0xff] }
  0x5d   :  { %335 = vmatpush.msra.mxu1 %v284_v27  ;;  %435 = vmatpush.msrb.mxu2 %v409_v55  ;;  %v487_v27 = vld [vmem:[#allocation16 + $0x70] sm:$0xff]  ;;  %v797_v45 = vld [vmem:[#allocation19 + $0xf8] sm:$0xff]  ;;  %v796_v48 = vld [vmem:[#allocation19 + $0xf0] sm:$0xff] }
  0x5e   :  { %316 = vmatpush.msra.mxu0 %v267_v28  ;;  %467 = vmatpush.msrb.mxu3 %v441_v0  ;;  %v503_v28 = vld [vmem:[#allocation16 + $0xf0] sm:$0xff]  ;;  %v501_v47 = vld [vmem:[#allocation16 + $0xe0] sm:$0xff]  ;;  %v516_v55 = vld [vmem:[#allocation16 + $0x158] sm:$0xff] }
  0x5f   :  { %336 = vmatpush.msra.mxu1 %v283_v29  ;;  %v504_v29 = vld [vmem:[#allocation16 + $0xf8] sm:$0xff]  ;;  %v781_v54 = vld [vmem:[#allocation19 + $0x78] sm:$0xff]  ;;  %v794_v56 = vld [vmem:[#allocation19 + $0xe0] sm:$0xff] }
  0x60   :  { %317 = vmatpush.msra.mxu0 %v266_v30  ;;  %v486_v30 = vld [vmem:[#allocation16 + $0x68] sm:$0xff]  ;;  %v780_v57 = vld [vmem:[#allocation19 + $0x70] sm:$0xff]  ;;  %v483_v63 = vld [vmem:[#allocation16 + $0x50] sm:$0xff] }
  0x61   :  { %337 = vmatpush.msra.mxu1 %v282_v31  ;;  %318 = vmatmul.f32.vlgmr.msra.gmra.mxu0 %v1937_v32  ;;  %v476_v31 = vld [vmem:[#allocation16 + $0x18] sm:$0xff] }
  0x62   :  { %338 = vmatmul.f32.vlgmr.msra.gmra.mxu1 %v1942_v33  ;;  %638 = vmatpush.msrb.mxu0 %v510_v3  ;;  %v792_v0 = vld [vmem:[#allocation19 + $0xd0] sm:$0xff] }
  0x63   :  { %658 = vmatpush.msrb.mxu1 %v511_v4  ;;  %v776_v3 = vld [vmem:[#allocation19 + $0x50] sm:$0xff]  ;;  %v790_v4 = vld [vmem:[#allocation19 + $0xc0] sm:$0xff] }
  0x64   :  { %639 = vmatpush.msrb.mxu0 %v499_v11  ;;  %v772_v11 = vld [vmem:[#allocation19 + $0x30] sm:$0xff] }
  0x65   :  { %659 = vmatpush.msrb.mxu1 %v500_v12  ;;  %v786_v12 = vld [vmem:[#allocation19 + $0xa0] sm:$0xff] }
  0x66   :  { %640 = vmatpush.msrb.mxu0 %v488_v15  ;;  %v770_v15 = vld [vmem:[#allocation19 + $0x20] sm:$0xff] }
  0x67   :  { %660 = vmatpush.msrb.mxu1 %v489_v16  ;;  %v784_v16 = vld [vmem:[#allocation19 + $0x90] sm:$0xff] }
  0x68   :  { %641 = vmatpush.msrb.mxu0 %v477_v20  ;;  %v782_v20 = vld [vmem:[#allocation19 + $0x80] sm:$0xff] }
  0x69   :  { %661 = vmatpush.msrb.mxu1 %v478_v21  ;;  %v767_v21 = vld [vmem:[#allocation19 + $0x8] sm:$0xff] }
  0x6a   :  { %718 = vmatpush.msra.mxu0 %v514_v24 }
  0x6b   :  { %738 = vmatpush.msra.mxu1 %v515_v25 }
  0x6c   :  { %719 = vmatpush.msra.mxu0 %v503_v28 }
  0x6d   :  { %739 = vmatpush.msra.mxu1 %v504_v29 }
  0x6e   :  { %720 = vmatpush.msra.mxu0 %v492_v34 }
  0x6f   :  { %740 = vmatpush.msra.mxu1 %v493_v35 }
  0x70   :  { %721 = vmatpush.msra.mxu0 %v481_v37 }
  0x71   :  { %741 = vmatpush.msra.mxu1 %v482_v38 }
  0xde   :  { %v319_v40 = vpop.f32.mrf.mxu0 }
  0xdf   :  { %v339_v41 = vpop.f32.mrf.mxu1  ;;  %v320_v42 = vadd.f32 %v1378_v39, %v319_v40  ;;  %v1382_v39 = vld [vmem:[#allocation15] ss:$0 sm:$0xff] }
  0xe1   :  { %v340_v43 = vadd.f32 %v339_v41, %v320_v42 }
  0xe3   :  { %v342_v44 = vmax.f32 %v340_v43, 0.0 }
  0xe5   :  { %1333 = vmatmul.msk.f32.vlgmr.msra.gmra.mxu2 %vm351_vm0, %v342_v44  ;;  %v512_v44 = vld [vmem:[#allocation16 + $0x138] sm:$0xff] }
  0xe6   :  { %558 = vmatpush.msra.mxu2 %v506_v1  ;;  %v777_v1 = vld [vmem:[#allocation19 + $0x58] sm:$0xff] }
  0xe8   :  { %559 = vmatpush.msra.mxu2 %v495_v5  ;;  %v775_v5 = vld [vmem:[#allocation19 + $0x48] sm:$0xff] }
  0xea   :  { %560 = vmatpush.msra.mxu2 %v484_v14  ;;  %v785_v14 = vld [vmem:[#allocation19 + $0x98] sm:$0xff] }
  0xec   :  { %561 = vmatpush.msra.mxu2 %v473_v18  ;;  %v783_v18 = vld [vmem:[#allocation19 + $0x88] sm:$0xff] }
 0x168   :  { %v372_v50 = vpop.f32.mrf.mxu2 }
 0x169   :  { %v373_v51 = vadd.f32 %v1379_v49, %v372_v50  ;;  %v491_v49 = vld [vmem:[#allocation16 + $0x90] sm:$0xff]  ;;  %v490_v50 = vld [vmem:[#allocation16 + $0x88] sm:$0xff] }
 0x16b   :  { %v375_v52 = vmax.f32 %v373_v51, 0.0  ;;  %v795_v51 = vld [vmem:[#allocation19 + $0xe8] sm:$0xff] }
 0x16d   :  { %1334 = vmatmul.msk.f32.vlgmr.msra.gmra.mxu3 %vm351_vm0, %v375_v52  ;;  %v480_v52 = vld [vmem:[#allocation16 + $0x38] sm:$0xff] }
 0x16e   :  { %578 = vmatpush.msra.mxu3 %v507_v2  ;;  %v791_v2 = vld [vmem:[#allocation19 + $0xc8] sm:$0xff] }
 0x170   :  { %579 = vmatpush.msra.mxu3 %v496_v6  ;;  %v789_v6 = vld [vmem:[#allocation19 + $0xb8] sm:$0xff] }
 0x172   :  { %580 = vmatpush.msra.mxu3 %v485_v13  ;;  %v771_v13 = vld [vmem:[#allocation19 + $0x28] sm:$0xff] }
 0x174   :  { %581 = vmatpush.msra.mxu3 %v474_v17  ;;  %v769_v17 = vld [vmem:[#allocation19 + $0x18] sm:$0xff] }
 0x1f0   :  { %v404_v59 = vpop.f32.mrf.mxu3 }
 0x1f1   :  { %v405_v60 = vadd.f32 %v1380_v58, %v404_v59  ;;  %v505_v58 = vld [vmem:[#allocation16 + $0x100] sm:$0xff] }
 0x1f2   :  { %v793_v59 = vld [vmem:[#allocation19 + $0xd8] sm:$0xff] }
 0x1f3   :  { %v1954_v61 = vadd.f32 %v405_v60, %v340_v43  ;;  %v513_v43 = vld [vmem:[#allocation16 + $0x140] sm:$0xff]  ;;  %v779_v60 = vld [vmem:[#allocation19 + $0x68] sm:$0xff] }
 0x1f5   :  { %v408_v62 = vmax.f32 %v1954_v61, 0.0 }
 0x1f7   :  { %1335 = vmatmul.msk.f32.vlgmr.msrb.gmra.mxu2 %vm351_vm0, %v408_v62  ;;  %v778_v62 = vld [vmem:[#allocation19 + $0x60] sm:$0xff] }
 0x1f8   :  { %598 = vmatpush.msrb.mxu2 %v508_v22  ;;  %v766_v22 = vld [vmem:[#allocation19] sm:$0xff] }
 0x1fa   :  { %599 = vmatpush.msrb.mxu2 %v497_v26 }
 0x1fc   :  { %600 = vmatpush.msrb.mxu2 %v486_v30 }
 0x1fe   :  { %601 = vmatpush.msrb.mxu2 %v475_v36 }
 0x27a   :  { %v437_v8 = vpop.f32.mrf.mxu2 }
 0x27b   :  { %v438_v9 = vadd.f32 %v1381_v7, %v437_v8  ;;  %v774_v7 = vld [vmem:[#allocation19 + $0x40] sm:$0xff]  ;;  %v788_v8 = vld [vmem:[#allocation19 + $0xb0] sm:$0xff] }
 0x27d   :  { %v440_v10 = vmax.f32 %v438_v9, 0.0  ;;  %v773_v9 = vld [vmem:[#allocation19 + $0x38] sm:$0xff] }
 0x27f   :  { %1336 = vmatmul.msk.f32.vlgmr.msrb.gmra.mxu3 %vm351_vm0, %v440_v10  ;;  %v787_v10 = vld [vmem:[#allocation19 + $0xa8] sm:$0xff] }
 0x280   :  { %618 = vmatpush.msrb.mxu3 %v509_v19  ;;  %v768_v19 = vld [vmem:[#allocation19 + $0x10] sm:$0xff] }
 0x282   :  { %619 = vmatpush.msrb.mxu3 %v498_v23  ;;  %v517_v23 = vld [vmem:[#allocation18] sm:$0xff] }
 0x283   :  { %v521_v26 = vperm.slane %v517_v23, 0  ;;  %v523_v30 = vperm.slane %v517_v23, 2  ;;  %v525_v34 = vperm.slane %v517_v23, 4  ;;  %v526_v35 = vperm.slane %v517_v23, 5 }
 0x284   :  { %620 = vmatpush.msrb.mxu3 %v487_v27  ;;  %v522_v27 = vperm.slane %v517_v23, 1 }
 0x286   :  { %621 = vmatpush.msrb.mxu3 %v476_v31  ;;  %v524_v31 = vperm.slane %v517_v23, 3 }
 0x302   :  { %v469_v40 = vpop.f32.mrf.mxu3 }
 0x303   :  { %v470_v41 = vadd.f32 %v1382_v39, %v469_v40 }
 0x305   :  { %v1966_v42 = vadd.f32 %v470_v41, %v1954_v61  ;;  %v494_v61 = vld [vmem:[#allocation16 + $0xa8] sm:$0xff] }
 0x307   :  { %1337 = vmatmul.msk.f32.vlgmr.msra.gmra.mxu2 %vm351_vm0, %v1966_v42  ;;  %1338 = vmatmul.msk.f32.vlgmr.msra.gmra.mxu3 %vm351_vm0, %v1966_v42 }
 0x308   :  { %1341 = vmatmul.msk.f32.vlgmr.msrb.gmra.mxu0 %vm351_vm0, %v1966_v42  ;;  %1342 = vmatmul.msk.f32.vlgmr.msrb.gmra.mxu1 %vm351_vm0, %v1966_v42 }
 0x309   :  { %698 = vmatpush.msra.mxu3 %v513_v43  ;;  %678 = vmatpush.msra.mxu2 %v512_v44 }
 0x30a   :  { %818 = vmatpush.msrb.mxu0 %v797_v45  ;;  %v527_v45 = vperm.slane %v517_v23, 6 }
 0x30b   :  { %699 = vmatpush.msra.mxu3 %v502_v46  ;;  %679 = vmatpush.msra.mxu2 %v501_v47 }
 0x30c   :  { %819 = vmatpush.msrb.mxu0 %v796_v48 }
 0x30d   :  { %700 = vmatpush.msra.mxu3 %v491_v49  ;;  %680 = vmatpush.msra.mxu2 %v490_v50  ;;  %v528_v49 = vperm.slane %v517_v23, 7 }
 0x30e   :  { %820 = vmatpush.msrb.mxu0 %v795_v51 }
 0x30f   :  { %1339 = vmatmul.msk.f32.vlgmr.msrb.gmra.mxu2 %vm351_vm0, %v1966_v42  ;;  %1340 = vmatmul.msk.f32.vlgmr.msrb.gmra.mxu3 %vm351_vm0, %v1966_v42 }
 0x310   :  { %1345 = vmatmul.msk.f32.vlgmr.msra.gmra.mxu0 %vm351_vm0, %v1966_v42  ;;  %1346 = vmatmul.msk.f32.vlgmr.msra.gmra.mxu1 %vm351_vm0, %v1966_v42 }
 0x311   :  { %701 = vmatpush.msra.mxu3 %v480_v52  ;;  %681 = vmatpush.msra.mxu2 %v479_v53 }
 0x312   :  { %821 = vmatpush.msrb.mxu0 %v794_v56 }
 0x313   :  { %798 = vmatpush.msrb.mxu3 %v781_v54  ;;  %758 = vmatpush.msrb.mxu2 %v516_v55 }
 0x314   :  { %822 = vmatpush.msrb.mxu0 %v793_v59 }
 0x315   :  { %799 = vmatpush.msrb.mxu3 %v780_v57  ;;  %759 = vmatpush.msrb.mxu2 %v505_v58 }
 0x316   :  { %823 = vmatpush.msrb.mxu0 %v792_v0 }
 0x317   :  { %800 = vmatpush.msrb.mxu3 %v779_v60  ;;  %760 = vmatpush.msrb.mxu2 %v494_v61 }
 0x318   :  { %1343 = vmatmul.msk.f32.vlgmr.msra.gmra.mxu2 %vm351_vm0, %v1966_v42  ;;  %1344 = vmatmul.msk.f32.vlgmr.msra.gmra.mxu3 %vm351_vm0, %v1966_v42 }
 0x319   :  { %801 = vmatpush.msrb.mxu3 %v778_v62  ;;  %761 = vmatpush.msrb.mxu2 %v483_v63  ;;  %v518_v62 = vld [vmem:[#allocation18 + $0x8] sm:$0x7] }
 0x31a   :  { %824 = vmatpush.msrb.mxu0 %v791_v2 }
 0x31b   :  { %802 = vmatpush.msrb.mxu3 %v777_v1 }
 0x31c   :  { %825 = vmatpush.msrb.mxu0 %v790_v4 }
 0x31d   :  { %803 = vmatpush.msrb.mxu3 %v776_v3 }
 0x31e   :  { %826 = vmatpush.msrb.mxu0 %v789_v6  ;;  %v529_v6 = vperm.slane %v518_v62, 0 }
 0x31f   :  { %804 = vmatpush.msrb.mxu3 %v775_v5 }
 0x320   :  { %1347 = vmatmul.msk.f32.vlgmr.msrb.gmra.mxu2 %vm351_vm0, %v1966_v42  ;;  %827 = vmatpush.msrb.mxu0 %v788_v8 }
 0x321   :  { %805 = vmatpush.msrb.mxu3 %v774_v7 }
 0x322   :  { %828 = vmatpush.msrb.mxu0 %v787_v10 }
 0x323   :  { %806 = vmatpush.msrb.mxu3 %v773_v9 }
 0x324   :  { %829 = vmatpush.msrb.mxu0 %v786_v12 }
 0x325   :  { %807 = vmatpush.msrb.mxu3 %v772_v11  ;;  %v530_v11 = vperm.slane %v518_v62, 1 }
 0x326   :  { %830 = vmatpush.msrb.mxu0 %v785_v14 }
 0x327   :  { %808 = vmatpush.msrb.mxu3 %v771_v13 }
 0x328   :  { %831 = vmatpush.msrb.mxu0 %v784_v16  ;;  %v1187_v16 = vld [vmem:[#allocation22 + $0xf0] sm:$0xff] }
 0x329   :  { %809 = vmatpush.msrb.mxu3 %v770_v15  ;;  %1189 = vmatpush.msrb.mxu1 %v1187_v16  ;;  %v1170_v16 = vld [vmem:[#allocation22 + $0x68] sm:$0xff] }
 0x32a   :  { %832 = vmatpush.msrb.mxu0 %v783_v18  ;;  %v1185_v18 = vld [vmem:[#allocation22 + $0xe0] sm:$0xff] }
 0x32b   :  { %810 = vmatpush.msrb.mxu3 %v769_v17  ;;  %v1188_v17 = vld [vmem:[#allocation22 + $0xf8] sm:$0xff]  ;;  %1190 = vmatpush.msrb.mxu1 %v1185_v18 }
 0x32c   :  { %833 = vmatpush.msrb.mxu0 %v782_v20  ;;  %1209 = vmatpush.msra.mxu2 %v1188_v17  ;;  %v1149_v17 = vld [vmem:[#allocation21 + $0x1c0] sm:$0xff] }
 0x32d   :  { %811 = vmatpush.msrb.mxu3 %v768_v19  ;;  %834 = vmatmul.f32.vlgmr.msrb.gmra.mxu0 %v1942_v33 }
 0x32f   :  { %812 = vmatpush.msrb.mxu3 %v767_v21  ;;  %v1186_v21 = vld [vmem:[#allocation22 + $0xe8] sm:$0xff] }
 0x330   :  { %1210 = vmatpush.msra.mxu2 %v1186_v21  ;;  %v1111_v21 = vld [vmem:[#allocation21 + $0x90] sm:$0xff] }
 0x331   :  { %813 = vmatpush.msrb.mxu3 %v766_v22 }
 0x332   :  { %814 = vmatmul.f32.vlgmr.msrb.gmra.mxu3 %v1937_v32 }
 0x385   :  { %v643_v38 = vpop.f32.mrf.mxu0  ;;  %v663_v39 = vpop.f32.mrf.mxu1 }
 0x386   :  { %v644_v32 = vadd.f32 %v643_v38, %v525_v34  ;;  %v664_v43 = vadd.f32 %v663_v39, %v526_v35  ;;  %v1182_v34 = vld [vmem:[#allocation22 + $0xc8] sm:$0xff]  ;;  %v1179_v38 = vld [vmem:[#allocation22 + $0xb0] sm:$0xff]  ;;  %v1180_v39 = vld [vmem:[#allocation22 + $0xb8] sm:$0xff] }
 0x388   :  { %v871_v50 = vmax.f32 %v644_v32, %v664_v43 }
 0x38a   :  { %v563_v24 = vpop.f32.mrf.mxu2  ;;  %v583_v25 = vpop.f32.mrf.mxu3 }
 0x38b   :  { %v564_v28 = vadd.f32 %v563_v24, %v521_v26  ;;  %v584_v29 = vadd.f32 %v583_v25, %v522_v27  ;;  %v531_v24 = vperm.slane %v518_v62, 2  ;;  %v1183_v25 = vld [vmem:[#allocation22 + $0xd0] sm:$0xff]  ;;  %v1184_v26 = vld [vmem:[#allocation22 + $0xd8] sm:$0xff]  ;;  %v1173_v62 = vld [vmem:[#allocation22 + $0x80] sm:$0xff] }
 0x38c   :  { %1191 = vmatpush.msrb.mxu1 %v1183_v25  ;;  %1211 = vmatpush.msra.mxu2 %v1184_v26  ;;  %v1167_v25 = vld [vmem:[#allocation22 + $0x50] sm:$0xff]  ;;  %v1168_v26 = vld [vmem:[#allocation22 + $0x58] sm:$0xff] }
 0x38d   :  { %v843_v40 = vmax.f32 %v564_v28, %v584_v29  ;;  %v723_v7 = vpop.f32.mrf.mxu0  ;;  %v743_v13 = vpop.f32.mrf.mxu1 }
 0x38e   :  { %v1998_v14 = vadd.f32 %v723_v7, %v529_v6  ;;  %v2000_v22 = vadd.f32 %v743_v13, %v530_v11  ;;  %1212 = vmatpush.msra.mxu2 %v1182_v34  ;;  %v1171_v7 = vld [vmem:[#allocation22 + $0x70] sm:$0xff]  ;;  %v1109_v34 = vld [vmem:[#allocation21 + $0x80] sm:$0xff] }
 0x390   :  { %1213 = vmatpush.msra.mxu2 %v1180_v39 }
 0x392   :  { %v603_v36 = vpop.f32.mrf.mxu2  ;;  %v623_v37 = vpop.f32.mrf.mxu3 }
 0x393   :  { %v604_v33 = vadd.f32 %v603_v36, %v523_v30  ;;  %v624_v42 = vadd.f32 %v623_v37, %v524_v31  ;;  %v926_v30 = vand.u32 2147483647, %v1998_v14  ;;  %v1181_v31 = vld [vmem:[#allocation22 + $0xc0] sm:$0xff]  ;;  %v936_v36 = vand.u32 2147483647, %v2000_v22 }
 0x394   :  { %1192 = vmatpush.msrb.mxu1 %v1181_v31 }
 0x395   :  { %v844_v41 = vmax.f32 %v843_v40, %v604_v33  ;;  %v1123_v40 = vld [vmem:[#allocation21 + $0xf0] sm:$0xff] }
 0x396   :  { %1229 = vmatpush.msra.mxu3 %v1123_v40  ;;  %1193 = vmatpush.msrb.mxu1 %v1179_v38  ;;  %v1166_v38 = vld [vmem:[#allocation22 + $0x48] sm:$0xff] }
 0x397   :  { %v845_v44 = vmax.f32 %v844_v41, %v624_v42  ;;  %v1121_v41 = vld [vmem:[#allocation21 + $0xe0] sm:$0xff] }
 0x398   :  { %1230 = vmatpush.msra.mxu3 %v1121_v41  ;;  %v1107_v41 = vld [vmem:[#allocation21 + $0x70] sm:$0xff] }
 0x399   :  { %v846_v46 = vsub.f32 %v564_v28, %v845_v44  ;;  %v849_v47 = vsub.f32 %v584_v29, %v845_v44  ;;  %v852_v48 = vsub.f32 %v604_v33, %v845_v44  ;;  %v855_v55 = vsub.f32 %v624_v42, %v845_v44  ;;  %v1178_v44 = vld [vmem:[#allocation22 + $0xa8] sm:$0xff] }
 0x39a   :  { %v927_v42 = vsub.f32 0.0, %v926_v30  ;;  %1214 = vmatpush.msra.mxu2 %v1178_v44 }
 0x39b   :  { %v683_v51 = vpop.f32.mrf.mxu2  ;;  %v703_v52 = vpop.f32.mrf.mxu3  ;;  %v847_v53 = vmul.f32 1.442695, %v846_v46  ;;  %v850_v54 = vmul.f32 1.442695, %v849_v47  ;;  %v853_v57 = vmul.f32 1.442695, %v852_v48 }
 0x39c   :  { %v684_v56 = vadd.f32 %v683_v51, %v527_v45  ;;  %v704_v59 = vadd.f32 %v703_v52, %v528_v49  ;;  %v856_v60 = vmul.f32 1.442695, %v855_v55  ;;  %v1119_v45 = vld [vmem:[#allocation21 + $0xd0] sm:$0xff]  ;;  %v937_v47 = vsub.f32 0.0, %v936_v36  ;;  %v1176_v51 = vld [vmem:[#allocation22 + $0x98] sm:$0xff]  ;;  %v1165_v36 = vld [vmem:[#allocation22 + $0x40] sm:$0xff] }
 0x39d   :  { %1383 = vpow2.f32 %v847_v53  ;;  %v1155_v52 = vld [vmem:[#allocation21 + $0x1f0] sm:$0xff]  ;;  %1231 = vmatpush.msra.mxu3 %v1119_v45  ;;  %1215 = vmatpush.msra.mxu2 %v1176_v51 }
 0x39e   :  { %v872_v58 = vmax.f32 %v871_v50, %v684_v56  ;;  %1385 = vpow2.f32 %v850_v54  ;;  %v1175_v50 = vld [vmem:[#allocation22 + $0x90] sm:$0xff]  ;;  %1249 = vmatpush.msra.mxu0 %v1155_v52 }
 0x39f   :  { %1387 = vpow2.f32 %v853_v57  ;;  %v1117_v57 = vld [vmem:[#allocation21 + $0xc0] sm:$0xff]  ;;  %v1163_v45 = vld [vmem:[#allocation22 + $0x30] sm:$0xff] }
 0x3a0   :  { %v873_v61 = vmax.f32 %v872_v58, %v704_v59  ;;  %1389 = vpow2.f32 %v856_v60  ;;  %v1153_v58 = vld [vmem:[#allocation21 + $0x1e0] sm:$0xff]  ;;  %1232 = vmatpush.msra.mxu3 %v1117_v57 }
 0x3a1   :  { %1250 = vmatpush.msra.mxu0 %v1153_v58 }
 0x3a2   :  { %v874_v63 = vsub.f32 %v644_v32, %v873_v61  ;;  %v877_v0 = vsub.f32 %v664_v43, %v873_v61  ;;  %v880_v1 = vsub.f32 %v684_v56, %v873_v61  ;;  %v883_v10 = vsub.f32 %v704_v59, %v873_v61  ;;  %v1177_v43 = vld [vmem:[#allocation22 + $0xa0] sm:$0xff] }
 0x3a3   :  { %v1992_v2 = vpop.eup %1383  ;;  %v763_v28 = vpop.f32.mrf.mxu2  ;;  %1194 = vmatpush.msrb.mxu1 %v1177_v43  ;;  %v928_v59 = vmul.f32 1.442695, %v927_v42  ;;  %v1143_v42 = vld [vmem:[#allocation21 + $0x190] sm:$0xff]  ;;  %v1795_v43 = vmov 0  }
 0x3a4   :  { %v875_v3 = vmul.f32 1.442695, %v874_v63  ;;  %v878_v4 = vmul.f32 1.442695, %v877_v0  ;;  %v1994_v5 = vpop.eup %1385  ;;  %v881_v9 = vmul.f32 1.442695, %v880_v1  ;;  %v2010_v37 = vadd.f32 %v763_v28, %v531_v24 }
 0x3a5   :  { %v858_v8 = vadd.f32 %v1994_v5, %v1992_v2  ;;  %v1388_v12 = vpop.eup %1387  ;;  %v884_v20 = vmul.f32 1.442695, %v883_v10  ;;  %v1174_v63 = vld [vmem:[#allocation22 + $0x88] sm:$0xff]  ;;  %v1115_v0 = vld [vmem:[#allocation21 + $0xb0] sm:$0xff]  ;;  %1195 = vmatpush.msrb.mxu1 %v1175_v50  ;;  %v1105_v50 = vld [vmem:[#allocation21 + $0x60] sm:$0xff] }
 0x3a6   :  { %1391 = vpow2.f32 %v875_v3  ;;  %v1390_v19 = vpop.eup %1389  ;;  %v946_v48 = vand.u32 2147483647, %v2010_v37  ;;  %1216 = vmatpush.msra.mxu2 %v1174_v63  ;;  %1233 = vmatpush.msra.mxu3 %v1115_v0  ;;  %v1159_v63 = vld [vmem:[#allocation22 + $0x10] sm:$0xff]  ;;  %v1160_v0 = vld [vmem:[#allocation22 + $0x18] sm:$0xff] }
 0x3a7   :  { %1393 = vpow2.f32 %v878_v4  ;;  %v859_v15 = vadd.f32 %v1388_v12, %v858_v8  ;;  %v1172_v8 = vld [vmem:[#allocation22 + $0x78] sm:$0xff]  ;;  %1196 = vmatpush.msrb.mxu1 %v1173_v62 }
 0x3a8   :  { %1395 = vpow2.f32 %v881_v9  ;;  %v1151_v9 = vld [vmem:[#allocation21 + $0x1d0] sm:$0xff]  ;;  %1217 = vmatpush.msra.mxu2 %v1172_v8  ;;  %v1124_v8 = vld [vmem:[#allocation21 + $0xf8] sm:$0xff] }
 0x3a9   :  { %v860_v23 = vadd.f32 %v1390_v19, %v859_v15  ;;  %v1169_v15 = vld [vmem:[#allocation22 + $0x60] sm:$0xff]  ;;  %1251 = vmatpush.msra.mxu0 %v1151_v9  ;;  %1197 = vmatpush.msrb.mxu1 %v1171_v7  ;;  %v1158_v7 = vld [vmem:[#allocation22 + $0x8] sm:$0xff] }
 0x3aa   :  { %v835_v49 = vpop.f32.mrf.mxu0  ;;  %1218 = vmatpush.msra.mxu2 %v1170_v16 }
 0x3ab   :  { %1397 = vrcp.f32 %v860_v23  ;;  %v1147_v23 = vld [vmem:[#allocation21 + $0x1b0] sm:$0xff]  ;;  %1252 = vmatpush.msra.mxu0 %v1149_v17  ;;  %1198 = vmatpush.msrb.mxu1 %v1169_v15  ;;  %v1156_v15 = vld [vmem:[#allocation21 + $0x1f8] sm:$0xff] }
 0x3ac   :  { %v2002_v27 = vpop.eup %1391  ;;  %1399 = vpow2.f32 %v884_v20  ;;  %1219 = vmatpush.msra.mxu2 %v1168_v26  ;;  %v1099_v17 = vld [vmem:[#allocation21 + $0x30] sm:$0xff] }
 0x3ad   :  { %v2004_v29 = vpop.eup %1393  ;;  %1253 = vmatpush.msra.mxu0 %v1147_v23  ;;  %1199 = vmatpush.msrb.mxu1 %v1167_v25  ;;  %v1133_v25 = vld [vmem:[#allocation21 + $0x140] sm:$0xff] }
 0x3ae   :  { %v886_v35 = vadd.f32 %v2004_v29, %v2002_v27  ;;  %v2012_v33 = vpop.eup %1395  ;;  %1220 = vmatpush.msra.mxu2 %v1166_v38  ;;  %v1131_v38 = vld [vmem:[#allocation21 + $0x130] sm:$0xff] }
 0x3af   :  { %1200 = vmatpush.msrb.mxu1 %v1165_v36  ;;  %v1095_v36 = vld [vmem:[#allocation21 + $0x10] sm:$0xff] }
 0x3b0   :  { %v887_v32 = vadd.f32 %v2012_v33, %v886_v35  ;;  %v1145_v35 = vld [vmem:[#allocation21 + $0x1a0] sm:$0xff] }
 0x3b1   :  { %v1398_v46 = vpop.eup %1397  ;;  %1254 = vmatpush.msra.mxu0 %v1145_v35  ;;  %1201 = vmatpush.msrb.mxu1 %v1163_v45  ;;  %v1093_v45 = vld [vmem:[#allocation21] sm:$0xff] }
 0x3b2   :  { %v1400_v53 = vpop.eup %1399  ;;  %v862_v54 = vmul.f32 %v1398_v46, %v1992_v2  ;;  %v865_v55 = vmul.f32 %v1398_v46, %v1994_v5  ;;  %v868_v56 = vmul.f32 %v1398_v46, %v1388_v12  ;;  %v938_v2 = vmul.f32 1.442695, %v937_v47  ;;  %v1113_v12 = vld [vmem:[#allocation21 + $0xa0] sm:$0xff]  ;;  %v1164_v46 = vld [vmem:[#allocation22 + $0x38] sm:$0xff] }
 0x3b3   :  { %v888_v60 = vadd.f32 %v1400_v53, %v887_v32  ;;  %v947_v5 = vsub.f32 0.0, %v946_v48  ;;  %1234 = vmatpush.msra.mxu3 %v1113_v12  ;;  %v1161_v53 = vld [vmem:[#allocation22 + $0x20] sm:$0xff]  ;;  %1255 = vmatpush.msra.mxu0 %v1143_v42  ;;  %v1150_v42 = vld [vmem:[#allocation21 + $0x1c8] sm:$0xff] }
 0x3b4   :  { %v863_v1 = vmul.f32 0.996, %v862_v54  ;;  %v866_v3 = vmul.f32 0.996, %v865_v55  ;;  %v869_v4 = vmul.f32 0.996, %v868_v56  ;;  %1221 = vmatpush.msra.mxu2 %v1164_v46  ;;  %1202 = vmatpush.msrb.mxu1 %v1161_v53 }
 0x3b5   :  { %v815_v61 = vpop.f32.mrf.mxu3  ;;  %1401 = vrcp.f32 %v888_v60  ;;  %v948_v24 = vmul.f32 1.442695, %v947_v5  ;;  %1235 = vmatpush.msra.mxu3 %v1111_v21  ;;  %v1162_v54 = vld [vmem:[#allocation22 + $0x28] sm:$0xff]  ;;  %v1141_v55 = vld [vmem:[#allocation21 + $0x180] sm:$0xff]  ;;  %v1139_v60 = vld [vmem:[#allocation21 + $0x170] sm:$0xff] }
 0x3b6   :  { %v2018_v6 = vadd.f32 %v835_v49, %v815_v61  ;;  %v864_v10 = vadd.f32 0.001, %v863_v1  ;;  %v867_v11 = vadd.f32 0.001, %v866_v3  ;;  %1403 = vpow2.f32 %v928_v59  ;;  %v1103_v59 = vld [vmem:[#allocation21 + $0x50] sm:$0xff]  ;;  %1256 = vmatpush.msra.mxu0 %v1141_v55  ;;  %1222 = vmatpush.msra.mxu2 %v1162_v54  ;;  %v1157_v5 = vld [vmem:[#allocation22] sm:$0xff] }
 0x3b7   :  { %v870_v18 = vadd.f32 0.001, %v869_v4  ;;  %1405 = vpow2.f32 %v938_v2  ;;  %1236 = vmatpush.msra.mxu3 %v1109_v34  ;;  %1203 = vmatpush.msrb.mxu1 %v1159_v63  ;;  %v1152_v34 = vld [vmem:[#allocation21 + $0x1d8] sm:$0xff]  ;;  %v1129_v46 = vld [vmem:[#allocation21 + $0x120] sm:$0xff]  ;;  %v1127_v55 = vld [vmem:[#allocation21 + $0x110] sm:$0xff] }
 0x3b8   :  { %v2021_v13 = vclamps-f32 %v2018_v6, 3.0  ;;  %v900_v19 = vmul.f32 6.0, %v864_v10  ;;  %v902_v20 = vadd.f32 %v867_v11, %v864_v10  ;;  %1407 = vpow2.f32 %v948_v24  ;;  %1257 = vmatpush.msra.mxu0 %v1139_v60  ;;  %1223 = vmatpush.msra.mxu2 %v1160_v0  ;;  %v1097_v24 = vld [vmem:[#allocation21 + $0x20] sm:$0xff] }
 0x3b9   :  { %1237 = vmatpush.msra.mxu3 %v1107_v41  ;;  %1204 = vmatpush.msrb.mxu1 %v1157_v5  ;;  %v1118_v41 = vld [vmem:[#allocation21 + $0xc8] sm:$0xff]  ;;  %v925_v5 = vmax.f32 %v1998_v14, 0.0 }
 0x3ba   :  { %v2023_v28 = vadd.f32 -3.0, %v900_v19  ;;  %v903_v30 = vmul.f32 6.0, %v902_v20  ;;  %v905_v31 = vadd.f32 %v902_v20, %v870_v18  ;;  %vm955_vm1 = vcmp.ge.f32.partialorder %v2021_v13, -3.0  ;;  %1224 = vmatpush.msra.mxu2 %v1158_v7  ;;  %v1122_v18 = vld [vmem:[#allocation21 + $0xe8] sm:$0xff] }
 0x3bb   :  { %v1402_v32 = vpop.eup %1401  ;;  %v956_v44 = vsel %vm955_vm1, 1, %v1795_v43  ;;  %vm969_vm5 = vcmp.ge.f32.partialorder %v2021_v13, 3.000001  ;;  %1238 = vmatpush.msra.mxu3 %v1105_v50  ;;  %v1154_v19 = vld [vmem:[#allocation21 + $0x1e8] sm:$0xff]  ;;  %1269 = vmatpush.msra.mxu1 %v1124_v8  ;;  %v1116_v50 = vld [vmem:[#allocation21 + $0xb8] sm:$0xff] }
 0x3bc   :  { %v2026_v39 = vadd.f32 -3.0, %v903_v30  ;;  %v906_v40 = vmul.f32 6.0, %v905_v31  ;;  %vm958_vm2 = vcmp.ge.f32.partialorder %v2021_v13, %v2023_v28  ;;  %v1404_v47 = vpop.eup %1403  ;;  %v890_v56 = vmul.f32 %v1402_v32, %v2002_v27  ;;  %v1101_v27 = vld [vmem:[#allocation21 + $0x40] sm:$0xff]  ;;  %1289 = vmatpush.msrb.mxu2 %v1156_v15  ;;  %v1120_v31 = vld [vmem:[#allocation21 + $0xd8] sm:$0xff] }
 0x3bd   :  { %v959_v49 = vsel %vm958_vm2, 1, %v1795_v43  ;;  %v1406_v51 = vpop.eup %1405  ;;  %v893_v57 = vmul.f32 %v1402_v32, %v2004_v29  ;;  %v930_v1 = vadd.f32 1.0, %v1404_v47  ;;  %v1137_v29 = vld [vmem:[#allocation21 + $0x160] sm:$0xff]  ;;  %v896_v4 = vmul.f32 %v1402_v32, %v2012_v33  ;;  %1239 = vmatpush.msra.mxu3 %v1103_v59  ;;  %v1135_v33 = vld [vmem:[#allocation21 + $0x150] sm:$0xff]  ;;  %1270 = vmatpush.msra.mxu1 %v1122_v18  ;;  %v1146_v59 = vld [vmem:[#allocation21 + $0x1a8] sm:$0xff] }
 0x3be   :  { %v2032_v48 = vadd.f32 -3.0, %v906_v40  ;;  %v960_v52 = vadd.s32 %v959_v49, %v956_v44  ;;  %vm962_vm3 = vcmp.ge.f32.partialorder %v2021_v13, %v2026_v39  ;;  %v940_v3 = vadd.f32 1.0, %v1406_v51  ;;  %v1408_v9 = vpop.eup %1407  ;;  %1258 = vmatpush.msra.mxu0 %v1137_v29  ;;  %1290 = vmatpush.msrb.mxu2 %v1154_v19  ;;  %v1148_v51 = vld [vmem:[#allocation21 + $0x1b8] sm:$0xff]  ;;  %v2068_v29 = vld [vmem:[%s2174_s23] sm:$0xff] }
 0x3bf   :  { %v963_v58 = vsel %vm962_vm3, 1, %v1795_v43  ;;  %v891_v10 = vmul.f32 0.996, %v890_v56  ;;  %v894_v11 = vmul.f32 0.996, %v893_v57  ;;  %v970_v12 = vsel %vm969_vm5, 1, %v1795_v43  ;;  %1240 = vmatpush.msra.mxu3 %v1101_v27  ;;  %1271 = vmatpush.msra.mxu1 %v1120_v31 }
 0x3c0   :  { %vm966_vm4 = vcmp.ge.f32.partialorder %v2021_v13, %v2032_v48  ;;  %v964_v61 = vadd.s32 %v963_v58, %v960_v52  ;;  %1409 = vlog2.f32 %v930_v1  ;;  %v897_v20 = vmul.f32 0.996, %v896_v4  ;;  %1259 = vmatpush.msra.mxu0 %v1135_v33  ;;  %1291 = vmatpush.msrb.mxu2 %v1152_v34  ;;  %v1114_v58 = vld [vmem:[#allocation21 + $0xa8] sm:$0xff]  ;;  %v1112_v1 = vld [vmem:[#allocation21 + $0x98] sm:$0xff] }
 0x3c1   :  { %v967_v62 = vsel %vm966_vm4, 1, %v1795_v43  ;;  %1411 = vlog2.f32 %v940_v3  ;;  %v950_v21 = vadd.f32 1.0, %v1408_v9  ;;  %v892_v26 = vadd.f32 0.001, %v891_v10  ;;  %1241 = vmatpush.msra.mxu3 %v1099_v17  ;;  %1272 = vmatpush.msra.mxu1 %v1118_v41  ;;  %v1144_v27 = vld [vmem:[#allocation21 + $0x198] sm:$0xff] }
 0x3c2   :  { %v968_v2 = vadd.s32 %v967_v62, %v964_v61  ;;  %v895_v30 = vadd.f32 0.001, %v894_v11  ;;  %v1349_v35 = vadd.f32 3.0, %v2023_v28  ;;  %v909_v40 = vsub.f32 %v2026_v39, %v2023_v28  ;;  %1260 = vmatpush.msra.mxu0 %v1133_v25  ;;  %1292 = vmatpush.msrb.mxu2 %v1150_v42  ;;  %v1110_v11 = vld [vmem:[#allocation21 + $0x88] sm:$0xff]  ;;  %v1108_v33 = vld [vmem:[#allocation21 + $0x78] sm:$0xff] }
 0x3c3   :  { %1242 = vmatpush.msra.mxu3 %v1097_v24  ;;  %v1796_v32 = vmov 0.0   ;;  %1413 = vlog2.f32 %v950_v21  ;;  %v910_v57 = vsub.f32 %v2032_v48, %v2026_v39  ;;  %v898_v60 = vadd.f32 0.001, %v897_v20  ;;  %1273 = vmatpush.msra.mxu1 %v1116_v50  ;;  %v1140_v18 = vld [vmem:[#allocation21 + $0x178] sm:$0xff]  ;;  %v1106_v24 = vld [vmem:[#allocation21 + $0x68] sm:$0xff] }
 0x3c4   :  { %v971_v16 = vadd.s32 %v970_v12, %v968_v2  ;;  %1261 = vmatpush.msra.mxu0 %v1131_v38  ;;  %v915_v52 = vadd.f32 %v895_v30, %v892_v26  ;;  %1293 = vmatpush.msrb.mxu2 %v1148_v51  ;;  %v913_v63 = vmul.f32 6.0, %v892_v26  ;;  %v935_v9 = vmax.f32 %v2000_v22, 0.0  ;;  %v1142_v12 = vld [vmem:[#allocation21 + $0x188] sm:$0xff]  ;;  %v1104_v38 = vld [vmem:[#allocation21 + $0x58] sm:$0xff] }
 0x3c5   :  { %1243 = vmatpush.msra.mxu3 %v1095_v36  ;;  %1274 = vmatpush.msra.mxu1 %v1114_v58  ;;  %v911_v10 = vsub.f32 3.0, %v2032_v48  ;;  %v945_v22 = vmax.f32 %v2010_v37, 0.0  ;;  %v1138_v25 = vld [vmem:[#allocation21 + $0x168] sm:$0xff]  ;;  %vm838_vm2 = vcmp.ge.f32.partialorder %v2018_v6, -3.0  ;;  %vm839_vm3 = vcmp.le.f32.partialorder %v2018_v6, 3.0 }
 0x3c6   :  { %v2044_v23 = vadd.s32 4294967295, %v971_v16  ;;  %v1410_v49 = vpop.eup %1409  ;;  %1262 = vmatpush.msra.mxu0 %v1129_v46  ;;  %v916_v3 = vmul.f32 6.0, %v915_v52  ;;  %v918_v4 = vadd.f32 %v915_v52, %v898_v60  ;;  %1294 = vmatpush.msrb.mxu2 %v1146_v59  ;;  %v2079_v17 = vadd.f32 -3.0, %v913_v63  ;;  %v1134_v46 = vld [vmem:[#allocation21 + $0x148] sm:$0xff]  ;;  %vm840_vm4 = vmand %vm838_vm2, %vm839_vm3 }
 0x3c7   :  { %v1412_v54 = vpop.eup %1411  ;;  %1244 = vmatpush.msra.mxu3 %v1093_v45  ;;  %v932_v62 = vmul.f32 0.6931472, %v1410_v49  ;;  %1275 = vmatpush.msra.mxu1 %v1112_v1  ;;  %v1102_v45 = vld [vmem:[#allocation21 + $0x48] sm:$0xff] }
 0x3c8   :  { %vm973_vm6 = vcmp.eq.s32.totalorder %v2044_v23, 0  ;;  %vm985_vm7 = vcmp.eq.s32.totalorder %v2044_v23, 1  ;;  %vm1000_vm8 = vcmp.eq.s32.totalorder %v2044_v23, 2  ;;  %vm1015_vm9 = vcmp.eq.s32.totalorder %v2044_v23, 3  ;;  %1245 = vmatmul.f32.vlgmr.msra.gmra.mxu3 %v2068_v29  ;;  %1263 = vmatpush.msra.mxu0 %v1127_v55 }
 0x3c9   :  { %v2051_v43 = vsel %vm973_vm6, 1.0, %v1796_v32  ;;  %v2053_v44 = vsel %vm985_vm7, 1.0, %v1796_v32  ;;  %v2060_v56 = vsel %vm1000_vm8, 1.0, %v1796_v32  ;;  %v942_v0 = vmul.f32 0.6931472, %v1412_v54  ;;  %v1414_v8 = vpop.eup %1413  ;;  %1295 = vmatpush.msrb.mxu2 %v1144_v27  ;;  %1276 = vmatpush.msra.mxu1 %v1110_v11 }
 0x3ca   :  { %v978_v47 = vmul.f32 %v2051_v43, %v1349_v35  ;;  %v990_v53 = vmul.f32 %v2053_v44, %v909_v40  ;;  %v1005_v2 = vmul.f32 %v2060_v56, %v910_v57  ;;  %v2075_v7 = vsel %vm1015_vm9, 1.0, %v1796_v32  ;;  %v1136_v40 = vld [vmem:[#allocation21 + $0x158] sm:$0xff] }
 0x3cb   :  { %v933_v16 = vadd.f32 %v932_v62, %v925_v5  ;;  %v943_v14 = vadd.f32 %v942_v0, %v935_v9  ;;  %v2081_v19 = vadd.f32 -3.0, %v916_v3  ;;  %v919_v20 = vmul.f32 6.0, %v918_v4  ;;  %1296 = vmatpush.msrb.mxu2 %v1142_v12  ;;  %1277 = vmatpush.msra.mxu1 %v1108_v33 }
 0x3cc   :  { %v991_v61 = vadd.f32 %v990_v53, %v978_v47  ;;  %v1020_v21 = vmul.f32 %v2075_v7, %v911_v10  ;;  %v952_v23 = vmul.f32 0.6931472, %v1414_v8  ;;  %v1350_v31 = vadd.f32 3.0, %v2079_v17 }
 0x3cd   :  { %v934_v30 = vadd.f32 0.001, %v933_v16  ;;  %1297 = vmatpush.msrb.mxu2 %v1140_v18  ;;  %v2087_v34 = vmul.f32 -3.0, %v2051_v43  ;;  %v988_v35 = vmul.f32 %v2053_v44, %v2023_v28  ;;  %v944_v36 = vadd.f32 0.001, %v943_v14  ;;  %1278 = vmatpush.msra.mxu1 %v1106_v24  ;;  %v1100_v24 = vld [vmem:[#allocation21 + $0x38] sm:$0xff] }
 0x3ce   :  { %v1006_v15 = vadd.f32 %v1005_v2, %v991_v61  ;;  %v2091_v41 = vadd.f32 -3.0, %v919_v20  ;;  %v922_v37 = vsub.f32 %v2081_v19, %v2079_v17  ;;  %v953_v42 = vadd.f32 %v952_v23, %v945_v22  ;;  %v1125_v22 = vld [vmem:[#allocation21 + $0x100] sm:$0xff] }
 0x3cf   :  { %1298 = vmatpush.msrb.mxu2 %v1138_v25  ;;  %v980_v32 = vmul.f32 %v2051_v43, %v1350_v31  ;;  %v983_v47 = vmul.f32 %v2051_v43, %v934_v30  ;;  %v996_v49 = vmul.f32 %v2053_v44, %v934_v30  ;;  %v998_v50 = vmul.f32 %v2053_v44, %v944_v36  ;;  %v1132_v25 = vld [vmem:[#allocation21 + $0x138] sm:$0xff]  ;;  %v1130_v30 = vld [vmem:[#allocation21 + $0x128] sm:$0xff] }
 0x3d0   :  { %v1021_v26 = vadd.f32 %v1020_v21, %v1006_v15  ;;  %v994_v28 = vmul.f32 %v2053_v44, %v922_v37  ;;  %1279 = vmatpush.msra.mxu1 %v1104_v38  ;;  %v989_v51 = vadd.f32 %v988_v35, %v2087_v34  ;;  %v923_v52 = vsub.f32 %v2091_v41, %v2081_v19  ;;  %v2122_v38 = vld [vmem:[%s2174_s23 + $0x8] sm:$0xff] }
 0x3d1   :  { %1299 = vmatpush.msrb.mxu2 %v1136_v40  ;;  %v1003_v53 = vmul.f32 %v2060_v56, %v2026_v39  ;;  %v954_v55 = vadd.f32 0.001, %v953_v42  ;;  %v997_v58 = vadd.f32 %v2051_v43, %v996_v49  ;;  %v999_v59 = vadd.f32 %v998_v50, %v983_v47  ;;  %1264 = vmatpush.msra.mxu0 %v1125_v22  ;;  %v1128_v40 = vld [vmem:[#allocation21 + $0x118] sm:$0xff] }
 0x3d2   :  { %1415 = vrcp.f32 %v1021_v26  ;;  %1280 = vmatpush.msra.mxu1 %v1102_v45  ;;  %v995_v57 = vadd.f32 %v994_v28, %v980_v32  ;;  %v924_v62 = vsub.f32 3.0, %v2091_v41  ;;  %v1009_v63 = vmul.f32 %v2060_v56, %v923_v52  ;;  %1265 = vmatmul.f32.vlgmr.msra.gmra.mxu0 %v2122_v38  ;;  %v1094_v32 = vld [vmem:[#allocation21 + $0x8] sm:$0xff] }
 0x3d3   :  { %1300 = vmatpush.msrb.mxu2 %v1134_v46  ;;  %v1004_v60 = vadd.f32 %v1003_v53, %v989_v51  ;;  %v1011_v0 = vmul.f32 %v2060_v56, %v944_v36  ;;  %v1013_v1 = vmul.f32 %v2060_v56, %v954_v55  ;;  %v1018_v27 = vmul.f32 %v2075_v7, %v2032_v48  ;;  %v1126_v45 = vld [vmem:[#allocation21 + $0x108] sm:$0xff] }
 0x3d4   :  { %v1010_v3 = vadd.f32 %v1009_v63, %v995_v57  ;;  %v1040_v5 = vand.u32 2147483648, %v1021_v26  ;;  %v1038_v9 = vand.u32 2147483647, %v1021_v26  ;;  %v1024_v10 = vmul.f32 %v2075_v7, %v924_v62  ;;  %1281 = vmatpush.msra.mxu1 %v1100_v24 }
 0x3d5   :  { %v1012_v4 = vadd.f32 %v1011_v0, %v997_v58  ;;  %v1014_v2 = vadd.f32 %v1013_v1, %v999_v59  ;;  %v1019_v43 = vadd.f32 %v1018_v27, %v1004_v60  ;;  %v1026_v11 = vmul.f32 %v2075_v7, %v954_v55  ;;  %1301 = vmatpush.msrb.mxu2 %v1132_v25 }
 0x3d6   :  { %vm1034_vm11 = vweird.f32 %v1021_v26  ;;  %v2114_v15 = vadd.f32 %v1024_v10, %v1010_v3  ;;  %v1041_v48 = vor.u32 1.1754944e-38, %v1040_v5  ;;  %vm1039_vm13 = vcmp.eq.f32.partialorder %v1038_v9, 8.507059e+37 }
 0x3d7   :  { %v1028_v16 = vadd.f32 %v2075_v7, %v1014_v2  ;;  %v1027_v14 = vadd.f32 %v1026_v11, %v1012_v4  ;;  %v1044_v18 = vsub.f32 %v2021_v13, %v1019_v43  ;;  %v1096_v13 = vld [vmem:[#allocation21 + $0x18] sm:$0xff]  ;;  %1302 = vmatpush.msrb.mxu2 %v1130_v30  ;;  %v992_v51 = vmul.f32 %v2053_v44, %v2079_v17 }
 0x3d8   :  { %v1416_v54 = vpop.eup %1415  ;;  %v1007_v63 = vmul.f32 %v2060_v56, %v2081_v19  ;;  %v1022_v2 = vmul.f32 %v2075_v7, %v2091_v41  ;;  %v1088_v11 = vlaneseq  ;;  %vm1315_vm7 = vcmask 7168  }
 0x3d9   :  { %v1030_v61 = vmul.f32 %v1416_v54, %v1021_v26  ;;  %vm1035_vm10 = vweird.f32 %v1416_v54  ;;  %v1098_v26 = vld [vmem:[#allocation21 + $0x28] sm:$0xff]  ;;  %v1053_v35 = vadd.f32 %v1028_v16, %v1027_v14  ;;  %1303 = vmatpush.msrb.mxu2 %v1128_v40  ;;  %v993_v60 = vadd.f32 %v992_v51, %v2087_v34 }
 0x3da   :  { %vm1036_vm12 = vmor %vm1034_vm11, %vm1035_vm10  ;;  %1282 = vmatpush.msra.mxu1 %v1098_v26  ;;  %v1089_v41 = vand.u32 127, %v1088_v11 }
 0x3db   :  { %v1031_v39 = vsub.f32 1.0, %v1030_v61  ;;  %1304 = vmatpush.msrb.mxu2 %v1126_v45  ;;  %v1008_v17 = vadd.f32 %v1007_v63, %v993_v60 }
 0x3dc   :  { %1283 = vmatpush.msra.mxu1 %v1096_v13  ;;  %vm1090_vm5 = vcmp.lt.s32.totalorder %v1089_v41, 79 }
 0x3dd   :  { %v1032_v8 = vmul.f32 %v1416_v54, %v1031_v39  ;;  %vm1091_vm6 = vmand %vm840_vm4, %vm1090_vm5 }
 0x3de   :  { %1284 = vmatpush.msra.mxu1 %v1094_v32 }
 0x3df   :  { %v1033_v12 = vadd.f32 %v1416_v54, %v1032_v8  ;;  %v1023_v8 = vadd.f32 %v1022_v2, %v1008_v17 }
 0x3e1   :  { %v1037_v33 = vsel %vm1036_vm12, %v1416_v54, %v1033_v12 }
 0x3e2   :  { %v1042_v20 = vsel %vm1039_vm13, %v1041_v48, %v1037_v33  ;;  %v1311_v33 = vld [vmem:[%s2175_s1] sm:$0xff] }
 0x3e3   :  { %v1043_v21 = vmul.f32 %v1042_v20, %v2114_v15  ;;  %v1045_v23 = vmul.f32 %v1044_v18, %v1042_v20 }
 0x3e5   :  { %v1046_v31 = vsub.f32 1.0, %v1045_v23  ;;  %v1054_v36 = vmul.f32 2.0, %v1043_v21  ;;  %v1075_v28 = vmul.f32 %v1045_v23, %v1028_v16  ;;  %v1048_v50 = vmul.f32 %v1045_v23, %v1043_v21 }
 0x3e6   :  { %v1074_v4 = vmul.f32 %v1043_v21, %v1043_v21 }
 0x3e7   :  { %v1047_v37 = vmul.f32 %v1046_v31, %v1045_v23  ;;  %v1055_v42 = vsub.f32 %v1053_v35, %v1054_v36  ;;  %v1076_v52 = vmul.f32 %v1075_v28, %v1045_v23  ;;  %v1079_v53 = vmul.f32 %v1046_v31, %v1027_v14 }
 0x3e8   :  { %v1049_v59 = vmul.f32 %v1048_v50, %v1045_v23 }
 0x3e9   :  { %v1056_v46 = vmul.f32 %v1055_v42, %v1047_v37  ;;  %v1077_v49 = vmul.f32 %v1054_v36, %v1047_v37  ;;  %v1050_v55 = vmul.f32 %v1047_v37, %v1027_v14  ;;  %v1080_v62 = vmul.f32 %v1079_v53, %v1046_v31 }
 0x3eb   :  { %v1057_v47 = vadd.f32 %v1056_v46, %v1043_v21  ;;  %v1078_v58 = vadd.f32 %v1077_v49, %v1076_v52  ;;  %v1051_v0 = vadd.f32 %v1050_v55, %v1049_v59 }
 0x3ed   :  { %1417 = vrcp.f32 %v1057_v47  ;;  %v1069_v1 = vand.u32 2147483648, %v1057_v47  ;;  %v1067_v39 = vand.u32 2147483647, %v1057_v47  ;;  %v1081_v44 = vadd.f32 %v1080_v62, %v1078_v58 }
 0x3ee   :  { %vm1063_vm15 = vweird.f32 %v1057_v47  ;;  %v1052_v5 = vmul.f32 %v1051_v0, %v2114_v15 }
 0x3ef   :  { %v1070_v34 = vor.u32 1.1754944e-38, %v1069_v1  ;;  %vm1068_vm1 = vcmp.eq.f32.partialorder %v1067_v39, 8.507059e+37  ;;  %v1082_v56 = vmul.f32 %v1081_v44, %v1074_v4 }
 0x3f3   :  { %v1418_v54 = vpop.eup %1417 }
 0x3f4   :  { %v1059_v57 = vmul.f32 %v1418_v54, %v1057_v47  ;;  %vm1064_vm14 = vweird.f32 %v1418_v54 }
 0x3f5   :  { %vm1065_vm0 = vmor %vm1063_vm15, %vm1064_vm14 }
 0x3f6   :  { %v1060_v61 = vsub.f32 1.0, %v1059_v57 }
 0x3f8   :  { %v1061_v27 = vmul.f32 %v1418_v54, %v1060_v61 }
 0x3fa   :  { %v1062_v3 = vadd.f32 %v1418_v54, %v1061_v27 }
 0x3fc   :  { %v1066_v43 = vsel %vm1065_vm0, %v1418_v54, %v1062_v3 }
 0x3fd   :  { %v1071_v19 = vsel %vm1068_vm1, %v1070_v34, %v1066_v43 }
 0x3fe   :  { %v1072_v9 = vmul.f32 %v1071_v19, %v1052_v5  ;;  %v1083_v10 = vmul.f32 %v1082_v56, %v1071_v19 }
 0x400   :  { %v1073_v12 = vadd.f32 %v1072_v9, %v1023_v8  ;;  %v1084_v16 = vmul.f32 %v1083_v10, %v1071_v19 }
 0x402   :  { %v1087_v7 = vsel %vm840_vm4, %v1073_v12, %v2018_v6  ;;  %1419 = vlog2.f32 %v1084_v16 }
 0x403   :  { %1205 = vmatmul.f32.vlgmr.msrb.gmra.mxu1 %v1087_v7  ;;  %1225 = vmatmul.f32.vlgmr.msra.gmra.mxu2 %v1087_v7 }
 0x408   :  { %v1420_v15 = vpop.eup %1419 }
 0x409   :  { %v1086_v48 = vmul.f32 0.6931472, %v1420_v15 }
 0x40b   :  { %1285 = vmatmul.f32.vlgmr.msra.gmra.mxu1 %v2068_v29  ;;  %1305 = vmatmul.f32.vlgmr.msrb.gmra.mxu2 %v2122_v38  ;;  %v1092_v14 = vsel %vm1091_vm6, %v1086_v48, 0.0 }
 0x40c   :  { %1312 = vadd.xlane.f32.xlu0 %v1092_v14 }
 0x44b   :  { %v1246_v18 = vpop.f32.mrf.mxu3 }
 0x44f   :  { %v1266_v23 = vpop.f32.mrf.mxu0 }
 0x47f   :  { %v1313_v6 = vpop.xlane.xlu0 %1312 }
 0x480   :  { %v1314_v20 = vadd.f32 %v1313_v6, %v1311_v33  ;;  %v1206_v21 = vpop.f32.mrf.mxu1 }
 0x481   :  { %v1247_v22 = vadd.f32 %v1246_v18, %v1206_v21 }
 0x482   :  { %1316 = vst.msk [vmem:[%s2168_s18] sm:$0xff] %vm1315_vm7, %v1314_v20 }
 0x483   :  { %v1267_v29 = vadd.f32 %v1266_v23, %v1247_v22 }
 0x485   :  { %1309 = vst [vmem:[%s2167_s17] sm:$0xff] %v1267_v29 }
 0x486   :  { %v1226_v24 = vpop.f32.mrf.mxu2 }
 0x488   :  { %v1286_v25 = vpop.f32.mrf.mxu1 }
 0x489   :  { %v1287_v26 = vadd.f32 %v1286_v25, %v1226_v24 }
 0x48e   :  { %v1306_v30 = vpop.f32.mrf.mxu2 }
 0x48f   :  { %v1307_v31 = vadd.f32 %v1306_v30, %v1287_v26 }
 0x491   :  { %1310 = vst [vmem:[%s2167_s17 + $0x8] sm:$0xff] %v1307_v31 }
 0x492   :  { %1325 = vsyncpa [#allocation3], 1 }
 0x493   :  { %1326 = vsyncpa [#allocation5], 1 }
 0x494   :  { %1327 = vsyncpa [#allocation8], 1 }
 0x495   :  { %1328 = vsyncpa [#allocation11], 1 }
 0x496   :  { %1329 = vsyncpa [#allocation14], 1 }
 0x497   :  { %1330 = vsyncpa [#allocation17], 1 }
 0x498   :  { %1331 = vsyncpa [#allocation20], 1 }
 0x499   :  { %1332 = vsyncpa [#allocation23], 1 }

</bundles_post_ra>
